<compile_context>
chip_gen: v6e
topology: v6e:2x2x1
jax: 0.10.0
libtpu: 0.0.40
codegen_flags: <defaults>
</compile_context>

<pallas_src>
import jax
import jax.numpy as jnp
from jax import lax
from jax.experimental import pallas as pl
from jax.experimental.pallas import tpu as pltpu


TK = 1024  # hidden-dim tile (multiple of 128; hidden dim is padded to a multiple of TK)


def schedule_param_alpha_kernel(seed_ref, w1_ref, b1_ref, w2_ref, b2_ref,
                                w3_ref, b3_ref, abase_ref, lp_ref,
                                alpha_ref, aacum_ref, h2_acc):
    """Grid axis 0 tiles the hidden dimension (accumulation axis, "arbitrary")."""
    k = pl.program_id(0)

    @pl.when(k == 0)
    def _init():
        h2_acc[...] = jnp.zeros_like(h2_acc)

    # Layer 1, one hidden-column chunk: (1, TK).
    h1 = jnp.dot(seed_ref[...], w1_ref[...],
                 preferred_element_type=jnp.float32) + b1_ref[...]
    # Layer 2, partial sum over this hidden chunk: accumulate into (1, HID_PAD) f32.
    h2_acc[...] += jnp.dot(h1.astype(jnp.bfloat16), w2_ref[...],
                           preferred_element_type=jnp.float32)

    @pl.when(k == pl.num_programs(0) - 1)
    def _finalize():
        h2 = h2_acc[...] + b2_ref[...]
        h3 = jnp.dot(h2.astype(jnp.bfloat16), w3_ref[...],
                     preferred_element_type=jnp.float32) + b3_ref[...]
        out = jnp.tanh(h3)
        alpha = abase_ref[...] + out * lp_ref[...]
        alpha_ref[...] = alpha

        # Exact cumprod via Hillis-Steele prefix doubling: ceil(log2(n)) tiny
        # shift-matmuls + selects.  No log/exp round trip, so alpha values
        # arbitrarily close to 0 stay finite.
        n = alpha.shape[-1]
        lane = lax.broadcasted_iota(jnp.int32, (1, n), 1)
        p = alpha
        shift = 1
        while shift < n:
            row = lax.broadcasted_iota(jnp.int32, (n, n), 0)
            col = lax.broadcasted_iota(jnp.int32, (n, n), 1)
            smat = (row + shift == col).astype(jnp.float32)   # shifts right by `shift`
            shifted = jnp.dot(p, smat, preferred_element_type=jnp.float32)
            shifted = jnp.where(lane >= shift, shifted, 1.0)  # identity below the shift
            p = p * shifted
            shift *= 2
        aacum_ref[...] = p


def pack_params(w1t, b1, w2t, b2, w3t, b3, tk=TK):
    """One-time repack of the trained parameters into the kernel layout:
    hidden dim zero-padded up to a multiple of `tk`, weights cast to bf16.
    Zero padding is exact: padded W1 cols / b1 entries give h1 == 0 in the padded
    slots, and padded W2/W3 rows & cols then contribute nothing."""
    hid = w1t.shape[1]
    hid_pad = ((hid + tk - 1) // tk) * tk
    pad = hid_pad - hid
    w1p = jnp.pad(w1t, ((0, 0), (0, pad))).astype(jnp.bfloat16)
    b1p = jnp.pad(b1, (0, pad)).astype(jnp.float32)
    w2p = jnp.pad(w2t, ((0, pad), (0, pad))).astype(jnp.bfloat16)
    b2p = jnp.pad(b2, (0, pad)).astype(jnp.float32)
    w3p = jnp.pad(w3t, ((0, pad), (0, 0))).astype(jnp.bfloat16)
    return w1p, b1p, w2p, b2p, w3p, b3.astype(jnp.float32)


def schedule_param_alpha_forward(seed_k, w1p, b1p, w2p, b2p, w3p, b3p,
                                 alpha_base, lp, *, tk=TK):
    """Runs the packed (bf16, hidden-padded) parameters through the Pallas kernel."""
    d_in = int(seed_k.shape[0])
    hid_pad = int(w1p.shape[1])
    n = int(alpha_base.shape[0])
    assert hid_pad % tk == 0 and tk % 128 == 0
    nt = hid_pad // tk

    row = lambda v: v.reshape(1, -1)
    seed2 = row(seed_k).astype(jnp.bfloat16)
    b1r, b2r = row(b1p), row(b2p)
    b3r = row(b3p)
    abr = row(alpha_base).astype(jnp.float32)
    lpr = row(lp).astype(jnp.float32)

    def full(shape):
        # full-array block, constant across the grid -> DMA'd once, stays resident
        return pl.BlockSpec(shape, lambda k, _s=len(shape): (0,) * _s)

    grid_spec = pltpu.PrefetchScalarGridSpec(
        num_scalar_prefetch=0,
        grid=(nt,),
        in_specs=[
            full((1, d_in)),                                # seed_k
            pl.BlockSpec((d_in, tk), lambda k: (0, k)),     # W1 (columns tiled)
            pl.BlockSpec((1, tk), lambda k: (0, k)),        # b1
            pl.BlockSpec((tk, hid_pad), lambda k: (k, 0)),  # W2 (rows tiled)
            full((1, hid_pad)),                             # b2
            full((hid_pad, n)),                             # W3
            full((1, n)),                                   # b3
            full((1, n)),                                   # alpha_base
            full((1, n)),                                   # _lp
        ],
        out_specs=(full((1, n)), full((1, n))),
        scratch_shapes=[pltpu.VMEM((1, hid_pad), jnp.float32)],
    )

    bytes_accessed = int((w1p.size + w2p.size + w3p.size) * 2        # bf16 weights
                         + (b1p.size + b2p.size) * 4                 # f32 biases
                         + d_in * 2 + 5 * n * 4)                     # seed + small vecs
    flops = int(2 * (d_in * hid_pad + hid_pad * hid_pad + hid_pad * n))

    fn = pl.pallas_call(
        schedule_param_alpha_kernel,
        out_shape=(jax.ShapeDtypeStruct((1, n), jnp.float32),
                   jax.ShapeDtypeStruct((1, n), jnp.float32)),
        grid_spec=grid_spec,
        compiler_params=pltpu.CompilerParams(
            dimension_semantics=("arbitrary",),
            vmem_limit_bytes=32 * 1024 * 1024),
        cost_estimate=pl.CostEstimate(flops=flops, transcendentals=n,
                                      bytes_accessed=bytes_accessed),
    )
    alpha2d, aacum2d = fn(seed2, w1p, b1r, w2p, b2r, w3p, b3r, abr, lpr)
    return alpha2d.reshape(n), aacum2d.reshape(n)


def forward_reference(seed_k, w1t, b1, w2t, b2, w3t, b3, alpha_base, lp):
    h = seed_k @ w1t + b1
    h = h @ w2t + b2
    h = h @ w3t + b3
    out = jnp.tanh(h)
    alpha = alpha_base + out * lp
    return alpha, jnp.cumprod(alpha)


def init_linear(key, fan_in, fan_out, dtype=jnp.float32):
    # torch.nn.Linear default init: U(-1/sqrt(fan_in), 1/sqrt(fan_in)); stored
    # PRE-TRANSPOSED as (in_features, out_features).
    kw, kb = jax.random.split(key)
    bound = 1.0 / float(fan_in) ** 0.5
    w_t = jax.random.uniform(kw, (fan_in, fan_out), dtype, -bound, bound)
    b = jax.random.uniform(kb, (fan_out,), dtype, -bound, bound)
    return w_t, b


if __name__ == "__main__":
    D_IN, D_HID, N_STEPS = 1000, 2000, 16   # out_channels = len(alpha_bar) = 16

    key = jax.random.PRNGKey(0)
    k1, k2, k3 = jax.random.split(key, 3)
    w1t, b1 = init_linear(k1, D_IN, D_HID)
    w2t, b2 = init_linear(k2, D_HID, D_HID)
    w3t, b3 = init_linear(k3, D_HID, N_STEPS)

    # seed_k = 0.5 * ones(1000)  (non-trainable parameter in the module)
    seed_k = jnp.full((D_IN,), 0.5, dtype=jnp.float32)

    # Synthetic alpha_bar (DDPM-style schedule) and the module's __init__ math.
    betas = jnp.linspace(1e-4, 2e-2, N_STEPS, dtype=jnp.float32)
    alpha_bar = jnp.cumprod(1.0 - betas)
    a_base = jnp.concatenate([alpha_bar[0:1], alpha_bar[1:] / alpha_bar[:-1]])
    learning_portion = 0.01
    lp = jnp.minimum(jnp.minimum(1.0 - a_base, learning_portion), a_base)

    # One-time repack into the kernel's bf16 / hidden-padded layout.
    w1p, b1p, w2p, b2p, w3p, b3p = pack_params(w1t, b1, w2t, b2, w3t, b3)

    alpha, aacum = schedule_param_alpha_forward(
        seed_k, w1p, b1p, w2p, b2p, w3p, b3p, a_base, lp)
    jax.block_until_ready((alpha, aacum))

    alpha_ref, aacum_ref = forward_reference(
        seed_k, w1t, b1, w2t, b2, w3t, b3, a_base, lp)

    assert alpha.shape == (N_STEPS,) and aacum.shape == (N_STEPS,)
    assert bool(jnp.all(jnp.isfinite(alpha))) and bool(jnp.all(jnp.isfinite(aacum)))
    assert jnp.allclose(alpha, alpha_ref, rtol=2e-3, atol=2e-3)
    assert jnp.allclose(aacum, aacum_ref, rtol=2e-3, atol=2e-3)

    print("KERNEL_OK")
</pallas_src>

<mosaic_0001>
module attributes {stable_mosaic.version = 11 : i64} {
  func.func @schedule_param_alpha_kernel(%arg0: i32, %arg1: memref<1x1000xbf16, #tpu.memory_space<vmem>>, %arg2: memref<1000x1024xbf16, #tpu.memory_space<vmem>>, %arg3: memref<1x1024xf32, #tpu.memory_space<vmem>>, %arg4: memref<1024x2048xbf16, #tpu.memory_space<vmem>>, %arg5: memref<1x2048xf32, #tpu.memory_space<vmem>>, %arg6: memref<2048x16xbf16, #tpu.memory_space<vmem>>, %arg7: memref<1x16xf32, #tpu.memory_space<vmem>>, %arg8: memref<1x16xf32, #tpu.memory_space<vmem>>, %arg9: memref<1x16xf32, #tpu.memory_space<vmem>>, %arg10: memref<1x16xf32, #tpu.memory_space<vmem>>, %arg11: memref<1x16xf32, #tpu.memory_space<vmem>>, %arg12: memref<1x2048xf32, #tpu.memory_space<vmem>>) attributes {dimension_semantics = [#tpu.dimension_semantics<arbitrary>], iteration_bounds = array<i64: 2>, scalar_prefetch = 0 : i64, scratch_operands = 1 : i64, tpu.core_type = #tpu.core_type<tc>, window_params = [{pipeline_mode = #tpu.pipeline_mode<synchronous>, transform_indices = @transform_0, window_bounds = array<i64: 1, 1000>}, {transform_indices = @transform_1, window_bounds = array<i64: 1000, 1024>}, {transform_indices = @transform_2, window_bounds = array<i64: 1, 1024>}, {transform_indices = @transform_3, window_bounds = array<i64: 1024, 2048>}, {pipeline_mode = #tpu.pipeline_mode<synchronous>, transform_indices = @transform_4, window_bounds = array<i64: 1, 2048>}, {pipeline_mode = #tpu.pipeline_mode<synchronous>, transform_indices = @transform_5, window_bounds = array<i64: 2048, 16>}, {pipeline_mode = #tpu.pipeline_mode<synchronous>, transform_indices = @transform_6, window_bounds = array<i64: 1, 16>}, {pipeline_mode = #tpu.pipeline_mode<synchronous>, transform_indices = @transform_7, window_bounds = array<i64: 1, 16>}, {pipeline_mode = #tpu.pipeline_mode<synchronous>, transform_indices = @transform_8, window_bounds = array<i64: 1, 16>}, {pipeline_mode = #tpu.pipeline_mode<synchronous>, transform_indices = @transform_9, window_bounds = array<i64: 1, 16>}, {pipeline_mode = #tpu.pipeline_mode<synchronous>, transform_indices = @transform_10, window_bounds = array<i64: 1, 16>}]} {
    %c0_i32 = arith.constant 0 : i32
    %0 = arith.cmpi eq, %arg0, %c0_i32 : i32
    %1 = arith.extui %0 : i1 to i32
    %c0_i32_0 = arith.constant 0 : i32
    %2 = arith.cmpi ne, %1, %c0_i32_0 : i32
    scf.if %2 {
      %cst_14 = arith.constant 0.000000e+00 : f32
      %17 = vector.broadcast %cst_14 : f32 to vector<1x2048xf32>
      %c0_15 = arith.constant 0 : index
      %c0_16 = arith.constant 0 : index
      %18 = vector.load %arg12[%c0_15, %c0_16] : memref<1x2048xf32, #tpu.memory_space<vmem>>, vector<1x2048xf32>
      tpu.vector_store %arg12[%c0_15, %c0_16], %17 {strides = array<i32>} : memref<1x2048xf32, #tpu.memory_space<vmem>>, vector<1x2048xf32>,
    } else {
    }
    %c0 = arith.constant 0 : index
    %c0_1 = arith.constant 0 : index
    %3 = vector.load %arg1[%c0, %c0_1] : memref<1x1000xbf16, #tpu.memory_space<vmem>>, vector<1x1000xbf16>
    %c0_2 = arith.constant 0 : index
    %c0_3 = arith.constant 0 : index
    %4 = vector.load %arg2[%c0_2, %c0_3] : memref<1000x1024xbf16, #tpu.memory_space<vmem>>, vector<1000x1024xbf16>
    %cst = arith.constant dense<0.000000e+00> : vector<1x1024xf32>
    %5 = tpu.matmul %3, %4, %cst {dimension_numbers = #tpu.dot_dimension_numbers<[1], [0], [0], [1], [0, 0, 1, 1], [], []>} : vector<1x1000xbf16>, vector<1000x1024xbf16>, vector<1x1024xf32> -> vector<1x1024xf32>
    %c0_4 = arith.constant 0 : index
    %c0_5 = arith.constant 0 : index
    %6 = vector.load %arg3[%c0_4, %c0_5] : memref<1x1024xf32, #tpu.memory_space<vmem>>, vector<1x1024xf32>
    %7 = arith.addf %5, %6 : vector<1x1024xf32>
    %c0_6 = arith.constant 0 : index
    %c0_7 = arith.constant 0 : index
    %8 = vector.load %arg12[%c0_6, %c0_7] : memref<1x2048xf32, #tpu.memory_space<vmem>>, vector<1x2048xf32>
    %9 = arith.truncf %7 : vector<1x1024xf32> to vector<1x1024xbf16>
    %c0_8 = arith.constant 0 : index
    %c0_9 = arith.constant 0 : index
    %10 = vector.load %arg4[%c0_8, %c0_9] : memref<1024x2048xbf16, #tpu.memory_space<vmem>>, vector<1024x2048xbf16>
    %cst_10 = arith.constant dense<0.000000e+00> : vector<1x2048xf32>
    %11 = tpu.matmul %9, %10, %cst_10 {dimension_numbers = #tpu.dot_dimension_numbers<[1], [0], [0], [1], [0, 0, 1, 1], [], []>} : vector<1x1024xbf16>, vector<1024x2048xbf16>, vector<1x2048xf32> -> vector<1x2048xf32>
    %12 = arith.addf %8, %11 : vector<1x2048xf32>
    %c0_11 = arith.constant 0 : index
    %c0_12 = arith.constant 0 : index
    %13 = vector.load %arg12[%c0_11, %c0_12] : memref<1x2048xf32, #tpu.memory_space<vmem>>, vector<1x2048xf32>
    tpu.vector_store %arg12[%c0_11, %c0_12], %12 {strides = array<i32>} : memref<1x2048xf32, #tpu.memory_space<vmem>>, vector<1x2048xf32>,
    %c1_i32 = arith.constant 1 : i32
    %14 = arith.cmpi eq, %arg0, %c1_i32 : i32
    %15 = arith.extui %14 : i1 to i32
    %c0_i32_13 = arith.constant 0 : i32
    %16 = arith.cmpi ne, %15, %c0_i32_13 : i32
    scf.if %16 {
      %c0_14 = arith.constant 0 : index
      %c0_15 = arith.constant 0 : index
      %17 = vector.load %arg12[%c0_14, %c0_15] : memref<1x2048xf32, #tpu.memory_space<vmem>>, vector<1x2048xf32>
      %c0_16 = arith.constant 0 : index
      %c0_17 = arith.constant 0 : index
      %18 = vector.load %arg5[%c0_16, %c0_17] : memref<1x2048xf32, #tpu.memory_space<vmem>>, vector<1x2048xf32>
      %19 = arith.addf %17, %18 : vector<1x2048xf32>
      %20 = arith.truncf %19 : vector<1x2048xf32> to vector<1x2048xbf16>
      %c0_18 = arith.constant 0 : index
      %c0_19 = arith.constant 0 : index
      %21 = vector.load %arg6[%c0_18, %c0_19] : memref<2048x16xbf16, #tpu.memory_space<vmem>>, vector<2048x16xbf16>
      %cst_20 = arith.constant dense<0.000000e+00> : vector<1x16xf32>
      %22 = tpu.matmul %20, %21, %cst_20 {dimension_numbers = #tpu.dot_dimension_numbers<[1], [0], [0], [1], [0, 0, 1, 1], [], []>} : vector<1x2048xbf16>, vector<2048x16xbf16>, vector<1x16xf32> -> vector<1x16xf32>
      %c0_21 = arith.constant 0 : index
      %c0_22 = arith.constant 0 : index
      %23 = vector.load %arg7[%c0_21, %c0_22] : memref<1x16xf32, #tpu.memory_space<vmem>>, vector<1x16xf32>
      %24 = arith.addf %22, %23 : vector<1x16xf32>
      %25 = math.tanh %24 : vector<1x16xf32>
      %c0_23 = arith.constant 0 : index
      %c0_24 = arith.constant 0 : index
      %26 = vector.load %arg8[%c0_23, %c0_24] : memref<1x16xf32, #tpu.memory_space<vmem>>, vector<1x16xf32>
      %c0_25 = arith.constant 0 : index
      %c0_26 = arith.constant 0 : index
      %27 = vector.load %arg9[%c0_25, %c0_26] : memref<1x16xf32, #tpu.memory_space<vmem>>, vector<1x16xf32>
      %28 = arith.mulf %25, %27 : vector<1x16xf32>
      %29 = arith.addf %26, %28 : vector<1x16xf32>
      %c0_27 = arith.constant 0 : index
      %c0_28 = arith.constant 0 : index
      %30 = vector.load %arg10[%c0_27, %c0_28] : memref<1x16xf32, #tpu.memory_space<vmem>>, vector<1x16xf32>
      tpu.vector_store %arg10[%c0_27, %c0_28], %29 {strides = array<i32>} : memref<1x16xf32, #tpu.memory_space<vmem>>, vector<1x16xf32>,
      %31 = tpu.iota {dimensions = array<i32: 1>} : vector<1x16xi32>
      %32 = tpu.iota {dimensions = array<i32: 0>} : vector<16x16xi32>
      %33 = tpu.iota {dimensions = array<i32: 1>} : vector<16x16xi32>
      %c1_i32_29 = arith.constant 1 : i32
      %34 = vector.broadcast %c1_i32_29 : i32 to vector<16x16xi32>
      %35 = arith.addi %32, %34 : vector<16x16xi32>
      %36 = arith.cmpi eq, %35, %33 : vector<16x16xi32>
      %37 = arith.extui %36 : vector<16x16xi1> to vector<16x16xi32>
      %38 = arith.sitofp %37 : vector<16x16xi32> to vector<16x16xf32>
      %cst_30 = arith.constant dense<0.000000e+00> : vector<1x16xf32>
      %39 = tpu.matmul %29, %38, %cst_30 {dimension_numbers = #tpu.dot_dimension_numbers<[1], [0], [0], [1], [0, 0, 1, 1], [], []>} : vector<1x16xf32>, vector<16x16xf32>, vector<1x16xf32> -> vector<1x16xf32>
      %c1_i32_31 = arith.constant 1 : i32
      %40 = vector.broadcast %c1_i32_31 : i32 to vector<1x16xi32>
      %41 = arith.cmpi sge, %31, %40 : vector<1x16xi32>
      %cst_32 = arith.constant 1.000000e+00 : f32
      %42 = vector.broadcast %cst_32 : f32 to vector<1x16xf32>
      %43 = arith.select %41, %39, %42 : vector<1x16xi1>, vector<1x16xf32>
      %44 = arith.mulf %29, %43 : vector<1x16xf32>
      %45 = tpu.iota {dimensions = array<i32: 0>} : vector<16x16xi32>
      %46 = tpu.iota {dimensions = array<i32: 1>} : vector<16x16xi32>
      %c2_i32 = arith.constant 2 : i32
      %47 = vector.broadcast %c2_i32 : i32 to vector<16x16xi32>
      %48 = arith.addi %45, %47 : vector<16x16xi32>
      %49 = arith.cmpi eq, %48, %46 : vector<16x16xi32>
      %50 = arith.extui %49 : vector<16x16xi1> to vector<16x16xi32>
      %51 = arith.sitofp %50 : vector<16x16xi32> to vector<16x16xf32>
      %cst_33 = arith.constant dense<0.000000e+00> : vector<1x16xf32>
      %52 = tpu.matmul %44, %51, %cst_33 {dimension_numbers = #tpu.dot_dimension_numbers<[1], [0], [0], [1], [0, 0, 1, 1], [], []>} : vector<1x16xf32>, vector<16x16xf32>, vector<1x16xf32> -> vector<1x16xf32>
      %c2_i32_34 = arith.constant 2 : i32
      %53 = vector.broadcast %c2_i32_34 : i32 to vector<1x16xi32>
      %54 = arith.cmpi sge, %31, %53 : vector<1x16xi32>
      %cst_35 = arith.constant 1.000000e+00 : f32
      %55 = vector.broadcast %cst_35 : f32 to vector<1x16xf32>
      %56 = arith.select %54, %52, %55 : vector<1x16xi1>, vector<1x16xf32>
      %57 = arith.mulf %44, %56 : vector<1x16xf32>
      %58 = tpu.iota {dimensions = array<i32: 0>} : vector<16x16xi32>
      %59 = tpu.iota {dimensions = array<i32: 1>} : vector<16x16xi32>
      %c4_i32 = arith.constant 4 : i32
      %60 = vector.broadcast %c4_i32 : i32 to vector<16x16xi32>
      %61 = arith.addi %58, %60 : vector<16x16xi32>
      %62 = arith.cmpi eq, %61, %59 : vector<16x16xi32>
      %63 = arith.extui %62 : vector<16x16xi1> to vector<16x16xi32>
      %64 = arith.sitofp %63 : vector<16x16xi32> to vector<16x16xf32>
      %cst_36 = arith.constant dense<0.000000e+00> : vector<1x16xf32>
      %65 = tpu.matmul %57, %64, %cst_36 {dimension_numbers = #tpu.dot_dimension_numbers<[1], [0], [0], [1], [0, 0, 1, 1], [], []>} : vector<1x16xf32>, vector<16x16xf32>, vector<1x16xf32> -> vector<1x16xf32>
      %c4_i32_37 = arith.constant 4 : i32
      %66 = vector.broadcast %c4_i32_37 : i32 to vector<1x16xi32>
      %67 = arith.cmpi sge, %31, %66 : vector<1x16xi32>
      %cst_38 = arith.constant 1.000000e+00 : f32
      %68 = vector.broadcast %cst_38 : f32 to vector<1x16xf32>
      %69 = arith.select %67, %65, %68 : vector<1x16xi1>, vector<1x16xf32>
      %70 = arith.mulf %57, %69 : vector<1x16xf32>
      %71 = tpu.iota {dimensions = array<i32: 0>} : vector<16x16xi32>
      %72 = tpu.iota {dimensions = array<i32: 1>} : vector<16x16xi32>
      %c8_i32 = arith.constant 8 : i32
      %73 = vector.broadcast %c8_i32 : i32 to vector<16x16xi32>
      %74 = arith.addi %71, %73 : vector<16x16xi32>
      %75 = arith.cmpi eq, %74, %72 : vector<16x16xi32>
      %76 = arith.extui %75 : vector<16x16xi1> to vector<16x16xi32>
      %77 = arith.sitofp %76 : vector<16x16xi32> to vector<16x16xf32>
      %cst_39 = arith.constant dense<0.000000e+00> : vector<1x16xf32>
      %78 = tpu.matmul %70, %77, %cst_39 {dimension_numbers = #tpu.dot_dimension_numbers<[1], [0], [0], [1], [0, 0, 1, 1], [], []>} : vector<1x16xf32>, vector<16x16xf32>, vector<1x16xf32> -> vector<1x16xf32>
      %c8_i32_40 = arith.constant 8 : i32
      %79 = vector.broadcast %c8_i32_40 : i32 to vector<1x16xi32>
      %80 = arith.cmpi sge, %31, %79 : vector<1x16xi32>
      %cst_41 = arith.constant 1.000000e+00 : f32
      %81 = vector.broadcast %cst_41 : f32 to vector<1x16xf32>
      %82 = arith.select %80, %78, %81 : vector<1x16xi1>, vector<1x16xf32>
      %83 = arith.mulf %70, %82 : vector<1x16xf32>
      %c0_42 = arith.constant 0 : index
      %c0_43 = arith.constant 0 : index
      %84 = vector.load %arg11[%c0_42, %c0_43] : memref<1x16xf32, #tpu.memory_space<vmem>>, vector<1x16xf32>
      tpu.vector_store %arg11[%c0_42, %c0_43], %83 {strides = array<i32>} : memref<1x16xf32, #tpu.memory_space<vmem>>, vector<1x16xf32>,
    } else {
    }
    return
  }
  func.func @transform_0(%arg0: i32) -> (i32, i32) {
    %c0_i32 = arith.constant 0 : i32
    %c0_i32_0 = arith.constant 0 : i32
    %c0_i32_1 = arith.constant 0 : i32
    return %c0_i32, %c0_i32_0 : i32, i32
  }
  func.func @transform_1(%arg0: i32) -> (i32, i32) {
    %c0_i32 = arith.constant 0 : i32
    %c0_i32_0 = arith.constant 0 : i32
    return %c0_i32, %arg0 : i32, i32
  }
  func.func @transform_2(%arg0: i32) -> (i32, i32) {
    %c0_i32 = arith.constant 0 : i32
    %c0_i32_0 = arith.constant 0 : i32
    return %c0_i32, %arg0 : i32, i32
  }
  func.func @transform_3(%arg0: i32) -> (i32, i32) {
    %c0_i32 = arith.constant 0 : i32
    %c0_i32_0 = arith.constant 0 : i32
    return %arg0, %c0_i32 : i32, i32
  }
  func.func @transform_4(%arg0: i32) -> (i32, i32) {
    %c0_i32 = arith.constant 0 : i32
    %c0_i32_0 = arith.constant 0 : i32
    %c0_i32_1 = arith.constant 0 : i32
    return %c0_i32, %c0_i32_0 : i32, i32
  }
  func.func @transform_5(%arg0: i32) -> (i32, i32) {
    %c0_i32 = arith.constant 0 : i32
    %c0_i32_0 = arith.constant 0 : i32
    %c0_i32_1 = arith.constant 0 : i32
    return %c0_i32, %c0_i32_0 : i32, i32
  }
  func.func @transform_6(%arg0: i32) -> (i32, i32) {
    %c0_i32 = arith.constant 0 : i32
    %c0_i32_0 = arith.constant 0 : i32
    %c0_i32_1 = arith.constant 0 : i32
    return %c0_i32, %c0_i32_0 : i32, i32
  }
  func.func @transform_7(%arg0: i32) -> (i32, i32) {
    %c0_i32 = arith.constant 0 : i32
    %c0_i32_0 = arith.constant 0 : i32
    %c0_i32_1 = arith.constant 0 : i32
    return %c0_i32, %c0_i32_0 : i32, i32
  }
  func.func @transform_8(%arg0: i32) -> (i32, i32) {
    %c0_i32 = arith.constant 0 : i32
    %c0_i32_0 = arith.constant 0 : i32
    %c0_i32_1 = arith.constant 0 : i32
    return %c0_i32, %c0_i32_0 : i32, i32
  }
  func.func @transform_9(%arg0: i32) -> (i32, i32) {
    %c0_i32 = arith.constant 0 : i32
    %c0_i32_0 = arith.constant 0 : i32
    %c0_i32_1 = arith.constant 0 : i32
    return %c0_i32, %c0_i32_0 : i32, i32
  }
  func.func @transform_10(%arg0: i32) -> (i32, i32) {
    %c0_i32 = arith.constant 0 : i32
    %c0_i32_0 = arith.constant 0 : i32
    %c0_i32_1 = arith.constant 0 : i32
    return %c0_i32, %c0_i32_0 : i32, i32
  }
}

</mosaic_0001>

<bundles_post_ra>
// kernel: tpu_custom_call.1
= control target key start
LH: loop header
LB: loop body
LE: loop exit
PB: predicated region body
PF: predicated region fallthrough
CT: control target
= control target key end

     0   :  { %s19166_s0 = inlined_call_operand.hbm [shape: bf16[1,1000], index: 0, kind: input, shape index: {}]   ;;  %s19167_s1 = inlined_call_operand.hbm [shape: bf16[1000,2048], index: 1, kind: input, shape index: {}]   ;;  %s19168_s2 = inlined_call_operand.hbm [shape: f32[1,2048], index: 2, kind: input, shape index: {}]   ;;  %s19169_s3 = inlined_call_operand.hbm [shape: bf16[2048,2048], index: 3, kind: input, shape index: {}]   ;;  %s19170_s4 = inlined_call_operand.hbm [shape: f32[1,2048], index: 4, kind: input, shape index: {}]   ;;  %s19171_s5 = inlined_call_operand.vmem [shape: bf16[2048,16], index: 5, kind: input, shape index: {}]   ;;  %s19172_s6 = inlined_call_operand.hbm [shape: f32[1,16], index: 6, kind: input, shape index: {}]   ;;  %s19173_s7 = inlined_call_operand.hbm [shape: f32[1,16], index: 7, kind: input, shape index: {}]   ;;  %s19174_s8 = inlined_call_operand.hbm [shape: f32[1,16], index: 8, kind: input, shape index: {}]   ;;  %s19175_s9 = inlined_call_operand.hbm [shape: f32[1,16], index: 9, kind: output, shape index: {0}]   ;;  %s19176_s10 = inlined_call_operand.hbm [shape: f32[1,16], index: 10, kind: output, shape index: {1}]  }
   0x1   :  { %19193 = sst [smem:[#allocation31_spill]] %s19166_s0 }
   0x2   :  { %19194 = sst [smem:[#allocation32_spill]] %s19167_s1 }
   0x3   :  { %19195 = sst [smem:[#allocation33_spill]] %s19170_s4 }
   0x4   :  { %19196 = sst [smem:[#allocation34_spill]] %s19172_s6 }
   0x5   :  { %16 = vsyncpa [#allocation4], 0 }
   0x6   :  { %17 = vsyncpa [#allocation7], 0 }
   0x7   :  { %19 = vsyncpa [#allocation7 + $0x1], 0 }
   0x8   :  { %20 = vsyncpa [#allocation10], 0 }
   0x9   :  { %22 = vsyncpa [#allocation10 + $0x1], 0 }
   0xa   :  { %23 = vsyncpa [#allocation13], 0 }
   0xb   :  { %24 = vsyncpa [#allocation16], 0 }
   0xc   :  { %25 = vsyncpa [#allocation5], 0 }
   0xd   :  { %26 = vsyncpa [#allocation19], 0  ;;  %s16462_s13 = smov 0   ;;  %s16464_s14 = smov 0  }
   0xe   :  { %s16466_s15 = smov 0   ;;  %s16468_s16 = smov 0  }
   0xf LB: > { %19197 = sst [smem:[#allocation28_spill]] %s16382_s15  ;;  %s16481_s17 = sadd.s32 4294967295, %s16386_s16   ;;  %s16386_s16 = sphi %s16468_s16, %s19227_s16   ;;  %s16382_s15 = sphi %s16466_s15, %s19229_s15   ;;  %s16378_s14 = sphi %s16464_s14, %s19231_s14   ;;  %s16374_s13 = sphi %s16462_s13, %s19230_s13  }
  0x10   : > { %p73_p0 = scmp.ne.s32.totalorder %s16378_s14, %s16374_s13  ;;  %p19177_p1 = scmp.eq.s32.totalorder %s16481_s17, 0 }
  0x11   : > { %p13860_p2 = scmp.ge.s32.totalorder %s16386_s16, 1  ;;  %p283_p3 = scmp.lt.s32.totalorder %s16386_s16, 3 }
  0x12   : > { %p16490_p5 = por %p19177_p1, %p73_p0  ;;  %s16388_s20 = smov [#allocation11]  }
  0x13   : > { %p16494_p6 = pnand %p13860_p2, %p283_p3  ;;  %s307_s21 = sshll.u32 %s16388_s20, 4  ;;  %s308_s21 = int_to_ptr.vmem [resolvable:$true] %s307_s21 }
  0x14   : > { %s19198_s18 = scalar_select %p16490_p5, 1, 0 }
  0x15   : > { %s19199_s19 = scalar_select %p16494_p6, 1, 0 }
  0x16   : > { %p15832_p7 = pneg %p16494_p6  ;;  %s16389_s22 = smov [#allocation12]  }
  0x17   : > { %s321_s23 = sshll.u32 %s16389_s22, 4  ;;  %s16507_s25 = sadd.s32 1, %s16386_s16   ;;  %s322_s23 = int_to_ptr.vmem [resolvable:$true] %s321_s23 }
  0x18   : > { %p16502_p8 = pnand %p15832_p7, %p19177_p1  ;;  %19201 = sst [smem:[#allocation29_spill]] %s16507_s25 }
  0x19   : > { %s57_s26 = ssub.s32 %s16386_s16, %s16507_s25  ;;  %s16073_s28 = scalar_lea.vmem %s308_s21, 256 }
  0x1a   : > { %s19200_s24 = scalar_select %p16502_p8, 1, 0 }
  0x1b   : > { %p16513_p9 = pneg %p16502_p8  ;;  %p16074_p10 = scmp.ne.s32.totalorder %s308_s21, %s16073_s28 }
  0x1c   : > { %p16081_p13 = scmp.lt.s32.totalorder %s308_s21, %s308_s21  ;;  %p16082_p0 = scmp.lt.s32.totalorder %s16073_s28, %s16073_s28 }
  0x1d   : > { %s19202_s27 = scalar_select %p16513_p9, 1, 0 }
  0x1e   : > { %p16076_p11 = pnand %p16074_p10, %p16513_p9  ;;  %p16083_p2 = por %p16082_p0, %p16081_p13 }
  0x20   : > { %p16077_p12 = pneg %p16076_p11 }
  0x22   : > { %p16084_p3 = pnand %p16083_p2, %p16077_p12 }
  0x24   : > { %16087 = shalt.err (!%p16084_p3)
}
  0x25   : > { %s19203_s4 = sld [smem:[#allocation33_spill]]  ;;  %s16099_s11 = scalar_lea.vmem %s322_s23, 16 }
  0x26   : > { %p16100_p7 = scmp.ne.s32.totalorder %s322_s23, %s16099_s11  ;;  %s16106_s12 = scalar_lea.vmem %s322_s23, 32 }
  0x27   : > { %p16107_p10 = scmp.lt.s32.totalorder %s322_s23, %s322_s23  ;;  %p16108_p11 = scmp.lt.s32.totalorder %s16106_s12, %s16099_s11 }
  0x28   : > { %p16102_p4 = pnand %p16100_p7, %p16513_p9 }
  0x29   : > { %p16109_p5 = por %p16108_p11, %p16107_p10 }
  0x2a   : > { %p16103_p1 = pneg %p16102_p4 }
  0x2b   : > { %15838 = dma.hbm_to_vmem [thread:$0]  (!%p16502_p8), %s19203_s4, 256, %s308_s21, [#allocation10]  }
  0x2c   : > { %p16110_p6 = pnand %p16109_p5, %p16103_p1 }
  0x2e   : > { %16113 = shalt.err (!%p16110_p6)
}
  0x2f   : > { %s19204_s6 = sld [smem:[#allocation34_spill]]  ;;  %p58_p4 = scmp.eq.s32.totalorder %s57_s26, 0 }
  0x30   : > { %s60_s21 = sadd.s32 1, %s16382_s15  ;;  %p67_p1 = scmp.ne.s32.totalorder %s16382_s15, %s16378_s14 }
  0x31   : > { %p68_p5 = scmp.eq.s32.totalorder %s16386_s16, 0  ;;  %p15863_p12 = scmp.lt.s32.totalorder %s16386_s16, 2 }
  0x32   : > { %s16536_s22 = scalar_select %p58_p4, %s16382_s15, %s60_s21  }
  0x33   : > { %p69_p6 = por %p68_p5, %p67_p1  ;;  %s19180_s28 = sand.u32 1, %s16386_s16  }
  0x34   : > { %19205 = sst [smem:[#allocation30_spill]] %s16536_s22  ;;  %s16541_s29 = sand.u32 1, %s16382_s15  }
  0x35   : > { %15841 = dma.hbm_to_vmem [thread:$0]  (!%p16502_p8), %s19204_s6, 16, %s322_s23, [#allocation13]  }
  0x36   : > { %s15796_s30 = smul.u32 4000, %s16541_s29  ;;  %s15576_s11 = sshll.u32 %s16386_s16, 9 }
  0x37   : > { %p16545_p13 = pnand %p15863_p12, %p69_p6  ;;  %s19207_s1 = sld [smem:[#allocation32_spill]] }
  0x38   : > { %s358_s20 = scalar_lea.vmem [#allocation6], %s15796_s30  ;;  %s16558_s4 = scalar_lea.sflag [#allocation7], %s19180_s28 }
  0x39   : > { %s19206_s12 = scalar_select %p16545_p13, 1, 0 }
  0x3a   : > { %s365_s21 = sshll.u32 %s358_s20, 4  ;;  %p16564_p2 = pneg %p16545_p13  ;;  %s16554_s21 = int_to_ptr.vmem [resolvable:$true] %s365_s21 }
  0x3c   : > { %s19208_s22 = scalar_select %p16564_p2, 1, 0 }
  0x3d   : > { %s16552_s13 = scalar_lea.hbm %s19207_s1, %s15576_s11  ;;  %s16119_s30 = scalar_lea.hbm %s19207_s1, 128000 }
  0x3e   : > { %s16114_s6 = scalar_lea.hbm %s16552_s13, 64000  ;;  %p16120_p10 = scmp.lt.s32.totalorder %s16552_s13, %s19207_s1 }
  0x3f   : > { %p16115_p0 = scmp.ne.s32.totalorder %s16552_s13, %s16114_s6  ;;  %p16121_p11 = scmp.lt.s32.totalorder %s16119_s30, %s16114_s6 }
  0x41   : > { %p16117_p3 = pnand %p16564_p2, %p16115_p0  ;;  %p16122_p4 = por %p16121_p11, %p16120_p10 }
  0x43   : > { %p16118_p7 = pneg %p16117_p3 }
  0x45   : > { %p16123_p1 = pnand %p16122_p4, %p16118_p7 }
  0x47   : > { %16126 = shalt.err (!%p16123_p1)
}
  0x48   : > { %s16127_s28 = scalar_lea.vmem %s16554_s21, 64000  ;;  %s16390_s15 = smov [#allocation6]  }
  0x49   : > { %p16128_p5 = scmp.ne.s32.totalorder %s16554_s21, %s16127_s28  ;;  %s16132_s11 = sshll.u32 %s16390_s15, 4  ;;  %s16133_s11 = int_to_ptr.vmem [resolvable:$false] %s16132_s11 }
  0x4a   : > { %s16134_s23 = scalar_lea.vmem %s16133_s11, 128000  ;;  %p16135_p0 = scmp.lt.s32.totalorder %s16554_s21, %s16133_s11 }
  0x4b   : > { %p16130_p6 = pnand %p16128_p5, %p16564_p2  ;;  %p16136_p3 = scmp.lt.s32.totalorder %s16134_s23, %s16127_s28 }
  0x4d   : > { %p16131_p12 = pneg %p16130_p6  ;;  %p16137_p8 = por %p16136_p3, %p16135_p0 }
  0x4f   : > { %p16138_p9 = pnand %p16137_p8, %p16131_p12 }
  0x51   : > { %16141 = shalt.err (!%p16138_p9)
}
  0x52   : > { %s19192_s6 = smov 1024   ;;  %s16392_s30 = smov 512  }
  0x53   : > { %s16393_s26 = smov 32   ;;  %s16394_s20 = smov [#allocation3]  }
  0x54   : > { %15851 = dma.hbm_to_vmem [thread:$0]  (!%p16545_p13), %s16552_s13, 64000, %s16554_s21, %s16558_s4, %s19192_s6, %s16392_s30, %s16393_s26  }
  0x55   : > { %s296_s15 = sshll.u32 %s16394_s20, 4  ;;  %s16395_s1 = smov [#allocation14]   ;;  %s297_s15 = int_to_ptr.vmem [resolvable:$true] %s296_s15 }
  0x56   : > { %s332_s25 = sshll.u32 %s16395_s1, 4  ;;  %s16153_s28 = scalar_lea.vmem %s297_s15, 128  ;;  %s333_s25 = int_to_ptr.vmem [resolvable:$true] %s332_s25 }
  0x57   : > { %p16154_p8 = scmp.ne.s32.totalorder %s297_s15, %s16153_s28  ;;  %p19209_p9 = scmp.ne.s32.totalorder %s19202_s27, 0 }
  0x58   : > { %p16161_p11 = scmp.lt.s32.totalorder %s297_s15, %s297_s15  ;;  %p16162_p4 = scmp.lt.s32.totalorder %s16153_s28, %s16153_s28 }
  0x59   : > { %p16156_p7 = pnand %p16154_p8, %p19209_p9 }
  0x5a   : > { %p16163_p1 = por %p16162_p4, %p16161_p11 }
  0x5b   : > { %p16157_p10 = pneg %p16156_p7 }
  0x5d   : > { %p16164_p5 = pnand %p16163_p1, %p16157_p10 }
  0x5f   : > { %16167 = shalt.err (!%p16164_p5)
}
  0x60   : > { %p19210_p6 = scmp.ne.s32.totalorder %s19200_s24, 0  ;;  %s19211_s0 = sld [smem:[#allocation31_spill]] }
  0x61   : > { %s16179_s1 = scalar_lea.vmem %s333_s25, 16  ;;  %s16186_s21 = scalar_lea.vmem %s333_s25, 32 }
  0x62   : > { %p16180_p12 = scmp.ne.s32.totalorder %s333_s25, %s16179_s1  ;;  %p16187_p8 = scmp.lt.s32.totalorder %s333_s25, %s333_s25 }
  0x63   : > { %p16188_p7 = scmp.lt.s32.totalorder %s16186_s21, %s16179_s1 }
  0x64   : > { %p16182_p0 = pnand %p16180_p12, %p19209_p9 }
  0x65   : > { %p16189_p13 = por %p16188_p7, %p16187_p8 }
  0x66   : > { %15835 = dma.hbm_to_vmem [thread:$0]  (!%p19210_p6), %s19211_s0, 128, %s297_s15, [#allocation4]  }
  0x67   : > { %p16183_p3 = pneg %p16182_p0 }
  0x69   : > { %p16190_p2 = pnand %p16189_p13, %p16183_p3 }
  0x6b   : > { %16193 = shalt.err (!%p16190_p2)
}
  0x6c   : > { %15844 = dma.hbm_to_vmem [thread:$0]  (!%p19210_p6), %s19173_s7, 16, %s333_s25, [#allocation13]  }
  0x6d   : > { %s13869_s26 = sshll.u32 %s16541_s29, 3  ;;  %s16396_s20 = smov [#allocation15]  }
  0x6e   : > { %s343_s15 = sshll.u32 %s16396_s20, 4  ;;  %s15577_s28 = sshll.u32 %s16386_s16, 7  ;;  %s344_s15 = int_to_ptr.vmem [resolvable:$true] %s343_s15 }
  0x6f   : > { %s16205_s11 = scalar_lea.vmem %s344_s15, 16  ;;  %s16212_s13 = scalar_lea.vmem %s344_s15, 32 }
  0x70   : > { %p16206_p10 = scmp.ne.s32.totalorder %s344_s15, %s16205_s11  ;;  %p16213_p2 = scmp.lt.s32.totalorder %s344_s15, %s344_s15 }
  0x71   : > { %p16214_p4 = scmp.lt.s32.totalorder %s16212_s13, %s16205_s11 }
  0x72   : > { %p16208_p11 = pnand %p16206_p10, %p19209_p9 }
  0x73   : > { %p16215_p1 = por %p16214_p4, %p16213_p2 }
  0x74   : > { %p16209_p13 = pneg %p16208_p11 }
  0x76   : > { %p16216_p5 = pnand %p16215_p1, %p16209_p13 }
  0x78   : > { %16219 = shalt.err (!%p16216_p5)
}
  0x79   : > { %15847 = dma.hbm_to_vmem [thread:$0]  (!%p19210_p6), %s19174_s8, 16, %s344_s15, [#allocation16]  }
  0x7a   : > { %s385_s30 = scalar_lea.hbm %s19168_s2, %s15577_s28  ;;  %s379_s27 = scalar_lea.vmem [#allocation8], %s13869_s26 }
  0x7b   : > { %s387_s20 = sshll.u32 %s379_s27, 4  ;;  %s16220_s6 = scalar_lea.hbm %s385_s30, 128  ;;  %s388_s20 = int_to_ptr.vmem [resolvable:$true] %s387_s20 }
  0x7c   : > { %p16221_p9 = scmp.ne.s32.totalorder %s385_s30, %s16220_s6  ;;  %p19212_p12 = scmp.ne.s32.totalorder %s19208_s22, 0 }
  0x7d   : > { %s16225_s24 = scalar_lea.hbm %s19168_s2, 256  ;;  %p16226_p6 = scmp.lt.s32.totalorder %s385_s30, %s19168_s2 }
  0x7e   : > { %p16223_p0 = pnand %p16221_p9, %p19212_p12  ;;  %p16227_p8 = scmp.lt.s32.totalorder %s16225_s24, %s16220_s6 }
  0x80   : > { %p16224_p3 = pneg %p16223_p0  ;;  %p16228_p7 = por %p16227_p8, %p16226_p6 }
  0x82   : > { %p16229_p10 = pnand %p16228_p7, %p16224_p3 }
  0x84   : > { %16232 = shalt.err (!%p16229_p10)
}
  0x85   : > { %s16233_s26 = scalar_lea.vmem %s388_s20, 128  ;;  %s16397_s15 = smov [#allocation8]  }
  0x86   : > { %p16234_p11 = scmp.ne.s32.totalorder %s388_s20, %s16233_s26  ;;  %s16238_s28 = sshll.u32 %s16397_s15, 4  ;;  %s16239_s28 = int_to_ptr.vmem [resolvable:$false] %s16238_s28 }
  0x87   : > { %s16240_s25 = scalar_lea.vmem %s16239_s28, 256  ;;  %p16241_p4 = scmp.lt.s32.totalorder %s388_s20, %s16239_s28 }
  0x88   : > { %p16236_p13 = pnand %p16234_p11, %p19212_p12  ;;  %p16242_p1 = scmp.lt.s32.totalorder %s16240_s25, %s16233_s26 }
  0x8a   : > { %p16237_p2 = pneg %p16236_p13  ;;  %p16243_p5 = por %p16242_p1, %p16241_p4 }
  0x8c   : > { %p16244_p9 = pnand %p16243_p5, %p16237_p2 }
  0x8e   : > { %16247 = shalt.err (!%p16244_p9)
}
  0x8f   : > { %p19213_p0 = scmp.ne.s32.totalorder %s19206_s12, 0  ;;  %s13872_s0 = sshll.u32 %s16541_s29, 13 }
  0x90   : > { %s15579_s6 = sshll.u32 %s16386_s16, 17  ;;  %s398_s11 = scalar_lea.vmem [#allocation9], %s13872_s0 }
  0x91   : > { %15854 = dma.hbm_to_vmem [thread:$0]  (!%p19213_p0), %s385_s30, 128, %s388_s20, %s16558_s4  }
  0x92   : > { %s16632_s27 = scalar_lea.hbm %s19169_s3, %s15579_s6  ;;  %s406_s13 = sshll.u32 %s398_s11, 4  ;;  %s16634_s13 = int_to_ptr.vmem [resolvable:$true] %s406_s13 }
  0x93   : > { %s19214_s24 = sand.u32 1, %s16386_s16   ;;  %s16248_s26 = scalar_lea.hbm %s16632_s27, 131072 }
  0x94   : > { %s16638_s1 = scalar_lea.sflag [#allocation10], %s19214_s24  ;;  %p16249_p3 = scmp.ne.s32.totalorder %s16632_s27, %s16248_s26 }
  0x95   : > { %s16253_s30 = scalar_lea.hbm %s19169_s3, 262144  ;;  %p16254_p7 = scmp.lt.s32.totalorder %s16632_s27, %s19169_s3 }
  0x96   : > { %p16251_p6 = pnand %p16249_p3, %p19212_p12  ;;  %p16255_p10 = scmp.lt.s32.totalorder %s16253_s30, %s16248_s26 }
  0x98   : > { %p16252_p8 = pneg %p16251_p6  ;;  %p16256_p11 = por %p16255_p10, %p16254_p7 }
  0x9a   : > { %p16257_p13 = pnand %p16256_p11, %p16252_p8 }
  0x9c   : > { %16260 = shalt.err (!%p16257_p13)
}
  0x9d   : > { %s16261_s16 = scalar_lea.vmem %s16634_s13, 131072  ;;  %s16398_s28 = smov [#allocation9]  }
  0x9e   : > { %p16262_p2 = scmp.ne.s32.totalorder %s16634_s13, %s16261_s16  ;;  %s16266_s25 = sshll.u32 %s16398_s28, 4  ;;  %s16267_s25 = int_to_ptr.vmem [resolvable:$false] %s16266_s25 }
  0x9f   : > { %s16268_s0 = scalar_lea.vmem %s16267_s25, 262144  ;;  %p16269_p5 = scmp.lt.s32.totalorder %s16634_s13, %s16267_s25 }
  0xa0   : > { %p16264_p4 = pnand %p16262_p2, %p19212_p12  ;;  %p16270_p9 = scmp.lt.s32.totalorder %s16268_s0, %s16261_s16 }
  0xa2   : > { %p16265_p1 = pneg %p16264_p4  ;;  %p16271_p3 = por %p16270_p9, %p16269_p5 }
  0xa4   : > { %p16272_p6 = pnand %p16271_p3, %p16265_p1 }
  0xa6   : > { %16275 = shalt.err (!%p16272_p6)
}
  0xa7   : > { %s16399_s6 = smov 64   ;;  %s19215_s21 = smov 1024  }
  0xa8   : > { %15857 = dma.hbm_to_vmem [thread:$0]  (!%p19213_p0), %s16632_s27, 131072, %s16634_s13, %s16638_s1, %s19215_s21, %s19215_s21, %s16399_s6  }
  0xa9   : > { %p19216_p12 = scmp.ne.s32.totalorder %s19199_s19, 0 }
  0xaa   : > { %p19217_p8 = scmp.eq.s32.totalorder (!%p19216_p12), %s16481_s17, 0 }
  0xab   : > { %418 = sbr.rel (%p19216_p12) target bundleno = 3184 (0xc70), region = 56 }
  0xb0   : > { %16341 = dma.done.wait (%p19217_p8), [#allocation4], 128   ;;  %p19218_p7 = pmov %p19217_p8 }
  0xb1   : > { %s424_s22 = sand.u32 1, %s16481_s17   ;;  %s426_s12 = sand.u32 1, %s16378_s14  }
  0xb2   : > { %16343 = vsyncadd (%p19218_p7), [#allocation4], 4294967168  ;;  %s15797_s23 = smul.u32 4000, %s426_s12  ;;  %s425_s11 = scalar_lea.sflag [#allocation7], %s424_s22 }
  0xb3   : > { %p19219_p10 = scmp.ne.s32.totalorder %s19198_s18, 0 }
  0xb4   : > { %s16671_s24 = scalar_lea.vmem [#allocation6], %s15797_s23 }
  0xb5   : > { %16345 = dma.done.wait (%p19219_p10), %s425_s11, 64128  }
  0xb6   : > { %16347 = vsyncadd (%p19219_p10), %s425_s11, 4294903168  ;;  %s13878_s19 = sshll.u32 %s426_s12, 3  ;;  %s13879_s27 = sshll.u32 %s426_s12, 13 }
  0xb7   : > { %s16677_s13 = scalar_lea.vmem [#allocation8], %s13878_s19  ;;  %s443_s1 = scalar_lea.sflag [#allocation10], %s424_s22 }
  0xb8   : > { %s16679_s26 = scalar_lea.vmem [#allocation9], %s13879_s27 }
  0xb9   : > { %16349 = dma.done.wait (%p19219_p10), %s443_s1, 131072  }
  0xba   : > { %16351 = vsyncadd (%p19219_p10), %s443_s1, 4294836224  ;;  %p19220_p0 = pmov %p19218_p7 }
  0xbc   : > { %16353 = dma.done.wait (%p19220_p0), [#allocation10], 256   ;;  %p19221_p11 = pmov %p19220_p0 }
  0xbd   : > { %p19222_p13 = pmov %p19220_p0 }
  0xbe   : > { %16355 = vsyncadd (%p19221_p11), [#allocation10], 4294967040 }
  0xbf   : > { %16357 = dma.done.wait (%p19222_p13), [#allocation13], 32   ;;  %p19223_p2 = pmov %p19220_p0 }
  0xc0   : > { %p19224_p4 = pmov %p19220_p0 }
  0xc1   : > { %16359 = vsyncadd (%p19223_p2), [#allocation13], 4294967264 }
  0xc2   : > { %16361 = dma.done.wait (%p19224_p4), [#allocation16], 16   ;;  %p19225_p1 = pmov %p19220_p0 }
  0xc3   : > { %p19226_p5 = scmp.ne.s32.totalorder %s16481_s17, 0 }
  0xc4   : > { %16363 = vsyncadd (%p19225_p1), [#allocation16], 4294967280 }
  0xc5   : > { %511 = sbr.rel (%p19226_p5) target bundleno = 204 (0xcc), region = 92 }
  0xca   : > { %v16400_v0 = vmov 0.0  }
  0xcb   : > { %512 = vst [vmem:[#allocation2] sm:$0xff] %v16400_v0  ;;  %513 = vst [vmem:[#allocation2 + $0x8] sm:$0xff] %v16400_v0 }
  0xcc PF: > { %v571_v1 = vld [vmem:[%s16671_s24 + $0x1c0] sm:$0xff]  ;;  %v16401_v33 = vmov 1966171168   ;;  %v1021_v35 = vlaneseq  ;;  %v16733_v60 = vld [vmem:[#allocation3] sm:$0xff]  ;;  %vm3614_vm0 = vcmask 850944   ;;  %vm3618_vm1 = vcmask 1043456  }
  0xcd   : > { %v575_v2 = vld [vmem:[%s16671_s24 + $0x1e0] sm:$0xff]  ;;  %v1019_v34 = vunpack.c.l.s4 %v16401_v33  ;;  %p15421_p9 = scmp.ne.s32.totalorder %s16481_s17, 1 }
  0xce   : > { %v699_v3 = vld [vmem:[%s16671_s24 + $0x5c0] sm:$0xff]  ;;  %v13942_v4 = vcombine.high %v571_v1, %v575_v2  ;;  %v13941_v6 = vcombine.low %v571_v1, %v575_v2  ;;  %v16722_v45 = vshrl.u32 %v1021_v35, 7 }
  0xcf   : > { %v703_v5 = vld [vmem:[%s16671_s24 + $0x5e0] sm:$0xff]  ;;  %v1020_v44 = vunpack.c.0.s8 %v1019_v34 }
  0xd0   : > { %v563_v7 = vld [vmem:[%s16671_s24 + $0x180] sm:$0xff]  ;;  %v14070_v9 = vcombine.high %v699_v3, %v703_v5  ;;  %v14069_v10 = vcombine.low %v699_v3, %v703_v5  ;;  %3643 = vmatprep.subr.bf16.mxu0 %v13942_v4 }
  0xd1   : > { %v567_v8 = vld [vmem:[%s16671_s24 + $0x1a0] sm:$0xff]  ;;  %3644 = vmatpush1.bf16.msra.mxu0 %v13941_v6  ;;  %v16729_v54 = vsub.s32 %v1020_v44, %v16722_v45 }
  0xd2   : > { %v13934_v11 = vcombine.high %v563_v7, %v567_v8  ;;  %v691_v12 = vld [vmem:[%s16671_s24 + $0x580] sm:$0xff]  ;;  %3684 = vmatprep.subr.bf16.mxu1 %v14070_v9  ;;  %v13933_v19 = vcombine.low %v563_v7, %v567_v8 }
  0xd3   : > { %v695_v13 = vld [vmem:[%s16671_s24 + $0x5a0] sm:$0xff]  ;;  %3685 = vmatpush1.bf16.msra.mxu1 %v14069_v10  ;;  %v16739_v0 = vrot.slane %v16733_v60, %v16729_v54 }
  0xd4   : > { %v555_v14 = vld [vmem:[%s16671_s24 + $0x140] sm:$0xff]  ;;  %v14062_v15 = vcombine.high %v691_v12, %v695_v13  ;;  %3645 = vmatprep.subr.bf16.mxu0 %v13934_v11  ;;  %v14061_v20 = vcombine.low %v691_v12, %v695_v13 }
  0xd5   : > { %v559_v16 = vld [vmem:[%s16671_s24 + $0x160] sm:$0xff]  ;;  %3646 = vmatpush1.bf16.msra.mxu0 %v13933_v19  ;;  %v1032_v4 = vcombine.high %v16739_v0, %v16739_v0 }
  0xd6   : > { %v683_v17 = vld [vmem:[%s16671_s24 + $0x540] sm:$0xff]  ;;  %v13926_v21 = vcombine.high %v555_v14, %v559_v16  ;;  %3686 = vmatprep.subr.bf16.mxu1 %v14062_v15  ;;  %v13925_v27 = vcombine.low %v555_v14, %v559_v16 }
  0xd7   : > { %v687_v18 = vld [vmem:[%s16671_s24 + $0x560] sm:$0xff]  ;;  %3687 = vmatpush1.bf16.msra.mxu1 %v14061_v20  ;;  %v16748_v10 = vrot.slane %v1032_v4, %v16729_v54 }
  0xd8   : > { %v14054_v22 = vcombine.high %v683_v17, %v687_v18  ;;  %v547_v23 = vld [vmem:[%s16671_s24 + $0x100] sm:$0xff]  ;;  %3647 = vmatprep.subr.bf16.mxu0 %v13926_v21  ;;  %v14053_v28 = vcombine.low %v683_v17, %v687_v18 }
  0xd9   : > { %v551_v24 = vld [vmem:[%s16671_s24 + $0x120] sm:$0xff]  ;;  %3648 = vmatpush1.bf16.msra.mxu0 %v13925_v27  ;;  %3675 = vmatprep.mubr.bf16.mxu0 %v16748_v10  ;;  %v16755_v14 = vcombine.high %v16748_v10, %v16748_v10 }
  0xda   : > { %v675_v25 = vld [vmem:[%s16671_s24 + $0x500] sm:$0xff]  ;;  %v13918_v29 = vcombine.high %v547_v23, %v551_v24  ;;  %3688 = vmatprep.subr.bf16.mxu1 %v14054_v22  ;;  %v13917_v38 = vcombine.low %v547_v23, %v551_v24 }
  0xdb   : > { %v679_v26 = vld [vmem:[%s16671_s24 + $0x520] sm:$0xff]  ;;  %3689 = vmatpush1.bf16.msra.mxu1 %v14053_v28  ;;  %3716 = vmatprep.mubr.bf16.mxu1 %v16755_v14 }
  0xdc   : > { %v14046_v30 = vcombine.high %v675_v25, %v679_v26  ;;  %v539_v31 = vld [vmem:[%s16671_s24 + $0xc0] sm:$0xff]  ;;  %3649 = vmatprep.subr.bf16.mxu0 %v13918_v29  ;;  %v14045_v39 = vcombine.low %v675_v25, %v679_v26 }
  0xdd   : > { %v543_v32 = vld [vmem:[%s16671_s24 + $0xe0] sm:$0xff]  ;;  %3650 = vmatpush1.bf16.msra.mxu0 %v13917_v38 }
  0xde   : > { %v667_v36 = vld [vmem:[%s16671_s24 + $0x4c0] sm:$0xff]  ;;  %v13910_v40 = vcombine.high %v539_v31, %v543_v32  ;;  %3690 = vmatprep.subr.bf16.mxu1 %v14046_v30  ;;  %v13909_v48 = vcombine.low %v539_v31, %v543_v32 }
  0xdf   : > { %v671_v37 = vld [vmem:[%s16671_s24 + $0x4e0] sm:$0xff]  ;;  %3691 = vmatpush1.bf16.msra.mxu1 %v14045_v39 }
  0xe0   : > { %v14038_v41 = vcombine.high %v667_v36, %v671_v37  ;;  %v531_v42 = vld [vmem:[%s16671_s24 + $0x80] sm:$0xff]  ;;  %3651 = vmatprep.subr.bf16.mxu0 %v13910_v40  ;;  %v14037_v49 = vcombine.low %v667_v36, %v671_v37 }
  0xe1   : > { %v535_v43 = vld [vmem:[%s16671_s24 + $0xa0] sm:$0xff]  ;;  %3652 = vmatpush1.bf16.msra.mxu0 %v13909_v48 }
  0xe2   : > { %v659_v46 = vld [vmem:[%s16671_s24 + $0x480] sm:$0xff]  ;;  %v13902_v50 = vcombine.high %v531_v42, %v535_v43  ;;  %3692 = vmatprep.subr.bf16.mxu1 %v14038_v41  ;;  %v13901_v57 = vcombine.low %v531_v42, %v535_v43 }
  0xe3   : > { %v663_v47 = vld [vmem:[%s16671_s24 + $0x4a0] sm:$0xff]  ;;  %3693 = vmatpush1.bf16.msra.mxu1 %v14037_v49 }
  0xe4   : > { %v14030_v51 = vcombine.high %v659_v46, %v663_v47  ;;  %v523_v52 = vld [vmem:[%s16671_s24 + $0x40] sm:$0xff]  ;;  %3653 = vmatprep.subr.bf16.mxu0 %v13902_v50  ;;  %v14029_v58 = vcombine.low %v659_v46, %v663_v47 }
  0xe5   : > { %v527_v53 = vld [vmem:[%s16671_s24 + $0x60] sm:$0xff]  ;;  %3654 = vmatpush1.bf16.msra.mxu0 %v13901_v57 }
  0xe6   : > { %v651_v55 = vld [vmem:[%s16671_s24 + $0x440] sm:$0xff]  ;;  %v13894_v59 = vcombine.high %v523_v52, %v527_v53  ;;  %3694 = vmatprep.subr.bf16.mxu1 %v14030_v51  ;;  %v13893_v3 = vcombine.low %v523_v52, %v527_v53 }
  0xe7   : > { %v655_v56 = vld [vmem:[%s16671_s24 + $0x460] sm:$0xff]  ;;  %3695 = vmatpush1.bf16.msra.mxu1 %v14029_v58 }
  0xe8   : > { %v14022_v61 = vcombine.high %v651_v55, %v655_v56  ;;  %v515_v62 = vld [vmem:[%s16671_s24] sm:$0xff]  ;;  %3655 = vmatprep.subr.bf16.mxu0 %v13894_v59  ;;  %v14021_v5 = vcombine.low %v651_v55, %v655_v56 }
  0xe9   : > { %v519_v63 = vld [vmem:[%s16671_s24 + $0x20] sm:$0xff]  ;;  %3656 = vmatpush1.bf16.msra.mxu0 %v13893_v3 }
  0xea   : > { %v643_v1 = vld [vmem:[%s16671_s24 + $0x400] sm:$0xff]  ;;  %v13886_v6 = vcombine.high %v515_v62, %v519_v63  ;;  %3696 = vmatprep.subr.bf16.mxu1 %v14022_v61  ;;  %v13885_v13 = vcombine.low %v515_v62, %v519_v63 }
  0xeb   : > { %v647_v2 = vld [vmem:[%s16671_s24 + $0x420] sm:$0xff]  ;;  %3697 = vmatpush1.bf16.msra.mxu1 %v14021_v5 }
  0xec   : > { %v14014_v7 = vcombine.high %v643_v1, %v647_v2  ;;  %v635_v8 = vld [vmem:[%s16671_s24 + $0x3c0] sm:$0xff]  ;;  %3657 = vmatprep.subr.bf16.mxu0 %v13886_v6  ;;  %v14013_v15 = vcombine.low %v643_v1, %v647_v2  ;;  %v1017_v1 = vcombine.high %v16733_v60, %v16733_v60 }
  0xed   : > { %v639_v9 = vld [vmem:[%s16671_s24 + $0x3e0] sm:$0xff]  ;;  %3658 = vmatpush1.bf16.msra.mxu0 %v13885_v13 }
  0xee   : > { %v763_v11 = vld [vmem:[%s16671_s24 + $0x7c0] sm:$0xff]  ;;  %v14006_v16 = vcombine.high %v635_v8, %v639_v9  ;;  %3698 = vmatprep.subr.bf16.mxu1 %v14014_v7  ;;  %v14005_v22 = vcombine.low %v635_v8, %v639_v9 }
  0xef   : > { %v767_v12 = vld [vmem:[%s16671_s24 + $0x7e0] sm:$0xff]  ;;  %3699 = vmatpush1.bf16.msra.mxu1 %v14013_v15 }
  0xf0   : > { %v14134_v17 = vcombine.high %v763_v11, %v767_v12  ;;  %v627_v18 = vld [vmem:[%s16671_s24 + $0x380] sm:$0xff]  ;;  %3659 = vmatprep.subr.bf16.mxu0 %v14006_v16  ;;  %v14133_v23 = vcombine.low %v763_v11, %v767_v12  ;;  %v16787_v11 = vrot.slane %v1017_v1, %v16729_v54 }
  0xf1   : > { %v631_v19 = vld [vmem:[%s16671_s24 + $0x3a0] sm:$0xff]  ;;  %3660 = vmatpush2.bf16.msra.mxu0 %v14005_v22 }
  0xf2   : > { %v755_v20 = vld [vmem:[%s16671_s24 + $0x780] sm:$0xff]  ;;  %v13998_v24 = vcombine.high %v627_v18, %v631_v19  ;;  %3700 = vmatprep.subr.bf16.mxu1 %v14134_v17  ;;  %v13997_v30 = vcombine.low %v627_v18, %v631_v19 }
  0xf3   : > { %v759_v21 = vld [vmem:[%s16671_s24 + $0x7a0] sm:$0xff]  ;;  %3701 = vmatpush2.bf16.msra.mxu1 %v14133_v23 }
  0xf4   : > { %v14126_v25 = vcombine.high %v755_v20, %v759_v21  ;;  %v619_v26 = vld [vmem:[%s16671_s24 + $0x340] sm:$0xff]  ;;  %3661 = vmatprep.subr.bf16.mxu0 %v13998_v24  ;;  %v14125_v31 = vcombine.low %v755_v20, %v759_v21  ;;  %v1033_v20 = vcombine.high %v16787_v11, %v16787_v11  ;;  %v16799_v24 = vrot.slane %v16739_v0, %v16729_v54 }
  0xf5   : > { %v623_v27 = vld [vmem:[%s16671_s24 + $0x360] sm:$0xff]  ;;  %3662 = vmatpush2.bf16.msra.mxu0 %v13997_v30 }
  0xf6   : > { %v747_v28 = vld [vmem:[%s16671_s24 + $0x740] sm:$0xff]  ;;  %v13990_v32 = vcombine.high %v619_v26, %v623_v27  ;;  %3702 = vmatprep.subr.bf16.mxu1 %v14126_v25  ;;  %v13989_v39 = vcombine.low %v619_v26, %v623_v27  ;;  %v16804_v30 = vrot.slane %v1033_v20, %v16729_v54  ;;  %v16810_v0 = vcombine.high %v16799_v24, %v16799_v24 }
  0xf7   : > { %v751_v29 = vld [vmem:[%s16671_s24 + $0x760] sm:$0xff]  ;;  %3703 = vmatpush2.bf16.msra.mxu1 %v14125_v31 }
  0xf8   : > { %v14118_v33 = vcombine.high %v747_v28, %v751_v29  ;;  %v611_v34 = vld [vmem:[%s16671_s24 + $0x300] sm:$0xff]  ;;  %3663 = vmatprep.subr.bf16.mxu0 %v13990_v32  ;;  %v14117_v40 = vcombine.low %v747_v28, %v751_v29 }
  0xf9   : > { %v615_v36 = vld [vmem:[%s16671_s24 + $0x320] sm:$0xff]  ;;  %3664 = vmatpush2.bf16.msra.mxu0 %v13989_v39 }
  0xfa   : > { %v739_v37 = vld [vmem:[%s16671_s24 + $0x700] sm:$0xff]  ;;  %v13982_v41 = vcombine.high %v611_v34, %v615_v36  ;;  %3704 = vmatprep.subr.bf16.mxu1 %v14118_v33  ;;  %v13981_v48 = vcombine.low %v611_v34, %v615_v36 }
  0xfb   : > { %v743_v38 = vld [vmem:[%s16671_s24 + $0x720] sm:$0xff]  ;;  %3705 = vmatpush2.bf16.msra.mxu1 %v14117_v40  ;;  %v16816_v40 = vcombine.high %v16804_v30, %v16804_v30 }
  0xfc   : > { %v14110_v42 = vcombine.high %v739_v37, %v743_v38  ;;  %v603_v43 = vld [vmem:[%s16671_s24 + $0x2c0] sm:$0xff]  ;;  %3665 = vmatprep.subr.bf16.mxu0 %v13982_v41  ;;  %v14109_v49 = vcombine.low %v739_v37, %v743_v38 }
  0xfd   : > { %v607_v44 = vld [vmem:[%s16671_s24 + $0x2e0] sm:$0xff]  ;;  %3666 = vmatpush2.bf16.msra.mxu0 %v13981_v48 }
  0xfe   : > { %v731_v46 = vld [vmem:[%s16671_s24 + $0x6c0] sm:$0xff]  ;;  %v13974_v50 = vcombine.high %v603_v43, %v607_v44  ;;  %3706 = vmatprep.subr.bf16.mxu1 %v14110_v42  ;;  %v13973_v57 = vcombine.low %v603_v43, %v607_v44 }
  0xff   : > { %v735_v47 = vld [vmem:[%s16671_s24 + $0x6e0] sm:$0xff]  ;;  %3707 = vmatpush2.bf16.msra.mxu1 %v14109_v49 }
 0x100   : > { %v14102_v51 = vcombine.high %v731_v46, %v735_v47  ;;  %v595_v52 = vld [vmem:[%s16671_s24 + $0x280] sm:$0xff]  ;;  %3667 = vmatprep.subr.bf16.mxu0 %v13974_v50  ;;  %v14101_v58 = vcombine.low %v731_v46, %v735_v47 }
 0x101   : > { %v599_v53 = vld [vmem:[%s16671_s24 + $0x2a0] sm:$0xff]  ;;  %3668 = vmatpush2.bf16.msra.mxu0 %v13973_v57 }
 0x102   : > { %v723_v55 = vld [vmem:[%s16671_s24 + $0x680] sm:$0xff]  ;;  %v13966_v59 = vcombine.high %v595_v52, %v599_v53  ;;  %3708 = vmatprep.subr.bf16.mxu1 %v14102_v51  ;;  %v13965_v4 = vcombine.low %v595_v52, %v599_v53 }
 0x103   : > { %v727_v56 = vld [vmem:[%s16671_s24 + $0x6a0] sm:$0xff]  ;;  %3709 = vmatpush2.bf16.msra.mxu1 %v14101_v58 }
 0x104   : > { %v14094_v61 = vcombine.high %v723_v55, %v727_v56  ;;  %v587_v62 = vld [vmem:[%s16671_s24 + $0x240] sm:$0xff]  ;;  %3669 = vmatprep.subr.bf16.mxu0 %v13966_v59  ;;  %v14093_v5 = vcombine.low %v723_v55, %v727_v56 }
 0x105   : > { %v591_v63 = vld [vmem:[%s16671_s24 + $0x260] sm:$0xff]  ;;  %3670 = vmatpush2.bf16.msra.mxu0 %v13965_v4 }
 0x106   : > { %v715_v2 = vld [vmem:[%s16671_s24 + $0x640] sm:$0xff]  ;;  %v13958_v6 = vcombine.high %v587_v62, %v591_v63  ;;  %3710 = vmatprep.subr.bf16.mxu1 %v14094_v61  ;;  %v13957_v13 = vcombine.low %v587_v62, %v591_v63 }
 0x107   : > { %v719_v3 = vld [vmem:[%s16671_s24 + $0x660] sm:$0xff]  ;;  %3711 = vmatpush2.bf16.msra.mxu1 %v14093_v5 }
 0x108   : > { %v14086_v7 = vcombine.high %v715_v2, %v719_v3  ;;  %v579_v8 = vld [vmem:[%s16671_s24 + $0x200] sm:$0xff]  ;;  %3671 = vmatprep.subr.bf16.mxu0 %v13958_v6  ;;  %v14085_v15 = vcombine.low %v715_v2, %v719_v3 }
 0x109   : > { %v583_v9 = vld [vmem:[%s16671_s24 + $0x220] sm:$0xff]  ;;  %3672 = vmatpush2.bf16.msra.mxu0 %v13957_v13 }
 0x10a   : > { %v707_v60 = vld [vmem:[%s16671_s24 + $0x600] sm:$0xff]  ;;  %v13950_v16 = vcombine.high %v579_v8, %v583_v9  ;;  %3712 = vmatprep.subr.bf16.mxu1 %v14086_v7  ;;  %v13949_v23 = vcombine.low %v579_v8, %v583_v9 }
 0x10b   : > { %v711_v12 = vld [vmem:[%s16671_s24 + $0x620] sm:$0xff]  ;;  %3713 = vmatpush2.bf16.msra.mxu1 %v14085_v15 }
 0x10c   : > { %v14078_v17 = vcombine.high %v707_v60, %v711_v12  ;;  %v827_v18 = vld [vmem:[%s16671_s24 + $0x9c0] sm:$0xff]  ;;  %3673 = vmatprep.subr.bf16.mxu0 %v13950_v16  ;;  %v14077_v25 = vcombine.low %v707_v60, %v711_v12 }
 0x10d   : > { %v831_v19 = vld [vmem:[%s16671_s24 + $0x9e0] sm:$0xff]  ;;  %3674 = vmatpush2.bf16.msra.mxu0 %v13949_v23 }
 0x10e   : > { %v955_v21 = vld [vmem:[%s16671_s24 + $0xdc0] sm:$0xff]  ;;  %v14198_v26 = vcombine.high %v827_v18, %v831_v19  ;;  %3714 = vmatprep.subr.bf16.mxu1 %v14078_v17  ;;  %v14197_v33 = vcombine.low %v827_v18, %v831_v19 }
 0x10f   : > { %v959_v22 = vld [vmem:[%s16671_s24 + $0xde0] sm:$0xff]  ;;  %3715 = vmatpush2.bf16.msra.mxu1 %v14077_v25 }
 0x110   : > { %v14326_v27 = vcombine.high %v955_v21, %v959_v22  ;;  %v819_v28 = vld [vmem:[%s16671_s24 + $0x980] sm:$0xff]  ;;  %3725 = vmatprep.subr.bf16.mxu0 %v14198_v26  ;;  %v14325_v34 = vcombine.low %v955_v21, %v959_v22  ;;  %3676 = vmatmul.mubr.bf16.vlgmr.msra.gmra.mxu0 %v16799_v24 }
 0x111   : > { %v823_v29 = vld [vmem:[%s16671_s24 + $0x9a0] sm:$0xff]  ;;  %3726 = vmatpush1.bf16.msra.mxu0 %v14197_v33  ;;  %3757 = vmatprep.mubr.bf16.mxu0 %v16804_v30 }
 0x112   : > { %v947_v31 = vld [vmem:[%s16671_s24 + $0xd80] sm:$0xff]  ;;  %v14190_v36 = vcombine.high %v819_v28, %v823_v29  ;;  %3766 = vmatprep.subr.bf16.mxu1 %v14326_v27  ;;  %3717 = vmatmul.mubr.bf16.vlgmr.msra.gmra.mxu1 %v16810_v0  ;;  %v14189_v43 = vcombine.low %v819_v28, %v823_v29 }
 0x113   : > { %v951_v32 = vld [vmem:[%s16671_s24 + $0xda0] sm:$0xff]  ;;  %3767 = vmatpush1.bf16.msra.mxu1 %v14325_v34  ;;  %14390 = vmatprep.mubr.msk.bf16.mxu1 %vm3614_vm0, %v16816_v40 }
 0x114   : > { %v14318_v37 = vcombine.high %v947_v31, %v951_v32  ;;  %v811_v38 = vld [vmem:[%s16671_s24 + $0x940] sm:$0xff]  ;;  %3727 = vmatprep.subr.bf16.mxu0 %v14190_v36  ;;  %v14317_v44 = vcombine.low %v947_v31, %v951_v32 }
 0x115   : > { %v815_v39 = vld [vmem:[%s16671_s24 + $0x960] sm:$0xff]  ;;  %3728 = vmatpush1.bf16.msra.mxu0 %v14189_v43 }
 0x116   : > { %v939_v41 = vld [vmem:[%s16671_s24 + $0xd40] sm:$0xff]  ;;  %v14182_v46 = vcombine.high %v811_v38, %v815_v39  ;;  %3768 = vmatprep.subr.bf16.mxu1 %v14318_v37  ;;  %v14181_v52 = vcombine.low %v811_v38, %v815_v39 }
 0x117   : > { %v943_v42 = vld [vmem:[%s16671_s24 + $0xd60] sm:$0xff]  ;;  %3769 = vmatpush1.bf16.msra.mxu1 %v14317_v44 }
 0x118   : > { %v14310_v47 = vcombine.high %v939_v41, %v943_v42  ;;  %v803_v48 = vld [vmem:[%s16671_s24 + $0x900] sm:$0xff]  ;;  %3729 = vmatprep.subr.bf16.mxu0 %v14182_v46  ;;  %v14309_v53 = vcombine.low %v939_v41, %v943_v42 }
 0x119   : > { %v807_v49 = vld [vmem:[%s16671_s24 + $0x920] sm:$0xff]  ;;  %3730 = vmatpush1.bf16.msra.mxu0 %v14181_v52 }
 0x11a   : > { %v931_v50 = vld [vmem:[%s16671_s24 + $0xd00] sm:$0xff]  ;;  %v14174_v55 = vcombine.high %v803_v48, %v807_v49  ;;  %3770 = vmatprep.subr.bf16.mxu1 %v14310_v47  ;;  %v14173_v62 = vcombine.low %v803_v48, %v807_v49 }
 0x11b   : > { %v935_v51 = vld [vmem:[%s16671_s24 + $0xd20] sm:$0xff]  ;;  %3771 = vmatpush1.bf16.msra.mxu1 %v14309_v53 }
 0x11c   : > { %v14302_v56 = vcombine.high %v931_v50, %v935_v51  ;;  %v795_v57 = vld [vmem:[%s16671_s24 + $0x8c0] sm:$0xff]  ;;  %3731 = vmatprep.subr.bf16.mxu0 %v14174_v55  ;;  %v14301_v63 = vcombine.low %v931_v50, %v935_v51 }
 0x11d   : > { %v799_v58 = vld [vmem:[%s16671_s24 + $0x8e0] sm:$0xff]  ;;  %3732 = vmatpush1.bf16.msra.mxu0 %v14173_v62 }
 0x11e   : > { %v923_v59 = vld [vmem:[%s16671_s24 + $0xcc0] sm:$0xff]  ;;  %v14166_v1 = vcombine.high %v795_v57, %v799_v58  ;;  %3772 = vmatprep.subr.bf16.mxu1 %v14302_v56  ;;  %v14165_v7 = vcombine.low %v795_v57, %v799_v58 }
 0x11f   : > { %v927_v61 = vld [vmem:[%s16671_s24 + $0xce0] sm:$0xff]  ;;  %3773 = vmatpush1.bf16.msra.mxu1 %v14301_v63 }
 0x120   : > { %v14294_v2 = vcombine.high %v923_v59, %v927_v61  ;;  %v787_v3 = vld [vmem:[%s16671_s24 + $0x880] sm:$0xff]  ;;  %3733 = vmatprep.subr.bf16.mxu0 %v14166_v1  ;;  %v14293_v8 = vcombine.low %v923_v59, %v927_v61 }
 0x121   : > { %v791_v4 = vld [vmem:[%s16671_s24 + $0x8a0] sm:$0xff]  ;;  %3734 = vmatpush1.bf16.msra.mxu0 %v14165_v7 }
 0x122   : > { %v915_v5 = vld [vmem:[%s16671_s24 + $0xc80] sm:$0xff]  ;;  %v14158_v9 = vcombine.high %v787_v3, %v791_v4  ;;  %3774 = vmatprep.subr.bf16.mxu1 %v14294_v2  ;;  %v14157_v17 = vcombine.low %v787_v3, %v791_v4 }
 0x123   : > { %v919_v6 = vld [vmem:[%s16671_s24 + $0xca0] sm:$0xff]  ;;  %3775 = vmatpush1.bf16.msra.mxu1 %v14293_v8 }
 0x124   : > { %v14286_v60 = vcombine.high %v915_v5, %v919_v6  ;;  %v779_v12 = vld [vmem:[%s16671_s24 + $0x840] sm:$0xff]  ;;  %3735 = vmatprep.subr.bf16.mxu0 %v14158_v9  ;;  %v14285_v18 = vcombine.low %v915_v5, %v919_v6 }
 0x125   : > { %v783_v13 = vld [vmem:[%s16671_s24 + $0x860] sm:$0xff]  ;;  %3736 = vmatpush1.bf16.msra.mxu0 %v14157_v17 }
 0x126   : > { %v907_v15 = vld [vmem:[%s16671_s24 + $0xc40] sm:$0xff]  ;;  %v14150_v19 = vcombine.high %v779_v12, %v783_v13  ;;  %3776 = vmatprep.subr.bf16.mxu1 %v14286_v60  ;;  %v14149_v26 = vcombine.low %v779_v12, %v783_v13 }
 0x127   : > { %v911_v16 = vld [vmem:[%s16671_s24 + $0xc60] sm:$0xff]  ;;  %3777 = vmatpush1.bf16.msra.mxu1 %v14285_v18 }
 0x128   : > { %v14278_v20 = vcombine.high %v907_v15, %v911_v16  ;;  %v771_v21 = vld [vmem:[%s16671_s24 + $0x800] sm:$0xff]  ;;  %3737 = vmatprep.subr.bf16.mxu0 %v14150_v19  ;;  %v14277_v27 = vcombine.low %v907_v15, %v911_v16 }
 0x129   : > { %v775_v22 = vld [vmem:[%s16671_s24 + $0x820] sm:$0xff]  ;;  %3738 = vmatpush1.bf16.msra.mxu0 %v14149_v26 }
 0x12a   : > { %v899_v23 = vld [vmem:[%s16671_s24 + $0xc00] sm:$0xff]  ;;  %v14142_v28 = vcombine.high %v771_v21, %v775_v22  ;;  %3778 = vmatprep.subr.bf16.mxu1 %v14278_v20  ;;  %v14141_v34 = vcombine.low %v771_v21, %v775_v22 }
 0x12b   : > { %v903_v25 = vld [vmem:[%s16671_s24 + $0xc20] sm:$0xff]  ;;  %3779 = vmatpush1.bf16.msra.mxu1 %v14277_v27 }
 0x12c   : > { %v14270_v29 = vcombine.high %v899_v23, %v903_v25  ;;  %v891_v31 = vld [vmem:[%s16671_s24 + $0xbc0] sm:$0xff]  ;;  %3739 = vmatprep.subr.bf16.mxu0 %v14142_v28  ;;  %v14269_v36 = vcombine.low %v899_v23, %v903_v25 }
 0x12d   : > { %v895_v32 = vld [vmem:[%s16671_s24 + $0xbe0] sm:$0xff]  ;;  %3740 = vmatpush1.bf16.msra.mxu0 %v14141_v34 }
 0x12e   : > { %v1011_v33 = vld [vmem:[%s16671_s24 + $0xf80] sm:$0xff]  ;;  %v14262_v37 = vcombine.high %v891_v31, %v895_v32  ;;  %3780 = vmatprep.subr.bf16.mxu1 %v14270_v29  ;;  %v14261_v46 = vcombine.low %v891_v31, %v895_v32 }
 0x12f   : > { %v14382_v38 = vcombine.high %v1011_v33, %v1011_v33  ;;  %v14381_v39 = vcombine.low %v1011_v33, %v1011_v33  ;;  %v883_v41 = vld [vmem:[%s16671_s24 + $0xb80] sm:$0xff]  ;;  %3781 = vmatpush1.bf16.msra.mxu1 %v14269_v36  ;;  %v572_v36 = vld [vmem:[%s16671_s24 + $0x1c8] sm:$0xff] }
 0x130   : > { %v887_v42 = vld [vmem:[%s16671_s24 + $0xba0] sm:$0xff]  ;;  %3741 = vmatprep.subr.bf16.mxu0 %v14262_v37  ;;  %v576_v37 = vld [vmem:[%s16671_s24 + $0x1e8] sm:$0xff] }
 0x131   : > { %v1003_v43 = vld [vmem:[%s16671_s24 + $0xf40] sm:$0xff]  ;;  %v14254_v47 = vcombine.high %v883_v41, %v887_v42  ;;  %14389 = vmatprep.subr.msk.bf16.mxu1 %vm3618_vm1, %v14382_v38  ;;  %v3620_v48 = vsel %vm3618_vm1, %v14381_v39, 0  ;;  %3742 = vmatpush2.bf16.msra.mxu0 %v14261_v46  ;;  %v14253_v55 = vcombine.low %v883_v41, %v887_v42  ;;  %v16880_v39 = vrot.slane %v16787_v11, %v16729_v54  ;;  %v704_v46 = vld [vmem:[%s16671_s24 + $0x5e8] sm:$0xff] }
 0x132   : > { %v1007_v44 = vld [vmem:[%s16671_s24 + $0xf60] sm:$0xff] }
 0x133   : > { %v14374_v49 = vcombine.high %v1003_v43, %v1007_v44  ;;  %v875_v50 = vld [vmem:[%s16671_s24 + $0xb40] sm:$0xff]  ;;  %3785 = vmatpush2.bf16.msra.mxu1 %v3620_v48  ;;  %3743 = vmatprep.subr.bf16.mxu0 %v14254_v47  ;;  %v14373_v56 = vcombine.low %v1003_v43, %v1007_v44  ;;  %v13944_v43 = vcombine.high %v572_v36, %v576_v37  ;;  %v700_v44 = vld [vmem:[%s16671_s24 + $0x5c8] sm:$0xff] }
 0x134   : > { %v879_v51 = vld [vmem:[%s16671_s24 + $0xb60] sm:$0xff]  ;;  %v564_v47 = vld [vmem:[%s16671_s24 + $0x188] sm:$0xff]  ;;  %v16888_v11 = vcombine.high %v16880_v39, %v16880_v39 }
 0x135   : > { %v995_v52 = vld [vmem:[%s16671_s24 + $0xf00] sm:$0xff]  ;;  %v14246_v57 = vcombine.high %v875_v50, %v879_v51  ;;  %3786 = vmatprep.subr.bf16.mxu1 %v14374_v49  ;;  %3744 = vmatpush2.bf16.msra.mxu0 %v14253_v55  ;;  %v14245_v1 = vcombine.low %v875_v50, %v879_v51  ;;  %v568_v48 = vld [vmem:[%s16671_s24 + $0x1a8] sm:$0xff]  ;;  %v13943_v50 = vcombine.low %v572_v36, %v576_v37 }
 0x136   : > { %v999_v53 = vld [vmem:[%s16671_s24 + $0xf20] sm:$0xff]  ;;  %v14072_v51 = vcombine.high %v700_v44, %v704_v46  ;;  %v696_v55 = vld [vmem:[%s16671_s24 + $0x5a8] sm:$0xff] }
 0x137   : > { %v14366_v58 = vcombine.high %v995_v52, %v999_v53  ;;  %v867_v59 = vld [vmem:[%s16671_s24 + $0xb00] sm:$0xff]  ;;  %3787 = vmatpush2.bf16.msra.mxu1 %v14373_v56  ;;  %3745 = vmatprep.subr.bf16.mxu0 %v14246_v57  ;;  %v14365_v2 = vcombine.low %v995_v52, %v999_v53  ;;  %v13936_v52 = vcombine.high %v564_v47, %v568_v48  ;;  %v692_v53 = vld [vmem:[%s16671_s24 + $0x588] sm:$0xff] }
 0x138   : > { %v871_v61 = vld [vmem:[%s16671_s24 + $0xb20] sm:$0xff]  ;;  %v556_v56 = vld [vmem:[%s16671_s24 + $0x148] sm:$0xff] }
 0x139   : > { %v987_v62 = vld [vmem:[%s16671_s24 + $0xec0] sm:$0xff]  ;;  %v14238_v3 = vcombine.high %v867_v59, %v871_v61  ;;  %3788 = vmatprep.subr.bf16.mxu1 %v14366_v58  ;;  %3746 = vmatpush2.bf16.msra.mxu0 %v14245_v1  ;;  %v14237_v9 = vcombine.low %v867_v59, %v871_v61  ;;  %v560_v57 = vld [vmem:[%s16671_s24 + $0x168] sm:$0xff]  ;;  %v14071_v58 = vcombine.low %v700_v44, %v704_v46 }
 0x13a   : > { %v991_v63 = vld [vmem:[%s16671_s24 + $0xee0] sm:$0xff]  ;;  %v13935_v59 = vcombine.low %v564_v47, %v568_v48  ;;  %v14064_v61 = vcombine.high %v692_v53, %v696_v55  ;;  %v688_v1 = vld [vmem:[%s16671_s24 + $0x568] sm:$0xff] }
 0x13b   : > { %v14358_v4 = vcombine.high %v987_v62, %v991_v63  ;;  %v859_v5 = vld [vmem:[%s16671_s24 + $0xac0] sm:$0xff]  ;;  %3789 = vmatpush2.bf16.msra.mxu1 %v14365_v2  ;;  %3747 = vmatprep.subr.bf16.mxu0 %v14238_v3  ;;  %v14357_v60 = vcombine.low %v987_v62, %v991_v63  ;;  %v13928_v62 = vcombine.high %v556_v56, %v560_v57  ;;  %v684_v63 = vld [vmem:[%s16671_s24 + $0x548] sm:$0xff] }
 0x13c   : > { %v863_v6 = vld [vmem:[%s16671_s24 + $0xae0] sm:$0xff]  ;;  %v548_v2 = vld [vmem:[%s16671_s24 + $0x108] sm:$0xff] }
 0x13d   : > { %v979_v7 = vld [vmem:[%s16671_s24 + $0xe80] sm:$0xff]  ;;  %v14230_v12 = vcombine.high %v859_v5, %v863_v6  ;;  %3790 = vmatprep.subr.bf16.mxu1 %v14358_v4  ;;  %3748 = vmatpush2.bf16.msra.mxu0 %v14237_v9  ;;  %v14229_v19 = vcombine.low %v859_v5, %v863_v6  ;;  %v552_v3 = vld [vmem:[%s16671_s24 + $0x128] sm:$0xff]  ;;  %v14063_v4 = vcombine.low %v692_v53, %v696_v55 }
 0x13e   : > { %v983_v8 = vld [vmem:[%s16671_s24 + $0xea0] sm:$0xff]  ;;  %v13927_v5 = vcombine.low %v556_v56, %v560_v57  ;;  %v14056_v6 = vcombine.high %v684_v63, %v688_v1  ;;  %v680_v9 = vld [vmem:[%s16671_s24 + $0x528] sm:$0xff] }
 0x13f   : > { %v14350_v13 = vcombine.high %v979_v7, %v983_v8  ;;  %v851_v15 = vld [vmem:[%s16671_s24 + $0xa80] sm:$0xff]  ;;  %3791 = vmatpush2.bf16.msra.mxu1 %v14357_v60  ;;  %3749 = vmatprep.subr.bf16.mxu0 %v14230_v12  ;;  %v14349_v20 = vcombine.low %v979_v7, %v983_v8  ;;  %v13920_v7 = vcombine.high %v548_v2, %v552_v3  ;;  %v676_v8 = vld [vmem:[%s16671_s24 + $0x508] sm:$0xff] }
 0x140   : > { %v855_v16 = vld [vmem:[%s16671_s24 + $0xaa0] sm:$0xff]  ;;  %v540_v60 = vld [vmem:[%s16671_s24 + $0xc8] sm:$0xff] }
 0x141   : > { %v971_v17 = vld [vmem:[%s16671_s24 + $0xe40] sm:$0xff]  ;;  %v14222_v21 = vcombine.high %v851_v15, %v855_v16  ;;  %3792 = vmatprep.subr.bf16.mxu1 %v14350_v13  ;;  %3750 = vmatpush2.bf16.msra.mxu0 %v14229_v19  ;;  %v14221_v28 = vcombine.low %v851_v15, %v855_v16  ;;  %v544_v12 = vld [vmem:[%s16671_s24 + $0xe8] sm:$0xff]  ;;  %v14055_v13 = vcombine.low %v684_v63, %v688_v1 }
 0x142   : > { %v975_v18 = vld [vmem:[%s16671_s24 + $0xe60] sm:$0xff]  ;;  %v13919_v15 = vcombine.low %v548_v2, %v552_v3  ;;  %v14048_v16 = vcombine.high %v676_v8, %v680_v9  ;;  %v672_v19 = vld [vmem:[%s16671_s24 + $0x4e8] sm:$0xff] }
 0x143   : > { %v14342_v22 = vcombine.high %v971_v17, %v975_v18  ;;  %v843_v23 = vld [vmem:[%s16671_s24 + $0xa40] sm:$0xff]  ;;  %3793 = vmatpush2.bf16.msra.mxu1 %v14349_v20  ;;  %3751 = vmatprep.subr.bf16.mxu0 %v14222_v21  ;;  %v14341_v29 = vcombine.low %v971_v17, %v975_v18  ;;  %v13912_v17 = vcombine.high %v540_v60, %v544_v12  ;;  %v668_v18 = vld [vmem:[%s16671_s24 + $0x4c8] sm:$0xff] }
 0x144   : > { %v847_v25 = vld [vmem:[%s16671_s24 + $0xa60] sm:$0xff]  ;;  %v532_v20 = vld [vmem:[%s16671_s24 + $0x88] sm:$0xff] }
 0x145   : > { %v963_v26 = vld [vmem:[%s16671_s24 + $0xe00] sm:$0xff]  ;;  %v14214_v31 = vcombine.high %v843_v23, %v847_v25  ;;  %3794 = vmatprep.subr.bf16.mxu1 %v14342_v22  ;;  %3752 = vmatpush2.bf16.msra.mxu0 %v14221_v28  ;;  %v14213_v38 = vcombine.low %v843_v23, %v847_v25  ;;  %v536_v21 = vld [vmem:[%s16671_s24 + $0xa8] sm:$0xff]  ;;  %v14047_v22 = vcombine.low %v676_v8, %v680_v9 }
 0x146   : > { %v967_v27 = vld [vmem:[%s16671_s24 + $0xe20] sm:$0xff]  ;;  %v13911_v23 = vcombine.low %v540_v60, %v544_v12  ;;  %v14040_v25 = vcombine.high %v668_v18, %v672_v19  ;;  %v664_v28 = vld [vmem:[%s16671_s24 + $0x4a8] sm:$0xff] }
 0x147   : > { %v14334_v32 = vcombine.high %v963_v26, %v967_v27  ;;  %v835_v33 = vld [vmem:[%s16671_s24 + $0xa00] sm:$0xff]  ;;  %3795 = vmatpush2.bf16.msra.mxu1 %v14341_v29  ;;  %3753 = vmatprep.subr.bf16.mxu0 %v14214_v31  ;;  %v14333_v41 = vcombine.low %v963_v26, %v967_v27  ;;  %v13904_v26 = vcombine.high %v532_v20, %v536_v21  ;;  %v660_v27 = vld [vmem:[%s16671_s24 + $0x488] sm:$0xff] }
 0x148   : > { %v839_v34 = vld [vmem:[%s16671_s24 + $0xa20] sm:$0xff]  ;;  %v524_v29 = vld [vmem:[%s16671_s24 + $0x48] sm:$0xff] }
 0x149   : > { %v14206_v42 = vcombine.high %v835_v33, %v839_v34  ;;  %3796 = vmatprep.subr.bf16.mxu1 %v14334_v32  ;;  %3754 = vmatpush2.bf16.msra.mxu0 %v14213_v38  ;;  %v14205_v49 = vcombine.low %v835_v33, %v839_v34  ;;  %v528_v31 = vld [vmem:[%s16671_s24 + $0x68] sm:$0xff]  ;;  %v14039_v32 = vcombine.low %v668_v18, %v672_v19 }
 0x14a   : > { %v13903_v33 = vcombine.low %v532_v20, %v536_v21  ;;  %v14032_v34 = vcombine.high %v660_v27, %v664_v28  ;;  %v13896_v36 = vcombine.high %v524_v29, %v528_v31  ;;  %v652_v37 = vld [vmem:[%s16671_s24 + $0x448] sm:$0xff]  ;;  %v13895_v44 = vcombine.low %v524_v29, %v528_v31 }
 0x14b   : > { %3797 = vmatpush2.bf16.msra.mxu1 %v14333_v41  ;;  %3755 = vmatprep.subr.bf16.mxu0 %v14206_v42  ;;  %v656_v38 = vld [vmem:[%s16671_s24 + $0x468] sm:$0xff] }
 0x14c   : > { %3807 = vmatprep.subr.bf16.mxu1 %v13944_v43  ;;  %v516_v41 = vld [vmem:[%s16671_s24 + $0x8] sm:$0xff]  ;;  %v14031_v43 = vcombine.low %v660_v27, %v664_v28  ;;  %v14024_v46 = vcombine.high %v652_v37, %v656_v38 }
 0x14d   : > { %3756 = vmatpush2.bf16.msra.mxu0 %v14205_v49  ;;  %v520_v42 = vld [vmem:[%s16671_s24 + $0x28] sm:$0xff] }
 0x14e   : > { %3799 = vmatmul.mubr.bf16.vlgmr.msra.gmra.mxu1 %v16888_v11  ;;  %3848 = vmatprep.subr.bf16.mxu0 %v14072_v51  ;;  %v13888_v47 = vcombine.high %v516_v41, %v520_v42  ;;  %v644_v48 = vld [vmem:[%s16671_s24 + $0x408] sm:$0xff]  ;;  %v13887_v53 = vcombine.low %v516_v41, %v520_v42 }
 0x14f   : > { %3808 = vmatpush1.bf16.msra.mxu1 %v13943_v50  ;;  %3839 = vmatprep.mubr.bf16.mxu1 %v16748_v10  ;;  %v648_v49 = vld [vmem:[%s16671_s24 + $0x428] sm:$0xff] }
 0x150   : > { %3809 = vmatprep.subr.bf16.mxu1 %v13936_v52  ;;  %3758 = vmatmul.mubr.bf16.vlgmr.msra.gmra.mxu0 %v16880_v39  ;;  %v636_v50 = vld [vmem:[%s16671_s24 + $0x3c8] sm:$0xff]  ;;  %v14023_v52 = vcombine.low %v652_v37, %v656_v38  ;;  %v14016_v55 = vcombine.high %v644_v48, %v648_v49 }
 0x151   : > { %3849 = vmatpush1.bf16.msra.mxu0 %v14071_v58  ;;  %3880 = vmatprep.mubr.bf16.mxu0 %v16755_v14  ;;  %v640_v51 = vld [vmem:[%s16671_s24 + $0x3e8] sm:$0xff] }
 0x152   : > { %3850 = vmatprep.subr.bf16.mxu0 %v14064_v61  ;;  %v14008_v56 = vcombine.high %v636_v50, %v640_v51  ;;  %v764_v57 = vld [vmem:[%s16671_s24 + $0x7c8] sm:$0xff]  ;;  %v14007_v63 = vcombine.low %v636_v50, %v640_v51 }
 0x153   : > { %3810 = vmatpush1.bf16.msra.mxu1 %v13935_v59  ;;  %v768_v58 = vld [vmem:[%s16671_s24 + $0x7e8] sm:$0xff] }
 0x154   : > { %3811 = vmatprep.subr.bf16.mxu1 %v13928_v62  ;;  %v628_v59 = vld [vmem:[%s16671_s24 + $0x388] sm:$0xff]  ;;  %v14015_v62 = vcombine.low %v644_v48, %v648_v49  ;;  %v14136_v1 = vcombine.high %v764_v57, %v768_v58 }
 0x155   : > { %3851 = vmatpush1.bf16.msra.mxu0 %v14063_v4  ;;  %v632_v61 = vld [vmem:[%s16671_s24 + $0x3a8] sm:$0xff] }
 0x156   : > { %3852 = vmatprep.subr.bf16.mxu0 %v14056_v6  ;;  %v14000_v2 = vcombine.high %v628_v59, %v632_v61  ;;  %v756_v3 = vld [vmem:[%s16671_s24 + $0x788] sm:$0xff]  ;;  %v13999_v8 = vcombine.low %v628_v59, %v632_v61 }
 0x157   : > { %3812 = vmatpush1.bf16.msra.mxu1 %v13927_v5  ;;  %v760_v4 = vld [vmem:[%s16671_s24 + $0x7a8] sm:$0xff] }
 0x158   : > { %3813 = vmatprep.subr.bf16.mxu1 %v13920_v7  ;;  %v620_v5 = vld [vmem:[%s16671_s24 + $0x348] sm:$0xff]  ;;  %v14135_v7 = vcombine.low %v764_v57, %v768_v58  ;;  %v14128_v9 = vcombine.high %v756_v3, %v760_v4 }
 0x159   : > { %3853 = vmatpush1.bf16.msra.mxu0 %v14055_v13  ;;  %v624_v6 = vld [vmem:[%s16671_s24 + $0x368] sm:$0xff] }
 0x15a   : > { %3854 = vmatprep.subr.bf16.mxu0 %v14048_v16  ;;  %v13992_v60 = vcombine.high %v620_v5, %v624_v6  ;;  %v748_v12 = vld [vmem:[%s16671_s24 + $0x748] sm:$0xff]  ;;  %v13991_v18 = vcombine.low %v620_v5, %v624_v6 }
 0x15b   : > { %3814 = vmatpush1.bf16.msra.mxu1 %v13919_v15  ;;  %v752_v13 = vld [vmem:[%s16671_s24 + $0x768] sm:$0xff] }
 0x15c   : > { %3815 = vmatprep.subr.bf16.mxu1 %v13912_v17  ;;  %v612_v15 = vld [vmem:[%s16671_s24 + $0x308] sm:$0xff]  ;;  %v14127_v17 = vcombine.low %v756_v3, %v760_v4  ;;  %v14120_v19 = vcombine.high %v748_v12, %v752_v13 }
 0x15d   : > { %3855 = vmatpush1.bf16.msra.mxu0 %v14047_v22  ;;  %v616_v16 = vld [vmem:[%s16671_s24 + $0x328] sm:$0xff] }
 0x15e   : > { %3856 = vmatprep.subr.bf16.mxu0 %v14040_v25  ;;  %v13984_v20 = vcombine.high %v612_v15, %v616_v16  ;;  %v740_v21 = vld [vmem:[%s16671_s24 + $0x708] sm:$0xff]  ;;  %v13983_v27 = vcombine.low %v612_v15, %v616_v16 }
 0x15f   : > { %3816 = vmatpush1.bf16.msra.mxu1 %v13911_v23  ;;  %v744_v22 = vld [vmem:[%s16671_s24 + $0x728] sm:$0xff] }
 0x160   : > { %3817 = vmatprep.subr.bf16.mxu1 %v13904_v26  ;;  %v604_v23 = vld [vmem:[%s16671_s24 + $0x2c8] sm:$0xff]  ;;  %v14119_v26 = vcombine.low %v748_v12, %v752_v13  ;;  %v14112_v28 = vcombine.high %v740_v21, %v744_v22 }
 0x161   : > { %3857 = vmatpush1.bf16.msra.mxu0 %v14039_v32  ;;  %v608_v25 = vld [vmem:[%s16671_s24 + $0x2e8] sm:$0xff] }
 0x162   : > { %3858 = vmatprep.subr.bf16.mxu0 %v14032_v34  ;;  %v13976_v29 = vcombine.high %v604_v23, %v608_v25  ;;  %v732_v31 = vld [vmem:[%s16671_s24 + $0x6c8] sm:$0xff]  ;;  %v13975_v37 = vcombine.low %v604_v23, %v608_v25 }
 0x163   : > { %3818 = vmatpush1.bf16.msra.mxu1 %v13903_v33  ;;  %v736_v32 = vld [vmem:[%s16671_s24 + $0x6e8] sm:$0xff] }
 0x164   : > { %3819 = vmatprep.subr.bf16.mxu1 %v13896_v36  ;;  %v596_v33 = vld [vmem:[%s16671_s24 + $0x288] sm:$0xff]  ;;  %v14111_v36 = vcombine.low %v740_v21, %v744_v22  ;;  %v14104_v38 = vcombine.high %v732_v31, %v736_v32 }
 0x165   : > { %3859 = vmatpush1.bf16.msra.mxu0 %v14031_v43  ;;  %v600_v34 = vld [vmem:[%s16671_s24 + $0x2a8] sm:$0xff] }
 0x166   : > { %3860 = vmatprep.subr.bf16.mxu0 %v14024_v46  ;;  %v13968_v41 = vcombine.high %v596_v33, %v600_v34  ;;  %v724_v42 = vld [vmem:[%s16671_s24 + $0x688] sm:$0xff]  ;;  %v13967_v48 = vcombine.low %v596_v33, %v600_v34 }
 0x167   : > { %3820 = vmatpush1.bf16.msra.mxu1 %v13895_v44  ;;  %v728_v43 = vld [vmem:[%s16671_s24 + $0x6a8] sm:$0xff] }
 0x168   : > { %3821 = vmatprep.subr.bf16.mxu1 %v13888_v47  ;;  %v588_v44 = vld [vmem:[%s16671_s24 + $0x248] sm:$0xff]  ;;  %v14103_v47 = vcombine.low %v732_v31, %v736_v32  ;;  %v14096_v49 = vcombine.high %v724_v42, %v728_v43 }
 0x169   : > { %3861 = vmatpush1.bf16.msra.mxu0 %v14023_v52  ;;  %v592_v46 = vld [vmem:[%s16671_s24 + $0x268] sm:$0xff] }
 0x16a   : > { %3862 = vmatprep.subr.bf16.mxu0 %v14016_v55  ;;  %v13960_v50 = vcombine.high %v588_v44, %v592_v46  ;;  %v716_v51 = vld [vmem:[%s16671_s24 + $0x648] sm:$0xff]  ;;  %v13959_v57 = vcombine.low %v588_v44, %v592_v46 }
 0x16b   : > { %3822 = vmatpush1.bf16.msra.mxu1 %v13887_v53  ;;  %v720_v52 = vld [vmem:[%s16671_s24 + $0x668] sm:$0xff] }
 0x16c   : > { %3823 = vmatprep.subr.bf16.mxu1 %v14008_v56  ;;  %v580_v53 = vld [vmem:[%s16671_s24 + $0x208] sm:$0xff]  ;;  %v14095_v56 = vcombine.low %v724_v42, %v728_v43  ;;  %v14088_v58 = vcombine.high %v716_v51, %v720_v52 }
 0x16d   : > { %3863 = vmatpush1.bf16.msra.mxu0 %v14015_v62  ;;  %v584_v55 = vld [vmem:[%s16671_s24 + $0x228] sm:$0xff] }
 0x16e   : > { %3864 = vmatprep.subr.bf16.mxu0 %v14136_v1  ;;  %v13952_v59 = vcombine.high %v580_v53, %v584_v55  ;;  %v708_v61 = vld [vmem:[%s16671_s24 + $0x608] sm:$0xff]  ;;  %v13951_v3 = vcombine.low %v580_v53, %v584_v55 }
 0x16f   : > { %3824 = vmatpush2.bf16.msra.mxu1 %v14007_v63  ;;  %v712_v62 = vld [vmem:[%s16671_s24 + $0x628] sm:$0xff] }
 0x170   : > { %3825 = vmatprep.subr.bf16.mxu1 %v14000_v2  ;;  %v828_v63 = vld [vmem:[%s16671_s24 + $0x9c8] sm:$0xff]  ;;  %v14087_v2 = vcombine.low %v716_v51, %v720_v52  ;;  %v14080_v4 = vcombine.high %v708_v61, %v712_v62 }
 0x171   : > { %3865 = vmatpush2.bf16.msra.mxu0 %v14135_v7  ;;  %v832_v1 = vld [vmem:[%s16671_s24 + $0x9e8] sm:$0xff] }
 0x172   : > { %3866 = vmatprep.subr.bf16.mxu0 %v14128_v9  ;;  %v14200_v5 = vcombine.high %v828_v63, %v832_v1  ;;  %v956_v6 = vld [vmem:[%s16671_s24 + $0xdc8] sm:$0xff]  ;;  %v14199_v12 = vcombine.low %v828_v63, %v832_v1 }
 0x173   : > { %3826 = vmatpush2.bf16.msra.mxu1 %v13999_v8  ;;  %v960_v7 = vld [vmem:[%s16671_s24 + $0xde8] sm:$0xff] }
 0x174   : > { %3827 = vmatprep.subr.bf16.mxu1 %v13992_v60  ;;  %v820_v8 = vld [vmem:[%s16671_s24 + $0x988] sm:$0xff]  ;;  %v14079_v60 = vcombine.low %v708_v61, %v712_v62  ;;  %v14328_v13 = vcombine.high %v956_v6, %v960_v7 }
 0x175   : > { %3867 = vmatpush2.bf16.msra.mxu0 %v14127_v17  ;;  %v824_v9 = vld [vmem:[%s16671_s24 + $0x9a8] sm:$0xff] }
 0x176   : > { %3868 = vmatprep.subr.bf16.mxu0 %v14120_v19  ;;  %v14192_v15 = vcombine.high %v820_v8, %v824_v9  ;;  %v948_v16 = vld [vmem:[%s16671_s24 + $0xd88] sm:$0xff]  ;;  %v14191_v21 = vcombine.low %v820_v8, %v824_v9 }
 0x177   : > { %3828 = vmatpush2.bf16.msra.mxu1 %v13991_v18  ;;  %v952_v17 = vld [vmem:[%s16671_s24 + $0xda8] sm:$0xff] }
 0x178   : > { %3829 = vmatprep.subr.bf16.mxu1 %v13984_v20  ;;  %v812_v18 = vld [vmem:[%s16671_s24 + $0x948] sm:$0xff]  ;;  %v14327_v20 = vcombine.low %v956_v6, %v960_v7  ;;  %v14320_v22 = vcombine.high %v948_v16, %v952_v17 }
 0x179   : > { %3869 = vmatpush2.bf16.msra.mxu0 %v14119_v26  ;;  %v816_v19 = vld [vmem:[%s16671_s24 + $0x968] sm:$0xff] }
 0x17a   : > { %3870 = vmatprep.subr.bf16.mxu0 %v14112_v28  ;;  %v14184_v23 = vcombine.high %v812_v18, %v816_v19  ;;  %v940_v25 = vld [vmem:[%s16671_s24 + $0xd48] sm:$0xff]  ;;  %v14183_v31 = vcombine.low %v812_v18, %v816_v19 }
 0x17b   : > { %3830 = vmatpush2.bf16.msra.mxu1 %v13983_v27  ;;  %v944_v26 = vld [vmem:[%s16671_s24 + $0xd68] sm:$0xff] }
 0x17c   : > { %3831 = vmatprep.subr.bf16.mxu1 %v13976_v29  ;;  %v804_v27 = vld [vmem:[%s16671_s24 + $0x908] sm:$0xff]  ;;  %v14319_v29 = vcombine.low %v948_v16, %v952_v17  ;;  %v14312_v32 = vcombine.high %v940_v25, %v944_v26 }
 0x17d   : > { %3871 = vmatpush2.bf16.msra.mxu0 %v14111_v36  ;;  %v808_v28 = vld [vmem:[%s16671_s24 + $0x928] sm:$0xff] }
 0x17e   : > { %3872 = vmatprep.subr.bf16.mxu0 %v14104_v38  ;;  %v14176_v33 = vcombine.high %v804_v27, %v808_v28  ;;  %v932_v34 = vld [vmem:[%s16671_s24 + $0xd08] sm:$0xff]  ;;  %v14175_v42 = vcombine.low %v804_v27, %v808_v28 }
 0x17f   : > { %3832 = vmatpush2.bf16.msra.mxu1 %v13975_v37  ;;  %v936_v36 = vld [vmem:[%s16671_s24 + $0xd28] sm:$0xff] }
 0x180   : > { %3833 = vmatprep.subr.bf16.mxu1 %v13968_v41  ;;  %v796_v37 = vld [vmem:[%s16671_s24 + $0x8c8] sm:$0xff]  ;;  %v14311_v41 = vcombine.low %v940_v25, %v944_v26  ;;  %v14304_v43 = vcombine.high %v932_v34, %v936_v36 }
 0x181   : > { %3873 = vmatpush2.bf16.msra.mxu0 %v14103_v47  ;;  %v800_v38 = vld [vmem:[%s16671_s24 + $0x8e8] sm:$0xff] }
 0x182   : > { %3874 = vmatprep.subr.bf16.mxu0 %v14096_v49  ;;  %v14168_v44 = vcombine.high %v796_v37, %v800_v38  ;;  %v924_v46 = vld [vmem:[%s16671_s24 + $0xcc8] sm:$0xff]  ;;  %v14167_v51 = vcombine.low %v796_v37, %v800_v38 }
 0x183   : > { %3834 = vmatpush2.bf16.msra.mxu1 %v13967_v48  ;;  %v928_v47 = vld [vmem:[%s16671_s24 + $0xce8] sm:$0xff] }
 0x184   : > { %3835 = vmatprep.subr.bf16.mxu1 %v13960_v50  ;;  %v788_v48 = vld [vmem:[%s16671_s24 + $0x888] sm:$0xff]  ;;  %v14303_v50 = vcombine.low %v932_v34, %v936_v36  ;;  %v14296_v52 = vcombine.high %v924_v46, %v928_v47 }
 0x185   : > { %3875 = vmatpush2.bf16.msra.mxu0 %v14095_v56  ;;  %v792_v49 = vld [vmem:[%s16671_s24 + $0x8a8] sm:$0xff] }
 0x186   : > { %3876 = vmatprep.subr.bf16.mxu0 %v14088_v58  ;;  %v14160_v53 = vcombine.high %v788_v48, %v792_v49  ;;  %v916_v55 = vld [vmem:[%s16671_s24 + $0xc88] sm:$0xff]  ;;  %v14159_v61 = vcombine.low %v788_v48, %v792_v49 }
 0x187   : > { %3836 = vmatpush2.bf16.msra.mxu1 %v13959_v57  ;;  %v920_v56 = vld [vmem:[%s16671_s24 + $0xca8] sm:$0xff] }
 0x188   : > { %3837 = vmatprep.subr.bf16.mxu1 %v13952_v59  ;;  %v780_v57 = vld [vmem:[%s16671_s24 + $0x848] sm:$0xff]  ;;  %v14295_v59 = vcombine.low %v924_v46, %v928_v47  ;;  %v14288_v62 = vcombine.high %v916_v55, %v920_v56 }
 0x189   : > { %3877 = vmatpush2.bf16.msra.mxu0 %v14087_v2  ;;  %v784_v58 = vld [vmem:[%s16671_s24 + $0x868] sm:$0xff] }
 0x18a   : > { %3878 = vmatprep.subr.bf16.mxu0 %v14080_v4  ;;  %v14152_v63 = vcombine.high %v780_v57, %v784_v58  ;;  %v908_v1 = vld [vmem:[%s16671_s24 + $0xc48] sm:$0xff]  ;;  %v14151_v6 = vcombine.low %v780_v57, %v784_v58 }
 0x18b   : > { %3838 = vmatpush2.bf16.msra.mxu1 %v13951_v3  ;;  %v912_v2 = vld [vmem:[%s16671_s24 + $0xc68] sm:$0xff] }
 0x18c   : > { %3889 = vmatprep.subr.bf16.mxu1 %v14200_v5  ;;  %v772_v3 = vld [vmem:[%s16671_s24 + $0x808] sm:$0xff]  ;;  %v14287_v5 = vcombine.low %v916_v55, %v920_v56  ;;  %v14280_v7 = vcombine.high %v908_v1, %v912_v2 }
 0x18d   : > { %3879 = vmatpush2.bf16.msra.mxu0 %v14079_v60  ;;  %v776_v4 = vld [vmem:[%s16671_s24 + $0x828] sm:$0xff] }
 0x18e   : > { %3840 = vmatmul.mubr.bf16.vlgmr.msra.gmra.mxu1 %v16799_v24  ;;  %3930 = vmatprep.subr.bf16.mxu0 %v14328_v13  ;;  %v14144_v8 = vcombine.high %v772_v3, %v776_v4  ;;  %v900_v9 = vld [vmem:[%s16671_s24 + $0xc08] sm:$0xff]  ;;  %v14143_v16 = vcombine.low %v772_v3, %v776_v4 }
 0x18f   : > { %3890 = vmatpush1.bf16.msra.mxu1 %v14199_v12  ;;  %3921 = vmatprep.mubr.bf16.mxu1 %v16804_v30  ;;  %v904_v60 = vld [vmem:[%s16671_s24 + $0xc28] sm:$0xff] }
 0x190   : > { %3891 = vmatprep.subr.bf16.mxu1 %v14192_v15  ;;  %3881 = vmatmul.mubr.bf16.vlgmr.msra.gmra.mxu0 %v16810_v0  ;;  %v892_v12 = vld [vmem:[%s16671_s24 + $0xbc8] sm:$0xff]  ;;  %v14279_v15 = vcombine.low %v908_v1, %v912_v2  ;;  %v14272_v17 = vcombine.high %v900_v9, %v904_v60 }
 0x191   : > { %3931 = vmatpush1.bf16.msra.mxu0 %v14327_v20  ;;  %14392 = vmatprep.mubr.msk.bf16.mxu0 %vm3614_vm0, %v16816_v40  ;;  %v896_v13 = vld [vmem:[%s16671_s24 + $0xbe8] sm:$0xff] }
 0x192   : > { %3932 = vmatprep.subr.bf16.mxu0 %v14320_v22  ;;  %v14264_v18 = vcombine.high %v892_v12, %v896_v13  ;;  %v1012_v19 = vld [vmem:[%s16671_s24 + $0xf88] sm:$0xff]  ;;  %v14271_v22 = vcombine.low %v900_v9, %v904_v60 }
 0x193   : > { %3892 = vmatpush1.bf16.msra.mxu1 %v14191_v21  ;;  %v884_v20 = vld [vmem:[%s16671_s24 + $0xb88] sm:$0xff]  ;;  %v14384_v25 = vcombine.high %v1012_v19, %v1012_v19  ;;  %v14383_v26 = vcombine.low %v1012_v19, %v1012_v19 }
 0x194   : > { %3893 = vmatprep.subr.bf16.mxu1 %v14184_v23  ;;  %v888_v21 = vld [vmem:[%s16671_s24 + $0xba8] sm:$0xff]  ;;  %v14263_v23 = vcombine.low %v892_v12, %v896_v13 }
 0x195   : > { %3933 = vmatpush1.bf16.msra.mxu0 %v14319_v29  ;;  %v14256_v27 = vcombine.high %v884_v20, %v888_v21  ;;  %v1004_v28 = vld [vmem:[%s16671_s24 + $0xf48] sm:$0xff]  ;;  %v3626_v34 = vsel %vm3618_vm1, %v14383_v26, 0  ;;  %v705_v26 = vld [vmem:[%s16671_s24 + $0x5f0] sm:$0xff] }
 0x196   : > { %3934 = vmatprep.subr.bf16.mxu0 %v14312_v32  ;;  %v1008_v29 = vld [vmem:[%s16671_s24 + $0xf68] sm:$0xff] }
 0x197   : > { %3894 = vmatpush1.bf16.msra.mxu1 %v14183_v31  ;;  %v876_v31 = vld [vmem:[%s16671_s24 + $0xb48] sm:$0xff]  ;;  %v14376_v36 = vcombine.high %v1004_v28, %v1008_v29 }
 0x198   : > { %3895 = vmatprep.subr.bf16.mxu1 %v14176_v33  ;;  %v880_v32 = vld [vmem:[%s16671_s24 + $0xb68] sm:$0xff]  ;;  %v14255_v33 = vcombine.low %v884_v20, %v888_v21 }
 0x199   : > { %3935 = vmatpush1.bf16.msra.mxu0 %v14311_v41  ;;  %v14248_v37 = vcombine.high %v876_v31, %v880_v32  ;;  %v996_v38 = vld [vmem:[%s16671_s24 + $0xf08] sm:$0xff]  ;;  %v14247_v46 = vcombine.low %v876_v31, %v880_v32  ;;  %v565_v32 = vld [vmem:[%s16671_s24 + $0x190] sm:$0xff] }
 0x19a   : > { %3936 = vmatprep.subr.bf16.mxu0 %v14304_v43  ;;  %v1000_v41 = vld [vmem:[%s16671_s24 + $0xf28] sm:$0xff] }
 0x19b   : > { %3896 = vmatpush1.bf16.msra.mxu1 %v14175_v42  ;;  %v868_v42 = vld [vmem:[%s16671_s24 + $0xb08] sm:$0xff]  ;;  %v14368_v47 = vcombine.high %v996_v38, %v1000_v41 }
 0x19c   : > { %3897 = vmatprep.subr.bf16.mxu1 %v14168_v44  ;;  %v872_v43 = vld [vmem:[%s16671_s24 + $0xb28] sm:$0xff]  ;;  %v14375_v44 = vcombine.low %v1004_v28, %v1008_v29 }
 0x19d   : > { %3937 = vmatpush1.bf16.msra.mxu0 %v14303_v50  ;;  %v14240_v48 = vcombine.high %v868_v42, %v872_v43  ;;  %v988_v49 = vld [vmem:[%s16671_s24 + $0xec8] sm:$0xff]  ;;  %v14239_v55 = vcombine.low %v868_v42, %v872_v43 }
 0x19e   : > { %3938 = vmatprep.subr.bf16.mxu0 %v14296_v52  ;;  %v992_v50 = vld [vmem:[%s16671_s24 + $0xee8] sm:$0xff] }
 0x19f   : > { %3898 = vmatpush1.bf16.msra.mxu1 %v14167_v51  ;;  %v860_v51 = vld [vmem:[%s16671_s24 + $0xac8] sm:$0xff]  ;;  %v14360_v56 = vcombine.high %v988_v49, %v992_v50 }
 0x1a0   : > { %3899 = vmatprep.subr.bf16.mxu1 %v14160_v53  ;;  %v864_v52 = vld [vmem:[%s16671_s24 + $0xae8] sm:$0xff]  ;;  %v14367_v53 = vcombine.low %v996_v38, %v1000_v41  ;;  %v17029_v38 = vsub.s32 0, %v16722_v45 }
 0x1a1   : > { %3939 = vmatpush1.bf16.msra.mxu0 %v14295_v59  ;;  %v14232_v57 = vcombine.high %v860_v51, %v864_v52  ;;  %v980_v58 = vld [vmem:[%s16671_s24 + $0xe88] sm:$0xff]  ;;  %v14231_v1 = vcombine.low %v860_v51, %v864_v52 }
 0x1a2   : > { %3940 = vmatprep.subr.bf16.mxu0 %v14288_v62  ;;  %v984_v59 = vld [vmem:[%s16671_s24 + $0xea8] sm:$0xff] }
 0x1a3   : > { %3900 = vmatpush1.bf16.msra.mxu1 %v14159_v61  ;;  %v852_v61 = vld [vmem:[%s16671_s24 + $0xa88] sm:$0xff]  ;;  %v14352_v2 = vcombine.high %v980_v58, %v984_v59 }
 0x1a4   : > { %3901 = vmatprep.subr.bf16.mxu1 %v14152_v63  ;;  %v856_v62 = vld [vmem:[%s16671_s24 + $0xaa8] sm:$0xff]  ;;  %v14359_v63 = vcombine.low %v988_v49, %v992_v50  ;;  %v685_v49 = vld [vmem:[%s16671_s24 + $0x550] sm:$0xff] }
 0x1a5   : > { %3941 = vmatpush1.bf16.msra.mxu0 %v14287_v5  ;;  %v14224_v3 = vcombine.high %v852_v61, %v856_v62  ;;  %v972_v4 = vld [vmem:[%s16671_s24 + $0xe48] sm:$0xff]  ;;  %v14223_v9 = vcombine.low %v852_v61, %v856_v62  ;;  %v689_v50 = vld [vmem:[%s16671_s24 + $0x570] sm:$0xff] }
 0x1a6   : > { %3942 = vmatprep.subr.bf16.mxu0 %v14280_v7  ;;  %v976_v5 = vld [vmem:[%s16671_s24 + $0xe68] sm:$0xff]  ;;  %v677_v62 = vld [vmem:[%s16671_s24 + $0x510] sm:$0xff] }
 0x1a7   : > { %3902 = vmatpush1.bf16.msra.mxu1 %v14151_v6  ;;  %v844_v6 = vld [vmem:[%s16671_s24 + $0xa48] sm:$0xff]  ;;  %v14344_v60 = vcombine.high %v972_v4, %v976_v5 }
 0x1a8   : > { %3903 = vmatprep.subr.bf16.mxu1 %v14144_v8  ;;  %v848_v7 = vld [vmem:[%s16671_s24 + $0xa68] sm:$0xff]  ;;  %v14351_v8 = vcombine.low %v980_v58, %v984_v59  ;;  %v549_v58 = vld [vmem:[%s16671_s24 + $0x110] sm:$0xff] }
 0x1a9   : > { %3943 = vmatpush1.bf16.msra.mxu0 %v14279_v15  ;;  %v14216_v12 = vcombine.high %v844_v6, %v848_v7  ;;  %v964_v13 = vld [vmem:[%s16671_s24 + $0xe08] sm:$0xff]  ;;  %v14215_v19 = vcombine.low %v844_v6, %v848_v7  ;;  %v553_v59 = vld [vmem:[%s16671_s24 + $0x130] sm:$0xff] }
 0x1aa   : > { %3944 = vmatprep.subr.bf16.mxu0 %v14272_v17  ;;  %v968_v15 = vld [vmem:[%s16671_s24 + $0xe28] sm:$0xff]  ;;  %v13922_v6 = vcombine.high %v549_v58, %v553_v59 }
 0x1ab   : > { %3904 = vmatpush1.bf16.msra.mxu1 %v14143_v16  ;;  %v836_v16 = vld [vmem:[%s16671_s24 + $0xa08] sm:$0xff]  ;;  %v14336_v20 = vcombine.high %v964_v13, %v968_v15 }
 0x1ac   : > { %3905 = vmatprep.subr.bf16.mxu1 %v14264_v18  ;;  %v840_v17 = vld [vmem:[%s16671_s24 + $0xa28] sm:$0xff]  ;;  %v14343_v18 = vcombine.low %v972_v4, %v976_v5  ;;  %v14057_v5 = vcombine.low %v685_v49, %v689_v50 }
 0x1ad   : > { %3945 = vmatpush1.bf16.msra.mxu0 %v14271_v22  ;;  %v14208_v21 = vcombine.high %v836_v16, %v840_v17  ;;  %v573_v22 = vld [vmem:[%s16671_s24 + $0x1d0] sm:$0xff]  ;;  %v14207_v28 = vcombine.low %v836_v16, %v840_v17  ;;  %v17032_v42 = vld [vmem:[%s16677_s13] sm:$0xff] }
 0x1ae   : > { %14391 = vmatprep.subr.msk.bf16.mxu0 %vm3618_vm1, %v14384_v25  ;;  %v701_v25 = vld [vmem:[%s16671_s24 + $0x5d0] sm:$0xff]  ;;  %v3577_v51 = vrot.slane %v17032_v42, %v17029_v38 }
 0x1af   : > { %3906 = vmatpush2.bf16.msra.mxu1 %v14263_v23  ;;  %v577_v23 = vld [vmem:[%s16671_s24 + $0x1f0] sm:$0xff]  ;;  %v14074_v31 = vcombine.high %v701_v25, %v705_v26  ;;  %v14073_v41 = vcombine.low %v701_v25, %v705_v26 }
 0x1b0   : > { %3907 = vmatprep.subr.bf16.mxu1 %v14256_v27  ;;  %v14335_v27 = vcombine.low %v964_v13, %v968_v15  ;;  %v13946_v29 = vcombine.high %v573_v22, %v577_v23  ;;  %v545_v13 = vld [vmem:[%s16671_s24 + $0xf0] sm:$0xff] }
 0x1b1   : > { %3949 = vmatpush2.bf16.msra.mxu0 %v3626_v34  ;;  %v693_v34 = vld [vmem:[%s16671_s24 + $0x590] sm:$0xff] }
 0x1b2   : > { %3950 = vmatprep.subr.bf16.mxu0 %v14376_v36  ;;  %v697_v36 = vld [vmem:[%s16671_s24 + $0x5b0] sm:$0xff] }
 0x1b3   : > { %3908 = vmatpush2.bf16.msra.mxu1 %v14255_v33  ;;  %v569_v33 = vld [vmem:[%s16671_s24 + $0x1b0] sm:$0xff] }
 0x1b4   : > { %3909 = vmatprep.subr.bf16.mxu1 %v14248_v37  ;;  %v13945_v37 = vcombine.low %v573_v22, %v577_v23  ;;  %v13938_v43 = vcombine.high %v565_v32, %v569_v33  ;;  %v13937_v52 = vcombine.low %v565_v32, %v569_v33  ;;  %v669_v16 = vld [vmem:[%s16671_s24 + $0x4d0] sm:$0xff] }
 0x1b5   : > { %3951 = vmatpush2.bf16.msra.mxu0 %v14375_v44  ;;  %v14066_v44 = vcombine.high %v693_v34, %v697_v36  ;;  %v673_v17 = vld [vmem:[%s16671_s24 + $0x4f0] sm:$0xff] }
 0x1b6   : > { %3952 = vmatprep.subr.bf16.mxu0 %v14368_v47  ;;  %v557_v47 = vld [vmem:[%s16671_s24 + $0x150] sm:$0xff]  ;;  %v14042_v26 = vcombine.high %v669_v16, %v673_v17  ;;  %v14041_v33 = vcombine.low %v669_v16, %v673_v17 }
 0x1b7   : > { %3910 = vmatpush2.bf16.msra.mxu1 %v14247_v46  ;;  %v17035_v46 = vsub.s32 1, %v16722_v45  ;;  %v621_v17 = vld [vmem:[%s16671_s24 + $0x350] sm:$0xff] }
 0x1b8   : > { %3911 = vmatprep.subr.bf16.mxu1 %v14240_v48  ;;  %v561_v48 = vld [vmem:[%s16671_s24 + $0x170] sm:$0xff] }
 0x1b9   : > { %3953 = vmatpush2.bf16.msra.mxu0 %v14367_v53  ;;  %v14065_v53 = vcombine.low %v693_v34, %v697_v36 }
 0x1ba   : > { %3954 = vmatprep.subr.bf16.mxu0 %v14360_v56  ;;  %v3581_v56 = vrot.slane %v17032_v42, %v17035_v46 }
 0x1bb   : > { %3912 = vmatpush2.bf16.msra.mxu1 %v14239_v55  ;;  %v13930_v55 = vcombine.high %v557_v47, %v561_v48 }
 0x1bc   : > { %3913 = vmatprep.subr.bf16.mxu1 %v14232_v57  ;;  %v14058_v57 = vcombine.high %v685_v49, %v689_v50 }
 0x1bd   : > { %3955 = vmatpush2.bf16.msra.mxu0 %v14359_v63  ;;  %v681_v63 = vld [vmem:[%s16671_s24 + $0x530] sm:$0xff] }
 0x1be   : > { %3956 = vmatprep.subr.bf16.mxu0 %v14352_v2  ;;  %v14049_v22 = vcombine.low %v677_v62, %v681_v63 }
 0x1bf   : > { %3914 = vmatpush2.bf16.msra.mxu1 %v14231_v1 }
 0x1c0   : > { %3915 = vmatprep.subr.bf16.mxu1 %v14224_v3  ;;  %v13929_v3 = vcombine.low %v557_v47, %v561_v48 }
 0x1c1   : > { %3957 = vmatpush2.bf16.msra.mxu0 %v14351_v8 }
 0x1c2   : > { %3958 = vmatprep.subr.bf16.mxu0 %v14344_v60  ;;  %v14050_v60 = vcombine.high %v677_v62, %v681_v63  ;;  %v641_v62 = vld [vmem:[%s16671_s24 + $0x3f0] sm:$0xff] }
 0x1c3   : > { %3916 = vmatpush2.bf16.msra.mxu1 %v14223_v9  ;;  %v765_v63 = vld [vmem:[%s16671_s24 + $0x7d0] sm:$0xff] }
 0x1c4   : > { %3917 = vmatprep.subr.bf16.mxu1 %v14216_v12  ;;  %v541_v12 = vld [vmem:[%s16671_s24 + $0xd0] sm:$0xff] }
 0x1c5   : > { %3959 = vmatpush2.bf16.msra.mxu0 %v14343_v18  ;;  %v13914_v23 = vcombine.high %v541_v12, %v545_v13  ;;  %v13913_v32 = vcombine.low %v541_v12, %v545_v13 }
 0x1c6   : > { %3960 = vmatprep.subr.bf16.mxu0 %v14336_v20  ;;  %v13921_v20 = vcombine.low %v549_v58, %v553_v59 }
 0x1c7   : > { %3918 = vmatpush2.bf16.msra.mxu1 %v14215_v19 }
 0x1c8   : > { %3919 = vmatprep.subr.bf16.mxu1 %v14208_v21 }
 0x1c9   : > { %3961 = vmatpush2.bf16.msra.mxu0 %v14335_v27  ;;  %v533_v27 = vld [vmem:[%s16671_s24 + $0x90] sm:$0xff] }
 0x1ca   : > { %3971 = vmatprep.subr.bf16.mxu0 %v13946_v29  ;;  %v661_v29 = vld [vmem:[%s16671_s24 + $0x490] sm:$0xff] }
 0x1cb   : > { %3920 = vmatpush2.bf16.msra.mxu1 %v14207_v28  ;;  %v537_v28 = vld [vmem:[%s16671_s24 + $0xb0] sm:$0xff] }
 0x1cc   : > { %4012 = vmatprep.subr.bf16.mxu1 %v14074_v31  ;;  %3963 = vmatmul.mubr.bf16.vlgmr.msra.gmra.mxu0 %v16888_v11  ;;  %v665_v31 = vld [vmem:[%s16671_s24 + $0x4b0] sm:$0xff]  ;;  %v13906_v34 = vcombine.high %v533_v27, %v537_v28  ;;  %v13905_v47 = vcombine.low %v533_v27, %v537_v28 }
 0x1cd   : > { %3972 = vmatpush1.bf16.msra.mxu0 %v13945_v37  ;;  %4003 = vmatprep.mubr.bf16.mxu0 %v16748_v10  ;;  %v14034_v36 = vcombine.high %v661_v29, %v665_v31  ;;  %v525_v37 = vld [vmem:[%s16671_s24 + $0x50] sm:$0xff]  ;;  %v14033_v48 = vcombine.low %v661_v29, %v665_v31 }
 0x1ce   : > { %3922 = vmatmul.mubr.bf16.vlgmr.msra.gmra.mxu1 %v16880_v39  ;;  %3973 = vmatprep.subr.bf16.mxu0 %v13938_v43  ;;  %v653_v43 = vld [vmem:[%s16671_s24 + $0x450] sm:$0xff] }
 0x1cf   : > { %4013 = vmatpush1.bf16.msra.mxu1 %v14073_v41  ;;  %4044 = vmatprep.mubr.bf16.mxu1 %v16755_v14  ;;  %v529_v41 = vld [vmem:[%s16671_s24 + $0x70] sm:$0xff] }
 0x1d0   : > { %4014 = vmatprep.subr.bf16.mxu1 %v14066_v44  ;;  %v3677_v61 = vpop.f32.mrf.mxu0  ;;  %v657_v44 = vld [vmem:[%s16671_s24 + $0x470] sm:$0xff]  ;;  %v13898_v49 = vcombine.high %v525_v37, %v529_v41 }
 0x1d1   : > { %v3678_v1 = vadd.f32 %v3677_v61, %v3577_v51  ;;  %3974 = vmatpush1.bf16.msra.mxu0 %v13937_v52  ;;  %v14026_v50 = vcombine.high %v653_v43, %v657_v44  ;;  %v517_v51 = vld [vmem:[%s16671_s24 + $0x10] sm:$0xff] }
 0x1d2   : > { %v3718_v2 = vpop.f32.mrf.mxu1  ;;  %v3679_v4 = vpop.f32.mrf.mxu0  ;;  %3975 = vmatprep.subr.bf16.mxu0 %v13930_v55  ;;  %v521_v52 = vld [vmem:[%s16671_s24 + $0x30] sm:$0xff] }
 0x1d3   : > { %4015 = vmatpush1.bf16.msra.mxu1 %v14065_v53  ;;  %v17053_v7 = vadd.f32 %v3718_v2, %v3678_v1  ;;  %v3680_v8 = vadd.f32 %v3679_v4, %v3581_v56  ;;  %v645_v53 = vld [vmem:[%s16671_s24 + $0x410] sm:$0xff]  ;;  %v13897_v56 = vcombine.low %v525_v37, %v529_v41  ;;  %v13890_v58 = vcombine.high %v517_v51, %v521_v52 }
 0x1d4   : > { %v3720_v9 = vpop.f32.mrf.mxu1  ;;  %4016 = vmatprep.subr.bf16.mxu1 %v14058_v57  ;;  %v3681_v15 = vpop.f32.mrf.mxu0  ;;  %v649_v55 = vld [vmem:[%s16671_s24 + $0x430] sm:$0xff]  ;;  %v14025_v57 = vcombine.low %v653_v43, %v657_v44  ;;  %v13889_v2 = vcombine.low %v517_v51, %v521_v52 }
 0x1d5   : > { %v17059_v18 = vadd.f32 %v3720_v9, %v3680_v8  ;;  %3976 = vmatpush1.bf16.msra.mxu0 %v13929_v3  ;;  %v14018_v59 = vcombine.high %v645_v53, %v649_v55  ;;  %v637_v61 = vld [vmem:[%s16671_s24 + $0x3d0] sm:$0xff]  ;;  %v14017_v3 = vcombine.low %v645_v53, %v649_v55 }
 0x1d6   : > { %v3722_v19 = vpop.f32.mrf.mxu1  ;;  %v3682_v21 = vpop.f32.mrf.mxu0  ;;  %3977 = vmatprep.subr.bf16.mxu0 %v13922_v6  ;;  %v769_v1 = vld [vmem:[%s16671_s24 + $0x7f0] sm:$0xff]  ;;  %v14010_v4 = vcombine.high %v637_v61, %v641_v62  ;;  %v14009_v12 = vcombine.low %v637_v61, %v641_v62 }
 0x1d7   : > { %4017 = vmatpush1.bf16.msra.mxu1 %v14057_v5  ;;  %v14138_v5 = vcombine.high %v765_v63, %v769_v1  ;;  %v629_v6 = vld [vmem:[%s16671_s24 + $0x390] sm:$0xff]  ;;  %v14137_v13 = vcombine.low %v765_v63, %v769_v1 }
 0x1d8   : > { %v3723_v25 = vpop.f32.mrf.mxu1  ;;  %4018 = vmatprep.subr.bf16.mxu1 %v14050_v60  ;;  %v633_v8 = vld [vmem:[%s16671_s24 + $0x3b0] sm:$0xff] }
 0x1d9   : > { %3978 = vmatpush1.bf16.msra.mxu0 %v13921_v20  ;;  %v757_v9 = vld [vmem:[%s16671_s24 + $0x790] sm:$0xff]  ;;  %v14002_v15 = vcombine.high %v629_v6, %v633_v8 }
 0x1da   : > { %3979 = vmatprep.subr.bf16.mxu0 %v13914_v23  ;;  %v761_v60 = vld [vmem:[%s16671_s24 + $0x7b0] sm:$0xff] }
 0x1db   : > { %4019 = vmatpush1.bf16.msra.mxu1 %v14049_v22  ;;  %v14130_v16 = vcombine.high %v757_v9, %v761_v60  ;;  %v625_v19 = vld [vmem:[%s16671_s24 + $0x370] sm:$0xff]  ;;  %v14001_v22 = vcombine.low %v629_v6, %v633_v8  ;;  %v14129_v23 = vcombine.low %v757_v9, %v761_v60 }
 0x1dc   : > { %4020 = vmatprep.subr.bf16.mxu1 %v14042_v26  ;;  %v749_v20 = vld [vmem:[%s16671_s24 + $0x750] sm:$0xff]  ;;  %v13994_v25 = vcombine.high %v621_v17, %v625_v19 }
 0x1dd   : > { %3980 = vmatpush1.bf16.msra.mxu0 %v13913_v32  ;;  %v753_v21 = vld [vmem:[%s16671_s24 + $0x770] sm:$0xff]  ;;  %v13993_v32 = vcombine.low %v621_v17, %v625_v19 }
 0x1de   : > { %3981 = vmatprep.subr.bf16.mxu0 %v13906_v34  ;;  %v14122_v26 = vcombine.high %v749_v20, %v753_v21  ;;  %v613_v27 = vld [vmem:[%s16671_s24 + $0x310] sm:$0xff] }
 0x1df   : > { %4021 = vmatpush1.bf16.msra.mxu1 %v14041_v33  ;;  %v617_v28 = vld [vmem:[%s16671_s24 + $0x330] sm:$0xff]  ;;  %v14121_v33 = vcombine.low %v749_v20, %v753_v21 }
 0x1e0   : > { %4022 = vmatprep.subr.bf16.mxu1 %v14034_v36  ;;  %v741_v29 = vld [vmem:[%s16671_s24 + $0x710] sm:$0xff]  ;;  %v13986_v34 = vcombine.high %v613_v27, %v617_v28 }
 0x1e1   : > { %3982 = vmatpush1.bf16.msra.mxu0 %v13905_v47  ;;  %v745_v31 = vld [vmem:[%s16671_s24 + $0x730] sm:$0xff]  ;;  %v13985_v47 = vcombine.low %v613_v27, %v617_v28 }
 0x1e2   : > { %3983 = vmatprep.subr.bf16.mxu0 %v13898_v49  ;;  %v14114_v36 = vcombine.high %v741_v29, %v745_v31  ;;  %v605_v37 = vld [vmem:[%s16671_s24 + $0x2d0] sm:$0xff] }
 0x1e3   : > { %4023 = vmatpush1.bf16.msra.mxu1 %v14033_v48  ;;  %v609_v41 = vld [vmem:[%s16671_s24 + $0x2f0] sm:$0xff]  ;;  %v14113_v48 = vcombine.low %v741_v29, %v745_v31 }
 0x1e4   : > { %4024 = vmatprep.subr.bf16.mxu1 %v14026_v50  ;;  %v733_v43 = vld [vmem:[%s16671_s24 + $0x6d0] sm:$0xff]  ;;  %v13978_v49 = vcombine.high %v605_v37, %v609_v41 }
 0x1e5   : > { %3984 = vmatpush1.bf16.msra.mxu0 %v13897_v56  ;;  %v737_v44 = vld [vmem:[%s16671_s24 + $0x6f0] sm:$0xff]  ;;  %v13977_v56 = vcombine.low %v605_v37, %v609_v41 }
 0x1e6   : > { %3985 = vmatprep.subr.bf16.mxu0 %v13890_v58  ;;  %v14106_v50 = vcombine.high %v733_v43, %v737_v44  ;;  %v597_v51 = vld [vmem:[%s16671_s24 + $0x290] sm:$0xff] }
 0x1e7   : > { %4025 = vmatpush1.bf16.msra.mxu1 %v14025_v57  ;;  %v601_v52 = vld [vmem:[%s16671_s24 + $0x2b0] sm:$0xff]  ;;  %v14105_v57 = vcombine.low %v733_v43, %v737_v44 }
 0x1e8   : > { %4026 = vmatprep.subr.bf16.mxu1 %v14018_v59  ;;  %v725_v53 = vld [vmem:[%s16671_s24 + $0x690] sm:$0xff]  ;;  %v13970_v58 = vcombine.high %v597_v51, %v601_v52 }
 0x1e9   : > { %3986 = vmatpush1.bf16.msra.mxu0 %v13889_v2  ;;  %v729_v55 = vld [vmem:[%s16671_s24 + $0x6b0] sm:$0xff]  ;;  %v13969_v2 = vcombine.low %v597_v51, %v601_v52 }
 0x1ea   : > { %3987 = vmatprep.subr.bf16.mxu0 %v14010_v4  ;;  %v14098_v59 = vcombine.high %v725_v53, %v729_v55  ;;  %v589_v61 = vld [vmem:[%s16671_s24 + $0x250] sm:$0xff] }
 0x1eb   : > { %4027 = vmatpush1.bf16.msra.mxu1 %v14017_v3  ;;  %v593_v62 = vld [vmem:[%s16671_s24 + $0x270] sm:$0xff]  ;;  %v14097_v3 = vcombine.low %v725_v53, %v729_v55 }
 0x1ec   : > { %4028 = vmatprep.subr.bf16.mxu1 %v14138_v5  ;;  %v717_v63 = vld [vmem:[%s16671_s24 + $0x650] sm:$0xff]  ;;  %v13962_v4 = vcombine.high %v589_v61, %v593_v62 }
 0x1ed   : > { %3988 = vmatpush2.bf16.msra.mxu0 %v14009_v12  ;;  %v721_v1 = vld [vmem:[%s16671_s24 + $0x670] sm:$0xff]  ;;  %v13961_v12 = vcombine.low %v589_v61, %v593_v62 }
 0x1ee   : > { %3989 = vmatprep.subr.bf16.mxu0 %v14002_v15  ;;  %v14090_v5 = vcombine.high %v717_v63, %v721_v1  ;;  %v581_v6 = vld [vmem:[%s16671_s24 + $0x210] sm:$0xff] }
 0x1ef   : > { %4029 = vmatpush2.bf16.msra.mxu1 %v14137_v13  ;;  %v585_v8 = vld [vmem:[%s16671_s24 + $0x230] sm:$0xff]  ;;  %v14089_v13 = vcombine.low %v717_v63, %v721_v1 }
 0x1f0   : > { %4030 = vmatprep.subr.bf16.mxu1 %v14130_v16  ;;  %v709_v9 = vld [vmem:[%s16671_s24 + $0x610] sm:$0xff]  ;;  %v13954_v15 = vcombine.high %v581_v6, %v585_v8 }
 0x1f1   : > { %3990 = vmatpush2.bf16.msra.mxu0 %v14001_v22  ;;  %v713_v60 = vld [vmem:[%s16671_s24 + $0x630] sm:$0xff]  ;;  %v13953_v22 = vcombine.low %v581_v6, %v585_v8 }
 0x1f2   : > { %3991 = vmatprep.subr.bf16.mxu0 %v13994_v25  ;;  %v14082_v16 = vcombine.high %v709_v9, %v713_v60  ;;  %v829_v17 = vld [vmem:[%s16671_s24 + $0x9d0] sm:$0xff] }
 0x1f3   : > { %4031 = vmatpush2.bf16.msra.mxu1 %v14129_v23  ;;  %v833_v19 = vld [vmem:[%s16671_s24 + $0x9f0] sm:$0xff]  ;;  %v14081_v23 = vcombine.low %v709_v9, %v713_v60 }
 0x1f4   : > { %4032 = vmatprep.subr.bf16.mxu1 %v14122_v26  ;;  %v957_v20 = vld [vmem:[%s16671_s24 + $0xdd0] sm:$0xff]  ;;  %v14202_v25 = vcombine.high %v829_v17, %v833_v19 }
 0x1f5   : > { %3992 = vmatpush2.bf16.msra.mxu0 %v13993_v32  ;;  %v961_v21 = vld [vmem:[%s16671_s24 + $0xdf0] sm:$0xff]  ;;  %v14201_v32 = vcombine.low %v829_v17, %v833_v19 }
 0x1f6   : > { %3993 = vmatprep.subr.bf16.mxu0 %v13986_v34  ;;  %v14330_v26 = vcombine.high %v957_v20, %v961_v21  ;;  %v821_v27 = vld [vmem:[%s16671_s24 + $0x990] sm:$0xff] }
 0x1f7   : > { %4033 = vmatpush2.bf16.msra.mxu1 %v14121_v33  ;;  %v825_v28 = vld [vmem:[%s16671_s24 + $0x9b0] sm:$0xff]  ;;  %v14329_v33 = vcombine.low %v957_v20, %v961_v21 }
 0x1f8   : > { %4034 = vmatprep.subr.bf16.mxu1 %v14114_v36  ;;  %v949_v29 = vld [vmem:[%s16671_s24 + $0xd90] sm:$0xff]  ;;  %v14194_v34 = vcombine.high %v821_v27, %v825_v28 }
 0x1f9   : > { %3994 = vmatpush2.bf16.msra.mxu0 %v13985_v47  ;;  %v953_v31 = vld [vmem:[%s16671_s24 + $0xdb0] sm:$0xff] }
 0x1fa   : > { %3995 = vmatprep.subr.bf16.mxu0 %v13978_v49  ;;  %v14322_v36 = vcombine.high %v949_v29, %v953_v31  ;;  %v813_v37 = vld [vmem:[%s16671_s24 + $0x950] sm:$0xff]  ;;  %v14321_v49 = vcombine.low %v949_v29, %v953_v31 }
 0x1fb   : > { %4035 = vmatpush2.bf16.msra.mxu1 %v14113_v48  ;;  %v817_v41 = vld [vmem:[%s16671_s24 + $0x970] sm:$0xff]  ;;  %v14193_v48 = vcombine.low %v821_v27, %v825_v28 }
 0x1fc   : > { %4036 = vmatprep.subr.bf16.mxu1 %v14106_v50  ;;  %v941_v43 = vld [vmem:[%s16671_s24 + $0xd50] sm:$0xff]  ;;  %v14186_v50 = vcombine.high %v813_v37, %v817_v41  ;;  %v14185_v62 = vcombine.low %v813_v37, %v817_v41 }
 0x1fd   : > { %3996 = vmatpush2.bf16.msra.mxu0 %v13977_v56  ;;  %v945_v44 = vld [vmem:[%s16671_s24 + $0xd70] sm:$0xff] }
 0x1fe   : > { %3997 = vmatprep.subr.bf16.mxu0 %v13970_v58  ;;  %v14314_v52 = vcombine.high %v941_v43, %v945_v44  ;;  %v805_v53 = vld [vmem:[%s16671_s24 + $0x910] sm:$0xff]  ;;  %v14313_v1 = vcombine.low %v941_v43, %v945_v44 }
 0x1ff   : > { %4037 = vmatpush2.bf16.msra.mxu1 %v14105_v57  ;;  %v809_v55 = vld [vmem:[%s16671_s24 + $0x930] sm:$0xff] }
 0x200   : > { %4038 = vmatprep.subr.bf16.mxu1 %v14098_v59  ;;  %v933_v57 = vld [vmem:[%s16671_s24 + $0xd10] sm:$0xff] }
 0x201   : > { %3998 = vmatpush2.bf16.msra.mxu0 %v13969_v2  ;;  %v937_v58 = vld [vmem:[%s16671_s24 + $0xd30] sm:$0xff]  ;;  %v14178_v2 = vcombine.high %v805_v53, %v809_v55 }
 0x202   : > { %3999 = vmatprep.subr.bf16.mxu0 %v13962_v4  ;;  %v14306_v6 = vcombine.high %v933_v57, %v937_v58  ;;  %v797_v8 = vld [vmem:[%s16671_s24 + $0x8d0] sm:$0xff] }
 0x203   : > { %4039 = vmatpush2.bf16.msra.mxu1 %v14097_v3  ;;  %v925_v60 = vld [vmem:[%s16671_s24 + $0xcd0] sm:$0xff] }
 0x204   : > { %4040 = vmatprep.subr.bf16.mxu1 %v14090_v5  ;;  %v789_v20 = vld [vmem:[%s16671_s24 + $0x890] sm:$0xff] }
 0x205   : > { %4000 = vmatpush2.bf16.msra.mxu0 %v13961_v12  ;;  %v929_v12 = vld [vmem:[%s16671_s24 + $0xcf0] sm:$0xff] }
 0x206   : > { %4001 = vmatprep.subr.bf16.mxu0 %v13954_v15  ;;  %v14177_v15 = vcombine.low %v805_v53, %v809_v55  ;;  %v14298_v19 = vcombine.high %v925_v60, %v929_v12  ;;  %v793_v21 = vld [vmem:[%s16671_s24 + $0x8b0] sm:$0xff] }
 0x207   : > { %4041 = vmatpush2.bf16.msra.mxu1 %v14089_v13  ;;  %v14162_v27 = vcombine.high %v789_v20, %v793_v21  ;;  %v781_v29 = vld [vmem:[%s16671_s24 + $0x850] sm:$0xff] }
 0x208   : > { %4042 = vmatprep.subr.bf16.mxu1 %v14082_v16  ;;  %v785_v31 = vld [vmem:[%s16671_s24 + $0x870] sm:$0xff] }
 0x209   : > { %4002 = vmatpush2.bf16.msra.mxu0 %v13953_v22  ;;  %v917_v22 = vld [vmem:[%s16671_s24 + $0xc90] sm:$0xff]  ;;  %v14154_v37 = vcombine.high %v781_v29, %v785_v31 }
 0x20a   : > { %4053 = vmatprep.subr.bf16.mxu0 %v14202_v25  ;;  %v773_v43 = vld [vmem:[%s16671_s24 + $0x810] sm:$0xff] }
 0x20b   : > { %4043 = vmatpush2.bf16.msra.mxu1 %v14081_v23  ;;  %v921_v23 = vld [vmem:[%s16671_s24 + $0xcb0] sm:$0xff] }
 0x20c   : > { %4094 = vmatprep.subr.bf16.mxu1 %v14330_v26  ;;  %4004 = vmatmul.mubr.bf16.vlgmr.msra.gmra.mxu0 %v16799_v24  ;;  %v14297_v26 = vcombine.low %v925_v60, %v929_v12  ;;  %v14290_v28 = vcombine.high %v917_v22, %v921_v23  ;;  %v777_v44 = vld [vmem:[%s16671_s24 + $0x830] sm:$0xff] }
 0x20d   : > { %4054 = vmatpush1.bf16.msra.mxu0 %v14201_v32  ;;  %4085 = vmatprep.mubr.bf16.mxu0 %v16804_v30  ;;  %v909_v32 = vld [vmem:[%s16671_s24 + $0xc50] sm:$0xff] }
 0x20e   : > { %v3800_v47 = vpop.f32.mrf.mxu1  ;;  %4045 = vmatmul.mubr.bf16.vlgmr.msra.gmra.mxu1 %v16810_v0  ;;  %4055 = vmatprep.subr.bf16.mxu0 %v14194_v34  ;;  %v14161_v34 = vcombine.low %v789_v20, %v793_v21  ;;  %v893_v53 = vld [vmem:[%s16671_s24 + $0xbd0] sm:$0xff] }
 0x20f   : > { %4095 = vmatpush1.bf16.msra.mxu1 %v14329_v33  ;;  %14394 = vmatprep.mubr.msk.bf16.mxu1 %vm3614_vm0, %v16816_v40  ;;  %v913_v33 = vld [vmem:[%s16671_s24 + $0xc70] sm:$0xff] }
 0x210   : > { %v3802_v51 = vpop.f32.mrf.mxu1  ;;  %4096 = vmatprep.subr.bf16.mxu1 %v14322_v36  ;;  %v3759_v56 = vpop.f32.mrf.mxu0  ;;  %v14289_v36 = vcombine.low %v917_v22, %v921_v23  ;;  %v14282_v41 = vcombine.high %v909_v32, %v913_v33  ;;  %v897_v55 = vld [vmem:[%s16671_s24 + $0xbf0] sm:$0xff] }
 0x211   : > { %v3760_v59 = vadd.f32 %v3759_v56, %v17053_v7  ;;  %4056 = vmatpush1.bf16.msra.mxu0 %v14193_v48  ;;  %v801_v7 = vld [vmem:[%s16671_s24 + $0x8f0] sm:$0xff] }
 0x212   : > { %v3804_v61 = vpop.f32.mrf.mxu1  ;;  %v3761_v63 = vpop.f32.mrf.mxu0  ;;  %4057 = vmatprep.subr.bf16.mxu0 %v14186_v50  ;;  %v14170_v17 = vcombine.high %v797_v8, %v801_v7  ;;  %v14169_v25 = vcombine.low %v797_v8, %v801_v7  ;;  %v905_v48 = vld [vmem:[%s16671_s24 + $0xc30] sm:$0xff]  ;;  %v14281_v50 = vcombine.low %v909_v32, %v913_v33 }
 0x213   : > { %4097 = vmatpush1.bf16.msra.mxu1 %v14321_v49  ;;  %v17127_v3 = vadd.f32 %v3800_v47, %v3760_v59  ;;  %v3762_v4 = vadd.f32 %v3761_v63, %v17059_v18  ;;  %v14305_v18 = vcombine.low %v933_v57, %v937_v58  ;;  %v901_v47 = vld [vmem:[%s16671_s24 + $0xc10] sm:$0xff]  ;;  %v14153_v49 = vcombine.low %v781_v29, %v785_v31 }
 0x214   : > { %v3805_v5 = vpop.f32.mrf.mxu1  ;;  %4098 = vmatprep.subr.bf16.mxu1 %v14314_v52  ;;  %v3763_v9 = vpop.f32.mrf.mxu0  ;;  %v14274_v52 = vcombine.high %v901_v47, %v905_v48  ;;  %v1013_v56 = vld [vmem:[%s16671_s24 + $0xf90] sm:$0xff]  ;;  %v14145_v57 = vcombine.low %v773_v43, %v777_v44  ;;  %v14273_v58 = vcombine.low %v901_v47, %v905_v48  ;;  %v14266_v59 = vcombine.high %v893_v53, %v897_v55 }
 0x215   : > { %v17134_v13 = vadd.f32 %v3802_v51, %v3762_v4  ;;  %4058 = vmatpush1.bf16.msra.mxu0 %v14185_v62  ;;  %v14146_v51 = vcombine.high %v773_v43, %v777_v44  ;;  %v14386_v61 = vcombine.high %v1013_v56, %v1013_v56  ;;  %v14385_v62 = vcombine.low %v1013_v56, %v1013_v56  ;;  %v885_v63 = vld [vmem:[%s16671_s24 + $0xb90] sm:$0xff] }
 0x216   : > { %v3764_v16 = vpop.f32.mrf.mxu0  ;;  %4059 = vmatprep.subr.bf16.mxu0 %v14178_v2  ;;  %v1005_v2 = vld [vmem:[%s16671_s24 + $0xf50] sm:$0xff]  ;;  %v14265_v5 = vcombine.low %v893_v53, %v897_v55 }
 0x217   : > { %4099 = vmatpush1.bf16.msra.mxu1 %v14313_v1  ;;  %v889_v1 = vld [vmem:[%s16671_s24 + $0xbb0] sm:$0xff]  ;;  %v3632_v8 = vsel %vm3618_vm1, %v14385_v62, 0 }
 0x218   : > { %4100 = vmatprep.subr.bf16.mxu1 %v14306_v6  ;;  %v1009_v4 = vld [vmem:[%s16671_s24 + $0xf70] sm:$0xff]  ;;  %v14258_v6 = vcombine.high %v885_v63, %v889_v1  ;;  %v14257_v16 = vcombine.low %v885_v63, %v889_v1 }
 0x219   : > { %4060 = vmatpush1.bf16.msra.mxu0 %v14177_v15  ;;  %v14378_v7 = vcombine.high %v1005_v2, %v1009_v4  ;;  %v877_v9 = vld [vmem:[%s16671_s24 + $0xb50] sm:$0xff] }
 0x21a   : > { %4061 = vmatprep.subr.bf16.mxu0 %v14170_v17  ;;  %v881_v60 = vld [vmem:[%s16671_s24 + $0xb70] sm:$0xff] }
 0x21b   : > { %4101 = vmatpush1.bf16.msra.mxu1 %v14305_v18  ;;  %v997_v12 = vld [vmem:[%s16671_s24 + $0xf10] sm:$0xff]  ;;  %v14377_v18 = vcombine.low %v1005_v2, %v1009_v4  ;;  %v14250_v17 = vcombine.high %v877_v9, %v881_v60  ;;  %v574_v2 = vld [vmem:[%s16671_s24 + $0x1d8] sm:$0xff] }
 0x21c   : > { %4102 = vmatprep.subr.bf16.mxu1 %v14298_v19  ;;  %v1001_v15 = vld [vmem:[%s16671_s24 + $0xf30] sm:$0xff]  ;;  %v578_v4 = vld [vmem:[%s16671_s24 + $0x1f8] sm:$0xff] }
 0x21d   : > { %4062 = vmatpush1.bf16.msra.mxu0 %v14169_v25  ;;  %v14370_v19 = vcombine.high %v997_v12, %v1001_v15  ;;  %v869_v20 = vld [vmem:[%s16671_s24 + $0xb10] sm:$0xff]  ;;  %v14249_v25 = vcombine.low %v877_v9, %v881_v60  ;;  %v702_v9 = vld [vmem:[%s16671_s24 + $0x5d8] sm:$0xff] }
 0x21e   : > { %4063 = vmatprep.subr.bf16.mxu0 %v14162_v27  ;;  %v873_v21 = vld [vmem:[%s16671_s24 + $0xb30] sm:$0xff]  ;;  %v706_v60 = vld [vmem:[%s16671_s24 + $0x5f8] sm:$0xff] }
 0x21f   : > { %4103 = vmatpush1.bf16.msra.mxu1 %v14297_v26  ;;  %v989_v22 = vld [vmem:[%s16671_s24 + $0xed0] sm:$0xff]  ;;  %v14369_v26 = vcombine.low %v997_v12, %v1001_v15  ;;  %v14242_v27 = vcombine.high %v869_v20, %v873_v21  ;;  %v566_v12 = vld [vmem:[%s16671_s24 + $0x198] sm:$0xff] }
 0x220   : > { %4104 = vmatprep.subr.bf16.mxu1 %v14290_v28  ;;  %v993_v23 = vld [vmem:[%s16671_s24 + $0xef0] sm:$0xff]  ;;  %v570_v15 = vld [vmem:[%s16671_s24 + $0x1b8] sm:$0xff] }
 0x221   : > { %4064 = vmatpush1.bf16.msra.mxu0 %v14161_v34  ;;  %v14362_v28 = vcombine.high %v989_v22, %v993_v23  ;;  %v861_v29 = vld [vmem:[%s16671_s24 + $0xad0] sm:$0xff]  ;;  %v14241_v34 = vcombine.low %v869_v20, %v873_v21  ;;  %v13940_v20 = vcombine.high %v566_v12, %v570_v15  ;;  %v694_v21 = vld [vmem:[%s16671_s24 + $0x598] sm:$0xff] }
 0x222   : > { %4065 = vmatprep.subr.bf16.mxu0 %v14154_v37  ;;  %v865_v31 = vld [vmem:[%s16671_s24 + $0xaf0] sm:$0xff] }
 0x223   : > { %4105 = vmatpush1.bf16.msra.mxu1 %v14289_v36  ;;  %v981_v32 = vld [vmem:[%s16671_s24 + $0xe90] sm:$0xff]  ;;  %v14361_v36 = vcombine.low %v989_v22, %v993_v23  ;;  %v14234_v37 = vcombine.high %v861_v29, %v865_v31  ;;  %v698_v22 = vld [vmem:[%s16671_s24 + $0x5b8] sm:$0xff] }
 0x224   : > { %4106 = vmatprep.subr.bf16.mxu1 %v14282_v41  ;;  %v985_v33 = vld [vmem:[%s16671_s24 + $0xeb0] sm:$0xff]  ;;  %v558_v23 = vld [vmem:[%s16671_s24 + $0x158] sm:$0xff] }
 0x225   : > { %4066 = vmatpush1.bf16.msra.mxu0 %v14153_v49  ;;  %v14354_v41 = vcombine.high %v981_v32, %v985_v33  ;;  %v853_v43 = vld [vmem:[%s16671_s24 + $0xa90] sm:$0xff]  ;;  %v14233_v49 = vcombine.low %v861_v29, %v865_v31  ;;  %v13939_v29 = vcombine.low %v566_v12, %v570_v15  ;;  %v14068_v31 = vcombine.high %v694_v21, %v698_v22 }
 0x226   : > { %4067 = vmatprep.subr.bf16.mxu0 %v14146_v51  ;;  %v857_v44 = vld [vmem:[%s16671_s24 + $0xab0] sm:$0xff] }
 0x227   : > { %4107 = vmatpush1.bf16.msra.mxu1 %v14281_v50  ;;  %v973_v47 = vld [vmem:[%s16671_s24 + $0xe50] sm:$0xff]  ;;  %v14353_v50 = vcombine.low %v981_v32, %v985_v33  ;;  %v14226_v51 = vcombine.high %v853_v43, %v857_v44  ;;  %v686_v33 = vld [vmem:[%s16671_s24 + $0x558] sm:$0xff] }
 0x228   : > { %4108 = vmatprep.subr.bf16.mxu1 %v14274_v52  ;;  %v977_v48 = vld [vmem:[%s16671_s24 + $0xe70] sm:$0xff] }
 0x229   : > { %4068 = vmatpush1.bf16.msra.mxu0 %v14145_v57  ;;  %v14346_v52 = vcombine.high %v973_v47, %v977_v48  ;;  %v845_v53 = vld [vmem:[%s16671_s24 + $0xa50] sm:$0xff] }
 0x22a   : > { %4069 = vmatprep.subr.bf16.mxu0 %v14266_v59  ;;  %v849_v55 = vld [vmem:[%s16671_s24 + $0xa70] sm:$0xff]  ;;  %v14345_v59 = vcombine.low %v973_v47, %v977_v48 }
 0x22b   : > { %4109 = vmatpush1.bf16.msra.mxu1 %v14273_v58  ;;  %v965_v56 = vld [vmem:[%s16671_s24 + $0xe10] sm:$0xff]  ;;  %v14225_v58 = vcombine.low %v853_v43, %v857_v44  ;;  %v14067_v44 = vcombine.low %v694_v21, %v698_v22  ;;  %v530_v21 = vld [vmem:[%s16671_s24 + $0x78] sm:$0xff] }
 0x22c   : > { %14393 = vmatprep.subr.msk.bf16.mxu1 %vm3618_vm1, %v14386_v61  ;;  %v969_v57 = vld [vmem:[%s16671_s24 + $0xe30] sm:$0xff]  ;;  %v14218_v61 = vcombine.high %v845_v53, %v849_v55 }
 0x22d   : > { %4070 = vmatpush2.bf16.msra.mxu0 %v14265_v5  ;;  %v14338_v62 = vcombine.high %v965_v56, %v969_v57  ;;  %v837_v63 = vld [vmem:[%s16671_s24 + $0xa10] sm:$0xff]  ;;  %v14217_v5 = vcombine.low %v845_v53, %v849_v55  ;;  %v542_v55 = vld [vmem:[%s16671_s24 + $0xd8] sm:$0xff] }
 0x22e   : > { %4071 = vmatprep.subr.bf16.mxu0 %v14258_v6  ;;  %v841_v1 = vld [vmem:[%s16671_s24 + $0xa30] sm:$0xff]  ;;  %v14337_v6 = vcombine.low %v965_v56, %v969_v57  ;;  %v546_v56 = vld [vmem:[%s16671_s24 + $0xf8] sm:$0xff] }
 0x22f   : > { %4113 = vmatpush2.bf16.msra.mxu1 %v3632_v8  ;;  %v14210_v8 = vcombine.high %v837_v63, %v841_v1  ;;  %v13915_v12 = vcombine.low %v542_v55, %v546_v56 }
 0x230   : > { %4114 = vmatprep.subr.bf16.mxu1 %v14378_v7  ;;  %v13948_v7 = vcombine.high %v574_v2, %v578_v4 }
 0x231   : > { %4072 = vmatpush2.bf16.msra.mxu0 %v14257_v16  ;;  %v14209_v16 = vcombine.low %v837_v63, %v841_v1 }
 0x232   : > { %4073 = vmatprep.subr.bf16.mxu0 %v14250_v17  ;;  %v17186_v17 = vsub.s32 2, %v16722_v45 }
 0x233   : > { %4115 = vmatpush2.bf16.msra.mxu1 %v14377_v18  ;;  %v13947_v18 = vcombine.low %v574_v2, %v578_v4  ;;  %v13916_v2 = vcombine.high %v542_v55, %v546_v56  ;;  %v670_v4 = vld [vmem:[%s16671_s24 + $0x4d8] sm:$0xff] }
 0x234   : > { %4116 = vmatprep.subr.bf16.mxu1 %v14370_v19  ;;  %v14076_v19 = vcombine.high %v702_v9, %v706_v60  ;;  %v634_v55 = vld [vmem:[%s16671_s24 + $0x3b8] sm:$0xff] }
 0x235   : > { %4074 = vmatpush2.bf16.msra.mxu0 %v14249_v25  ;;  %v562_v25 = vld [vmem:[%s16671_s24 + $0x178] sm:$0xff] }
 0x236   : > { %4075 = vmatprep.subr.bf16.mxu0 %v14242_v27  ;;  %v17194_v27 = vsub.s32 3, %v16722_v45  ;;  %v13932_v32 = vcombine.high %v558_v23, %v562_v25  ;;  %v13931_v48 = vcombine.low %v558_v23, %v562_v25 }
 0x237   : > { %4117 = vmatpush2.bf16.msra.mxu1 %v14369_v26  ;;  %v14075_v26 = vcombine.low %v702_v9, %v706_v60 }
 0x238   : > { %4118 = vmatprep.subr.bf16.mxu1 %v14362_v28  ;;  %v3585_v28 = vrot.slane %v17032_v42, %v17186_v17  ;;  %v3589_v43 = vrot.slane %v17032_v42, %v17194_v27 }
 0x239   : > { %4076 = vmatpush2.bf16.msra.mxu0 %v14241_v34  ;;  %v690_v34 = vld [vmem:[%s16671_s24 + $0x578] sm:$0xff] }
 0x23a   : > { %4077 = vmatprep.subr.bf16.mxu0 %v14234_v37  ;;  %v554_v37 = vld [vmem:[%s16671_s24 + $0x138] sm:$0xff] }
 0x23b   : > { %4119 = vmatpush2.bf16.msra.mxu1 %v14361_v36  ;;  %v550_v36 = vld [vmem:[%s16671_s24 + $0x118] sm:$0xff] }
 0x23c   : > { %4120 = vmatprep.subr.bf16.mxu1 %v14354_v41 }
 0x23d   : > { %4078 = vmatpush2.bf16.msra.mxu0 %v14233_v49 }
 0x23e   : > { %4079 = vmatprep.subr.bf16.mxu0 %v14226_v51  ;;  %v678_v51 = vld [vmem:[%s16671_s24 + $0x518] sm:$0xff] }
 0x23f   : > { %4121 = vmatpush2.bf16.msra.mxu1 %v14353_v50  ;;  %v13924_v50 = vcombine.high %v550_v36, %v554_v37 }
 0x240   : > { %4122 = vmatprep.subr.bf16.mxu1 %v14346_v52  ;;  %v682_v52 = vld [vmem:[%s16671_s24 + $0x538] sm:$0xff] }
 0x241   : > { %4080 = vmatpush2.bf16.msra.mxu0 %v14225_v58  ;;  %v14051_v9 = vcombine.low %v678_v51, %v682_v52 }
 0x242   : > { %4081 = vmatprep.subr.bf16.mxu0 %v14218_v61  ;;  %v13923_v61 = vcombine.low %v550_v36, %v554_v37 }
 0x243   : > { %4123 = vmatpush2.bf16.msra.mxu1 %v14345_v59 }
 0x244   : > { %4124 = vmatprep.subr.bf16.mxu1 %v14338_v62  ;;  %v14052_v62 = vcombine.high %v678_v51, %v682_v52  ;;  %v766_v51 = vld [vmem:[%s16671_s24 + $0x7d8] sm:$0xff] }
 0x245   : > { %4082 = vmatpush2.bf16.msra.mxu0 %v14217_v5  ;;  %v674_v5 = vld [vmem:[%s16671_s24 + $0x4f8] sm:$0xff] }
 0x246   : > { %4083 = vmatprep.subr.bf16.mxu0 %v14210_v8  ;;  %v534_v8 = vld [vmem:[%s16671_s24 + $0x98] sm:$0xff]  ;;  %v14044_v15 = vcombine.high %v670_v4, %v674_v5  ;;  %v14043_v22 = vcombine.low %v670_v4, %v674_v5 }
 0x247   : > { %4125 = vmatpush2.bf16.msra.mxu1 %v14337_v6  ;;  %v770_v52 = vld [vmem:[%s16671_s24 + $0x7f8] sm:$0xff] }
 0x248   : > { %4135 = vmatprep.subr.bf16.mxu1 %v13948_v7  ;;  %v538_v7 = vld [vmem:[%s16671_s24 + $0xb8] sm:$0xff] }
 0x249   : > { %4084 = vmatpush2.bf16.msra.mxu0 %v14209_v16  ;;  %v13908_v16 = vcombine.high %v534_v8, %v538_v7  ;;  %v13907_v23 = vcombine.low %v534_v8, %v538_v7  ;;  %v750_v8 = vld [vmem:[%s16671_s24 + $0x758] sm:$0xff] }
 0x24a   : > { %4127 = vmatmul.mubr.bf16.vlgmr.msra.gmra.mxu1 %v16888_v11  ;;  %4176 = vmatprep.subr.bf16.mxu0 %v14076_v19  ;;  %v666_v19 = vld [vmem:[%s16671_s24 + $0x4b8] sm:$0xff] }
 0x24b   : > { %4136 = vmatpush1.bf16.msra.mxu1 %v13947_v18  ;;  %4167 = vmatprep.mubr.bf16.mxu1 %v16748_v10  ;;  %v14060_v10 = vcombine.high %v686_v33, %v690_v34  ;;  %v662_v18 = vld [vmem:[%s16671_s24 + $0x498] sm:$0xff] }
 0x24c   : > { %4137 = vmatprep.subr.bf16.mxu1 %v13940_v20  ;;  %4086 = vmatmul.mubr.bf16.vlgmr.msra.gmra.mxu0 %v16880_v39  ;;  %v526_v20 = vld [vmem:[%s16671_s24 + $0x58] sm:$0xff]  ;;  %v14036_v25 = vcombine.high %v662_v18, %v666_v19 }
 0x24d   : > { %4177 = vmatpush1.bf16.msra.mxu0 %v14075_v26  ;;  %4208 = vmatprep.mubr.bf16.mxu0 %v16755_v14  ;;  %v14059_v14 = vcombine.low %v686_v33, %v690_v34  ;;  %v13900_v26 = vcombine.high %v526_v20, %v530_v21  ;;  %v14035_v33 = vcombine.low %v662_v18, %v666_v19  ;;  %v754_v7 = vld [vmem:[%s16671_s24 + $0x778] sm:$0xff] }
 0x24e   : > { %v3841_v41 = vpop.f32.mrf.mxu1  ;;  %4178 = vmatprep.subr.bf16.mxu0 %v14068_v31  ;;  %v518_v31 = vld [vmem:[%s16671_s24 + $0x18] sm:$0xff]  ;;  %v13899_v34 = vcombine.low %v526_v20, %v530_v21 }
 0x24f   : > { %v3842_v47 = vadd.f32 %v3841_v41, %v3585_v28  ;;  %4138 = vmatpush1.bf16.msra.mxu1 %v13939_v29  ;;  %v654_v28 = vld [vmem:[%s16671_s24 + $0x458] sm:$0xff] }
 0x250   : > { %v3843_v49 = vpop.f32.mrf.mxu1  ;;  %4139 = vmatprep.subr.bf16.mxu1 %v13932_v32  ;;  %v3882_v53 = vpop.f32.mrf.mxu0  ;;  %v658_v29 = vld [vmem:[%s16671_s24 + $0x478] sm:$0xff] }
 0x251   : > { %v3844_v57 = vadd.f32 %v3843_v49, %v3589_v43  ;;  %v17211_v58 = vadd.f32 %v3882_v53, %v3842_v47  ;;  %4179 = vmatpush1.bf16.msra.mxu0 %v14067_v44  ;;  %v522_v32 = vld [vmem:[%s16671_s24 + $0x38] sm:$0xff]  ;;  %v14028_v36 = vcombine.high %v654_v28, %v658_v29 }
 0x252   : > { %v3845_v42 = vpop.f32.mrf.mxu1  ;;  %v3884_v59 = vpop.f32.mrf.mxu0  ;;  %4180 = vmatprep.subr.bf16.mxu0 %v14060_v10  ;;  %v13892_v37 = vcombine.high %v518_v31, %v522_v32  ;;  %v646_v41 = vld [vmem:[%s16671_s24 + $0x418] sm:$0xff]  ;;  %v13891_v10 = vcombine.low %v518_v31, %v522_v32 }
 0x253   : > { %4140 = vmatpush1.bf16.msra.mxu1 %v13931_v48  ;;  %v17213_v1 = vadd.f32 %v3884_v59, %v3844_v57  ;;  %v650_v43 = vld [vmem:[%s16671_s24 + $0x438] sm:$0xff]  ;;  %v14027_v48 = vcombine.low %v654_v28, %v658_v29  ;;  %v14140_v42 = vcombine.high %v766_v51, %v770_v52 }
 0x254   : > { %v3846_v63 = vpop.f32.mrf.mxu1  ;;  %4141 = vmatprep.subr.bf16.mxu1 %v13924_v50  ;;  %v3886_v6 = vpop.f32.mrf.mxu0  ;;  %v638_v44 = vld [vmem:[%s16671_s24 + $0x3d8] sm:$0xff]  ;;  %v14020_v49 = vcombine.high %v646_v41, %v650_v43  ;;  %v14019_v56 = vcombine.low %v646_v41, %v650_v43 }
 0x255   : > { %4181 = vmatpush1.bf16.msra.mxu0 %v14059_v14  ;;  %v642_v47 = vld [vmem:[%s16671_s24 + $0x3f8] sm:$0xff] }
 0x256   : > { %v3887_v60 = vpop.f32.mrf.mxu0  ;;  %4182 = vmatprep.subr.bf16.mxu0 %v14052_v62  ;;  %v14012_v50 = vcombine.high %v638_v44, %v642_v47  ;;  %v630_v53 = vld [vmem:[%s16671_s24 + $0x398] sm:$0xff]  ;;  %v14011_v57 = vcombine.low %v638_v44, %v642_v47 }
 0x257   : > { %4142 = vmatpush1.bf16.msra.mxu1 %v13923_v61  ;;  %v14004_v14 = vcombine.high %v630_v53, %v634_v55  ;;  %v758_v59 = vld [vmem:[%s16671_s24 + $0x798] sm:$0xff]  ;;  %v14003_v4 = vcombine.low %v630_v53, %v634_v55 }
 0x258   : > { %4143 = vmatprep.subr.bf16.mxu1 %v13916_v2  ;;  %v762_v61 = vld [vmem:[%s16671_s24 + $0x7b8] sm:$0xff]  ;;  %v14139_v2 = vcombine.low %v766_v51, %v770_v52 }
 0x259   : > { %4183 = vmatpush1.bf16.msra.mxu0 %v14051_v9  ;;  %v622_v62 = vld [vmem:[%s16671_s24 + $0x358] sm:$0xff]  ;;  %v14132_v5 = vcombine.high %v758_v59, %v762_v61 }
 0x25a   : > { %4184 = vmatprep.subr.bf16.mxu0 %v14044_v15  ;;  %v626_v63 = vld [vmem:[%s16671_s24 + $0x378] sm:$0xff] }
 0x25b   : > { %4144 = vmatpush1.bf16.msra.mxu1 %v13915_v12  ;;  %v13996_v6 = vcombine.high %v622_v62, %v626_v63  ;;  %v614_v9 = vld [vmem:[%s16671_s24 + $0x318] sm:$0xff]  ;;  %v14131_v12 = vcombine.low %v758_v59, %v762_v61  ;;  %v13995_v15 = vcombine.low %v622_v62, %v626_v63 }
 0x25c   : > { %4145 = vmatprep.subr.bf16.mxu1 %v13908_v16  ;;  %v618_v60 = vld [vmem:[%s16671_s24 + $0x338] sm:$0xff]  ;;  %v14124_v16 = vcombine.high %v750_v8, %v754_v7 }
 0x25d   : > { %4185 = vmatpush1.bf16.msra.mxu0 %v14043_v22  ;;  %v13988_v18 = vcombine.high %v614_v9, %v618_v60  ;;  %v742_v19 = vld [vmem:[%s16671_s24 + $0x718] sm:$0xff] }
 0x25e   : > { %4186 = vmatprep.subr.bf16.mxu0 %v14036_v25  ;;  %v746_v20 = vld [vmem:[%s16671_s24 + $0x738] sm:$0xff]  ;;  %v13987_v25 = vcombine.low %v614_v9, %v618_v60 }
 0x25f   : > { %4146 = vmatpush1.bf16.msra.mxu1 %v13907_v23  ;;  %v606_v21 = vld [vmem:[%s16671_s24 + $0x2d8] sm:$0xff]  ;;  %v14123_v23 = vcombine.low %v750_v8, %v754_v7 }
 0x260   : > { %4147 = vmatprep.subr.bf16.mxu1 %v13900_v26  ;;  %v610_v22 = vld [vmem:[%s16671_s24 + $0x2f8] sm:$0xff]  ;;  %v14116_v26 = vcombine.high %v742_v19, %v746_v20 }
 0x261   : > { %4187 = vmatpush1.bf16.msra.mxu0 %v14035_v33  ;;  %v13980_v28 = vcombine.high %v606_v21, %v610_v22  ;;  %v734_v29 = vld [vmem:[%s16671_s24 + $0x6d8] sm:$0xff] }
 0x262   : > { %4188 = vmatprep.subr.bf16.mxu0 %v14028_v36  ;;  %v738_v31 = vld [vmem:[%s16671_s24 + $0x6f8] sm:$0xff]  ;;  %v13979_v36 = vcombine.low %v606_v21, %v610_v22 }
 0x263   : > { %4148 = vmatpush1.bf16.msra.mxu1 %v13899_v34  ;;  %v598_v32 = vld [vmem:[%s16671_s24 + $0x298] sm:$0xff]  ;;  %v14115_v34 = vcombine.low %v742_v19, %v746_v20 }
 0x264   : > { %4149 = vmatprep.subr.bf16.mxu1 %v13892_v37  ;;  %v602_v33 = vld [vmem:[%s16671_s24 + $0x2b8] sm:$0xff]  ;;  %v14108_v37 = vcombine.high %v734_v29, %v738_v31 }
 0x265   : > { %4189 = vmatpush1.bf16.msra.mxu0 %v14027_v48  ;;  %v13972_v41 = vcombine.high %v598_v32, %v602_v33  ;;  %v726_v43 = vld [vmem:[%s16671_s24 + $0x698] sm:$0xff] }
 0x266   : > { %4190 = vmatprep.subr.bf16.mxu0 %v14020_v49  ;;  %v730_v44 = vld [vmem:[%s16671_s24 + $0x6b8] sm:$0xff]  ;;  %v13971_v49 = vcombine.low %v598_v32, %v602_v33 }
 0x267   : > { %4150 = vmatpush1.bf16.msra.mxu1 %v13891_v10  ;;  %v590_v47 = vld [vmem:[%s16671_s24 + $0x258] sm:$0xff]  ;;  %v14107_v10 = vcombine.low %v734_v29, %v738_v31 }
 0x268   : > { %4151 = vmatprep.subr.bf16.mxu1 %v14012_v50  ;;  %v594_v48 = vld [vmem:[%s16671_s24 + $0x278] sm:$0xff]  ;;  %v14100_v50 = vcombine.high %v726_v43, %v730_v44 }
 0x269   : > { %4191 = vmatpush1.bf16.msra.mxu0 %v14019_v56  ;;  %v13964_v51 = vcombine.high %v590_v47, %v594_v48  ;;  %v718_v52 = vld [vmem:[%s16671_s24 + $0x658] sm:$0xff] }
 0x26a   : > { %4192 = vmatprep.subr.bf16.mxu0 %v14140_v42  ;;  %v722_v53 = vld [vmem:[%s16671_s24 + $0x678] sm:$0xff]  ;;  %v13963_v42 = vcombine.low %v590_v47, %v594_v48 }
 0x26b   : > { %4152 = vmatpush2.bf16.msra.mxu1 %v14011_v57  ;;  %v582_v55 = vld [vmem:[%s16671_s24 + $0x218] sm:$0xff]  ;;  %v14099_v57 = vcombine.low %v726_v43, %v730_v44 }
 0x26c   : > { %4153 = vmatprep.subr.bf16.mxu1 %v14004_v14  ;;  %v586_v56 = vld [vmem:[%s16671_s24 + $0x238] sm:$0xff]  ;;  %v14092_v14 = vcombine.high %v718_v52, %v722_v53 }
 0x26d   : > { %4193 = vmatpush2.bf16.msra.mxu0 %v14139_v2  ;;  %v13956_v59 = vcombine.high %v582_v55, %v586_v56  ;;  %v710_v61 = vld [vmem:[%s16671_s24 + $0x618] sm:$0xff] }
 0x26e   : > { %4194 = vmatprep.subr.bf16.mxu0 %v14132_v5  ;;  %v714_v62 = vld [vmem:[%s16671_s24 + $0x638] sm:$0xff]  ;;  %v13955_v5 = vcombine.low %v582_v55, %v586_v56 }
 0x26f   : > { %4154 = vmatpush2.bf16.msra.mxu1 %v14003_v4  ;;  %v830_v63 = vld [vmem:[%s16671_s24 + $0x9d8] sm:$0xff]  ;;  %v14091_v4 = vcombine.low %v718_v52, %v722_v53 }
 0x270   : > { %4155 = vmatprep.subr.bf16.mxu1 %v13996_v6  ;;  %v834_v2 = vld [vmem:[%s16671_s24 + $0x9f8] sm:$0xff]  ;;  %v14084_v6 = vcombine.high %v710_v61, %v714_v62 }
 0x271   : > { %4195 = vmatpush2.bf16.msra.mxu0 %v14131_v12  ;;  %v14204_v8 = vcombine.high %v830_v63, %v834_v2  ;;  %v958_v7 = vld [vmem:[%s16671_s24 + $0xdd8] sm:$0xff] }
 0x272   : > { %4196 = vmatprep.subr.bf16.mxu0 %v14124_v16  ;;  %v962_v9 = vld [vmem:[%s16671_s24 + $0xdf8] sm:$0xff]  ;;  %v14203_v16 = vcombine.low %v830_v63, %v834_v2 }
 0x273   : > { %4156 = vmatpush2.bf16.msra.mxu1 %v13995_v15  ;;  %v822_v60 = vld [vmem:[%s16671_s24 + $0x998] sm:$0xff]  ;;  %v14083_v15 = vcombine.low %v710_v61, %v714_v62 }
 0x274   : > { %4157 = vmatprep.subr.bf16.mxu1 %v13988_v18  ;;  %v826_v12 = vld [vmem:[%s16671_s24 + $0x9b8] sm:$0xff]  ;;  %v14332_v18 = vcombine.high %v958_v7, %v962_v9 }
 0x275   : > { %4197 = vmatpush2.bf16.msra.mxu0 %v14123_v23  ;;  %v14196_v19 = vcombine.high %v822_v60, %v826_v12  ;;  %v950_v20 = vld [vmem:[%s16671_s24 + $0xd98] sm:$0xff] }
 0x276   : > { %4198 = vmatprep.subr.bf16.mxu0 %v14116_v26  ;;  %v954_v21 = vld [vmem:[%s16671_s24 + $0xdb8] sm:$0xff]  ;;  %v14195_v26 = vcombine.low %v822_v60, %v826_v12 }
 0x277   : > { %4158 = vmatpush2.bf16.msra.mxu1 %v13987_v25  ;;  %v814_v22 = vld [vmem:[%s16671_s24 + $0x958] sm:$0xff]  ;;  %v14331_v25 = vcombine.low %v958_v7, %v962_v9 }
 0x278   : > { %4159 = vmatprep.subr.bf16.mxu1 %v13980_v28  ;;  %v818_v23 = vld [vmem:[%s16671_s24 + $0x978] sm:$0xff]  ;;  %v14324_v28 = vcombine.high %v950_v20, %v954_v21 }
 0x279   : > { %4199 = vmatpush2.bf16.msra.mxu0 %v14115_v34  ;;  %v14188_v29 = vcombine.high %v814_v22, %v818_v23  ;;  %v942_v31 = vld [vmem:[%s16671_s24 + $0xd58] sm:$0xff] }
 0x27a   : > { %4200 = vmatprep.subr.bf16.mxu0 %v14108_v37  ;;  %v946_v32 = vld [vmem:[%s16671_s24 + $0xd78] sm:$0xff]  ;;  %v14323_v37 = vcombine.low %v950_v20, %v954_v21 }
 0x27b   : > { %4160 = vmatpush2.bf16.msra.mxu1 %v13979_v36  ;;  %v806_v34 = vld [vmem:[%s16671_s24 + $0x918] sm:$0xff]  ;;  %v14315_v52 = vcombine.low %v942_v31, %v946_v32 }
 0x27c   : > { %4161 = vmatprep.subr.bf16.mxu1 %v13972_v41  ;;  %v810_v36 = vld [vmem:[%s16671_s24 + $0x938] sm:$0xff] }
 0x27d   : > { %4201 = vmatpush2.bf16.msra.mxu0 %v14107_v10  ;;  %v14180_v47 = vcombine.high %v806_v34, %v810_v36  ;;  %v934_v48 = vld [vmem:[%s16671_s24 + $0xd18] sm:$0xff]  ;;  %v14179_v55 = vcombine.low %v806_v34, %v810_v36 }
 0x27e   : > { %4202 = vmatprep.subr.bf16.mxu0 %v14100_v50  ;;  %v938_v10 = vld [vmem:[%s16671_s24 + $0xd38] sm:$0xff] }
 0x27f   : > { %4162 = vmatpush2.bf16.msra.mxu1 %v13971_v49  ;;  %v14308_v56 = vcombine.high %v934_v48, %v938_v10  ;;  %v790_v61 = vld [vmem:[%s16671_s24 + $0x898] sm:$0xff]  ;;  %v14307_v63 = vcombine.low %v934_v48, %v938_v10 }
 0x280   : > { %4163 = vmatprep.subr.bf16.mxu1 %v13964_v51  ;;  %v794_v62 = vld [vmem:[%s16671_s24 + $0x8b8] sm:$0xff] }
 0x281   : > { %4203 = vmatpush2.bf16.msra.mxu0 %v14099_v57  ;;  %v782_v7 = vld [vmem:[%s16671_s24 + $0x858] sm:$0xff]  ;;  %v14163_v12 = vcombine.low %v790_v61, %v794_v62 }
 0x282   : > { %4204 = vmatprep.subr.bf16.mxu0 %v14092_v14  ;;  %v926_v14 = vld [vmem:[%s16671_s24 + $0xcd8] sm:$0xff] }
 0x283   : > { %4164 = vmatpush2.bf16.msra.mxu1 %v13963_v42  ;;  %v786_v9 = vld [vmem:[%s16671_s24 + $0x878] sm:$0xff] }
 0x284   : > { %4165 = vmatprep.subr.bf16.mxu1 %v13956_v59  ;;  %v930_v59 = vld [vmem:[%s16671_s24 + $0xcf8] sm:$0xff] }
 0x285   : > { %4205 = vmatpush2.bf16.msra.mxu0 %v14091_v4  ;;  %v14300_v4 = vcombine.high %v926_v14, %v930_v59  ;;  %v14299_v60 = vcombine.low %v926_v14, %v930_v59  ;;  %v774_v20 = vld [vmem:[%s16671_s24 + $0x818] sm:$0xff] }
 0x286   : > { %4206 = vmatprep.subr.bf16.mxu0 %v14084_v6  ;;  %v918_v6 = vld [vmem:[%s16671_s24 + $0xc98] sm:$0xff] }
 0x287   : > { %4166 = vmatpush2.bf16.msra.mxu1 %v13955_v5  ;;  %v14164_v5 = vcombine.high %v790_v61, %v794_v62  ;;  %v778_v21 = vld [vmem:[%s16671_s24 + $0x838] sm:$0xff] }
 0x288   : > { %4217 = vmatprep.subr.bf16.mxu1 %v14204_v8  ;;  %v922_v8 = vld [vmem:[%s16671_s24 + $0xcb8] sm:$0xff]  ;;  %v14147_v34 = vcombine.low %v774_v20, %v778_v21 }
 0x289   : > { %4207 = vmatpush2.bf16.msra.mxu0 %v14083_v15  ;;  %v14292_v15 = vcombine.high %v918_v6, %v922_v8  ;;  %v1002_v14 = vld [vmem:[%s16671_s24 + $0xf38] sm:$0xff] }
 0x28a   : > { %4168 = vmatmul.mubr.bf16.vlgmr.msra.gmra.mxu1 %v16799_v24  ;;  %4258 = vmatprep.subr.bf16.mxu0 %v14332_v18  ;;  %v910_v18 = vld [vmem:[%s16671_s24 + $0xc58] sm:$0xff] }
 0x28b   : > { %4218 = vmatpush1.bf16.msra.mxu1 %v14203_v16  ;;  %4249 = vmatprep.mubr.bf16.mxu1 %v16804_v30  ;;  %v14187_v30 = vcombine.low %v814_v22, %v818_v23  ;;  %v14156_v16 = vcombine.high %v782_v7, %v786_v9  ;;  %v14291_v22 = vcombine.low %v918_v6, %v922_v8  ;;  %v870_v59 = vld [vmem:[%s16671_s24 + $0xb18] sm:$0xff] }
 0x28c   : > { %4219 = vmatprep.subr.bf16.mxu1 %v14196_v19  ;;  %v3964_v33 = vpop.f32.mrf.mxu0  ;;  %4209 = vmatmul.mubr.bf16.vlgmr.msra.gmra.mxu0 %v16810_v0  ;;  %v14316_v0 = vcombine.high %v942_v31, %v946_v32  ;;  %v914_v19 = vld [vmem:[%s16671_s24 + $0xc78] sm:$0xff]  ;;  %v14155_v23 = vcombine.low %v782_v7, %v786_v9 }
 0x28d   : > { %4259 = vmatpush1.bf16.msra.mxu0 %v14331_v25  ;;  %14396 = vmatprep.mubr.msk.bf16.mxu0 %vm3614_vm0, %v16816_v40  ;;  %v798_v40 = vld [vmem:[%s16671_s24 + $0x8d8] sm:$0xff]  ;;  %v14284_v25 = vcombine.high %v910_v18, %v914_v19 }
 0x28e   : > { %v3923_v24 = vpop.f32.mrf.mxu1  ;;  %v17281_v43 = vpop.f32.mrf.mxu0  ;;  %4260 = vmatprep.subr.bf16.mxu0 %v14324_v28  ;;  %v902_v28 = vld [vmem:[%s16671_s24 + $0xc18] sm:$0xff] }
 0x28f   : > { %v3924_v41 = vadd.f32 %v3923_v24, %v17211_v58  ;;  %4220 = vmatpush1.bf16.msra.mxu1 %v14195_v26  ;;  %v802_v58 = vld [vmem:[%s16671_s24 + $0x8f8] sm:$0xff]  ;;  %v14148_v26 = vcombine.high %v774_v20, %v778_v21 }
 0x290   : > { %v17283_v44 = vpop.f32.mrf.mxu1  ;;  %4221 = vmatprep.subr.bf16.mxu1 %v14188_v29  ;;  %v3968_v50 = vpop.f32.mrf.mxu0  ;;  %v14172_v42 = vcombine.high %v798_v40, %v802_v58  ;;  %v14171_v2 = vcombine.low %v798_v40, %v802_v58  ;;  %v906_v29 = vld [vmem:[%s16671_s24 + $0xc38] sm:$0xff] }
 0x291   : > { %v17287_v49 = vadd.f32 %v3964_v33, %v3924_v41  ;;  %4261 = vmatpush1.bf16.msra.mxu0 %v14323_v37  ;;  %v894_v31 = vld [vmem:[%s16671_s24 + $0xbd8] sm:$0xff]  ;;  %v14283_v33 = vcombine.low %v910_v18, %v914_v19  ;;  %v14276_v36 = vcombine.high %v902_v28, %v906_v29 }
 0x292   : > { %v3927_v51 = vpop.f32.mrf.mxu1  ;;  %v3969_v53 = vpop.f32.mrf.mxu0  ;;  %4262 = vmatprep.subr.bf16.mxu0 %v14316_v0  ;;  %v898_v32 = vld [vmem:[%s16671_s24 + $0xbf8] sm:$0xff]  ;;  %v14275_v0 = vcombine.low %v902_v28, %v906_v29 }
 0x293   : > { %4222 = vmatpush1.bf16.msra.mxu1 %v14187_v30  ;;  %v14268_v24 = vcombine.high %v894_v31, %v898_v32  ;;  %v1014_v37 = vld [vmem:[%s16671_s24 + $0xf98] sm:$0xff] }
 0x294   : > { %v3928_v57 = vpop.f32.mrf.mxu1  ;;  %4223 = vmatprep.subr.bf16.mxu1 %v14180_v47  ;;  %v886_v41 = vld [vmem:[%s16671_s24 + $0xb98] sm:$0xff]  ;;  %v14267_v47 = vcombine.low %v894_v31, %v898_v32  ;;  %v14388_v48 = vcombine.high %v1014_v37, %v1014_v37  ;;  %v14387_v10 = vcombine.low %v1014_v37, %v1014_v37 }
 0x295   : > { %4263 = vmatpush1.bf16.msra.mxu0 %v14315_v52  ;;  %v890_v30 = vld [vmem:[%s16671_s24 + $0xbb8] sm:$0xff] }
 0x296   : > { %4264 = vmatprep.subr.bf16.mxu0 %v14308_v56  ;;  %v14260_v50 = vcombine.high %v886_v41, %v890_v30  ;;  %v1006_v40 = vld [vmem:[%s16671_s24 + $0xf58] sm:$0xff]  ;;  %v14259_v53 = vcombine.low %v886_v41, %v890_v30 }
 0x297   : > { %4224 = vmatpush1.bf16.msra.mxu1 %v14179_v55  ;;  %v1010_v58 = vld [vmem:[%s16671_s24 + $0xf78] sm:$0xff]  ;;  %v3638_v55 = vsel %vm3618_vm1, %v14387_v10, 0 }
 0x298   : > { %4225 = vmatprep.subr.bf16.mxu1 %v14172_v42  ;;  %v878_v51 = vld [vmem:[%s16671_s24 + $0xb58] sm:$0xff]  ;;  %v14380_v56 = vcombine.high %v1006_v40, %v1010_v58  ;;  %v14379_v62 = vcombine.low %v1006_v40, %v1010_v58  ;;  %v4429_v40 = vld [vmem:[%s16679_s26 + $0x3c0] sm:$0xff] }
 0x299   : > { %4265 = vmatpush1.bf16.msra.mxu0 %v14307_v63  ;;  %v882_v52 = vld [vmem:[%s16671_s24 + $0xb78] sm:$0xff]  ;;  %v4677_v58 = vld [vmem:[%s16679_s26 + $0xb80] sm:$0xff] }
 0x29a   : > { %4266 = vmatprep.subr.bf16.mxu0 %v14300_v4  ;;  %v14252_v57 = vcombine.high %v878_v51, %v882_v52  ;;  %v998_v42 = vld [vmem:[%s16671_s24 + $0xf18] sm:$0xff]  ;;  %v14251_v63 = vcombine.low %v878_v51, %v882_v52  ;;  %v4685_v51 = vld [vmem:[%s16679_s26 + $0xbc0] sm:$0xff]  ;;  %v3926_v52 = vadd.f32 %v17283_v44, %v17213_v1  ;;  %v17346_v1 = vsub.s32 4, %v16722_v45 }
 0x29b   : > { %4226 = vmatpush1.bf16.msra.mxu1 %v14171_v2  ;;  %v874_v61 = vld [vmem:[%s16671_s24 + $0xb38] sm:$0xff]  ;;  %v14372_v2 = vcombine.high %v998_v42, %v1002_v14  ;;  %v14371_v9 = vcombine.low %v998_v42, %v1002_v14  ;;  %v4405_v42 = vld [vmem:[%s16679_s26 + $0x300] sm:$0xff] }
 0x29c   : > { %4227 = vmatprep.subr.bf16.mxu1 %v14164_v5  ;;  %v14244_v4 = vcombine.high %v870_v59, %v874_v61  ;;  %v990_v5 = vld [vmem:[%s16671_s24 + $0xed8] sm:$0xff]  ;;  %v4413_v14 = vld [vmem:[%s16679_s26 + $0x340] sm:$0xff] }
 0x29d   : > { %4267 = vmatpush1.bf16.msra.mxu0 %v14299_v60  ;;  %v994_v6 = vld [vmem:[%s16671_s24 + $0xef8] sm:$0xff]  ;;  %v14243_v60 = vcombine.low %v870_v59, %v874_v61  ;;  %v3967_v59 = vadd.f32 %v17281_v43, %v3926_v52  ;;  %v4661_v44 = vld [vmem:[%s16679_s26 + $0xb00] sm:$0xff]  ;;  %v17354_v43 = vpack.c.bf16 %v17134_v13, %v17134_v13 }
 0x29e   : > { %4268 = vmatprep.subr.bf16.mxu0 %v14292_v15  ;;  %v862_v8 = vld [vmem:[%s16671_s24 + $0xad8] sm:$0xff]  ;;  %v14363_v21 = vcombine.low %v990_v5, %v994_v6  ;;  %v4597_v52 = vld [vmem:[%s16679_s26 + $0x900] sm:$0xff] }
 0x29f   : > { %4228 = vmatpush1.bf16.msra.mxu1 %v14163_v12  ;;  %v866_v7 = vld [vmem:[%s16671_s24 + $0xaf8] sm:$0xff]  ;;  %v14364_v12 = vcombine.high %v990_v5, %v994_v6  ;;  %v4397_v5 = vld [vmem:[%s16679_s26 + $0x2c0] sm:$0xff] }
 0x2a0   : > { %4229 = vmatprep.subr.bf16.mxu1 %v14156_v16  ;;  %v14236_v15 = vcombine.high %v862_v8, %v866_v7  ;;  %v982_v16 = vld [vmem:[%s16671_s24 + $0xe98] sm:$0xff] }
 0x2a1   : > { %4269 = vmatpush1.bf16.msra.mxu0 %v14291_v22  ;;  %v986_v18 = vld [vmem:[%s16671_s24 + $0xeb8] sm:$0xff]  ;;  %v14235_v22 = vcombine.low %v862_v8, %v866_v7  ;;  %v4645_v8 = vld [vmem:[%s16679_s26 + $0xa80] sm:$0xff] }
 0x2a2   : > { %4270 = vmatprep.subr.bf16.mxu0 %v14284_v25  ;;  %v854_v19 = vld [vmem:[%s16671_s24 + $0xa98] sm:$0xff]  ;;  %v14355_v32 = vcombine.low %v982_v16, %v986_v18  ;;  %v4653_v7 = vld [vmem:[%s16679_s26 + $0xac0] sm:$0xff] }
 0x2a3   : > { %4230 = vmatpush1.bf16.msra.mxu1 %v14155_v23  ;;  %v858_v20 = vld [vmem:[%s16671_s24 + $0xab8] sm:$0xff]  ;;  %v14356_v23 = vcombine.high %v982_v16, %v986_v18  ;;  %v14734_v16 = vcombine.high %v4645_v8, %v4653_v7  ;;  %v4373_v18 = vld [vmem:[%s16679_s26 + $0x200] sm:$0xff] }
 0x2a4   : > { %4231 = vmatprep.subr.bf16.mxu1 %v14148_v26  ;;  %v14228_v25 = vcombine.high %v854_v19, %v858_v20  ;;  %v974_v26 = vld [vmem:[%s16671_s24 + $0xe58] sm:$0xff] }
 0x2a5   : > { %4271 = vmatpush1.bf16.msra.mxu0 %v14283_v33  ;;  %v978_v28 = vld [vmem:[%s16671_s24 + $0xe78] sm:$0xff]  ;;  %v14227_v33 = vcombine.low %v854_v19, %v858_v20  ;;  %v4629_v20 = vld [vmem:[%s16679_s26 + $0xa00] sm:$0xff] }
 0x2a6   : > { %4272 = vmatprep.subr.bf16.mxu0 %v14276_v36  ;;  %v846_v29 = vld [vmem:[%s16671_s24 + $0xa58] sm:$0xff] }
 0x2a7   : > { %4232 = vmatpush1.bf16.msra.mxu1 %v14147_v34  ;;  %v850_v31 = vld [vmem:[%s16671_s24 + $0xa78] sm:$0xff]  ;;  %v14348_v34 = vcombine.high %v974_v26, %v978_v28 }
 0x2a8   : > { %4233 = vmatprep.subr.bf16.mxu1 %v14268_v24  ;;  %v14220_v36 = vcombine.high %v846_v29, %v850_v31  ;;  %v966_v24 = vld [vmem:[%s16671_s24 + $0xe18] sm:$0xff] }
 0x2a9   : > { %4273 = vmatpush1.bf16.msra.mxu0 %v14275_v0  ;;  %v970_v37 = vld [vmem:[%s16671_s24 + $0xe38] sm:$0xff]  ;;  %v14347_v0 = vcombine.low %v974_v26, %v978_v28  ;;  %v14733_v28 = vcombine.low %v4645_v8, %v4653_v7  ;;  %v4565_v8 = vld [vmem:[%s16679_s26 + $0x800] sm:$0xff] }
 0x2aa   : > { %14395 = vmatprep.subr.msk.bf16.mxu0 %vm3618_vm1, %v14388_v48  ;;  %v838_v41 = vld [vmem:[%s16671_s24 + $0xa18] sm:$0xff]  ;;  %v14340_v48 = vcombine.high %v966_v24, %v970_v37  ;;  %v4573_v7 = vld [vmem:[%s16679_s26 + $0x840] sm:$0xff] }
 0x2ab   : > { %4234 = vmatpush2.bf16.msra.mxu1 %v14267_v47  ;;  %v842_v30 = vld [vmem:[%s16671_s24 + $0xa38] sm:$0xff]  ;;  %v14219_v47 = vcombine.low %v846_v29, %v850_v31 }
 0x2ac   : > { %4235 = vmatprep.subr.bf16.mxu1 %v14260_v50  ;;  %v14212_v10 = vcombine.high %v838_v41, %v842_v30  ;;  %v4421_v50 = vld [vmem:[%s16679_s26 + $0x380] sm:$0xff] }
 0x2ad   : > { %4277 = vmatpush2.bf16.msra.mxu0 %v3638_v55  ;;  %v14211_v55 = vcombine.low %v838_v41, %v842_v30  ;;  %v14509_v61 = vcombine.low %v4421_v50, %v4429_v40  ;;  %v4621_v41 = vld [vmem:[%s16679_s26 + $0x9c0] sm:$0xff] }
 0x2ae   : > { %4278 = vmatprep.subr.bf16.mxu0 %v14380_v56  ;;  %v14510_v56 = vcombine.high %v4421_v50, %v4429_v40 }
 0x2af   : > { %4236 = vmatpush2.bf16.msra.mxu1 %v14259_v53  ;;  %v14339_v53 = vcombine.low %v966_v24, %v970_v37  ;;  %v4613_v37 = vld [vmem:[%s16679_s26 + $0x980] sm:$0xff] }
 0x2b0   : > { %4237 = vmatprep.subr.bf16.mxu1 %v14252_v57  ;;  %v14766_v57 = vcombine.high %v4677_v58, %v4685_v51  ;;  %v14702_v40 = vcombine.high %v4613_v37, %v4621_v41 }
 0x2b1   : > { %4279 = vmatpush2.bf16.msra.mxu0 %v14379_v62  ;;  %v4669_v62 = vld [vmem:[%s16679_s26 + $0xb40] sm:$0xff] }
 0x2b2   : > { %4280 = vmatprep.subr.bf16.mxu0 %v14372_v2  ;;  %v14494_v2 = vcombine.high %v4405_v42, %v4413_v14  ;;  %v14750_v6 = vcombine.high %v4661_v44, %v4669_v62 }
 0x2b3   : > { %4238 = vmatpush2.bf16.msra.mxu1 %v14251_v63  ;;  %v14765_v63 = vcombine.low %v4677_v58, %v4685_v51  ;;  %v4341_v58 = vld [vmem:[%s16679_s26 + $0x100] sm:$0xff] }
 0x2b4   : > { %4239 = vmatprep.subr.bf16.mxu1 %v14244_v4  ;;  %v4389_v4 = vld [vmem:[%s16679_s26 + $0x280] sm:$0xff] }
 0x2b5   : > { %4281 = vmatpush2.bf16.msra.mxu0 %v14371_v9  ;;  %v17359_v9 = vpack.c.bf16 %v3967_v59, %v3967_v59  ;;  %v4349_v51 = vld [vmem:[%s16679_s26 + $0x140] sm:$0xff] }
 0x2b6   : > { %4282 = vmatprep.subr.bf16.mxu0 %v14364_v12  ;;  %v14493_v12 = vcombine.low %v4405_v42, %v4413_v14  ;;  %v4325_v14 = vld [vmem:[%s16679_s26 + $0x80] sm:$0xff] }
 0x2b7   : > { %4240 = vmatpush2.bf16.msra.mxu1 %v14243_v60  ;;  %v17363_v60 = vld [vmem:[%s16677_s13] sm:$0xff]  ;;  %v4333_v59 = vld [vmem:[%s16679_s26 + $0xc0] sm:$0xff] }
 0x2b8   : > { %4241 = vmatprep.subr.bf16.mxu1 %v14236_v15  ;;  %v3593_v13 = vrot.slane %v17363_v60, %v17346_v1  ;;  %v14478_v15 = vcombine.high %v4389_v4, %v4397_v5 }
 0x2b9   : > { %4283 = vmatpush2.bf16.msra.mxu0 %v14363_v21  ;;  %v4637_v21 = vld [vmem:[%s16679_s26 + $0xa40] sm:$0xff] }
 0x2ba   : > { %4284 = vmatprep.subr.bf16.mxu0 %v14356_v23 }
 0x2bb   : > { %4242 = vmatpush2.bf16.msra.mxu1 %v14235_v22 }
 0x2bc   : > { %4243 = vmatprep.subr.bf16.mxu1 %v14228_v25  ;;  %v14477_v25 = vcombine.low %v4389_v4, %v4397_v5  ;;  %v4309_v5 = vld [vmem:[%s16679_s26] sm:$0xff] }
 0x2bd   : > { %4285 = vmatpush2.bf16.msra.mxu0 %v14355_v32 }
 0x2be   : > { %4286 = vmatprep.subr.bf16.mxu0 %v14348_v34  ;;  %v4357_v34 = vld [vmem:[%s16679_s26 + $0x180] sm:$0xff] }
 0x2bf   : > { %4244 = vmatpush2.bf16.msra.mxu1 %v14227_v33  ;;  %v14718_v33 = vcombine.high %v4629_v20, %v4637_v21 }
 0x2c0   : > { %4245 = vmatprep.subr.bf16.mxu1 %v14220_v36  ;;  %v4365_v36 = vld [vmem:[%s16679_s26 + $0x1c0] sm:$0xff] }
 0x2c1   : > { %4287 = vmatpush2.bf16.msra.mxu0 %v14347_v0 }
 0x2c2   : > { %4288 = vmatprep.subr.bf16.mxu0 %v14340_v48  ;;  %v14717_v48 = vcombine.low %v4629_v20, %v4637_v21  ;;  %v14653_v21 = vcombine.low %v4565_v8, %v4573_v7 }
 0x2c3   : > { %4246 = vmatpush2.bf16.msra.mxu1 %v14219_v47 }
 0x2c4   : > { %4247 = vmatprep.subr.bf16.mxu1 %v14212_v10  ;;  %v14446_v10 = vcombine.high %v4357_v34, %v4365_v36 }
 0x2c5   : > { %4289 = vmatpush2.bf16.msra.mxu0 %v14339_v53  ;;  %v4605_v53 = vld [vmem:[%s16679_s26 + $0x940] sm:$0xff] }
 0x2c6   : > { %10453 = vmatprep.subr.bf16.mxu0 %v14510_v56  ;;  %v14701_v56 = vcombine.low %v4613_v37, %v4621_v41  ;;  %v14686_v42 = vcombine.high %v4597_v52, %v4605_v53  ;;  %v4517_v41 = vld [vmem:[%s16679_s26 + $0x680] sm:$0xff] }
 0x2c7   : > { %4248 = vmatpush2.bf16.msra.mxu1 %v14211_v55  ;;  %v14445_v55 = vcombine.low %v4357_v34, %v4365_v36 }
 0x2c8   : > { %10494 = vmatprep.subr.bf16.mxu1 %v14766_v57  ;;  %4291 = vmatmul.mubr.bf16.vlgmr.msra.gmra.mxu0 %v16888_v11  ;;  %v14749_v11 = vcombine.low %v4661_v44, %v4669_v62  ;;  %v14430_v57 = vcombine.high %v4341_v58, %v4349_v51  ;;  %v4589_v44 = vld [vmem:[%s16679_s26 + $0x8c0] sm:$0xff]  ;;  %v14429_v62 = vcombine.low %v4341_v58, %v4349_v51 }
 0x2c9   : > { %10454 = vmatpush1.bf16.msra.mxu0 %v14509_v61  ;;  %10485 = vmatprep.mubr.bf16.mxu0 %v17354_v43  ;;  %v4581_v61 = vld [vmem:[%s16679_s26 + $0x880] sm:$0xff] }
 0x2ca   : > { %4250 = vmatmul.mubr.bf16.vlgmr.msra.gmra.mxu1 %v16880_v39  ;;  %10455 = vmatprep.subr.bf16.mxu0 %v14494_v2  ;;  %v4381_v39 = vld [vmem:[%s16679_s26 + $0x240] sm:$0xff]  ;;  %v14414_v2 = vcombine.high %v4325_v14, %v4333_v59  ;;  %v14670_v4 = vcombine.high %v4581_v61, %v4589_v44 }
 0x2cb   : > { %10495 = vmatpush1.bf16.msra.mxu1 %v14765_v63  ;;  %10526 = vmatprep.mubr.bf16.mxu1 %v17359_v9  ;;  %v14462_v29 = vcombine.high %v4373_v18, %v4381_v39  ;;  %v14461_v0 = vcombine.low %v4373_v18, %v4381_v39  ;;  %v14685_v63 = vcombine.low %v4597_v52, %v4605_v53  ;;  %v4557_v18 = vld [vmem:[%s16679_s26 + $0x7c0] sm:$0xff] }
 0x2cc   : > { %v4005_v19 = vpop.f32.mrf.mxu0  ;;  %10496 = vmatprep.subr.bf16.mxu1 %v14750_v6  ;;  %v4317_v6 = vld [vmem:[%s16679_s26 + $0x40] sm:$0xff] }
 0x2cd   : > { %v4006_v22 = vadd.f32 %v4005_v19, %v3593_v13  ;;  %10456 = vmatpush1.bf16.msra.mxu0 %v14493_v12  ;;  %v14413_v13 = vcombine.low %v4325_v14, %v4333_v59  ;;  %v14669_v12 = vcombine.low %v4581_v61, %v4589_v44  ;;  %v4805_v39 = vld [vmem:[%s16679_s26 + $0xf80] sm:$0xff]  ;;  %v14397_v20 = vcombine.low %v4309_v5, %v4317_v6 }
 0x2ce   : > { %v4046_v23 = vpop.f32.mrf.mxu1  ;;  %v17373_v26 = vpop.f32.mrf.mxu0  ;;  %10457 = vmatprep.subr.bf16.mxu0 %v14478_v15  ;;  %v14654_v15 = vcombine.high %v4565_v8, %v4573_v7  ;;  %v4813_v19 = vld [vmem:[%s16679_s26 + $0xfc0] sm:$0xff] }
 0x2cf   : > { %10497 = vmatpush1.bf16.msra.mxu1 %v14749_v11  ;;  %v17375_v31 = vadd.f32 %v4046_v23, %v4006_v22  ;;  %v14398_v11 = vcombine.high %v4309_v5, %v4317_v6  ;;  %v14894_v23 = vcombine.high %v4805_v39, %v4813_v19  ;;  %v14893_v36 = vcombine.low %v4805_v39, %v4813_v19  ;;  %v4501_v58 = vld [vmem:[%s16679_s26 + $0x600] sm:$0xff] }
 0x2d0   : > { %v17377_v32 = vpop.f32.mrf.mxu1  ;;  %10498 = vmatprep.subr.bf16.mxu1 %v14734_v16  ;;  %v4009_v24 = vpop.f32.mrf.mxu0  ;;  %v4549_v16 = vld [vmem:[%s16679_s26 + $0x780] sm:$0xff] }
 0x2d1   : > { %10458 = vmatpush1.bf16.msra.mxu0 %v14477_v25  ;;  %v14638_v22 = vcombine.high %v4549_v16, %v4557_v18  ;;  %v4533_v25 = vld [vmem:[%s16679_s26 + $0x700] sm:$0xff]  ;;  %v14637_v34 = vcombine.low %v4549_v16, %v4557_v18 }
 0x2d2   : > { %v4050_v30 = vpop.f32.mrf.mxu1  ;;  %v4010_v47 = vpop.f32.mrf.mxu0  ;;  %10459 = vmatprep.subr.bf16.mxu0 %v14462_v29  ;;  %v4789_v29 = vld [vmem:[%s16679_s26 + $0xf00] sm:$0xff] }
 0x2d3   : > { %10499 = vmatpush1.bf16.msra.mxu1 %v14733_v28  ;;  %v4541_v28 = vld [vmem:[%s16679_s26 + $0x740] sm:$0xff] }
 0x2d4   : > { %v4051_v50 = vpop.f32.mrf.mxu1  ;;  %10500 = vmatprep.subr.bf16.mxu1 %v14718_v33  ;;  %v4797_v33 = vld [vmem:[%s16679_s26 + $0xf40] sm:$0xff]  ;;  %v14622_v24 = vcombine.high %v4533_v25, %v4541_v28 }
 0x2d5   : > { %10460 = vmatpush1.bf16.msra.mxu0 %v14461_v0  ;;  %v14878_v37 = vcombine.high %v4789_v29, %v4797_v33  ;;  %v4525_v30 = vld [vmem:[%s16679_s26 + $0x6c0] sm:$0xff] }
 0x2d6   : > { %10461 = vmatprep.subr.bf16.mxu0 %v14446_v10  ;;  %v4773_v0 = vld [vmem:[%s16679_s26 + $0xe80] sm:$0xff]  ;;  %v14877_v10 = vcombine.low %v4789_v29, %v4797_v33  ;;  %v14606_v50 = vcombine.high %v4517_v41, %v4525_v30 }
 0x2d7   : > { %10501 = vmatpush1.bf16.msra.mxu1 %v14717_v48  ;;  %v4781_v47 = vld [vmem:[%s16679_s26 + $0xec0] sm:$0xff]  ;;  %v14621_v48 = vcombine.low %v4533_v25, %v4541_v28 }
 0x2d8   : > { %10502 = vmatprep.subr.bf16.mxu1 %v14702_v40  ;;  %v14862_v40 = vcombine.high %v4773_v0, %v4781_v47  ;;  %v4509_v51 = vld [vmem:[%s16679_s26 + $0x640] sm:$0xff] }
 0x2d9   : > { %10462 = vmatpush1.bf16.msra.mxu0 %v14445_v55  ;;  %v4757_v52 = vld [vmem:[%s16679_s26 + $0xe00] sm:$0xff]  ;;  %v14605_v55 = vcombine.low %v4517_v41, %v4525_v30 }
 0x2da   : > { %10463 = vmatprep.subr.bf16.mxu0 %v14430_v57  ;;  %v4765_v53 = vld [vmem:[%s16679_s26 + $0xe40] sm:$0xff]  ;;  %v14590_v57 = vcombine.high %v4501_v58, %v4509_v51 }
 0x2db   : > { %10503 = vmatpush1.bf16.msra.mxu1 %v14701_v56  ;;  %v14861_v56 = vcombine.low %v4773_v0, %v4781_v47  ;;  %v4485_v14 = vld [vmem:[%s16679_s26 + $0x580] sm:$0xff] }
 0x2dc   : > { %10504 = vmatprep.subr.bf16.mxu1 %v14686_v42  ;;  %v14846_v42 = vcombine.high %v4757_v52, %v4765_v53  ;;  %v4493_v59 = vld [vmem:[%s16679_s26 + $0x5c0] sm:$0xff] }
 0x2dd   : > { %10464 = vmatpush1.bf16.msra.mxu0 %v14429_v62  ;;  %v4741_v61 = vld [vmem:[%s16679_s26 + $0xd80] sm:$0xff]  ;;  %v14589_v62 = vcombine.low %v4501_v58, %v4509_v51 }
 0x2de   : > { %10465 = vmatprep.subr.bf16.mxu0 %v14414_v2  ;;  %v4749_v44 = vld [vmem:[%s16679_s26 + $0xdc0] sm:$0xff]  ;;  %v14574_v2 = vcombine.high %v4485_v14, %v4493_v59 }
 0x2df   : > { %10505 = vmatpush1.bf16.msra.mxu1 %v14685_v63  ;;  %v14845_v63 = vcombine.low %v4757_v52, %v4765_v53  ;;  %v4469_v5 = vld [vmem:[%s16679_s26 + $0x500] sm:$0xff] }
 0x2e0   : > { %10506 = vmatprep.subr.bf16.mxu1 %v14670_v4  ;;  %v14830_v4 = vcombine.high %v4741_v61, %v4749_v44  ;;  %v4477_v6 = vld [vmem:[%s16679_s26 + $0x540] sm:$0xff] }
 0x2e1   : > { %10466 = vmatpush1.bf16.msra.mxu0 %v14413_v13  ;;  %v4725_v8 = vld [vmem:[%s16679_s26 + $0xd00] sm:$0xff]  ;;  %v14573_v13 = vcombine.low %v4485_v14, %v4493_v59 }
 0x2e2   : > { %10467 = vmatprep.subr.bf16.mxu0 %v14398_v11  ;;  %v4733_v7 = vld [vmem:[%s16679_s26 + $0xd40] sm:$0xff]  ;;  %v14558_v11 = vcombine.high %v4469_v5, %v4477_v6 }
 0x2e3   : > { %10507 = vmatpush1.bf16.msra.mxu1 %v14669_v12  ;;  %v14829_v12 = vcombine.low %v4741_v61, %v4749_v44  ;;  %v4453_v16 = vld [vmem:[%s16679_s26 + $0x480] sm:$0xff]  ;;  %v17446_v61 = vpack.c.bf16 %v17287_v49, %v17287_v49 }
 0x2e4   : > { %10508 = vmatprep.subr.bf16.mxu1 %v14654_v15  ;;  %v14814_v15 = vcombine.high %v4725_v8, %v4733_v7  ;;  %v4461_v18 = vld [vmem:[%s16679_s26 + $0x4c0] sm:$0xff] }
 0x2e5   : > { %10468 = vmatpush1.bf16.msra.mxu0 %v14397_v20  ;;  %v4709_v39 = vld [vmem:[%s16679_s26 + $0xc80] sm:$0xff]  ;;  %v14557_v20 = vcombine.low %v4469_v5, %v4477_v6 }
 0x2e6   : > { %10469 = vmatprep.subr.bf16.mxu0 %v14638_v22  ;;  %v4717_v19 = vld [vmem:[%s16679_s26 + $0xcc0] sm:$0xff]  ;;  %v14542_v22 = vcombine.high %v4453_v16, %v4461_v18 }
 0x2e7   : > { %10509 = vmatpush1.bf16.msra.mxu1 %v14653_v21  ;;  %v14813_v21 = vcombine.low %v4725_v8, %v4733_v7  ;;  %v4437_v25 = vld [vmem:[%s16679_s26 + $0x400] sm:$0xff] }
 0x2e8   : > { %10510 = vmatprep.subr.bf16.mxu1 %v14894_v23  ;;  %v14798_v23 = vcombine.high %v4709_v39, %v4717_v19  ;;  %v4445_v28 = vld [vmem:[%s16679_s26 + $0x440] sm:$0xff] }
 0x2e9   : > { %10470 = vmatpush2.bf16.msra.mxu0 %v14637_v34  ;;  %v4693_v29 = vld [vmem:[%s16679_s26 + $0xc00] sm:$0xff]  ;;  %v14541_v34 = vcombine.low %v4453_v16, %v4461_v18 }
 0x2ea   : > { %10471 = vmatprep.subr.bf16.mxu0 %v14622_v24  ;;  %v4701_v33 = vld [vmem:[%s16679_s26 + $0xc40] sm:$0xff]  ;;  %v14526_v24 = vcombine.high %v4437_v25, %v4445_v28 }
 0x2eb   : > { %10511 = vmatpush2.bf16.msra.mxu1 %v14893_v36  ;;  %v14797_v36 = vcombine.low %v4709_v39, %v4717_v19  ;;  %v4933_v41 = vld [vmem:[%s16679_s26 + $0x1380] sm:$0xff] }
 0x2ec   : > { %10512 = vmatprep.subr.bf16.mxu1 %v14878_v37  ;;  %v14782_v37 = vcombine.high %v4693_v29, %v4701_v33  ;;  %v4941_v30 = vld [vmem:[%s16679_s26 + $0x13c0] sm:$0xff] }
 0x2ed   : > { %10472 = vmatpush2.bf16.msra.mxu0 %v14621_v48  ;;  %v5189_v0 = vld [vmem:[%s16679_s26 + $0x1b80] sm:$0xff]  ;;  %v17432_v48 = vsub.s32 5, %v16722_v45 }
 0x2ee   : > { %10473 = vmatprep.subr.bf16.mxu0 %v14606_v50  ;;  %v5197_v47 = vld [vmem:[%s16679_s26 + $0x1bc0] sm:$0xff]  ;;  %v14781_v50 = vcombine.low %v4693_v29, %v4701_v33 }
 0x2ef   : > { %10513 = vmatpush2.bf16.msra.mxu1 %v14877_v10  ;;  %v14525_v10 = vcombine.low %v4437_v25, %v4445_v28  ;;  %v4917_v58 = vld [vmem:[%s16679_s26 + $0x1300] sm:$0xff]  ;;  %v15278_v52 = vcombine.high %v5189_v0, %v5197_v47  ;;  %v15277_v59 = vcombine.low %v5189_v0, %v5197_v47 }
 0x2f0   : > { %10514 = vmatprep.subr.bf16.mxu1 %v14862_v40  ;;  %v15022_v40 = vcombine.high %v4933_v41, %v4941_v30  ;;  %v4925_v51 = vld [vmem:[%s16679_s26 + $0x1340] sm:$0xff] }
 0x2f1   : > { %10474 = vmatpush2.bf16.msra.mxu0 %v14605_v55  ;;  %v5173_v53 = vld [vmem:[%s16679_s26 + $0x1b00] sm:$0xff]  ;;  %v15006_v14 = vcombine.high %v4917_v58, %v4925_v51  ;;  %v15005_v49 = vcombine.low %v4917_v58, %v4925_v51 }
 0x2f2   : > { %10475 = vmatprep.subr.bf16.mxu0 %v14590_v57  ;;  %v5181_v55 = vld [vmem:[%s16679_s26 + $0x1b40] sm:$0xff]  ;;  %v15021_v57 = vcombine.low %v4933_v41, %v4941_v30 }
 0x2f3   : > { %10515 = vmatpush2.bf16.msra.mxu1 %v14861_v56  ;;  %v3597_v56 = vrot.slane %v17363_v60, %v17432_v48  ;;  %v4901_v44 = vld [vmem:[%s16679_s26 + $0x1280] sm:$0xff]  ;;  %v15261_v8 = vcombine.low %v5173_v53, %v5181_v55 }
 0x2f4   : > { %10516 = vmatprep.subr.bf16.mxu1 %v14846_v42  ;;  %v17442_v42 = vpack.c.bf16 %v17127_v3, %v17127_v3  ;;  %v5149_v16 = vld [vmem:[%s16679_s26 + $0x1a40] sm:$0xff] }
 0x2f5   : > { %10476 = vmatpush2.bf16.msra.mxu0 %v14589_v62  ;;  %v4909_v62 = vld [vmem:[%s16679_s26 + $0x12c0] sm:$0xff]  ;;  %v4008_v3 = vadd.f32 %v17373_v26, %v3597_v56 }
 0x2f6   : > { %10477 = vmatprep.subr.bf16.mxu0 %v14574_v2  ;;  %v5157_v2 = vld [vmem:[%s16679_s26 + $0x1a80] sm:$0xff]  ;;  %v14990_v6 = vcombine.high %v4901_v44, %v4909_v62  ;;  %v14989_v19 = vcombine.low %v4901_v44, %v4909_v62 }
 0x2f7   : > { %10517 = vmatpush2.bf16.msra.mxu1 %v14845_v63  ;;  %v15262_v63 = vcombine.high %v5173_v53, %v5181_v55  ;;  %v5141_v26 = vld [vmem:[%s16679_s26 + $0x1a00] sm:$0xff]  ;;  %v4049_v18 = vadd.f32 %v17377_v32, %v4008_v3 }
 0x2f8   : > { %10518 = vmatprep.subr.bf16.mxu1 %v14830_v4  ;;  %v5165_v4 = vld [vmem:[%s16679_s26 + $0x1ac0] sm:$0xff]  ;;  %v15230_v33 = vcombine.high %v5141_v26, %v5149_v16 }
 0x2f9   : > { %10478 = vmatpush2.bf16.msra.mxu0 %v14573_v13  ;;  %v4885_v13 = vld [vmem:[%s16679_s26 + $0x1200] sm:$0xff] }
 0x2fa   : > { %10479 = vmatprep.subr.bf16.mxu0 %v14558_v11  ;;  %v15246_v11 = vcombine.high %v5157_v2, %v5165_v4  ;;  %v4869_v28 = vld [vmem:[%s16679_s26 + $0x1180] sm:$0xff] }
 0x2fb   : > { %10519 = vmatpush2.bf16.msra.mxu1 %v14829_v12  ;;  %v4893_v12 = vld [vmem:[%s16679_s26 + $0x1240] sm:$0xff] }
 0x2fc   : > { %10520 = vmatprep.subr.bf16.mxu1 %v14814_v15  ;;  %v4877_v29 = vld [vmem:[%s16679_s26 + $0x11c0] sm:$0xff]  ;;  %v14973_v30 = vcombine.low %v4885_v13, %v4893_v12 }
 0x2fd   : > { %10480 = vmatpush2.bf16.msra.mxu0 %v14557_v20  ;;  %v14958_v47 = vcombine.high %v4869_v28, %v4877_v29  ;;  %v4853_v58 = vld [vmem:[%s16679_s26 + $0x1100] sm:$0xff]  ;;  %v14957_v56 = vcombine.low %v4869_v28, %v4877_v29 }
 0x2fe   : > { %10481 = vmatprep.subr.bf16.mxu0 %v14542_v22  ;;  %v15245_v22 = vcombine.low %v5157_v2, %v5165_v4  ;;  %v4861_v51 = vld [vmem:[%s16679_s26 + $0x1140] sm:$0xff] }
 0x2ff   : > { %10521 = vmatpush2.bf16.msra.mxu1 %v14813_v21  ;;  %v14974_v21 = vcombine.high %v4885_v13, %v4893_v12  ;;  %v5109_v53 = vld [vmem:[%s16679_s26 + $0x1900] sm:$0xff]  ;;  %v14941_v4 = vcombine.low %v4853_v58, %v4861_v51 }
 0x300   : > { %10522 = vmatprep.subr.bf16.mxu1 %v14798_v23  ;;  %v5117_v55 = vld [vmem:[%s16679_s26 + $0x1940] sm:$0xff] }
 0x301   : > { %10482 = vmatpush2.bf16.msra.mxu0 %v14541_v34  ;;  %v5125_v34 = vld [vmem:[%s16679_s26 + $0x1980] sm:$0xff]  ;;  %v15198_v62 = vcombine.high %v5109_v53, %v5117_v55 }
 0x302   : > { %10483 = vmatprep.subr.bf16.mxu0 %v14526_v24  ;;  %v17469_v24 = vld [vmem:[%s16679_s26 + $0xb88] sm:$0xff]  ;;  %v4845_v44 = vld [vmem:[%s16679_s26 + $0x10c0] sm:$0xff] }
 0x303   : > { %10523 = vmatpush2.bf16.msra.mxu1 %v14797_v36  ;;  %v5133_v36 = vld [vmem:[%s16679_s26 + $0x19c0] sm:$0xff] }
 0x304   : > { %10524 = vmatprep.subr.bf16.mxu1 %v14782_v37  ;;  %v17472_v37 = vld [vmem:[%s16679_s26 + $0xbc8] sm:$0xff]  ;;  %v5101_v2 = vld [vmem:[%s16679_s26 + $0x18c0] sm:$0xff] }
 0x305   : > { %10484 = vmatpush2.bf16.msra.mxu0 %v14525_v10  ;;  %v15229_v10 = vcombine.low %v5141_v26, %v5149_v16  ;;  %v5077_v13 = vld [vmem:[%s16679_s26 + $0x1800] sm:$0xff] }
 0x306   : > { %10535 = vmatprep.subr.bf16.mxu0 %v15022_v40  ;;  %v5085_v12 = vld [vmem:[%s16679_s26 + $0x1840] sm:$0xff] }
 0x307   : > { %10525 = vmatpush2.bf16.msra.mxu1 %v14781_v50  ;;  %v14767_v50 = vcombine.low %v17469_v24, %v17472_v37  ;;  %v5045_v28 = vld [vmem:[%s16679_s26 + $0x1700] sm:$0xff] }
 0x308   : > { %10576 = vmatprep.subr.bf16.mxu1 %v15278_v52  ;;  %10486 = vmatmul.mubr.bf16.vlgmr.msra.gmra.mxu0 %v17442_v42  ;;  %v15214_v52 = vcombine.high %v5125_v34, %v5133_v36  ;;  %v5053_v29 = vld [vmem:[%s16679_s26 + $0x1740] sm:$0xff] }
 0x309   : > { %10536 = vmatpush1.bf16.msra.mxu0 %v15021_v57  ;;  %v14942_v57 = vcombine.high %v4853_v58, %v4861_v51  ;;  %v5285_v58 = vld [vmem:[%s16679_s26 + $0x1e80] sm:$0xff] }
 0x30a   : > { %v17454_v5 = vpop.f32.mrf.mxu1  ;;  %10527 = vmatmul.mubr.bf16.vlgmr.msra.gmra.mxu1 %v17446_v61  ;;  %10537 = vmatprep.subr.bf16.mxu0 %v15006_v14  ;;  %v15213_v14 = vcombine.low %v5125_v34, %v5133_v36  ;;  %v5301_v34 = vld [vmem:[%s16679_s26 + $0x1f00] sm:$0xff] }
 0x30b   : > { %10577 = vmatpush1.bf16.msra.mxu1 %v15277_v59  ;;  %v4837_v59 = vld [vmem:[%s16679_s26 + $0x1080] sm:$0xff] }
 0x30c   : > { %v4130_v7 = vpop.f32.mrf.mxu1  ;;  %10578 = vmatprep.subr.bf16.mxu1 %v15262_v63  ;;  %v17459_v15 = vpop.f32.mrf.mxu0  ;;  %v5093_v63 = vld [vmem:[%s16679_s26 + $0x1880] sm:$0xff]  ;;  %v14926_v3 = vcombine.high %v4837_v59, %v4845_v44 }
 0x30d   : > { %10538 = vmatpush1.bf16.msra.mxu0 %v15005_v49  ;;  %v15197_v49 = vcombine.low %v5109_v53, %v5117_v55  ;;  %v15181_v16 = vcombine.low %v5093_v63, %v5101_v2  ;;  %v5293_v51 = vld [vmem:[%s16679_s26 + $0x1ec0] sm:$0xff] }
 0x30e   : > { %v4132_v39 = vpop.f32.mrf.mxu1  ;;  %v4089_v20 = vpop.f32.mrf.mxu0  ;;  %10539 = vmatprep.subr.bf16.mxu0 %v14990_v6  ;;  %v4821_v6 = vld [vmem:[%s16679_s26 + $0x1000] sm:$0xff] }
 0x30f   : > { %10579 = vmatpush1.bf16.msra.mxu1 %v15261_v8  ;;  %v4090_v23 = vadd.f32 %v4089_v20, %v4049_v18  ;;  %v4829_v8 = vld [vmem:[%s16679_s26 + $0x1040] sm:$0xff] }
 0x310   : > { %v4133_v25 = vpop.f32.mrf.mxu1  ;;  %10580 = vmatprep.subr.bf16.mxu1 %v15246_v11  ;;  %v4091_v32 = vpop.f32.mrf.mxu0  ;;  %v14925_v11 = vcombine.low %v4837_v59, %v4845_v44  ;;  %v14910_v26 = vcombine.high %v4821_v6, %v4829_v8  ;;  %v5061_v18 = vld [vmem:[%s16679_s26 + $0x1780] sm:$0xff] }
 0x311   : > { %v4131_v41 = vadd.f32 %v4130_v7, %v4090_v23  ;;  %10540 = vmatpush1.bf16.msra.mxu0 %v14989_v19  ;;  %v15182_v7 = vcombine.high %v5093_v63, %v5101_v2  ;;  %v5069_v39 = vld [vmem:[%s16679_s26 + $0x17c0] sm:$0xff]  ;;  %v15166_v19 = vcombine.high %v5077_v13, %v5085_v12  ;;  %v15165_v25 = vcombine.low %v5077_v13, %v5085_v12 }
 0x312   : > { %v4092_v0 = vpop.f32.mrf.mxu0  ;;  %10541 = vmatprep.subr.bf16.mxu0 %v14974_v21  ;;  %v5317_v20 = vld [vmem:[%s16679_s26 + $0x1f80] sm:$0xff]  ;;  %v15150_v23 = vcombine.high %v5061_v18, %v5069_v39  ;;  %v15149_v36 = vcombine.low %v5061_v18, %v5069_v39  ;;  %v15373_v2 = vcombine.low %v5285_v58, %v5293_v51 }
 0x313   : > { %10581 = vmatpush1.bf16.msra.mxu1 %v15245_v22  ;;  %v17476_v40 = vpack.c.bf16 %v4131_v41, %v4131_v41  ;;  %v5325_v21 = vld [vmem:[%s16679_s26 + $0x1fc0] sm:$0xff]  ;;  %v14909_v22 = vcombine.low %v4821_v6, %v4829_v8  ;;  %v15134_v41 = vcombine.high %v5045_v28, %v5053_v29 }
 0x314   : > { %10582 = vmatprep.subr.bf16.mxu1 %v15230_v33  ;;  %v15406_v33 = vcombine.high %v5317_v20, %v5325_v21  ;;  %v5309_v32 = vld [vmem:[%s16679_s26 + $0x1f40] sm:$0xff] }
 0x315   : > { %10542 = vmatpush1.bf16.msra.mxu0 %v14973_v30  ;;  %10567 = vmatprep.mubr.bf16.mxu0 %v17476_v40  ;;  %v15405_v30 = vcombine.low %v5317_v20, %v5325_v21  ;;  %v5029_v0 = vld [vmem:[%s16679_s26 + $0x1680] sm:$0xff]  ;;  %v15389_v55 = vcombine.low %v5301_v34, %v5309_v32 }
 0x316   : > { %10543 = vmatprep.subr.bf16.mxu0 %v14958_v47  ;;  %v5037_v47 = vld [vmem:[%s16679_s26 + $0x16c0] sm:$0xff] }
 0x317   : > { %10583 = vmatpush1.bf16.msra.mxu1 %v15229_v10  ;;  %v15390_v10 = vcombine.high %v5301_v34, %v5309_v32  ;;  %v15118_v53 = vcombine.high %v5029_v0, %v5037_v47  ;;  %v5269_v59 = vld [vmem:[%s16679_s26 + $0x1e00] sm:$0xff] }
 0x318   : > { %10584 = vmatprep.subr.bf16.mxu1 %v15214_v52  ;;  %v15133_v52 = vcombine.low %v5045_v28, %v5053_v29  ;;  %v5277_v44 = vld [vmem:[%s16679_s26 + $0x1e40] sm:$0xff] }
 0x319   : > { %10544 = vmatpush1.bf16.msra.mxu0 %v14957_v56  ;;  %v5013_v56 = vld [vmem:[%s16679_s26 + $0x1600] sm:$0xff]  ;;  %v15357_v12 = vcombine.low %v5269_v59, %v5277_v44 }
 0x31a   : > { %10545 = vmatprep.subr.bf16.mxu0 %v14942_v57  ;;  %v5021_v57 = vld [vmem:[%s16679_s26 + $0x1640] sm:$0xff] }
 0x31b   : > { %10585 = vmatpush1.bf16.msra.mxu1 %v15213_v14  ;;  %v15374_v14 = vcombine.high %v5285_v58, %v5293_v51  ;;  %v15102_v63 = vcombine.high %v5013_v56, %v5021_v57  ;;  %v5253_v6 = vld [vmem:[%s16679_s26 + $0x1d80] sm:$0xff]  ;;  %v4088_v58 = vadd.f32 %v17459_v15, %v17375_v31  ;;  %v4406_v15 = vld [vmem:[%s16679_s26 + $0x308] sm:$0xff] }
 0x31c   : > { %10586 = vmatprep.subr.bf16.mxu1 %v15198_v62  ;;  %v15117_v62 = vcombine.low %v5029_v0, %v5037_v47  ;;  %v5261_v8 = vld [vmem:[%s16679_s26 + $0x1dc0] sm:$0xff] }
 0x31d   : > { %10546 = vmatpush1.bf16.msra.mxu0 %v14941_v4  ;;  %v4997_v4 = vld [vmem:[%s16679_s26 + $0x1580] sm:$0xff]  ;;  %v15341_v21 = vcombine.low %v5253_v6, %v5261_v8 }
 0x31e   : > { %10547 = vmatprep.subr.bf16.mxu0 %v14926_v3  ;;  %v5005_v3 = vld [vmem:[%s16679_s26 + $0x15c0] sm:$0xff] }
 0x31f   : > { %10587 = vmatpush1.bf16.msra.mxu1 %v15197_v49  ;;  %v15358_v49 = vcombine.high %v5269_v59, %v5277_v44  ;;  %v15086_v13 = vcombine.high %v4997_v4, %v5005_v3  ;;  %v5237_v18 = vld [vmem:[%s16679_s26 + $0x1d00] sm:$0xff]  ;;  %v4414_v44 = vld [vmem:[%s16679_s26 + $0x348] sm:$0xff] }
 0x320   : > { %10588 = vmatprep.subr.bf16.mxu1 %v15182_v7  ;;  %v15101_v7 = vcombine.low %v5013_v56, %v5021_v57  ;;  %v5245_v39 = vld [vmem:[%s16679_s26 + $0x1d40] sm:$0xff] }
 0x321   : > { %10548 = vmatpush1.bf16.msra.mxu0 %v14925_v11  ;;  %v4981_v11 = vld [vmem:[%s16679_s26 + $0x1500] sm:$0xff]  ;;  %v15325_v32 = vcombine.low %v5237_v18, %v5245_v39 }
 0x322   : > { %10549 = vmatprep.subr.bf16.mxu0 %v14910_v26  ;;  %v4989_v26 = vld [vmem:[%s16679_s26 + $0x1540] sm:$0xff] }
 0x323   : > { %10589 = vmatpush1.bf16.msra.mxu1 %v15181_v16  ;;  %v15342_v16 = vcombine.high %v5253_v6, %v5261_v8  ;;  %v15070_v20 = vcombine.high %v4981_v11, %v4989_v26  ;;  %v5221_v28 = vld [vmem:[%s16679_s26 + $0x1c80] sm:$0xff]  ;;  %v14495_v6 = vcombine.low %v4406_v15, %v4414_v44 }
 0x324   : > { %10590 = vmatprep.subr.bf16.mxu1 %v15166_v19  ;;  %v15085_v19 = vcombine.low %v4997_v4, %v5005_v3  ;;  %v5229_v29 = vld [vmem:[%s16679_s26 + $0x1cc0] sm:$0xff]  ;;  %v14496_v4 = vcombine.high %v4406_v15, %v4414_v44  ;;  %v4398_v3 = vld [vmem:[%s16679_s26 + $0x2c8] sm:$0xff] }
 0x325   : > { %10550 = vmatpush1.bf16.msra.mxu0 %v14909_v22  ;;  %v4965_v22 = vld [vmem:[%s16679_s26 + $0x1480] sm:$0xff]  ;;  %v4518_v15 = vld [vmem:[%s16679_s26 + $0x688] sm:$0xff] }
 0x326   : > { %10551 = vmatprep.subr.bf16.mxu0 %v15150_v23  ;;  %v4973_v23 = vld [vmem:[%s16679_s26 + $0x14c0] sm:$0xff]  ;;  %v4526_v44 = vld [vmem:[%s16679_s26 + $0x6c8] sm:$0xff] }
 0x327   : > { %10591 = vmatpush1.bf16.msra.mxu1 %v15165_v25  ;;  %v15326_v25 = vcombine.high %v5237_v18, %v5245_v39  ;;  %v15054_v34 = vcombine.high %v4965_v22, %v4973_v23  ;;  %v5205_v0 = vld [vmem:[%s16679_s26 + $0x1c00] sm:$0xff] }
 0x328   : > { %10592 = vmatprep.subr.bf16.mxu1 %v15406_v33  ;;  %v15069_v33 = vcombine.low %v4981_v11, %v4989_v26  ;;  %v5213_v47 = vld [vmem:[%s16679_s26 + $0x1c40] sm:$0xff] }
 0x329   : > { %10552 = vmatpush2.bf16.msra.mxu0 %v15149_v36  ;;  %v4949_v36 = vld [vmem:[%s16679_s26 + $0x1400] sm:$0xff]  ;;  %v15294_v56 = vcombine.high %v5205_v0, %v5213_v47  ;;  %v15293_v31 = vcombine.low %v5205_v0, %v5213_v47  ;;  %v4310_v47 = vld [vmem:[%s16679_s26 + $0x8] sm:$0xff] }
 0x32a   : > { %10553 = vmatprep.subr.bf16.mxu0 %v15134_v41  ;;  %v4957_v41 = vld [vmem:[%s16679_s26 + $0x1440] sm:$0xff] }
 0x32b   : > { %10593 = vmatpush2.bf16.msra.mxu1 %v15405_v30  ;;  %v15310_v30 = vcombine.high %v5221_v28, %v5229_v29  ;;  %v15038_v51 = vcombine.high %v4949_v36, %v4957_v41  ;;  %v15037_v57 = vcombine.low %v4949_v36, %v4957_v41  ;;  %v4326_v36 = vld [vmem:[%s16679_s26 + $0x88] sm:$0xff] }
 0x32c   : > { %10594 = vmatprep.subr.bf16.mxu1 %v15390_v10  ;;  %v15053_v10 = vcombine.low %v4965_v22, %v4973_v23  ;;  %v4334_v41 = vld [vmem:[%s16679_s26 + $0xc8] sm:$0xff] }
 0x32d   : > { %10554 = vmatpush2.bf16.msra.mxu0 %v15133_v52  ;;  %v15309_v52 = vcombine.low %v5221_v28, %v5229_v29  ;;  %v4342_v29 = vld [vmem:[%s16679_s26 + $0x108] sm:$0xff]  ;;  %v14416_v0 = vcombine.high %v4326_v36, %v4334_v41 }
 0x32e   : > { %10555 = vmatprep.subr.bf16.mxu0 %v15118_v53  ;;  %v4422_v53 = vld [vmem:[%s16679_s26 + $0x388] sm:$0xff] }
 0x32f   : > { %10595 = vmatpush2.bf16.msra.mxu1 %v15389_v55  ;;  %v4430_v55 = vld [vmem:[%s16679_s26 + $0x3c8] sm:$0xff] }
 0x330   : > { %10596 = vmatprep.subr.bf16.mxu1 %v15374_v14  ;;  %v4129_v14 = vadd.f32 %v17454_v5, %v4088_v58  ;;  %v14512_v59 = vcombine.high %v4422_v53, %v4430_v55  ;;  %v4390_v5 = vld [vmem:[%s16679_s26 + $0x288] sm:$0xff]  ;;  %v14415_v58 = vcombine.low %v4326_v36, %v4334_v41 }
 0x331   : > { %10556 = vmatpush2.bf16.msra.mxu0 %v15117_v62  ;;  %v14768_v62 = vcombine.high %v17469_v24, %v17472_v37  ;;  %v14480_v8 = vcombine.high %v4390_v5, %v4398_v3  ;;  %v4934_v36 = vld [vmem:[%s16679_s26 + $0x1388] sm:$0xff] }
 0x332   : > { %10557 = vmatprep.subr.bf16.mxu0 %v15102_v63  ;;  %v14511_v63 = vcombine.low %v4422_v53, %v4430_v55  ;;  %v4558_v53 = vld [vmem:[%s16679_s26 + $0x7c8] sm:$0xff] }
 0x333   : > { %10597 = vmatpush2.bf16.msra.mxu1 %v15373_v2  ;;  %v17532_v2 = vpack.c.bf16 %v4129_v14, %v4129_v14  ;;  %v4542_v14 = vld [vmem:[%s16679_s26 + $0x748] sm:$0xff] }
 0x334   : > { %10598 = vmatprep.subr.bf16.mxu1 %v15358_v49  ;;  %v4942_v41 = vld [vmem:[%s16679_s26 + $0x13c8] sm:$0xff] }
 0x335   : > { %10558 = vmatpush2.bf16.msra.mxu0 %v15101_v7 }
 0x336   : > { %10559 = vmatprep.subr.bf16.mxu0 %v15086_v13  ;;  %v4374_v13 = vld [vmem:[%s16679_s26 + $0x208] sm:$0xff] }
 0x337   : > { %10599 = vmatpush2.bf16.msra.mxu1 %v15357_v12  ;;  %v4382_v12 = vld [vmem:[%s16679_s26 + $0x248] sm:$0xff] }
 0x338   : > { %10600 = vmatprep.subr.bf16.mxu1 %v15342_v16  ;;  %v14479_v16 = vcombine.low %v4390_v5, %v4398_v3  ;;  %v14464_v39 = vcombine.high %v4374_v13, %v4382_v12  ;;  %v14463_v23 = vcombine.low %v4374_v13, %v4382_v12  ;;  %v4510_v5 = vld [vmem:[%s16679_s26 + $0x648] sm:$0xff]  ;;  %v14607_v3 = vcombine.low %v4518_v15, %v4526_v44 }
 0x339   : > { %10560 = vmatpush2.bf16.msra.mxu0 %v15085_v19  ;;  %v4494_v13 = vld [vmem:[%s16679_s26 + $0x5c8] sm:$0xff] }
 0x33a   : > { %10561 = vmatprep.subr.bf16.mxu0 %v15070_v20  ;;  %v4358_v20 = vld [vmem:[%s16679_s26 + $0x188] sm:$0xff] }
 0x33b   : > { %10601 = vmatpush2.bf16.msra.mxu1 %v15341_v21  ;;  %v4366_v21 = vld [vmem:[%s16679_s26 + $0x1c8] sm:$0xff] }
 0x33c   : > { %10602 = vmatprep.subr.bf16.mxu1 %v15326_v25  ;;  %v14448_v28 = vcombine.high %v4358_v20, %v4366_v21 }
 0x33d   : > { %10562 = vmatpush2.bf16.msra.mxu0 %v15069_v33  ;;  %v4350_v33 = vld [vmem:[%s16679_s26 + $0x148] sm:$0xff] }
 0x33e   : > { %10563 = vmatprep.subr.bf16.mxu0 %v15054_v34  ;;  %v14447_v34 = vcombine.low %v4358_v20, %v4366_v21  ;;  %v4454_v21 = vld [vmem:[%s16679_s26 + $0x488] sm:$0xff] }
 0x33f   : > { %10603 = vmatpush2.bf16.msra.mxu1 %v15325_v32  ;;  %v14432_v32 = vcombine.high %v4342_v29, %v4350_v33 }
 0x340   : > { %10604 = vmatprep.subr.bf16.mxu1 %v15310_v30  ;;  %v14431_v30 = vcombine.low %v4342_v29, %v4350_v33  ;;  %v4446_v29 = vld [vmem:[%s16679_s26 + $0x448] sm:$0xff]  ;;  %v17573_v33 = vsub.s32 6, %v16722_v45 }
 0x341   : > { %10564 = vmatpush2.bf16.msra.mxu0 %v15053_v10  ;;  %v4318_v10 = vld [vmem:[%s16679_s26 + $0x48] sm:$0xff] }
 0x342   : > { %10565 = vmatprep.subr.bf16.mxu0 %v15038_v51  ;;  %v14400_v51 = vcombine.high %v4310_v47, %v4318_v10  ;;  %v14399_v55 = vcombine.low %v4310_v47, %v4318_v10  ;;  %v15024_v10 = vcombine.high %v4934_v36, %v4942_v41 }
 0x343   : > { %10605 = vmatpush2.bf16.msra.mxu1 %v15309_v52  ;;  %v4550_v52 = vld [vmem:[%s16679_s26 + $0x788] sm:$0xff] }
 0x344   : > { %10606 = vmatprep.subr.bf16.mxu1 %v15294_v56  ;;  %v14640_v56 = vcombine.high %v4550_v52, %v4558_v53 }
 0x345   : > { %10566 = vmatpush2.bf16.msra.mxu0 %v15037_v57  ;;  %v4534_v57 = vld [vmem:[%s16679_s26 + $0x708] sm:$0xff] }
 0x346   : > { %10617 = vmatprep.subr.bf16.mxu0 %v14512_v59  ;;  %v14639_v59 = vcombine.low %v4550_v52, %v4558_v53  ;;  %v15931_v53 = vld [vmem:[%s16677_s13] sm:$0xff] }
 0x347   : > { %10607 = vmatpush2.bf16.msra.mxu1 %v15293_v31  ;;  %v14624_v31 = vcombine.high %v4534_v57, %v4542_v14 }
 0x348   : > { %10658 = vmatprep.subr.bf16.mxu1 %v14768_v62  ;;  %10568 = vmatmul.mubr.bf16.vlgmr.msra.gmra.mxu0 %v17532_v2  ;;  %v14623_v62 = vcombine.low %v4534_v57, %v4542_v14  ;;  %v4910_v14 = vld [vmem:[%s16679_s26 + $0x12c8] sm:$0xff] }
 0x349   : > { %10618 = vmatpush1.bf16.msra.mxu0 %v14511_v63  ;;  %10649 = vmatprep.mubr.bf16.mxu0 %v17354_v43  ;;  %v14608_v63 = vcombine.high %v4518_v15, %v4526_v44 }
 0x34a   : > { %v17537_v49 = vpop.f32.mrf.mxu1  ;;  %10619 = vmatprep.subr.bf16.mxu0 %v14496_v4  ;;  %v4502_v4 = vld [vmem:[%s16679_s26 + $0x608] sm:$0xff] }
 0x34b   : > { %v14591_v12 = vcombine.low %v4502_v4, %v4510_v5 }
 0x34c   : > { %v17540_v7 = vpop.f32.mrf.mxu1  ;;  %v17544_v11 = vpop.f32.mrf.mxu0 }
 0x34d   : > { %10620 = vmatpush1.bf16.msra.mxu0 %v14495_v6  ;;  %v14592_v6 = vcombine.high %v4502_v4, %v4510_v5 }
 0x34e   : > { %v4173_v26 = vpop.f32.mrf.mxu1  ;;  %v17546_v18 = vpop.f32.mrf.mxu0  ;;  %10621 = vmatprep.subr.bf16.mxu0 %v14480_v8  ;;  %v4486_v8 = vld [vmem:[%s16679_s26 + $0x588] sm:$0xff] }
 0x34f   : > { %v14576_v26 = vcombine.high %v4486_v8, %v4494_v13 }
 0x350   : > { %v4174_v19 = vpop.f32.mrf.mxu1  ;;  %v4214_v22 = vpop.f32.mrf.mxu0 }
 0x351   : > { %10622 = vmatpush1.bf16.msra.mxu0 %v14479_v16  ;;  %v4470_v16 = vld [vmem:[%s16679_s26 + $0x508] sm:$0xff]  ;;  %v14575_v19 = vcombine.low %v4486_v8, %v4494_v13 }
 0x352   : > { %v4215_v25 = vpop.f32.mrf.mxu0  ;;  %10623 = vmatprep.subr.bf16.mxu0 %v14464_v39  ;;  %v4478_v39 = vld [vmem:[%s16679_s26 + $0x548] sm:$0xff] }
 0x353   : > { %v14560_v20 = vcombine.high %v4470_v16, %v4478_v39  ;;  %v4462_v22 = vld [vmem:[%s16679_s26 + $0x4c8] sm:$0xff] }
 0x354   : > { %v14544_v25 = vcombine.high %v4454_v21, %v4462_v22 }
 0x355   : > { %10624 = vmatpush1.bf16.msra.mxu0 %v14463_v23  ;;  %v14559_v23 = vcombine.low %v4470_v16, %v4478_v39 }
 0x356   : > { %10625 = vmatprep.subr.bf16.mxu0 %v14448_v28  ;;  %v4438_v28 = vld [vmem:[%s16679_s26 + $0x408] sm:$0xff] }
 0x357   : > { %v14527_v47 = vcombine.low %v4438_v28, %v4446_v29 }
 0x359   : > { %10626 = vmatpush1.bf16.msra.mxu0 %v14447_v34  ;;  %v14543_v34 = vcombine.low %v4454_v21, %v4462_v22  ;;  %v4870_v22 = vld [vmem:[%s16679_s26 + $0x1188] sm:$0xff] }
 0x35a   : > { %10627 = vmatprep.subr.bf16.mxu0 %v14432_v32  ;;  %v14528_v32 = vcombine.high %v4438_v28, %v4446_v29 }
 0x35d   : > { %10628 = vmatpush1.bf16.msra.mxu0 %v14431_v30  ;;  %v3601_v30 = vrot.slane %v17363_v60, %v17573_v33  ;;  %v4902_v60 = vld [vmem:[%s16679_s26 + $0x1288] sm:$0xff] }
 0x35e   : > { %10629 = vmatprep.subr.bf16.mxu0 %v14416_v0  ;;  %v17580_v0 = vsub.s32 7, %v16722_v45  ;;  %v14992_v5 = vcombine.high %v4902_v60, %v4910_v14 }
 0x35f   : > { %v4170_v52 = vadd.f32 %v17537_v49, %v3601_v30  ;;  %v4854_v30 = vld [vmem:[%s16679_s26 + $0x1108] sm:$0xff] }
 0x361   : > { %10630 = vmatpush1.bf16.msra.mxu0 %v14415_v58  ;;  %v4918_v58 = vld [vmem:[%s16679_s26 + $0x1308] sm:$0xff] }
 0x362   : > { %10631 = vmatprep.subr.bf16.mxu0 %v14400_v51  ;;  %v4926_v51 = vld [vmem:[%s16679_s26 + $0x1348] sm:$0xff] }
 0x363   : > { %v15008_v57 = vcombine.high %v4918_v58, %v4926_v51  ;;  %v15007_v49 = vcombine.low %v4918_v58, %v4926_v51 }
 0x365   : > { %10632 = vmatpush1.bf16.msra.mxu0 %v14399_v55  ;;  %v3605_v55 = vrot.slane %v15931_v53, %v17580_v0  ;;  %v4630_v53 = vld [vmem:[%s16679_s26 + $0xa08] sm:$0xff] }
 0x366   : > { %10633 = vmatprep.subr.bf16.mxu0 %v14640_v56  ;;  %v15023_v56 = vcombine.low %v4934_v36, %v4942_v41  ;;  %v4646_v36 = vld [vmem:[%s16679_s26 + $0xa88] sm:$0xff] }
 0x367   : > { %v4654_v41 = vld [vmem:[%s16679_s26 + $0xac8] sm:$0xff] }
 0x368   : > { %v14736_v51 = vcombine.high %v4646_v36, %v4654_v41  ;;  %v14735_v24 = vcombine.low %v4646_v36, %v4654_v41 }
 0x369   : > { %10634 = vmatpush2.bf16.msra.mxu0 %v14639_v59  ;;  %v4172_v59 = vadd.f32 %v17540_v7, %v3605_v55  ;;  %v4886_v7 = vld [vmem:[%s16679_s26 + $0x1208] sm:$0xff] }
 0x36a   : > { %10635 = vmatprep.subr.bf16.mxu0 %v14624_v31  ;;  %v4211_v31 = vadd.f32 %v17544_v11, %v4170_v52  ;;  %v4894_v11 = vld [vmem:[%s16679_s26 + $0x1248] sm:$0xff] }
 0x36b   : > { %v14975_v29 = vcombine.low %v4886_v7, %v4894_v11  ;;  %v4638_v55 = vld [vmem:[%s16679_s26 + $0xa48] sm:$0xff] }
 0x36d   : > { %10636 = vmatpush2.bf16.msra.mxu0 %v14623_v62  ;;  %v4213_v62 = vadd.f32 %v17546_v18, %v4172_v59  ;;  %v14976_v18 = vcombine.high %v4886_v7, %v4894_v11  ;;  %v4622_v59 = vld [vmem:[%s16679_s26 + $0x9c8] sm:$0xff] }
 0x36e   : > { %10637 = vmatprep.subr.bf16.mxu0 %v14608_v63  ;;  %v5070_v7 = vld [vmem:[%s16679_s26 + $0x17c8] sm:$0xff] }
 0x371   : > { %10638 = vmatpush2.bf16.msra.mxu0 %v14607_v3 }
 0x372   : > { %10639 = vmatprep.subr.bf16.mxu0 %v14592_v6 }
 0x375   : > { %10640 = vmatpush2.bf16.msra.mxu0 %v14591_v12 }
 0x376   : > { %10641 = vmatprep.subr.bf16.mxu0 %v14576_v26  ;;  %v14991_v26 = vcombine.low %v4902_v60, %v4910_v14  ;;  %v4614_v14 = vld [vmem:[%s16679_s26 + $0x988] sm:$0xff] }
 0x377   : > { %v14703_v11 = vcombine.low %v4614_v14, %v4622_v59 }
 0x379   : > { %10642 = vmatpush2.bf16.msra.mxu0 %v14575_v19  ;;  %v4662_v19 = vld [vmem:[%s16679_s26 + $0xb08] sm:$0xff] }
 0x37a   : > { %10643 = vmatprep.subr.bf16.mxu0 %v14560_v20  ;;  %v4670_v20 = vld [vmem:[%s16679_s26 + $0xb48] sm:$0xff] }
 0x37d   : > { %10644 = vmatpush2.bf16.msra.mxu0 %v14559_v23  ;;  %v4878_v23 = vld [vmem:[%s16679_s26 + $0x11c8] sm:$0xff] }
 0x37e   : > { %10645 = vmatprep.subr.bf16.mxu0 %v14544_v25  ;;  %v14959_v58 = vcombine.low %v4870_v22, %v4878_v23 }
 0x381   : > { %10646 = vmatpush2.bf16.msra.mxu0 %v14543_v34  ;;  %v14752_v34 = vcombine.high %v4662_v19, %v4670_v20 }
 0x382   : > { %10647 = vmatprep.subr.bf16.mxu0 %v14528_v32  ;;  %v14960_v32 = vcombine.high %v4870_v22, %v4878_v23  ;;  %v4566_v22 = vld [vmem:[%s16679_s26 + $0x808] sm:$0xff] }
 0x383   : > { %v4574_v23 = vld [vmem:[%s16679_s26 + $0x848] sm:$0xff] }
 0x384   : > { %v14656_v41 = vcombine.high %v4566_v22, %v4574_v23 }
 0x385   : > { %10648 = vmatpush2.bf16.msra.mxu0 %v14527_v47  ;;  %v4862_v47 = vld [vmem:[%s16679_s26 + $0x1148] sm:$0xff] }
 0x386   : > { %10699 = vmatprep.subr.bf16.mxu0 %v15024_v10  ;;  %v14751_v10 = vcombine.low %v4662_v19, %v4670_v20  ;;  %v14944_v52 = vcombine.high %v4854_v30, %v4862_v47  ;;  %v14943_v37 = vcombine.low %v4854_v30, %v4862_v47  ;;  %v4806_v47 = vld [vmem:[%s16679_s26 + $0xf88] sm:$0xff] }
 0x388   : > { %v4292_v15 = vpop.f32.mrf.mxu0  ;;  %10650 = vmatmul.mubr.bf16.vlgmr.msra.gmra.mxu0 %v17442_v42 }
 0x389   : > { %10700 = vmatpush1.bf16.msra.mxu0 %v15023_v56  ;;  %10731 = vmatprep.mubr.bf16.mxu0 %v17476_v40  ;;  %v4838_v56 = vld [vmem:[%s16679_s26 + $0x1088] sm:$0xff] }
 0x38a   : > { %v4251_v44 = vpop.f32.mrf.mxu1  ;;  %v4294_v4 = vpop.f32.mrf.mxu0  ;;  %10701 = vmatprep.subr.bf16.mxu0 %v15008_v57  ;;  %v4846_v57 = vld [vmem:[%s16679_s26 + $0x10c8] sm:$0xff] }
 0x38b   : > { %v4252_v63 = vadd.f32 %v4251_v44, %v4211_v31  ;;  %v14928_v60 = vcombine.high %v4838_v56, %v4846_v57  ;;  %v4822_v31 = vld [vmem:[%s16679_s26 + $0x1008] sm:$0xff]  ;;  %v14719_v44 = vcombine.low %v4630_v53, %v4638_v55 }
 0x38c   : > { %v4253_v3 = vpop.f32.mrf.mxu1  ;;  %v4296_v8 = vpop.f32.mrf.mxu0 }
 0x38d   : > { %v4254_v6 = vadd.f32 %v4253_v3, %v4213_v62  ;;  %v4293_v13 = vadd.f32 %v4292_v15, %v4252_v63  ;;  %10702 = vmatpush1.bf16.msra.mxu0 %v15007_v49  ;;  %v4830_v15 = vld [vmem:[%s16679_s26 + $0x1048] sm:$0xff]  ;;  %v14927_v49 = vcombine.low %v4838_v56, %v4846_v57  ;;  %v14704_v62 = vcombine.high %v4614_v14, %v4622_v59 }
 0x38e   : > { %v4255_v12 = vpop.f32.mrf.mxu1  ;;  %v4297_v39 = vpop.f32.mrf.mxu0  ;;  %10703 = vmatprep.subr.bf16.mxu0 %v14992_v5  ;;  %v14912_v63 = vcombine.high %v4822_v31, %v4830_v15  ;;  %v4606_v5 = vld [vmem:[%s16679_s26 + $0x948] sm:$0xff] }
 0x38f   : > { %v4295_v16 = vadd.f32 %v4294_v4, %v4254_v6  ;;  %v17602_v28 = vpack.c.bf16 %v4293_v13, %v4293_v13  ;;  %v4598_v4 = vld [vmem:[%s16679_s26 + $0x908] sm:$0xff]  ;;  %v14911_v6 = vcombine.low %v4822_v31, %v4830_v15 }
 0x390   : > { %v4256_v21 = vpop.f32.mrf.mxu1  ;;  %v5062_v3 = vld [vmem:[%s16679_s26 + $0x1788] sm:$0xff]  ;;  %v14688_v8 = vcombine.high %v4598_v4, %v4606_v5 }
 0x391   : > { %v17600_v25 = vpack.c.bf16 %v4295_v16, %v4295_v16  ;;  %10704 = vmatpush1.bf16.msra.mxu0 %v14991_v26  ;;  %v15152_v13 = vcombine.high %v5062_v3, %v5070_v7  ;;  %v4582_v12 = vld [vmem:[%s16679_s26 + $0x888] sm:$0xff]  ;;  %v15151_v19 = vcombine.low %v5062_v3, %v5070_v7 }
 0x392   : > { %10705 = vmatprep.subr.bf16.mxu0 %v14976_v18  ;;  %v4590_v26 = vld [vmem:[%s16679_s26 + $0x8c8] sm:$0xff]  ;;  %v14687_v18 = vcombine.low %v4598_v4, %v4606_v5 }
 0x393   : > { %10608 = vmatprep.mubr.bf16.mxu1 %v17600_v25  ;;  %v5046_v16 = vld [vmem:[%s16679_s26 + $0x1708] sm:$0xff]  ;;  %v14672_v20 = vcombine.high %v4582_v12, %v4590_v26 }
 0x394   : > { %10609 = vmatmul.mubr.bf16.vlgmr.msra.gmra.mxu1 %v17602_v28  ;;  %v5054_v39 = vld [vmem:[%s16679_s26 + $0x1748] sm:$0xff] }
 0x395   : > { %10659 = vmatpush1.bf16.msra.mxu1 %v14767_v50  ;;  %10690 = vmatprep.mubr.bf16.mxu1 %v17359_v9  ;;  %v14720_v50 = vcombine.high %v4630_v53, %v4638_v55  ;;  %v15136_v21 = vcombine.high %v5046_v16, %v5054_v39  ;;  %v15135_v36 = vcombine.low %v5046_v16, %v5054_v39  ;;  %v4790_v57 = vld [vmem:[%s16679_s26 + $0xf08] sm:$0xff] }
 0x396   : > { %10660 = vmatprep.subr.bf16.mxu1 %v14752_v34  ;;  %10706 = vmatpush1.bf16.msra.mxu0 %v14975_v29  ;;  %v5030_v29 = vld [vmem:[%s16679_s26 + $0x1688] sm:$0xff] }
 0x397   : > { %10707 = vmatprep.subr.bf16.mxu0 %v14960_v32  ;;  %v5038_v34 = vld [vmem:[%s16679_s26 + $0x16c8] sm:$0xff]  ;;  %v14671_v32 = vcombine.low %v4582_v12, %v4590_v26 }
 0x398   : > { %v15120_v30 = vcombine.high %v5030_v29, %v5038_v34  ;;  %v15119_v53 = vcombine.low %v5030_v29, %v5038_v34  ;;  %v4774_v15 = vld [vmem:[%s16679_s26 + $0xe88] sm:$0xff] }
 0x399   : > { %10661 = vmatpush1.bf16.msra.mxu1 %v14751_v10  ;;  %v4814_v10 = vld [vmem:[%s16679_s26 + $0xfc8] sm:$0xff] }
 0x39a   : > { %10662 = vmatprep.subr.bf16.mxu1 %v14736_v51  ;;  %10708 = vmatpush1.bf16.msra.mxu0 %v14959_v58  ;;  %v5014_v58 = vld [vmem:[%s16679_s26 + $0x1608] sm:$0xff]  ;;  %v14896_v55 = vcombine.high %v4806_v47, %v4814_v10 }
 0x39b   : > { %10709 = vmatprep.subr.bf16.mxu0 %v14944_v52  ;;  %v5022_v51 = vld [vmem:[%s16679_s26 + $0x1648] sm:$0xff]  ;;  %v14655_v52 = vcombine.low %v4566_v22, %v4574_v23 }
 0x39c   : > { %v15104_v56 = vcombine.high %v5014_v58, %v5022_v51  ;;  %v15103_v14 = vcombine.low %v5014_v58, %v5022_v51  ;;  %v4758_v7 = vld [vmem:[%s16679_s26 + $0xe08] sm:$0xff] }
 0x39d   : > { %10663 = vmatpush1.bf16.msra.mxu1 %v14735_v24  ;;  %v4798_v24 = vld [vmem:[%s16679_s26 + $0xf48] sm:$0xff] }
 0x39e   : > { %10664 = vmatprep.subr.bf16.mxu1 %v14720_v50  ;;  %10710 = vmatpush1.bf16.msra.mxu0 %v14943_v37  ;;  %v4998_v37 = vld [vmem:[%s16679_s26 + $0x1588] sm:$0xff]  ;;  %v14880_v59 = vcombine.high %v4790_v57, %v4798_v24 }
 0x39f   : > { %10711 = vmatprep.subr.bf16.mxu0 %v14928_v60  ;;  %v5006_v50 = vld [vmem:[%s16679_s26 + $0x15c8] sm:$0xff]  ;;  %v14895_v60 = vcombine.low %v4806_v47, %v4814_v10 }
 0x3a0   : > { %v15088_v31 = vcombine.high %v4998_v37, %v5006_v50  ;;  %v15087_v4 = vcombine.low %v4998_v37, %v5006_v50  ;;  %v4742_v39 = vld [vmem:[%s16679_s26 + $0xd88] sm:$0xff] }
 0x3a1   : > { %10665 = vmatpush1.bf16.msra.mxu1 %v14719_v44  ;;  %v4782_v44 = vld [vmem:[%s16679_s26 + $0xec8] sm:$0xff] }
 0x3a2   : > { %10666 = vmatprep.subr.bf16.mxu1 %v14704_v62  ;;  %10712 = vmatpush1.bf16.msra.mxu0 %v14927_v49  ;;  %v4982_v49 = vld [vmem:[%s16679_s26 + $0x1508] sm:$0xff]  ;;  %v14864_v5 = vcombine.high %v4774_v15, %v4782_v44 }
 0x3a3   : > { %10713 = vmatprep.subr.bf16.mxu0 %v14912_v63  ;;  %v4990_v62 = vld [vmem:[%s16679_s26 + $0x1548] sm:$0xff]  ;;  %v14879_v63 = vcombine.low %v4790_v57, %v4798_v24 }
 0x3a4   : > { %v15072_v3 = vcombine.high %v4982_v49, %v4990_v62  ;;  %v15071_v12 = vcombine.low %v4982_v49, %v4990_v62  ;;  %v4726_v34 = vld [vmem:[%s16679_s26 + $0xd08] sm:$0xff] }
 0x3a5   : > { %10667 = vmatpush1.bf16.msra.mxu1 %v14703_v11  ;;  %v4766_v11 = vld [vmem:[%s16679_s26 + $0xe48] sm:$0xff] }
 0x3a6   : > { %10668 = vmatprep.subr.bf16.mxu1 %v14688_v8  ;;  %10714 = vmatpush1.bf16.msra.mxu0 %v14911_v6  ;;  %v4966_v6 = vld [vmem:[%s16679_s26 + $0x1488] sm:$0xff]  ;;  %v14848_v26 = vcombine.high %v4758_v7, %v4766_v11 }
 0x3a7   : > { %10715 = vmatprep.subr.bf16.mxu0 %v15152_v13  ;;  %v4974_v8 = vld [vmem:[%s16679_s26 + $0x14c8] sm:$0xff]  ;;  %v14863_v13 = vcombine.low %v4774_v15, %v4782_v44 }
 0x3a8   : > { %v15056_v16 = vcombine.high %v4966_v6, %v4974_v8  ;;  %v15055_v22 = vcombine.low %v4966_v6, %v4974_v8  ;;  %v4710_v51 = vld [vmem:[%s16679_s26 + $0xc88] sm:$0xff]  ;;  %v4375_v6 = vld [vmem:[%s16679_s26 + $0x210] sm:$0xff] }
 0x3a9   : > { %10669 = vmatpush1.bf16.msra.mxu1 %v14687_v18  ;;  %v4750_v18 = vld [vmem:[%s16679_s26 + $0xdc8] sm:$0xff]  ;;  %v4383_v8 = vld [vmem:[%s16679_s26 + $0x250] sm:$0xff] }
 0x3aa   : > { %10670 = vmatprep.subr.bf16.mxu1 %v14672_v20  ;;  %10716 = vmatpush2.bf16.msra.mxu0 %v15151_v19  ;;  %v4950_v19 = vld [vmem:[%s16679_s26 + $0x1408] sm:$0xff]  ;;  %v14832_v23 = vcombine.high %v4742_v39, %v4750_v18 }
 0x3ab   : > { %10717 = vmatprep.subr.bf16.mxu0 %v15136_v21  ;;  %v4958_v20 = vld [vmem:[%s16679_s26 + $0x1448] sm:$0xff]  ;;  %v14847_v21 = vcombine.low %v4758_v7, %v4766_v11 }
 0x3ac   : > { %v15040_v29 = vcombine.high %v4950_v19, %v4958_v20  ;;  %v15039_v47 = vcombine.low %v4950_v19, %v4958_v20  ;;  %v4694_v50 = vld [vmem:[%s16679_s26 + $0xc08] sm:$0xff]  ;;  %v14466_v20 = vcombine.high %v4375_v6, %v4383_v8 }
 0x3ad   : > { %10671 = vmatpush1.bf16.msra.mxu1 %v14671_v32  ;;  %v4734_v32 = vld [vmem:[%s16679_s26 + $0xd48] sm:$0xff] }
 0x3ae   : > { %10672 = vmatprep.subr.bf16.mxu1 %v14656_v41  ;;  %10718 = vmatpush2.bf16.msra.mxu0 %v15135_v36  ;;  %v4423_v36 = vld [vmem:[%s16679_s26 + $0x390] sm:$0xff]  ;;  %v14816_v10 = vcombine.high %v4726_v34, %v4734_v32  ;;  %v5198_v7 = vld [vmem:[%s16679_s26 + $0x1bc8] sm:$0xff] }
 0x3af   : > { %10719 = vmatprep.subr.bf16.mxu0 %v15120_v30  ;;  %v4431_v41 = vld [vmem:[%s16679_s26 + $0x3d0] sm:$0xff]  ;;  %v14831_v30 = vcombine.low %v4742_v39, %v4750_v18 }
 0x3b0   : > { %v14514_v58 = vcombine.high %v4423_v36, %v4431_v41  ;;  %v14513_v57 = vcombine.low %v4423_v36, %v4431_v41  ;;  %v14465_v36 = vcombine.low %v4375_v6, %v4383_v8  ;;  %v5118_v6 = vld [vmem:[%s16679_s26 + $0x1948] sm:$0xff]  ;;  %v4551_v8 = vld [vmem:[%s16679_s26 + $0x790] sm:$0xff] }
 0x3b1   : > { %10673 = vmatpush1.bf16.msra.mxu1 %v14655_v52  ;;  %v4718_v52 = vld [vmem:[%s16679_s26 + $0xcc8] sm:$0xff] }
 0x3b2   : > { %10674 = vmatprep.subr.bf16.mxu1 %v14896_v55  ;;  %10720 = vmatpush2.bf16.msra.mxu0 %v15119_v53  ;;  %v4407_v53 = vld [vmem:[%s16679_s26 + $0x310] sm:$0xff]  ;;  %v14800_v24 = vcombine.high %v4710_v51, %v4718_v52  ;;  %v14799_v15 = vcombine.low %v4710_v51, %v4718_v52 }
 0x3b3   : > { %10721 = vmatprep.subr.bf16.mxu0 %v15104_v56  ;;  %v4415_v55 = vld [vmem:[%s16679_s26 + $0x350] sm:$0xff]  ;;  %v14815_v56 = vcombine.low %v4726_v34, %v4734_v32 }
 0x3b4   : > { %v14498_v37 = vcombine.high %v4407_v53, %v4415_v55  ;;  %v14497_v49 = vcombine.low %v4407_v53, %v4415_v55  ;;  %v4367_v34 = vld [vmem:[%s16679_s26 + $0x1d0] sm:$0xff] }
 0x3b5   : > { %10675 = vmatpush2.bf16.msra.mxu1 %v14895_v60  ;;  %v4702_v60 = vld [vmem:[%s16679_s26 + $0xc48] sm:$0xff]  ;;  %v4351_v51 = vld [vmem:[%s16679_s26 + $0x150] sm:$0xff] }
 0x3b6   : > { %10676 = vmatprep.subr.bf16.mxu1 %v14880_v59  ;;  %10722 = vmatpush2.bf16.msra.mxu0 %v15103_v14  ;;  %v4391_v14 = vld [vmem:[%s16679_s26 + $0x290] sm:$0xff]  ;;  %v14784_v62 = vcombine.high %v4694_v50, %v4702_v60 }
 0x3b7   : > { %10723 = vmatprep.subr.bf16.mxu0 %v15088_v31  ;;  %v4399_v59 = vld [vmem:[%s16679_s26 + $0x2d0] sm:$0xff] }
 0x3b8   : > { %v14481_v39 = vcombine.low %v4391_v14, %v4399_v59 }
 0x3b9   : > { %10677 = vmatpush2.bf16.msra.mxu1 %v14879_v63 }
 0x3ba   : > { %10678 = vmatprep.subr.bf16.mxu1 %v14864_v5  ;;  %10724 = vmatpush2.bf16.msra.mxu0 %v15087_v4  ;;  %v14482_v5 = vcombine.high %v4391_v14, %v4399_v59 }
 0x3bb   : > { %10725 = vmatprep.subr.bf16.mxu0 %v15072_v3  ;;  %v5190_v3 = vld [vmem:[%s16679_s26 + $0x1b88] sm:$0xff] }
 0x3bc   : > { %v15280_v18 = vcombine.high %v5190_v3, %v5198_v7  ;;  %v15279_v32 = vcombine.low %v5190_v3, %v5198_v7 }
 0x3bd   : > { %10679 = vmatpush2.bf16.msra.mxu1 %v14863_v13 }
 0x3be   : > { %10680 = vmatprep.subr.bf16.mxu1 %v14848_v26  ;;  %10726 = vmatpush2.bf16.msra.mxu0 %v15071_v12  ;;  %v14783_v26 = vcombine.low %v4694_v50, %v4702_v60  ;;  %v4335_v50 = vld [vmem:[%s16679_s26 + $0xd0] sm:$0xff] }
 0x3bf   : > { %10727 = vmatprep.subr.bf16.mxu0 %v15056_v16 }
 0x3c1   : > { %10681 = vmatpush2.bf16.msra.mxu1 %v14847_v21  ;;  %v5174_v21 = vld [vmem:[%s16679_s26 + $0x1b08] sm:$0xff] }
 0x3c2   : > { %10682 = vmatprep.subr.bf16.mxu1 %v14832_v23  ;;  %10728 = vmatpush2.bf16.msra.mxu0 %v15055_v22  ;;  %v5182_v22 = vld [vmem:[%s16679_s26 + $0x1b48] sm:$0xff] }
 0x3c3   : > { %10729 = vmatprep.subr.bf16.mxu0 %v15040_v29  ;;  %v4359_v29 = vld [vmem:[%s16679_s26 + $0x190] sm:$0xff]  ;;  %v15264_v41 = vcombine.high %v5174_v21, %v5182_v22  ;;  %v15263_v52 = vcombine.low %v5174_v21, %v5182_v22 }
 0x3c4   : > { %v14449_v53 = vcombine.low %v4359_v29, %v4367_v34  ;;  %v4535_v21 = vld [vmem:[%s16679_s26 + $0x710] sm:$0xff] }
 0x3c5   : > { %10683 = vmatpush2.bf16.msra.mxu1 %v14831_v30  ;;  %v14450_v30 = vcombine.high %v4359_v29, %v4367_v34  ;;  %v4543_v22 = vld [vmem:[%s16679_s26 + $0x750] sm:$0xff] }
 0x3c6   : > { %10684 = vmatprep.subr.bf16.mxu1 %v14816_v10  ;;  %10730 = vmatpush2.bf16.msra.mxu0 %v15039_v47  ;;  %v5158_v47 = vld [vmem:[%s16679_s26 + $0x1a88] sm:$0xff] }
 0x3c7   : > { %10781 = vmatprep.subr.bf16.mxu0 %v14514_v58  ;;  %v5166_v10 = vld [vmem:[%s16679_s26 + $0x1ac8] sm:$0xff]  ;;  %v4343_v58 = vld [vmem:[%s16679_s26 + $0x110] sm:$0xff] }
 0x3c8   : > { %v10487_v31 = vpop.f32.mrf.mxu0  ;;  %v15248_v55 = vcombine.high %v5158_v47, %v5166_v10  ;;  %v15247_v60 = vcombine.low %v5158_v47, %v5166_v10  ;;  %v14433_v14 = vcombine.low %v4343_v58, %v4351_v51  ;;  %v4527_v47 = vld [vmem:[%s16679_s26 + $0x6d0] sm:$0xff] }
 0x3c9   : > { %10685 = vmatpush2.bf16.msra.mxu1 %v14815_v56  ;;  %10732 = vmatmul.mubr.bf16.vlgmr.msra.gmra.mxu0 %v17532_v2  ;;  %v14434_v56 = vcombine.high %v4343_v58, %v4351_v51  ;;  %v14625_v58 = vcombine.low %v4535_v21, %v4543_v22 }
 0x3ca   : > { %v10528_v44 = vpop.f32.mrf.mxu1  ;;  %10686 = vmatprep.subr.bf16.mxu1 %v14800_v24  ;;  %10782 = vmatpush1.bf16.msra.mxu0 %v14513_v57  ;;  %v10489_v4 = vpop.f32.mrf.mxu0  ;;  %v5142_v57 = vld [vmem:[%s16679_s26 + $0x1a08] sm:$0xff] }
 0x3cb   : > { %v17667_v63 = vadd.f32 %v10528_v44, %v10487_v31  ;;  %10813 = vmatprep.mubr.bf16.mxu0 %v17354_v43  ;;  %10783 = vmatprep.subr.bf16.mxu0 %v14498_v37  ;;  %v5150_v24 = vld [vmem:[%s16679_s26 + $0x1a48] sm:$0xff]  ;;  %v4327_v37 = vld [vmem:[%s16679_s26 + $0x90] sm:$0xff] }
 0x3cc   : > { %v10530_v11 = vpop.f32.mrf.mxu1  ;;  %v10491_v12 = vpop.f32.mrf.mxu0  ;;  %v15232_v59 = vcombine.high %v5142_v57, %v5150_v24  ;;  %v14418_v31 = vcombine.high %v4327_v37, %v4335_v50  ;;  %v5134_v44 = vld [vmem:[%s16679_s26 + $0x19c8] sm:$0xff] }
 0x3cd   : > { %v17674_v13 = vadd.f32 %v10530_v11, %v10489_v4  ;;  %10687 = vmatpush2.bf16.msra.mxu1 %v14799_v15  ;;  %v5126_v15 = vld [vmem:[%s16679_s26 + $0x1988] sm:$0xff]  ;;  %v15231_v4 = vcombine.low %v5142_v57, %v5150_v24  ;;  %v4559_v12 = vld [vmem:[%s16679_s26 + $0x7d0] sm:$0xff] }
 0x3ce   : > { %v10532_v16 = vpop.f32.mrf.mxu1  ;;  %10688 = vmatprep.subr.bf16.mxu1 %v14784_v62  ;;  %10784 = vmatpush1.bf16.msra.mxu0 %v14497_v49  ;;  %v10492_v19 = vpop.f32.mrf.mxu0  ;;  %v4311_v49 = vld [vmem:[%s16679_s26 + $0x10] sm:$0xff]  ;;  %v15216_v3 = vcombine.high %v5126_v15, %v5134_v44  ;;  %v5110_v11 = vld [vmem:[%s16679_s26 + $0x1908] sm:$0xff]  ;;  %v14641_v29 = vcombine.low %v4551_v8, %v4559_v12 }
 0x3cf   : > { %10785 = vmatprep.subr.bf16.mxu0 %v14482_v5  ;;  %v4319_v62 = vld [vmem:[%s16679_s26 + $0x50] sm:$0xff]  ;;  %v14417_v5 = vcombine.low %v4327_v37, %v4335_v50  ;;  %v5094_v19 = vld [vmem:[%s16679_s26 + $0x1888] sm:$0xff] }
 0x3d0   : > { %v10533_v23 = vpop.f32.mrf.mxu1  ;;  %v14402_v7 = vcombine.high %v4311_v49, %v4319_v62  ;;  %v14401_v16 = vcombine.low %v4311_v49, %v4319_v62  ;;  %v4511_v57 = vld [vmem:[%s16679_s26 + $0x650] sm:$0xff] }
 0x3d1   : > { %10689 = vmatpush2.bf16.msra.mxu1 %v14783_v26  ;;  %v15215_v26 = vcombine.low %v5126_v15, %v5134_v44  ;;  %v15199_v23 = vcombine.low %v5110_v11, %v5118_v6  ;;  %v4495_v15 = vld [vmem:[%s16679_s26 + $0x5d0] sm:$0xff] }
 0x3d2   : > { %10740 = vmatprep.subr.bf16.mxu1 %v15280_v18  ;;  %10786 = vmatpush1.bf16.msra.mxu0 %v14481_v39  ;;  %v15200_v39 = vcombine.high %v5110_v11, %v5118_v6  ;;  %v14642_v18 = vcombine.high %v4551_v8, %v4559_v12  ;;  %v4479_v11 = vld [vmem:[%s16679_s26 + $0x550] sm:$0xff] }
 0x3d3   : > { %10787 = vmatprep.subr.bf16.mxu0 %v14466_v20  ;;  %v5102_v20 = vld [vmem:[%s16679_s26 + $0x18c8] sm:$0xff] }
 0x3d4   : > { %10691 = vmatmul.mubr.bf16.vlgmr.msra.gmra.mxu1 %v17446_v61  ;;  %v15184_v34 = vcombine.high %v5094_v19, %v5102_v20  ;;  %v15183_v10 = vcombine.low %v5094_v19, %v5102_v20  ;;  %v4463_v19 = vld [vmem:[%s16679_s26 + $0x4d0] sm:$0xff] }
 0x3d5   : > { %10741 = vmatpush1.bf16.msra.mxu1 %v15279_v32  ;;  %10772 = vmatprep.mubr.bf16.mxu1 %v17600_v25  ;;  %v14626_v32 = vcombine.high %v4535_v21, %v4543_v22 }
 0x3d6   : > { %10742 = vmatprep.subr.bf16.mxu1 %v15264_v41  ;;  %10788 = vmatpush1.bf16.msra.mxu0 %v14465_v36  ;;  %v5078_v36 = vld [vmem:[%s16679_s26 + $0x1808] sm:$0xff] }
 0x3d7   : > { %10789 = vmatprep.subr.bf16.mxu0 %v14450_v30  ;;  %v5086_v41 = vld [vmem:[%s16679_s26 + $0x1848] sm:$0xff]  ;;  %v4519_v30 = vld [vmem:[%s16679_s26 + $0x690] sm:$0xff] }
 0x3d8   : > { %v15168_v51 = vcombine.high %v5078_v36, %v5086_v41  ;;  %v15167_v24 = vcombine.low %v5078_v36, %v5086_v41  ;;  %v14609_v37 = vcombine.low %v4519_v30, %v4527_v47  ;;  %v4447_v36 = vld [vmem:[%s16679_s26 + $0x450] sm:$0xff] }
 0x3d9   : > { %10743 = vmatpush1.bf16.msra.mxu1 %v15263_v52  ;;  %v14610_v52 = vcombine.high %v4519_v30, %v4527_v47 }
 0x3da   : > { %10744 = vmatprep.subr.bf16.mxu1 %v15248_v55  ;;  %10790 = vmatpush1.bf16.msra.mxu0 %v14449_v53  ;;  %v5318_v53 = vld [vmem:[%s16679_s26 + $0x1f88] sm:$0xff] }
 0x3db   : > { %10791 = vmatprep.subr.bf16.mxu0 %v14434_v56  ;;  %v5326_v55 = vld [vmem:[%s16679_s26 + $0x1fc8] sm:$0xff]  ;;  %v4503_v56 = vld [vmem:[%s16679_s26 + $0x610] sm:$0xff] }
 0x3dc   : > { %v15408_v50 = vcombine.high %v5318_v53, %v5326_v55  ;;  %v15407_v44 = vcombine.low %v5318_v53, %v5326_v55  ;;  %v14593_v49 = vcombine.low %v4503_v56, %v4511_v57  ;;  %v4943_v53 = vld [vmem:[%s16679_s26 + $0x13d0] sm:$0xff] }
 0x3dd   : > { %10745 = vmatpush1.bf16.msra.mxu1 %v15247_v60  ;;  %v14594_v60 = vcombine.high %v4503_v56, %v4511_v57 }
 0x3de   : > { %10746 = vmatprep.subr.bf16.mxu1 %v15232_v59  ;;  %10792 = vmatpush1.bf16.msra.mxu0 %v14433_v14  ;;  %v5302_v14 = vld [vmem:[%s16679_s26 + $0x1f08] sm:$0xff] }
 0x3df   : > { %10793 = vmatprep.subr.bf16.mxu0 %v14418_v31  ;;  %v5310_v59 = vld [vmem:[%s16679_s26 + $0x1f48] sm:$0xff]  ;;  %v4487_v31 = vld [vmem:[%s16679_s26 + $0x590] sm:$0xff] }
 0x3e0   : > { %v15392_v62 = vcombine.high %v5302_v14, %v5310_v59  ;;  %v15391_v6 = vcombine.low %v5302_v14, %v5310_v59  ;;  %v14577_v8 = vcombine.low %v4487_v31, %v4495_v15  ;;  %v4927_v14 = vld [vmem:[%s16679_s26 + $0x1350] sm:$0xff] }
 0x3e1   : > { %10747 = vmatpush1.bf16.msra.mxu1 %v15231_v4  ;;  %v14578_v4 = vcombine.high %v4487_v31, %v4495_v15 }
 0x3e2   : > { %10748 = vmatprep.subr.bf16.mxu1 %v15216_v3  ;;  %10794 = vmatpush1.bf16.msra.mxu0 %v14417_v5  ;;  %v5286_v5 = vld [vmem:[%s16679_s26 + $0x1e88] sm:$0xff] }
 0x3e3   : > { %10795 = vmatprep.subr.bf16.mxu0 %v14402_v7  ;;  %v5294_v3 = vld [vmem:[%s16679_s26 + $0x1ec8] sm:$0xff]  ;;  %v4471_v7 = vld [vmem:[%s16679_s26 + $0x510] sm:$0xff] }
 0x3e4   : > { %v15376_v12 = vcombine.high %v5286_v5, %v5294_v3  ;;  %v15375_v20 = vcombine.low %v5286_v5, %v5294_v3  ;;  %v14561_v21 = vcombine.low %v4471_v7, %v4479_v11  ;;  %v4911_v5 = vld [vmem:[%s16679_s26 + $0x12d0] sm:$0xff] }
 0x3e5   : > { %10749 = vmatpush1.bf16.msra.mxu1 %v15215_v26  ;;  %v14562_v26 = vcombine.high %v4471_v7, %v4479_v11 }
 0x3e6   : > { %10750 = vmatprep.subr.bf16.mxu1 %v15200_v39  ;;  %10796 = vmatpush1.bf16.msra.mxu0 %v14401_v16  ;;  %v5270_v16 = vld [vmem:[%s16679_s26 + $0x1e08] sm:$0xff] }
 0x3e7   : > { %10797 = vmatprep.subr.bf16.mxu0 %v14642_v18  ;;  %v5278_v39 = vld [vmem:[%s16679_s26 + $0x1e48] sm:$0xff]  ;;  %v4455_v18 = vld [vmem:[%s16679_s26 + $0x490] sm:$0xff] }
 0x3e8   : > { %v15360_v22 = vcombine.high %v5270_v16, %v5278_v39  ;;  %v15359_v41 = vcombine.low %v5270_v16, %v5278_v39  ;;  %v14545_v30 = vcombine.low %v4455_v18, %v4463_v19  ;;  %v4679_v16 = vld [vmem:[%s16679_s26 + $0xb90] sm:$0xff] }
 0x3e9   : > { %10751 = vmatpush1.bf16.msra.mxu1 %v15199_v23  ;;  %v14546_v23 = vcombine.high %v4455_v18, %v4463_v19  ;;  %v4687_v39 = vld [vmem:[%s16679_s26 + $0xbd0] sm:$0xff] }
 0x3ea   : > { %10752 = vmatprep.subr.bf16.mxu1 %v15184_v34  ;;  %10798 = vmatpush2.bf16.msra.mxu0 %v14641_v29  ;;  %v5254_v29 = vld [vmem:[%s16679_s26 + $0x1d88] sm:$0xff]  ;;  %v4895_v19 = vld [vmem:[%s16679_s26 + $0x1250] sm:$0xff] }
 0x3eb   : > { %10799 = vmatprep.subr.bf16.mxu0 %v14626_v32  ;;  %v5262_v34 = vld [vmem:[%s16679_s26 + $0x1dc8] sm:$0xff]  ;;  %v4439_v32 = vld [vmem:[%s16679_s26 + $0x410] sm:$0xff] }
 0x3ec   : > { %v15344_v47 = vcombine.high %v5254_v29, %v5262_v34  ;;  %v15343_v55 = vcombine.low %v5254_v29, %v5262_v34  ;;  %v14529_v56 = vcombine.low %v4439_v32, %v4447_v36 }
 0x3ed   : > { %10753 = vmatpush1.bf16.msra.mxu1 %v15183_v10  ;;  %v14530_v10 = vcombine.high %v4439_v32, %v4447_v36  ;;  %v4663_v32 = vld [vmem:[%s16679_s26 + $0xb10] sm:$0xff] }
 0x3ee   : > { %10754 = vmatprep.subr.bf16.mxu1 %v15168_v51  ;;  %10800 = vmatpush2.bf16.msra.mxu0 %v14625_v58  ;;  %v5238_v58 = vld [vmem:[%s16679_s26 + $0x1d08] sm:$0xff]  ;;  %v4871_v36 = vld [vmem:[%s16679_s26 + $0x1190] sm:$0xff] }
 0x3ef   : > { %10801 = vmatprep.subr.bf16.mxu0 %v14610_v52  ;;  %v5246_v51 = vld [vmem:[%s16679_s26 + $0x1d48] sm:$0xff]  ;;  %v4935_v52 = vld [vmem:[%s16679_s26 + $0x1390] sm:$0xff] }
 0x3f0   : > { %v15328_v57 = vcombine.high %v5238_v58, %v5246_v51  ;;  %v15327_v59 = vcombine.low %v5238_v58, %v5246_v51  ;;  %v15025_v31 = vcombine.low %v4935_v52, %v4943_v53  ;;  %v4647_v51 = vld [vmem:[%s16679_s26 + $0xa90] sm:$0xff] }
 0x3f1   : > { %10755 = vmatpush1.bf16.msra.mxu1 %v15167_v24  ;;  %v15026_v24 = vcombine.high %v4935_v52, %v4943_v53  ;;  %v4655_v52 = vld [vmem:[%s16679_s26 + $0xad0] sm:$0xff] }
 0x3f2   : > { %10756 = vmatprep.subr.bf16.mxu1 %v15408_v50  ;;  %10802 = vmatpush2.bf16.msra.mxu0 %v14609_v37  ;;  %v5222_v37 = vld [vmem:[%s16679_s26 + $0x1c88] sm:$0xff]  ;;  %v4855_v53 = vld [vmem:[%s16679_s26 + $0x1110] sm:$0xff] }
 0x3f3   : > { %10803 = vmatprep.subr.bf16.mxu0 %v14594_v60  ;;  %v5230_v50 = vld [vmem:[%s16679_s26 + $0x1cc8] sm:$0xff]  ;;  %v4919_v60 = vld [vmem:[%s16679_s26 + $0x1310] sm:$0xff] }
 0x3f4   : > { %v15312_v15 = vcombine.high %v5222_v37, %v5230_v50  ;;  %v15311_v7 = vcombine.low %v5222_v37, %v5230_v50  ;;  %v4631_v50 = vld [vmem:[%s16679_s26 + $0xa10] sm:$0xff] }
 0x3f5   : > { %10757 = vmatpush2.bf16.msra.mxu1 %v15407_v44  ;;  %v15010_v44 = vcombine.high %v4919_v60, %v4927_v14 }
 0x3f6   : > { %10758 = vmatprep.subr.bf16.mxu1 %v15392_v62  ;;  %10804 = vmatpush2.bf16.msra.mxu0 %v14593_v49  ;;  %v5206_v49 = vld [vmem:[%s16679_s26 + $0x1c08] sm:$0xff] }
 0x3f7   : > { %10805 = vmatprep.subr.bf16.mxu0 %v14578_v4  ;;  %v5214_v62 = vld [vmem:[%s16679_s26 + $0x1c48] sm:$0xff]  ;;  %v4903_v4 = vld [vmem:[%s16679_s26 + $0x1290] sm:$0xff] }
 0x3f9   : > { %10759 = vmatpush2.bf16.msra.mxu1 %v15391_v6  ;;  %v15009_v6 = vcombine.low %v4919_v60, %v4927_v14  ;;  %v4639_v60 = vld [vmem:[%s16679_s26 + $0xa50] sm:$0xff] }
 0x3fa   : > { %10760 = vmatprep.subr.bf16.mxu1 %v15376_v12  ;;  %10806 = vmatpush2.bf16.msra.mxu0 %v14577_v8  ;;  %v15296_v8 = vcombine.high %v5206_v49, %v5214_v62  ;;  %v4839_v14 = vld [vmem:[%s16679_s26 + $0x1090] sm:$0xff] }
 0x3fb   : > { %10807 = vmatprep.subr.bf16.mxu0 %v14562_v26  ;;  %v14994_v26 = vcombine.high %v4903_v4, %v4911_v5 }
 0x3fd   : > { %10761 = vmatpush2.bf16.msra.mxu1 %v15375_v20 }
 0x3fe   : > { %10762 = vmatprep.subr.bf16.mxu1 %v15360_v22  ;;  %10808 = vmatpush2.bf16.msra.mxu0 %v14561_v21  ;;  %v15295_v21 = vcombine.low %v5206_v49, %v5214_v62  ;;  %v14993_v22 = vcombine.low %v4903_v4, %v4911_v5  ;;  %v4615_v62 = vld [vmem:[%s16679_s26 + $0x990] sm:$0xff] }
 0x3ff   : > { %10809 = vmatprep.subr.bf16.mxu0 %v14546_v23  ;;  %v14770_v23 = vcombine.high %v4679_v16, %v4687_v39  ;;  %v4623_v4 = vld [vmem:[%s16679_s26 + $0x9d0] sm:$0xff] }
 0x400   : > { %v4823_v5 = vld [vmem:[%s16679_s26 + $0x1010] sm:$0xff] }
 0x401   : > { %10763 = vmatpush2.bf16.msra.mxu1 %v15359_v41  ;;  %v4879_v41 = vld [vmem:[%s16679_s26 + $0x11d0] sm:$0xff] }
 0x402   : > { %10764 = vmatprep.subr.bf16.mxu1 %v15344_v47  ;;  %10810 = vmatpush2.bf16.msra.mxu0 %v14545_v30  ;;  %v14769_v30 = vcombine.low %v4679_v16, %v4687_v39  ;;  %v14962_v58 = vcombine.high %v4871_v36, %v4879_v41  ;;  %v4607_v16 = vld [vmem:[%s16679_s26 + $0x950] sm:$0xff] }
 0x403   : > { %10811 = vmatprep.subr.bf16.mxu0 %v14530_v10  ;;  %v5063_v39 = vld [vmem:[%s16679_s26 + $0x1790] sm:$0xff] }
 0x405   : > { %10765 = vmatpush2.bf16.msra.mxu1 %v15343_v55  ;;  %v4863_v55 = vld [vmem:[%s16679_s26 + $0x1150] sm:$0xff] }
 0x406   : > { %10766 = vmatprep.subr.bf16.mxu1 %v15328_v57  ;;  %10812 = vmatpush2.bf16.msra.mxu0 %v14529_v56  ;;  %v14961_v57 = vcombine.low %v4871_v36, %v4879_v41  ;;  %v14946_v37 = vcombine.high %v4855_v53, %v4863_v55 }
 0x407   : > { %10863 = vmatprep.subr.bf16.mxu0 %v15026_v24  ;;  %v14738_v24 = vcombine.high %v4647_v51, %v4655_v52 }
 0x408   : > { %v10569_v3 = vpop.f32.mrf.mxu0 }
 0x409   : > { %10767 = vmatpush2.bf16.msra.mxu1 %v15327_v59  ;;  %10814 = vmatmul.mubr.bf16.vlgmr.msra.gmra.mxu0 %v17442_v42  ;;  %v17740_v11 = vadd.f32 %v10569_v3, %v17667_v63  ;;  %v4887_v63 = vld [vmem:[%s16679_s26 + $0x1210] sm:$0xff] }
 0x40a   : > { %10768 = vmatprep.subr.bf16.mxu1 %v15312_v15  ;;  %10864 = vmatpush1.bf16.msra.mxu0 %v15025_v31  ;;  %v10571_v12 = vpop.f32.mrf.mxu0  ;;  %v14978_v34 = vcombine.high %v4887_v63, %v4895_v19  ;;  %v14977_v47 = vcombine.low %v4887_v63, %v4895_v19  ;;  %v4847_v59 = vld [vmem:[%s16679_s26 + $0x10d0] sm:$0xff]  ;;  %v14737_v31 = vcombine.low %v4647_v51, %v4655_v52 }
 0x40b   : > { %10895 = vmatprep.mubr.bf16.mxu0 %v17476_v40  ;;  %10865 = vmatprep.subr.bf16.mxu0 %v15010_v44  ;;  %v17746_v18 = vadd.f32 %v10571_v12, %v17674_v13  ;;  %v4671_v13 = vld [vmem:[%s16679_s26 + $0xb50] sm:$0xff]  ;;  %v14945_v15 = vcombine.low %v4855_v53, %v4863_v55  ;;  %v14722_v44 = vcombine.high %v4631_v50, %v4639_v60 }
 0x40c   : > { %v10573_v20 = vpop.f32.mrf.mxu0  ;;  %v14754_v10 = vcombine.high %v4663_v32, %v4671_v13  ;;  %v14753_v56 = vcombine.low %v4663_v32, %v4671_v13  ;;  %v14930_v49 = vcombine.high %v4839_v14, %v4847_v59  ;;  %v4831_v3 = vld [vmem:[%s16679_s26 + $0x1050] sm:$0xff]  ;;  %v14705_v19 = vcombine.low %v4615_v62, %v4623_v4 }
 0x40d   : > { %10769 = vmatpush2.bf16.msra.mxu1 %v15311_v7  ;;  %v14721_v7 = vcombine.low %v4631_v50, %v4639_v60  ;;  %v14914_v12 = vcombine.high %v4823_v5, %v4831_v3  ;;  %v5071_v63 = vld [vmem:[%s16679_s26 + $0x17d0] sm:$0xff]  ;;  %v14913_v20 = vcombine.low %v4823_v5, %v4831_v3 }
 0x40e   : > { %10770 = vmatprep.subr.bf16.mxu1 %v15296_v8  ;;  %10866 = vmatpush1.bf16.msra.mxu0 %v15009_v6  ;;  %v10574_v29 = vpop.f32.mrf.mxu0  ;;  %v14929_v6 = vcombine.low %v4839_v14, %v4847_v59  ;;  %v14706_v8 = vcombine.high %v4615_v62, %v4623_v4  ;;  %v5055_v32 = vld [vmem:[%s16679_s26 + $0x1750] sm:$0xff]  ;;  %v15153_v36 = vcombine.low %v5063_v39, %v5071_v63 }
 0x40f   : > { %10867 = vmatprep.subr.bf16.mxu0 %v14994_v26  ;;  %v4599_v26 = vld [vmem:[%s16679_s26 + $0x910] sm:$0xff] }
 0x410   : > { %v4591_v29 = vld [vmem:[%s16679_s26 + $0x8d0] sm:$0xff]  ;;  %v14689_v13 = vcombine.low %v4599_v26, %v4607_v16 }
 0x411   : > { %10771 = vmatpush2.bf16.msra.mxu1 %v15295_v21  ;;  %v14690_v21 = vcombine.high %v4599_v26, %v4607_v16  ;;  %v5039_v51 = vld [vmem:[%s16679_s26 + $0x16d0] sm:$0xff] }
 0x412   : > { %10822 = vmatprep.subr.bf16.mxu1 %v14770_v23  ;;  %10868 = vmatpush1.bf16.msra.mxu0 %v14993_v22  ;;  %v15154_v22 = vcombine.high %v5063_v39, %v5071_v63  ;;  %v4583_v23 = vld [vmem:[%s16679_s26 + $0x890] sm:$0xff] }
 0x413   : > { %10869 = vmatprep.subr.bf16.mxu0 %v14978_v34  ;;  %v5047_v34 = vld [vmem:[%s16679_s26 + $0x1710] sm:$0xff]  ;;  %v14674_v41 = vcombine.high %v4583_v23, %v4591_v29  ;;  %v14673_v52 = vcombine.low %v4583_v23, %v4591_v29 }
 0x414   : > { %10773 = vmatmul.mubr.bf16.vlgmr.msra.gmra.mxu1 %v17602_v28  ;;  %v15137_v53 = vcombine.low %v5047_v34, %v5055_v32  ;;  %v5023_v50 = vld [vmem:[%s16679_s26 + $0x1650] sm:$0xff] }
 0x415   : > { %10823 = vmatpush1.bf16.msra.mxu1 %v14769_v30  ;;  %10854 = vmatprep.mubr.bf16.mxu1 %v17359_v9  ;;  %v15138_v30 = vcombine.high %v5047_v34, %v5055_v32  ;;  %v5007_v62 = vld [vmem:[%s16679_s26 + $0x15d0] sm:$0xff] }
 0x416   : > { %10824 = vmatprep.subr.bf16.mxu1 %v14754_v10  ;;  %10870 = vmatpush1.bf16.msra.mxu0 %v14977_v47  ;;  %v4567_v47 = vld [vmem:[%s16679_s26 + $0x810] sm:$0xff] }
 0x417   : > { %10871 = vmatprep.subr.bf16.mxu0 %v14962_v58  ;;  %v4575_v10 = vld [vmem:[%s16679_s26 + $0x850] sm:$0xff] }
 0x418   : > { %v5031_v58 = vld [vmem:[%s16679_s26 + $0x1690] sm:$0xff]  ;;  %v14658_v55 = vcombine.high %v4567_v47, %v4575_v10  ;;  %v14657_v60 = vcombine.low %v4567_v47, %v4575_v10 }
 0x419   : > { %10825 = vmatpush1.bf16.msra.mxu1 %v14753_v56  ;;  %v15122_v56 = vcombine.high %v5031_v58, %v5039_v51  ;;  %v15121_v14 = vcombine.low %v5031_v58, %v5039_v51  ;;  %v4991_v26 = vld [vmem:[%s16679_s26 + $0x1550] sm:$0xff] }
 0x41a   : > { %10826 = vmatprep.subr.bf16.mxu1 %v14738_v24  ;;  %10872 = vmatpush1.bf16.msra.mxu0 %v14961_v57  ;;  %v4807_v57 = vld [vmem:[%s16679_s26 + $0xf90] sm:$0xff] }
 0x41b   : > { %10873 = vmatprep.subr.bf16.mxu0 %v14946_v37  ;;  %v4815_v24 = vld [vmem:[%s16679_s26 + $0xfd0] sm:$0xff] }
 0x41c   : > { %v5015_v37 = vld [vmem:[%s16679_s26 + $0x1610] sm:$0xff]  ;;  %v14898_v59 = vcombine.high %v4807_v57, %v4815_v24  ;;  %v14897_v4 = vcombine.low %v4807_v57, %v4815_v24  ;;  %v4432_v57 = vld [vmem:[%s16679_s26 + $0x3d8] sm:$0xff] }
 0x41d   : > { %10827 = vmatpush1.bf16.msra.mxu1 %v14737_v31  ;;  %v15106_v31 = vcombine.high %v5015_v37, %v5023_v50  ;;  %v15105_v5 = vcombine.low %v5015_v37, %v5023_v50  ;;  %v4975_v23 = vld [vmem:[%s16679_s26 + $0x14d0] sm:$0xff] }
 0x41e   : > { %10828 = vmatprep.subr.bf16.mxu1 %v14722_v44  ;;  %10874 = vmatpush1.bf16.msra.mxu0 %v14945_v15  ;;  %v4791_v15 = vld [vmem:[%s16679_s26 + $0xf10] sm:$0xff] }
 0x41f   : > { %10875 = vmatprep.subr.bf16.mxu0 %v14930_v49  ;;  %v4799_v44 = vld [vmem:[%s16679_s26 + $0xf50] sm:$0xff] }
 0x420   : > { %v4999_v49 = vld [vmem:[%s16679_s26 + $0x1590] sm:$0xff]  ;;  %v14882_v3 = vcombine.high %v4791_v15, %v4799_v44  ;;  %v14881_v16 = vcombine.low %v4791_v15, %v4799_v44  ;;  %v4416_v15 = vld [vmem:[%s16679_s26 + $0x358] sm:$0xff] }
 0x421   : > { %10829 = vmatpush1.bf16.msra.mxu1 %v14721_v7  ;;  %v15090_v7 = vcombine.high %v4999_v49, %v5007_v62  ;;  %v15089_v39 = vcombine.low %v4999_v49, %v5007_v62  ;;  %v4959_v47 = vld [vmem:[%s16679_s26 + $0x1450] sm:$0xff] }
 0x422   : > { %10830 = vmatprep.subr.bf16.mxu1 %v14706_v8  ;;  %10876 = vmatpush1.bf16.msra.mxu0 %v14929_v6  ;;  %v4775_v6 = vld [vmem:[%s16679_s26 + $0xe90] sm:$0xff] }
 0x423   : > { %10877 = vmatprep.subr.bf16.mxu0 %v14914_v12  ;;  %v4783_v8 = vld [vmem:[%s16679_s26 + $0xed0] sm:$0xff] }
 0x424   : > { %v4983_v12 = vld [vmem:[%s16679_s26 + $0x1510] sm:$0xff]  ;;  %v14866_v63 = vcombine.high %v4775_v6, %v4783_v8  ;;  %v14865_v29 = vcombine.low %v4775_v6, %v4783_v8  ;;  %v4400_v6 = vld [vmem:[%s16679_s26 + $0x2d8] sm:$0xff] }
 0x425   : > { %10831 = vmatpush1.bf16.msra.mxu1 %v14705_v19  ;;  %v15074_v19 = vcombine.high %v4983_v12, %v4991_v26  ;;  %v15073_v34 = vcombine.low %v4983_v12, %v4991_v26 }
 0x426   : > { %10832 = vmatprep.subr.bf16.mxu1 %v14690_v21  ;;  %10878 = vmatpush1.bf16.msra.mxu0 %v14913_v20  ;;  %v4759_v20 = vld [vmem:[%s16679_s26 + $0xe10] sm:$0xff] }
 0x427   : > { %10879 = vmatprep.subr.bf16.mxu0 %v15154_v22  ;;  %v4767_v21 = vld [vmem:[%s16679_s26 + $0xe50] sm:$0xff] }
 0x428   : > { %v4967_v22 = vld [vmem:[%s16679_s26 + $0x1490] sm:$0xff]  ;;  %v14850_v32 = vcombine.high %v4759_v20, %v4767_v21  ;;  %v14849_v10 = vcombine.low %v4759_v20, %v4767_v21  ;;  %v4376_v21 = vld [vmem:[%s16679_s26 + $0x218] sm:$0xff] }
 0x429   : > { %10833 = vmatpush1.bf16.msra.mxu1 %v14689_v13  ;;  %v15058_v13 = vcombine.high %v4967_v22, %v4975_v23  ;;  %v15057_v58 = vcombine.low %v4967_v22, %v4975_v23  ;;  %v5199_v20 = vld [vmem:[%s16679_s26 + $0x1bd0] sm:$0xff]  ;;  %v4384_v22 = vld [vmem:[%s16679_s26 + $0x258] sm:$0xff] }
 0x42a   : > { %10834 = vmatprep.subr.bf16.mxu1 %v14674_v41  ;;  %10880 = vmatpush2.bf16.msra.mxu0 %v15153_v36  ;;  %v4743_v36 = vld [vmem:[%s16679_s26 + $0xd90] sm:$0xff] }
 0x42b   : > { %10881 = vmatprep.subr.bf16.mxu0 %v15138_v30  ;;  %v4751_v41 = vld [vmem:[%s16679_s26 + $0xdd0] sm:$0xff] }
 0x42c   : > { %v4951_v30 = vld [vmem:[%s16679_s26 + $0x1410] sm:$0xff]  ;;  %v14834_v51 = vcombine.high %v4743_v36, %v4751_v41  ;;  %v14833_v24 = vcombine.low %v4743_v36, %v4751_v41  ;;  %v14468_v36 = vcombine.high %v4376_v21, %v4384_v22 }
 0x42d   : > { %10835 = vmatpush1.bf16.msra.mxu1 %v14673_v52  ;;  %v15042_v52 = vcombine.high %v4951_v30, %v4959_v47  ;;  %v15041_v37 = vcombine.low %v4951_v30, %v4959_v47  ;;  %v5175_v41 = vld [vmem:[%s16679_s26 + $0x1b10] sm:$0xff]  ;;  %v4360_v47 = vld [vmem:[%s16679_s26 + $0x198] sm:$0xff] }
 0x42e   : > { %10836 = vmatprep.subr.bf16.mxu1 %v14658_v55  ;;  %10882 = vmatpush2.bf16.msra.mxu0 %v15137_v53  ;;  %v4727_v53 = vld [vmem:[%s16679_s26 + $0xd10] sm:$0xff] }
 0x42f   : > { %10883 = vmatprep.subr.bf16.mxu0 %v15122_v56  ;;  %v4735_v55 = vld [vmem:[%s16679_s26 + $0xd50] sm:$0xff]  ;;  %v4424_v56 = vld [vmem:[%s16679_s26 + $0x398] sm:$0xff] }
 0x430   : > { %v14818_v50 = vcombine.high %v4727_v53, %v4735_v55  ;;  %v14817_v44 = vcombine.low %v4727_v53, %v4735_v55  ;;  %v14515_v49 = vcombine.low %v4424_v56, %v4432_v57  ;;  %v5183_v30 = vld [vmem:[%s16679_s26 + $0x1b50] sm:$0xff] }
 0x431   : > { %10837 = vmatpush1.bf16.msra.mxu1 %v14657_v60  ;;  %v14516_v60 = vcombine.high %v4424_v56, %v4432_v57  ;;  %v5159_v55 = vld [vmem:[%s16679_s26 + $0x1a90] sm:$0xff] }
 0x432   : > { %10838 = vmatprep.subr.bf16.mxu1 %v14898_v59  ;;  %10884 = vmatpush2.bf16.msra.mxu0 %v15121_v14  ;;  %v4711_v14 = vld [vmem:[%s16679_s26 + $0xc90] sm:$0xff] }
 0x433   : > { %10885 = vmatprep.subr.bf16.mxu0 %v15106_v31  ;;  %v4719_v59 = vld [vmem:[%s16679_s26 + $0xcd0] sm:$0xff]  ;;  %v4408_v31 = vld [vmem:[%s16679_s26 + $0x318] sm:$0xff] }
 0x434   : > { %v14802_v62 = vcombine.high %v4711_v14, %v4719_v59  ;;  %v14801_v12 = vcombine.low %v4711_v14, %v4719_v59  ;;  %v14499_v26 = vcombine.low %v4408_v31, %v4416_v15  ;;  %v5167_v56 = vld [vmem:[%s16679_s26 + $0x1ad0] sm:$0xff] }
 0x435   : > { %10839 = vmatpush2.bf16.msra.mxu1 %v14897_v4  ;;  %v14500_v4 = vcombine.high %v4408_v31, %v4416_v15  ;;  %v15250_v31 = vcombine.high %v5159_v55, %v5167_v56 }
 0x436   : > { %10840 = vmatprep.subr.bf16.mxu1 %v14882_v3  ;;  %10886 = vmatpush2.bf16.msra.mxu0 %v15105_v5  ;;  %v4695_v5 = vld [vmem:[%s16679_s26 + $0xc10] sm:$0xff] }
 0x437   : > { %10887 = vmatprep.subr.bf16.mxu0 %v15090_v7  ;;  %v4703_v3 = vld [vmem:[%s16679_s26 + $0xc50] sm:$0xff]  ;;  %v4392_v7 = vld [vmem:[%s16679_s26 + $0x298] sm:$0xff] }
 0x439   : > { %10841 = vmatpush2.bf16.msra.mxu1 %v14881_v16  ;;  %v14786_v16 = vcombine.high %v4695_v5, %v4703_v3 }
 0x43a   : > { %10842 = vmatprep.subr.bf16.mxu1 %v14866_v63  ;;  %10888 = vmatpush2.bf16.msra.mxu0 %v15089_v39  ;;  %v14484_v63 = vcombine.high %v4392_v7, %v4400_v6 }
 0x43b   : > { %10889 = vmatprep.subr.bf16.mxu0 %v15074_v19  ;;  %v5191_v19 = vld [vmem:[%s16679_s26 + $0x1b90] sm:$0xff] }
 0x43d   : > { %10843 = vmatpush2.bf16.msra.mxu1 %v14865_v29  ;;  %v14785_v29 = vcombine.low %v4695_v5, %v4703_v3  ;;  %v4336_v5 = vld [vmem:[%s16679_s26 + $0xd8] sm:$0xff] }
 0x43e   : > { %10844 = vmatprep.subr.bf16.mxu1 %v14850_v32  ;;  %10890 = vmatpush2.bf16.msra.mxu0 %v15073_v34  ;;  %v14483_v34 = vcombine.low %v4392_v7, %v4400_v6  ;;  %v15282_v32 = vcombine.high %v5191_v19, %v5199_v20  ;;  %v15249_v7 = vcombine.low %v5159_v55, %v5167_v56 }
 0x43f   : > { %10891 = vmatprep.subr.bf16.mxu0 %v15058_v13 }
 0x441   : > { %10845 = vmatpush2.bf16.msra.mxu1 %v14849_v10  ;;  %v4368_v10 = vld [vmem:[%s16679_s26 + $0x1d8] sm:$0xff] }
 0x442   : > { %10846 = vmatprep.subr.bf16.mxu1 %v14834_v51  ;;  %10892 = vmatpush2.bf16.msra.mxu0 %v15057_v58  ;;  %v15281_v58 = vcombine.low %v5191_v19, %v5199_v20  ;;  %v14467_v51 = vcombine.low %v4376_v21, %v4384_v22  ;;  %v14452_v53 = vcombine.high %v4360_v47, %v4368_v10  ;;  %v4312_v19 = vld [vmem:[%s16679_s26 + $0x18] sm:$0xff] }
 0x443   : > { %10893 = vmatprep.subr.bf16.mxu0 %v15042_v52  ;;  %v15266_v52 = vcombine.high %v5175_v41, %v5183_v30  ;;  %v14451_v59 = vcombine.low %v4360_v47, %v4368_v10  ;;  %v4320_v20 = vld [vmem:[%s16679_s26 + $0x58] sm:$0xff] }
 0x445   : > { %10847 = vmatpush2.bf16.msra.mxu1 %v14833_v24  ;;  %v4344_v24 = vld [vmem:[%s16679_s26 + $0x118] sm:$0xff] }
 0x446   : > { %10848 = vmatprep.subr.bf16.mxu1 %v14818_v50  ;;  %10894 = vmatpush2.bf16.msra.mxu0 %v15041_v37  ;;  %v4352_v37 = vld [vmem:[%s16679_s26 + $0x158] sm:$0xff] }
 0x447   : > { %10945 = vmatprep.subr.bf16.mxu0 %v14516_v60  ;;  %v15265_v60 = vcombine.low %v5175_v41, %v5183_v30  ;;  %v14403_v30 = vcombine.low %v4312_v19, %v4320_v20 }
 0x448   : > { %v17812_v8 = vpop.f32.mrf.mxu0 }
 0x449   : > { %10849 = vmatpush2.bf16.msra.mxu1 %v14817_v44  ;;  %10896 = vmatmul.mubr.bf16.vlgmr.msra.gmra.mxu0 %v17532_v2  ;;  %v14436_v44 = vcombine.high %v4344_v24, %v4352_v37 }
 0x44a   : > { %10850 = vmatprep.subr.bf16.mxu1 %v14802_v62  ;;  %10946 = vmatpush1.bf16.msra.mxu0 %v14515_v49  ;;  %v17816_v39 = vpop.f32.mrf.mxu0  ;;  %v5143_v49 = vld [vmem:[%s16679_s26 + $0x1a10] sm:$0xff] }
 0x44b   : > { %10977 = vmatprep.mubr.bf16.mxu0 %v17354_v43  ;;  %10947 = vmatprep.subr.bf16.mxu0 %v14500_v4  ;;  %v4328_v4 = vld [vmem:[%s16679_s26 + $0x98] sm:$0xff] }
 0x44c   : > { %v10655_v23 = vpop.f32.mrf.mxu0  ;;  %v14419_v22 = vcombine.low %v4328_v4, %v4336_v5 }
 0x44d   : > { %10851 = vmatpush2.bf16.msra.mxu1 %v14801_v12 }
 0x44e   : > { %10852 = vmatprep.subr.bf16.mxu1 %v14786_v16  ;;  %10948 = vmatpush1.bf16.msra.mxu0 %v14499_v26  ;;  %v10656_v13 = vpop.f32.mrf.mxu0  ;;  %v14420_v26 = vcombine.high %v4328_v4, %v4336_v5  ;;  %v5127_v16 = vld [vmem:[%s16679_s26 + $0x1990] sm:$0xff]  ;;  %v4504_v5 = vld [vmem:[%s16679_s26 + $0x618] sm:$0xff] }
 0x44f   : > { %10949 = vmatprep.subr.bf16.mxu0 %v14484_v63  ;;  %v5135_v63 = vld [vmem:[%s16679_s26 + $0x19d0] sm:$0xff]  ;;  %v4552_v13 = vld [vmem:[%s16679_s26 + $0x798] sm:$0xff] }
 0x450   : > { %v15218_v23 = vcombine.high %v5127_v16, %v5135_v63  ;;  %v15217_v41 = vcombine.low %v5127_v16, %v5135_v63  ;;  %v5327_v4 = vld [vmem:[%s16679_s26 + $0x1fd0] sm:$0xff] }
 0x451   : > { %10853 = vmatpush2.bf16.msra.mxu1 %v14785_v29  ;;  %v14404_v29 = vcombine.high %v4312_v19, %v4320_v20  ;;  %v5303_v16 = vld [vmem:[%s16679_s26 + $0x1f10] sm:$0xff]  ;;  %v4488_v19 = vld [vmem:[%s16679_s26 + $0x598] sm:$0xff] }
 0x452   : > { %10904 = vmatprep.subr.bf16.mxu1 %v15282_v32  ;;  %10950 = vmatpush1.bf16.msra.mxu0 %v14483_v34  ;;  %v5111_v34 = vld [vmem:[%s16679_s26 + $0x1910] sm:$0xff]  ;;  %v4496_v20 = vld [vmem:[%s16679_s26 + $0x5d8] sm:$0xff] }
 0x453   : > { %10951 = vmatprep.subr.bf16.mxu0 %v14468_v36  ;;  %v5119_v32 = vld [vmem:[%s16679_s26 + $0x1950] sm:$0xff]  ;;  %v4560_v36 = vld [vmem:[%s16679_s26 + $0x7d8] sm:$0xff] }
 0x454   : > { %10855 = vmatmul.mubr.bf16.vlgmr.msra.gmra.mxu1 %v17446_v61  ;;  %v10610_v57 = vpop.f32.mrf.mxu1  ;;  %v15202_v47 = vcombine.high %v5111_v34, %v5119_v32  ;;  %v14644_v10 = vcombine.high %v4552_v13, %v4560_v36  ;;  %v15201_v55 = vcombine.low %v5111_v34, %v5119_v32  ;;  %v14643_v56 = vcombine.low %v4552_v13, %v4560_v36  ;;  %v5311_v63 = vld [vmem:[%s16679_s26 + $0x1f50] sm:$0xff]  ;;  %v4472_v13 = vld [vmem:[%s16679_s26 + $0x518] sm:$0xff] }
 0x455   : > { %v17832_v50 = vadd.f32 %v10610_v57, %v17740_v11  ;;  %10905 = vmatpush1.bf16.msra.mxu1 %v15281_v58  ;;  %10936 = vmatprep.mubr.bf16.mxu1 %v17600_v25  ;;  %v5151_v11 = vld [vmem:[%s16679_s26 + $0x1a50] sm:$0xff]  ;;  %v4480_v36 = vld [vmem:[%s16679_s26 + $0x558] sm:$0xff] }
 0x456   : > { %v10612_v14 = vpop.f32.mrf.mxu1  ;;  %10906 = vmatprep.subr.bf16.mxu1 %v15266_v52  ;;  %10952 = vmatpush1.bf16.msra.mxu0 %v14467_v51  ;;  %v15234_v12 = vcombine.high %v5143_v49, %v5151_v11  ;;  %v15233_v21 = vcombine.low %v5143_v49, %v5151_v11  ;;  %v5095_v58 = vld [vmem:[%s16679_s26 + $0x1890] sm:$0xff]  ;;  %v4536_v52 = vld [vmem:[%s16679_s26 + $0x718] sm:$0xff] }
 0x457   : > { %v17836_v15 = vadd.f32 %v10612_v14, %v17746_v18  ;;  %10953 = vmatprep.subr.bf16.mxu0 %v14452_v53  ;;  %v14435_v18 = vcombine.low %v4344_v24, %v4352_v37  ;;  %v5103_v51 = vld [vmem:[%s16679_s26 + $0x18d0] sm:$0xff]  ;;  %v4544_v53 = vld [vmem:[%s16679_s26 + $0x758] sm:$0xff] }
 0x458   : > { %v10614_v62 = vpop.f32.mrf.mxu1  ;;  %v15186_v57 = vcombine.high %v5095_v58, %v5103_v51  ;;  %v14628_v24 = vcombine.high %v4536_v52, %v4544_v53  ;;  %v5079_v37 = vld [vmem:[%s16679_s26 + $0x1810] sm:$0xff]  ;;  %v4520_v14 = vld [vmem:[%s16679_s26 + $0x698] sm:$0xff] }
 0x459   : > { %v11781_v3 = vcombine.low %v17832_v50, %v17836_v15  ;;  %10907 = vmatpush1.bf16.msra.mxu1 %v15265_v60  ;;  %v5087_v60 = vld [vmem:[%s16679_s26 + $0x1850] sm:$0xff] }
 0x45a   : > { %v10615_v6 = vpop.f32.mrf.mxu1  ;;  %10908 = vmatprep.subr.bf16.mxu1 %v15250_v31  ;;  %10954 = vmatpush1.bf16.msra.mxu0 %v14451_v59  ;;  %v4528_v59 = vld [vmem:[%s16679_s26 + $0x6d8] sm:$0xff]  ;;  %v15185_v31 = vcombine.low %v5095_v58, %v5103_v51  ;;  %v15170_v49 = vcombine.high %v5079_v37, %v5087_v60  ;;  %v5319_v62 = vld [vmem:[%s16679_s26 + $0x1f90] sm:$0xff] }
 0x45b   : > { %10955 = vmatprep.subr.bf16.mxu0 %v14436_v44  ;;  %v14627_v44 = vcombine.low %v4536_v52, %v4544_v53  ;;  %v14612_v11 = vcombine.high %v4520_v14, %v4528_v59  ;;  %v15169_v6 = vcombine.low %v5079_v37, %v5087_v60  ;;  %v5287_v34 = vld [vmem:[%s16679_s26 + $0x1e90] sm:$0xff]  ;;  %v4456_v52 = vld [vmem:[%s16679_s26 + $0x498] sm:$0xff] }
 0x45c   : > { %v5295_v32 = vld [vmem:[%s16679_s26 + $0x1ed0] sm:$0xff]  ;;  %v4464_v53 = vld [vmem:[%s16679_s26 + $0x4d8] sm:$0xff] }
 0x45d   : > { %10909 = vmatpush1.bf16.msra.mxu1 %v15249_v7  ;;  %v4512_v7 = vld [vmem:[%s16679_s26 + $0x658] sm:$0xff]  ;;  %v5271_v58 = vld [vmem:[%s16679_s26 + $0x1e10] sm:$0xff] }
 0x45e   : > { %10910 = vmatprep.subr.bf16.mxu1 %v15234_v12  ;;  %10956 = vmatpush1.bf16.msra.mxu0 %v14435_v18  ;;  %v14611_v18 = vcombine.low %v4520_v14, %v4528_v59  ;;  %v15410_v12 = vcombine.high %v5319_v62, %v5327_v4  ;;  %v5279_v51 = vld [vmem:[%s16679_s26 + $0x1e50] sm:$0xff]  ;;  %v4440_v14 = vld [vmem:[%s16679_s26 + $0x418] sm:$0xff] }
 0x45f   : > { %10957 = vmatprep.subr.bf16.mxu0 %v14420_v26  ;;  %v14596_v26 = vcombine.high %v4504_v5, %v4512_v7  ;;  %v5255_v37 = vld [vmem:[%s16679_s26 + $0x1d90] sm:$0xff]  ;;  %v4448_v59 = vld [vmem:[%s16679_s26 + $0x458] sm:$0xff] }
 0x460   : > { %v5263_v60 = vld [vmem:[%s16679_s26 + $0x1dd0] sm:$0xff] }
 0x461   : > { %10911 = vmatpush1.bf16.msra.mxu1 %v15233_v21  ;;  %v15409_v21 = vcombine.low %v5319_v62, %v5327_v4  ;;  %v5239_v62 = vld [vmem:[%s16679_s26 + $0x1d10] sm:$0xff] }
 0x462   : > { %10912 = vmatprep.subr.bf16.mxu1 %v15218_v23  ;;  %10958 = vmatpush1.bf16.msra.mxu0 %v14419_v22  ;;  %v14595_v22 = vcombine.low %v4504_v5, %v4512_v7  ;;  %v15394_v23 = vcombine.high %v5303_v16, %v5311_v63  ;;  %v5247_v4 = vld [vmem:[%s16679_s26 + $0x1d50] sm:$0xff]  ;;  %v4936_v5 = vld [vmem:[%s16679_s26 + $0x1398] sm:$0xff] }
 0x463   : > { %10959 = vmatprep.subr.bf16.mxu0 %v14404_v29  ;;  %v14580_v29 = vcombine.high %v4488_v19, %v4496_v20  ;;  %v4944_v7 = vld [vmem:[%s16679_s26 + $0x13d8] sm:$0xff] }
 0x465   : > { %10913 = vmatpush1.bf16.msra.mxu1 %v15217_v41  ;;  %v15393_v41 = vcombine.low %v5303_v16, %v5311_v63  ;;  %v5223_v16 = vld [vmem:[%s16679_s26 + $0x1c90] sm:$0xff] }
 0x466   : > { %10914 = vmatprep.subr.bf16.mxu1 %v15202_v47  ;;  %10960 = vmatpush1.bf16.msra.mxu0 %v14403_v30  ;;  %v14579_v30 = vcombine.low %v4488_v19, %v4496_v20  ;;  %v15378_v47 = vcombine.high %v5287_v34, %v5295_v32  ;;  %v5231_v63 = vld [vmem:[%s16679_s26 + $0x1cd0] sm:$0xff]  ;;  %v4920_v19 = vld [vmem:[%s16679_s26 + $0x1318] sm:$0xff] }
 0x467   : > { %10961 = vmatprep.subr.bf16.mxu0 %v14644_v10  ;;  %v14564_v10 = vcombine.high %v4472_v13, %v4480_v36  ;;  %v4928_v20 = vld [vmem:[%s16679_s26 + $0x1358] sm:$0xff] }
 0x469   : > { %10915 = vmatpush1.bf16.msra.mxu1 %v15201_v55  ;;  %v15377_v55 = vcombine.low %v5287_v34, %v5295_v32  ;;  %v5207_v34 = vld [vmem:[%s16679_s26 + $0x1c10] sm:$0xff] }
 0x46a   : > { %10916 = vmatprep.subr.bf16.mxu1 %v15186_v57  ;;  %10962 = vmatpush2.bf16.msra.mxu0 %v14643_v56  ;;  %v14563_v56 = vcombine.low %v4472_v13, %v4480_v36  ;;  %v15362_v57 = vcombine.high %v5271_v58, %v5279_v51  ;;  %v5215_v32 = vld [vmem:[%s16679_s26 + $0x1c50] sm:$0xff]  ;;  %v4904_v13 = vld [vmem:[%s16679_s26 + $0x1298] sm:$0xff] }
 0x46b   : > { %10963 = vmatprep.subr.bf16.mxu0 %v14628_v24  ;;  %v14548_v24 = vcombine.high %v4456_v52, %v4464_v53  ;;  %v4912_v36 = vld [vmem:[%s16679_s26 + $0x12d8] sm:$0xff] }
 0x46d   : > { %10917 = vmatpush1.bf16.msra.mxu1 %v15185_v31  ;;  %v15361_v31 = vcombine.low %v5271_v58, %v5279_v51  ;;  %v14996_v51 = vcombine.high %v4904_v13, %v4912_v36 }
 0x46e   : > { %10918 = vmatprep.subr.bf16.mxu1 %v15170_v49  ;;  %10964 = vmatpush2.bf16.msra.mxu0 %v14627_v44  ;;  %v14547_v44 = vcombine.low %v4456_v52, %v4464_v53  ;;  %v15346_v49 = vcombine.high %v5255_v37, %v5263_v60  ;;  %v4680_v52 = vld [vmem:[%s16679_s26 + $0xb98] sm:$0xff] }
 0x46f   : > { %10965 = vmatprep.subr.bf16.mxu0 %v14612_v11  ;;  %v14532_v11 = vcombine.high %v4440_v14, %v4448_v59  ;;  %v4688_v53 = vld [vmem:[%s16679_s26 + $0xbd8] sm:$0xff] }
 0x471   : > { %10919 = vmatpush1.bf16.msra.mxu1 %v15169_v6  ;;  %v15345_v6 = vcombine.low %v5255_v37, %v5263_v60  ;;  %v14995_v37 = vcombine.low %v4904_v13, %v4912_v36  ;;  %v14772_v60 = vcombine.high %v4680_v52, %v4688_v53  ;;  %v4840_v36 = vld [vmem:[%s16679_s26 + $0x1098] sm:$0xff] }
 0x472   : > { %10920 = vmatprep.subr.bf16.mxu1 %v15410_v12  ;;  %10966 = vmatpush2.bf16.msra.mxu0 %v14611_v18  ;;  %v14531_v18 = vcombine.low %v4440_v14, %v4448_v59  ;;  %v15330_v12 = vcombine.high %v5239_v62, %v5247_v4 }
 0x473   : > { %10967 = vmatprep.subr.bf16.mxu0 %v14596_v26  ;;  %v15028_v26 = vcombine.high %v4936_v5, %v4944_v7 }
 0x475   : > { %10921 = vmatpush2.bf16.msra.mxu1 %v15409_v21  ;;  %v15329_v21 = vcombine.low %v5239_v62, %v5247_v4  ;;  %v14771_v62 = vcombine.low %v4680_v52, %v4688_v53  ;;  %v4616_v53 = vld [vmem:[%s16679_s26 + $0x998] sm:$0xff] }
 0x476   : > { %10922 = vmatprep.subr.bf16.mxu1 %v15394_v23  ;;  %10968 = vmatpush2.bf16.msra.mxu0 %v14595_v22  ;;  %v15027_v22 = vcombine.low %v4936_v5, %v4944_v7  ;;  %v15314_v23 = vcombine.high %v5223_v16, %v5231_v63 }
 0x477   : > { %10969 = vmatprep.subr.bf16.mxu0 %v14580_v29  ;;  %v15012_v29 = vcombine.high %v4920_v19, %v4928_v20 }
 0x479   : > { %10923 = vmatpush2.bf16.msra.mxu1 %v15393_v41 }
 0x47a   : > { %10924 = vmatprep.subr.bf16.mxu1 %v15378_v47  ;;  %10970 = vmatpush2.bf16.msra.mxu0 %v14579_v30  ;;  %v15313_v30 = vcombine.low %v5223_v16, %v5231_v63  ;;  %v15011_v47 = vcombine.low %v4920_v19, %v4928_v20  ;;  %v4864_v16 = vld [vmem:[%s16679_s26 + $0x1158] sm:$0xff] }
 0x47b   : > { %10971 = vmatprep.subr.bf16.mxu0 %v14564_v10  ;;  %v15298_v10 = vcombine.high %v5207_v34, %v5215_v32 }
 0x47d   : > { %10925 = vmatpush2.bf16.msra.mxu1 %v15377_v55  ;;  %v4888_v55 = vld [vmem:[%s16679_s26 + $0x1218] sm:$0xff] }
 0x47e   : > { %10926 = vmatprep.subr.bf16.mxu1 %v15362_v57  ;;  %10972 = vmatpush2.bf16.msra.mxu0 %v14563_v56  ;;  %v4896_v56 = vld [vmem:[%s16679_s26 + $0x1258] sm:$0xff] }
 0x47f   : > { %10973 = vmatprep.subr.bf16.mxu0 %v14548_v24  ;;  %v15297_v24 = vcombine.low %v5207_v34, %v5215_v32  ;;  %v14980_v59 = vcombine.high %v4888_v55, %v4896_v56  ;;  %v14979_v4 = vcombine.low %v4888_v55, %v4896_v56  ;;  %v4632_v34 = vld [vmem:[%s16679_s26 + $0xa18] sm:$0xff] }
 0x480   : > { %v4640_v32 = vld [vmem:[%s16679_s26 + $0xa58] sm:$0xff] }
 0x481   : > { %10927 = vmatpush2.bf16.msra.mxu1 %v15361_v31  ;;  %v4664_v31 = vld [vmem:[%s16679_s26 + $0xb18] sm:$0xff]  ;;  %v14724_v52 = vcombine.high %v4632_v34, %v4640_v32 }
 0x482   : > { %10928 = vmatprep.subr.bf16.mxu1 %v15346_v49  ;;  %10974 = vmatpush2.bf16.msra.mxu0 %v14547_v44  ;;  %v4672_v44 = vld [vmem:[%s16679_s26 + $0xb58] sm:$0xff] }
 0x483   : > { %10975 = vmatprep.subr.bf16.mxu0 %v14532_v11  ;;  %v4872_v49 = vld [vmem:[%s16679_s26 + $0x1198] sm:$0xff]  ;;  %v14756_v5 = vcombine.high %v4664_v31, %v4672_v44  ;;  %v14755_v19 = vcombine.low %v4664_v31, %v4672_v44 }
 0x484   : > { %v4880_v11 = vld [vmem:[%s16679_s26 + $0x11d8] sm:$0xff] }
 0x485   : > { %10929 = vmatpush2.bf16.msra.mxu1 %v15345_v6  ;;  %v14964_v7 = vcombine.high %v4872_v49, %v4880_v11  ;;  %v4648_v6 = vld [vmem:[%s16679_s26 + $0xa98] sm:$0xff] }
 0x486   : > { %10930 = vmatprep.subr.bf16.mxu1 %v15330_v12  ;;  %10976 = vmatpush2.bf16.msra.mxu0 %v14531_v18  ;;  %v4656_v18 = vld [vmem:[%s16679_s26 + $0xad8] sm:$0xff] }
 0x487   : > { %11027 = vmatprep.subr.bf16.mxu0 %v15028_v26  ;;  %v4856_v26 = vld [vmem:[%s16679_s26 + $0x1118] sm:$0xff] }
 0x488   : > { %v4624_v55 = vld [vmem:[%s16679_s26 + $0x9d8] sm:$0xff] }
 0x489   : > { %10931 = vmatpush2.bf16.msra.mxu1 %v15329_v21  ;;  %v10733_v41 = vpop.f32.mrf.mxu0  ;;  %10978 = vmatmul.mubr.bf16.vlgmr.msra.gmra.mxu0 %v17442_v42  ;;  %v14963_v21 = vcombine.low %v4872_v49, %v4880_v11  ;;  %v4824_v56 = vld [vmem:[%s16679_s26 + $0x1018] sm:$0xff]  ;;  %v14707_v49 = vcombine.low %v4616_v53, %v4624_v55 }
 0x48a   : > { %10932 = vmatprep.subr.bf16.mxu1 %v15314_v23  ;;  %11028 = vmatpush1.bf16.msra.mxu0 %v15027_v22  ;;  %v14740_v22 = vcombine.high %v4648_v6, %v4656_v18  ;;  %v5064_v31 = vld [vmem:[%s16679_s26 + $0x1798] sm:$0xff] }
 0x48b   : > { %11059 = vmatprep.mubr.bf16.mxu0 %v17476_v40  ;;  %v10735_v58 = vpop.f32.mrf.mxu0  ;;  %11029 = vmatprep.subr.bf16.mxu0 %v15012_v29  ;;  %v14948_v29 = vcombine.high %v4856_v26, %v4864_v16  ;;  %v5072_v44 = vld [vmem:[%s16679_s26 + $0x17d8] sm:$0xff] }
 0x48d   : > { %10933 = vmatpush2.bf16.msra.mxu1 %v15313_v30  ;;  %v10737_v57 = vpop.f32.mrf.mxu0  ;;  %v4848_v30 = vld [vmem:[%s16679_s26 + $0x10d8] sm:$0xff] }
 0x48e   : > { %10934 = vmatprep.subr.bf16.mxu1 %v15298_v10  ;;  %11030 = vmatpush1.bf16.msra.mxu0 %v15011_v47  ;;  %v14739_v47 = vcombine.low %v4648_v6, %v4656_v18  ;;  %v4832_v57 = vld [vmem:[%s16679_s26 + $0x1058] sm:$0xff] }
 0x48f   : > { %v10738_v14 = vpop.f32.mrf.mxu0  ;;  %11031 = vmatprep.subr.bf16.mxu0 %v14996_v51  ;;  %v14915_v11 = vcombine.low %v4824_v56, %v4832_v57  ;;  %v5048_v6 = vld [vmem:[%s16679_s26 + $0x1718] sm:$0xff] }
 0x490   : > { %v4600_v14 = vld [vmem:[%s16679_s26 + $0x918] sm:$0xff] }
 0x491   : > { %10935 = vmatpush2.bf16.msra.mxu1 %v15297_v24  ;;  %v14723_v24 = vcombine.low %v4632_v34, %v4640_v32  ;;  %v5056_v18 = vld [vmem:[%s16679_s26 + $0x1758] sm:$0xff] }
 0x492   : > { %10986 = vmatprep.subr.bf16.mxu1 %v14772_v60  ;;  %11032 = vmatpush1.bf16.msra.mxu0 %v14995_v37  ;;  %v14708_v37 = vcombine.high %v4616_v53, %v4624_v55  ;;  %v14916_v60 = vcombine.high %v4824_v56, %v4832_v57  ;;  %v4792_v53 = vld [vmem:[%s16679_s26 + $0xf18] sm:$0xff] }
 0x493   : > { %11033 = vmatprep.subr.bf16.mxu0 %v14980_v59  ;;  %v4608_v59 = vld [vmem:[%s16679_s26 + $0x958] sm:$0xff] }
 0x494   : > { %v10692_v12 = vpop.f32.mrf.mxu1  ;;  %10937 = vmatmul.mubr.bf16.vlgmr.msra.gmra.mxu1 %v17602_v28  ;;  %v4800_v55 = vld [vmem:[%s16679_s26 + $0xf58] sm:$0xff] }
 0x495   : > { %v10693_v63 = vadd.f32 %v10692_v12, %v17812_v8  ;;  %10987 = vmatpush1.bf16.msra.mxu1 %v14771_v62  ;;  %11018 = vmatprep.mubr.bf16.mxu1 %v17359_v9  ;;  %v14692_v62 = vcombine.high %v4600_v14, %v4608_v59  ;;  %v14691_v12 = vcombine.low %v4600_v14, %v4608_v59  ;;  %v5000_v56 = vld [vmem:[%s16679_s26 + $0x1598] sm:$0xff] }
 0x496   : > { %v10694_v20 = vpop.f32.mrf.mxu1  ;;  %10988 = vmatprep.subr.bf16.mxu1 %v14756_v5  ;;  %11034 = vmatpush1.bf16.msra.mxu0 %v14979_v4  ;;  %v15156_v4 = vcombine.high %v5064_v31, %v5072_v44  ;;  %v4584_v5 = vld [vmem:[%s16679_s26 + $0x898] sm:$0xff] }
 0x497   : > { %v10695_v23 = vadd.f32 %v10694_v20, %v17816_v39  ;;  %11035 = vmatprep.subr.bf16.mxu0 %v14964_v7  ;;  %v17912_v8 = vadd.f32 %v10733_v41, %v10693_v63  ;;  %v14947_v39 = vcombine.low %v4856_v26, %v4864_v16  ;;  %v14932_v41 = vcombine.high %v4840_v36, %v4848_v30  ;;  %v4592_v7 = vld [vmem:[%s16679_s26 + $0x8d8] sm:$0xff] }
 0x498   : > { %v10696_v13 = vpop.f32.mrf.mxu1  ;;  %v15155_v26 = vcombine.low %v5064_v31, %v5072_v44  ;;  %v14676_v16 = vcombine.high %v4584_v5, %v4592_v7  ;;  %v15140_v63 = vcombine.high %v5048_v6, %v5056_v18  ;;  %v4576_v20 = vld [vmem:[%s16679_s26 + $0x858] sm:$0xff] }
 0x499   : > { %10989 = vmatpush1.bf16.msra.mxu1 %v14755_v19  ;;  %v17916_v10 = vadd.f32 %v10735_v58, %v10695_v23  ;;  %v14931_v58 = vcombine.low %v4840_v36, %v4848_v30  ;;  %v4568_v19 = vld [vmem:[%s16679_s26 + $0x818] sm:$0xff]  ;;  %v14675_v23 = vcombine.low %v4584_v5, %v4592_v7 }
 0x49a   : > { %v10697_v51 = vpop.f32.mrf.mxu1  ;;  %10990 = vmatprep.subr.bf16.mxu1 %v14740_v22  ;;  %11036 = vmatpush1.bf16.msra.mxu0 %v14963_v21  ;;  %v5032_v21 = vld [vmem:[%s16679_s26 + $0x1698] sm:$0xff]  ;;  %v14660_v34 = vcombine.high %v4568_v19, %v4576_v20 }
 0x49b   : > { %11037 = vmatprep.subr.bf16.mxu0 %v14948_v29  ;;  %v5040_v22 = vld [vmem:[%s16679_s26 + $0x16d8] sm:$0xff]  ;;  %v15139_v29 = vcombine.low %v5048_v6, %v5056_v18  ;;  %v14659_v51 = vcombine.low %v4568_v19, %v4576_v20 }
 0x49c   : > { %v15124_v32 = vcombine.high %v5032_v21, %v5040_v22  ;;  %v4808_v13 = vld [vmem:[%s16679_s26 + $0xf98] sm:$0xff] }
 0x49d   : > { %10991 = vmatpush1.bf16.msra.mxu1 %v14739_v47  ;;  %v4816_v36 = vld [vmem:[%s16679_s26 + $0xfd8] sm:$0xff] }
 0x49e   : > { %10992 = vmatprep.subr.bf16.mxu1 %v14724_v52  ;;  %11038 = vmatpush1.bf16.msra.mxu0 %v14947_v39  ;;  %v5016_v30 = vld [vmem:[%s16679_s26 + $0x1618] sm:$0xff]  ;;  %v15123_v39 = vcombine.low %v5032_v21, %v5040_v22  ;;  %v14900_v52 = vcombine.high %v4808_v13, %v4816_v36 }
 0x49f   : > { %11039 = vmatprep.subr.bf16.mxu0 %v14932_v41  ;;  %v5024_v47 = vld [vmem:[%s16679_s26 + $0x1658] sm:$0xff] }
 0x4a0   : > { %v15108_v41 = vcombine.high %v5016_v30, %v5024_v47  ;;  %v5008_v57 = vld [vmem:[%s16679_s26 + $0x15d8] sm:$0xff] }
 0x4a1   : > { %10993 = vmatpush1.bf16.msra.mxu1 %v14723_v24  ;;  %v14899_v24 = vcombine.low %v4808_v13, %v4816_v36  ;;  %v4776_v14 = vld [vmem:[%s16679_s26 + $0xe98] sm:$0xff] }
 0x4a2   : > { %10994 = vmatprep.subr.bf16.mxu1 %v14708_v37  ;;  %11040 = vmatpush1.bf16.msra.mxu0 %v14931_v58  ;;  %v15107_v58 = vcombine.low %v5016_v30, %v5024_v47  ;;  %v14884_v37 = vcombine.high %v4792_v53, %v4800_v55  ;;  %v4784_v59 = vld [vmem:[%s16679_s26 + $0xed8] sm:$0xff]  ;;  %v4425_v30 = vld [vmem:[%s16679_s26 + $0x3a0] sm:$0xff] }
 0x4a3   : > { %11041 = vmatprep.subr.bf16.mxu0 %v14916_v60  ;;  %v15092_v60 = vcombine.high %v5000_v56, %v5008_v57  ;;  %v4984_v31 = vld [vmem:[%s16679_s26 + $0x1518] sm:$0xff]  ;;  %v4433_v47 = vld [vmem:[%s16679_s26 + $0x3e0] sm:$0xff] }
 0x4a4   : > { %v4992_v44 = vld [vmem:[%s16679_s26 + $0x1558] sm:$0xff] }
 0x4a5   : > { %10995 = vmatpush1.bf16.msra.mxu1 %v14707_v49  ;;  %v14883_v49 = vcombine.low %v4792_v53, %v4800_v55  ;;  %v4760_v5 = vld [vmem:[%s16679_s26 + $0xe18] sm:$0xff] }
 0x4a6   : > { %10996 = vmatprep.subr.bf16.mxu1 %v14692_v62  ;;  %11042 = vmatpush1.bf16.msra.mxu0 %v14915_v11  ;;  %v15091_v11 = vcombine.low %v5000_v56, %v5008_v57  ;;  %v14868_v62 = vcombine.high %v4776_v14, %v4784_v59  ;;  %v4768_v7 = vld [vmem:[%s16679_s26 + $0xe58] sm:$0xff]  ;;  %v4409_v56 = vld [vmem:[%s16679_s26 + $0x320] sm:$0xff] }
 0x4a7   : > { %11043 = vmatprep.subr.bf16.mxu0 %v15156_v4  ;;  %v15076_v4 = vcombine.high %v4984_v31, %v4992_v44  ;;  %v4968_v6 = vld [vmem:[%s16679_s26 + $0x1498] sm:$0xff]  ;;  %v4417_v57 = vld [vmem:[%s16679_s26 + $0x360] sm:$0xff] }
 0x4a8   : > { %v4976_v18 = vld [vmem:[%s16679_s26 + $0x14d8] sm:$0xff] }
 0x4a9   : > { %10997 = vmatpush1.bf16.msra.mxu1 %v14691_v12  ;;  %v14867_v12 = vcombine.low %v4776_v14, %v4784_v59  ;;  %v4744_v19 = vld [vmem:[%s16679_s26 + $0xd98] sm:$0xff] }
 0x4aa   : > { %10998 = vmatprep.subr.bf16.mxu1 %v14676_v16  ;;  %11044 = vmatpush2.bf16.msra.mxu0 %v15155_v26  ;;  %v15075_v26 = vcombine.low %v4984_v31, %v4992_v44  ;;  %v14852_v16 = vcombine.high %v4760_v5, %v4768_v7  ;;  %v4752_v20 = vld [vmem:[%s16679_s26 + $0xdd8] sm:$0xff]  ;;  %v4393_v31 = vld [vmem:[%s16679_s26 + $0x2a0] sm:$0xff] }
 0x4ab   : > { %11045 = vmatprep.subr.bf16.mxu0 %v15140_v63  ;;  %v15060_v63 = vcombine.high %v4968_v6, %v4976_v18  ;;  %v4952_v21 = vld [vmem:[%s16679_s26 + $0x1418] sm:$0xff]  ;;  %v4401_v44 = vld [vmem:[%s16679_s26 + $0x2e0] sm:$0xff] }
 0x4ac   : > { %v4960_v22 = vld [vmem:[%s16679_s26 + $0x1458] sm:$0xff] }
 0x4ad   : > { %10999 = vmatpush1.bf16.msra.mxu1 %v14675_v23  ;;  %v14851_v23 = vcombine.low %v4760_v5, %v4768_v7  ;;  %v4728_v13 = vld [vmem:[%s16679_s26 + $0xd18] sm:$0xff]  ;;  %v14486_v7 = vcombine.high %v4393_v31, %v4401_v44 }
 0x4ae   : > { %11000 = vmatprep.subr.bf16.mxu1 %v14660_v34  ;;  %11046 = vmatpush2.bf16.msra.mxu0 %v15139_v29  ;;  %v15059_v29 = vcombine.low %v4968_v6, %v4976_v18  ;;  %v14836_v34 = vcombine.high %v4744_v19, %v4752_v20  ;;  %v4736_v36 = vld [vmem:[%s16679_s26 + $0xd58] sm:$0xff] }
 0x4af   : > { %11047 = vmatprep.subr.bf16.mxu0 %v15124_v32  ;;  %v15044_v32 = vcombine.high %v4952_v21, %v4960_v22  ;;  %v4712_v53 = vld [vmem:[%s16679_s26 + $0xc98] sm:$0xff] }
 0x4b0   : > { %v4720_v55 = vld [vmem:[%s16679_s26 + $0xcd8] sm:$0xff] }
 0x4b1   : > { %11001 = vmatpush1.bf16.msra.mxu1 %v14659_v51  ;;  %v14835_v51 = vcombine.low %v4744_v19, %v4752_v20  ;;  %v4696_v14 = vld [vmem:[%s16679_s26 + $0xc18] sm:$0xff]  ;;  %v14485_v19 = vcombine.low %v4393_v31, %v4401_v44  ;;  %v4337_v44 = vld [vmem:[%s16679_s26 + $0xe0] sm:$0xff] }
 0x4b2   : > { %11002 = vmatprep.subr.bf16.mxu1 %v14900_v52  ;;  %11048 = vmatpush2.bf16.msra.mxu0 %v15123_v39  ;;  %v15043_v39 = vcombine.low %v4952_v21, %v4960_v22  ;;  %v14820_v52 = vcombine.high %v4728_v13, %v4736_v36  ;;  %v4704_v59 = vld [vmem:[%s16679_s26 + $0xc58] sm:$0xff] }
 0x4b3   : > { %11049 = vmatprep.subr.bf16.mxu0 %v15108_v41  ;;  %v14518_v41 = vcombine.high %v4425_v30, %v4433_v47  ;;  %v5192_v6 = vld [vmem:[%s16679_s26 + $0x1b98] sm:$0xff] }
 0x4b4   : > { %v5200_v18 = vld [vmem:[%s16679_s26 + $0x1bd8] sm:$0xff] }
 0x4b5   : > { %11003 = vmatpush2.bf16.msra.mxu1 %v14899_v24  ;;  %v14819_v24 = vcombine.low %v4728_v13, %v4736_v36  ;;  %v15284_v20 = vcombine.high %v5192_v6, %v5200_v18  ;;  %v15283_v13 = vcombine.low %v5192_v6, %v5200_v18 }
 0x4b6   : > { %11004 = vmatprep.subr.bf16.mxu1 %v14884_v37  ;;  %11050 = vmatpush2.bf16.msra.mxu0 %v15107_v58  ;;  %v14517_v58 = vcombine.low %v4425_v30, %v4433_v47  ;;  %v14804_v37 = vcombine.high %v4712_v53, %v4720_v55 }
 0x4b7   : > { %11051 = vmatprep.subr.bf16.mxu0 %v15092_v60  ;;  %v14502_v60 = vcombine.high %v4409_v56, %v4417_v57 }
 0x4b9   : > { %11005 = vmatpush2.bf16.msra.mxu1 %v14883_v49 }
 0x4ba   : > { %11006 = vmatprep.subr.bf16.mxu1 %v14868_v62  ;;  %11052 = vmatpush2.bf16.msra.mxu0 %v15091_v11  ;;  %v14803_v11 = vcombine.low %v4712_v53, %v4720_v55  ;;  %v14501_v62 = vcombine.low %v4409_v56, %v4417_v57  ;;  %v4353_v53 = vld [vmem:[%s16679_s26 + $0x160] sm:$0xff] }
 0x4bb   : > { %11053 = vmatprep.subr.bf16.mxu0 %v15076_v4  ;;  %v14788_v4 = vcombine.high %v4696_v14, %v4704_v59 }
 0x4bd   : > { %11007 = vmatpush2.bf16.msra.mxu1 %v14867_v12  ;;  %v4377_v12 = vld [vmem:[%s16679_s26 + $0x220] sm:$0xff] }
 0x4be   : > { %11008 = vmatprep.subr.bf16.mxu1 %v14852_v16  ;;  %11054 = vmatpush2.bf16.msra.mxu0 %v15075_v26  ;;  %v4385_v26 = vld [vmem:[%s16679_s26 + $0x260] sm:$0xff] }
 0x4bf   : > { %11055 = vmatprep.subr.bf16.mxu0 %v15060_v63  ;;  %v14787_v63 = vcombine.low %v4696_v14, %v4704_v59  ;;  %v14470_v22 = vcombine.high %v4377_v12, %v4385_v26  ;;  %v14469_v36 = vcombine.low %v4377_v12, %v4385_v26  ;;  %v5144_v14 = vld [vmem:[%s16679_s26 + $0x1a18] sm:$0xff] }
 0x4c0   : > { %v5152_v59 = vld [vmem:[%s16679_s26 + $0x1a58] sm:$0xff] }
 0x4c1   : > { %11009 = vmatpush2.bf16.msra.mxu1 %v14851_v23  ;;  %v5176_v23 = vld [vmem:[%s16679_s26 + $0x1b18] sm:$0xff]  ;;  %v15236_v6 = vcombine.high %v5144_v14, %v5152_v59  ;;  %v15235_v50 = vcombine.low %v5144_v14, %v5152_v59 }
 0x4c2   : > { %11010 = vmatprep.subr.bf16.mxu1 %v14836_v34  ;;  %11056 = vmatpush2.bf16.msra.mxu0 %v15059_v29  ;;  %v5184_v29 = vld [vmem:[%s16679_s26 + $0x1b58] sm:$0xff]  ;;  %v4361_v34 = vld [vmem:[%s16679_s26 + $0x1a0] sm:$0xff] }
 0x4c3   : > { %11057 = vmatprep.subr.bf16.mxu0 %v15044_v32  ;;  %v4369_v32 = vld [vmem:[%s16679_s26 + $0x1e0] sm:$0xff]  ;;  %v15268_v30 = vcombine.high %v5176_v23, %v5184_v29  ;;  %v15267_v56 = vcombine.low %v5176_v23, %v5184_v29  ;;  %v5128_v26 = vld [vmem:[%s16679_s26 + $0x1998] sm:$0xff] }
 0x4c4   : > { %v14454_v47 = vcombine.high %v4361_v34, %v4369_v32  ;;  %v5120_v23 = vld [vmem:[%s16679_s26 + $0x1958] sm:$0xff]  ;;  %v4553_v29 = vld [vmem:[%s16679_s26 + $0x7a0] sm:$0xff] }
 0x4c5   : > { %11011 = vmatpush2.bf16.msra.mxu1 %v14835_v51  ;;  %v5160_v51 = vld [vmem:[%s16679_s26 + $0x1a98] sm:$0xff] }
 0x4c6   : > { %11012 = vmatprep.subr.bf16.mxu1 %v14820_v52  ;;  %11058 = vmatpush2.bf16.msra.mxu0 %v15043_v39  ;;  %v5168_v39 = vld [vmem:[%s16679_s26 + $0x1ad8] sm:$0xff] }
 0x4c7   : > { %11109 = vmatprep.subr.bf16.mxu0 %v14518_v41  ;;  %v4345_v41 = vld [vmem:[%s16679_s26 + $0x120] sm:$0xff] }
 0x4c9   : > { %11013 = vmatpush2.bf16.msra.mxu1 %v14819_v24  ;;  %v17966_v49 = vpop.f32.mrf.mxu0  ;;  %11060 = vmatmul.mubr.bf16.vlgmr.msra.gmra.mxu0 %v17532_v2  ;;  %v14453_v24 = vcombine.low %v4361_v34, %v4369_v32  ;;  %v4561_v34 = vld [vmem:[%s16679_s26 + $0x7e0] sm:$0xff] }
 0x4ca   : > { %11014 = vmatprep.subr.bf16.mxu1 %v14804_v37  ;;  %11110 = vmatpush1.bf16.msra.mxu0 %v14517_v58  ;;  %v15252_v58 = vcombine.high %v5160_v51, %v5168_v39 }
 0x4cb   : > { %11141 = vmatprep.mubr.bf16.mxu0 %v17354_v43  ;;  %v17970_v5 = vpop.f32.mrf.mxu0  ;;  %11111 = vmatprep.subr.bf16.mxu0 %v14502_v60  ;;  %v14438_v60 = vcombine.high %v4345_v41, %v4353_v53 }
 0x4cd   : > { %11015 = vmatpush2.bf16.msra.mxu1 %v14803_v11  ;;  %v10819_v16 = vpop.f32.mrf.mxu0 }
 0x4ce   : > { %11016 = vmatprep.subr.bf16.mxu1 %v14788_v4  ;;  %11112 = vmatpush1.bf16.msra.mxu0 %v14501_v62  ;;  %v15251_v62 = vcombine.low %v5160_v51, %v5168_v39  ;;  %v5136_v16 = vld [vmem:[%s16679_s26 + $0x19d8] sm:$0xff]  ;;  %v4537_v39 = vld [vmem:[%s16679_s26 + $0x720] sm:$0xff] }
 0x4cf   : > { %v10820_v21 = vpop.f32.mrf.mxu0  ;;  %11113 = vmatprep.subr.bf16.mxu0 %v14486_v7  ;;  %v14437_v7 = vcombine.low %v4345_v41, %v4353_v53  ;;  %v15219_v32 = vcombine.low %v5128_v26, %v5136_v16  ;;  %v5104_v51 = vld [vmem:[%s16679_s26 + $0x18d8] sm:$0xff]  ;;  %v14645_v53 = vcombine.low %v4553_v29, %v4561_v34 }
 0x4d1   : > { %11017 = vmatpush2.bf16.msra.mxu1 %v14787_v63  ;;  %v4313_v63 = vld [vmem:[%s16679_s26 + $0x20] sm:$0xff] }
 0x4d2   : > { %11068 = vmatprep.subr.bf16.mxu1 %v15284_v20  ;;  %11114 = vmatpush1.bf16.msra.mxu0 %v14485_v19  ;;  %v4321_v19 = vld [vmem:[%s16679_s26 + $0x60] sm:$0xff] }
 0x4d3   : > { %11115 = vmatprep.subr.bf16.mxu0 %v14470_v22  ;;  %v14406_v21 = vcombine.high %v4313_v63, %v4321_v19  ;;  %v5112_v22 = vld [vmem:[%s16679_s26 + $0x1918] sm:$0xff] }
 0x4d4   : > { %v10774_v52 = vpop.f32.mrf.mxu1  ;;  %11019 = vmatmul.mubr.bf16.vlgmr.msra.gmra.mxu1 %v17446_v61  ;;  %v15203_v41 = vcombine.low %v5112_v22, %v5120_v23 }
 0x4d5   : > { %v10775_v55 = vadd.f32 %v10774_v52, %v17912_v8  ;;  %11069 = vmatpush1.bf16.msra.mxu1 %v15283_v13  ;;  %11100 = vmatprep.mubr.bf16.mxu1 %v17600_v25  ;;  %v4329_v8 = vld [vmem:[%s16679_s26 + $0xa0] sm:$0xff]  ;;  %v14405_v13 = vcombine.low %v4313_v63, %v4321_v19 }
 0x4d6   : > { %v10776_v57 = vpop.f32.mrf.mxu1  ;;  %11070 = vmatprep.subr.bf16.mxu1 %v15268_v30  ;;  %11116 = vmatpush1.bf16.msra.mxu0 %v14469_v36  ;;  %v14422_v12 = vcombine.high %v4329_v8, %v4337_v44  ;;  %v14421_v15 = vcombine.low %v4329_v8, %v4337_v44  ;;  %v15204_v36 = vcombine.high %v5112_v22, %v5120_v23  ;;  %v4545_v52 = vld [vmem:[%s16679_s26 + $0x760] sm:$0xff]  ;;  %v5320_v8 = vld [vmem:[%s16679_s26 + $0x1f98] sm:$0xff] }
 0x4d7   : > { %v10777_v37 = vadd.f32 %v10776_v57, %v17916_v10  ;;  %11117 = vmatprep.subr.bf16.mxu0 %v14454_v47  ;;  %v17996_v10 = vrot.slane %v11781_v3, %v16729_v54  ;;  %v15220_v3 = vcombine.high %v5128_v26, %v5136_v16  ;;  %v14646_v30 = vcombine.high %v4553_v29, %v4561_v34  ;;  %v5096_v47 = vld [vmem:[%s16679_s26 + $0x1898] sm:$0xff]  ;;  %v4489_v63 = vld [vmem:[%s16679_s26 + $0x5a0] sm:$0xff] }
 0x4d8   : > { %v10778_v31 = vpop.f32.mrf.mxu1  ;;  %v5080_v57 = vld [vmem:[%s16679_s26 + $0x1818] sm:$0xff]  ;;  %v14629_v14 = vcombine.low %v4537_v39, %v4545_v52  ;;  %v4497_v19 = vld [vmem:[%s16679_s26 + $0x5e0] sm:$0xff] }
 0x4d9   : > { %v11782_v11 = vcombine.low %v10775_v55, %v10777_v37  ;;  %11071 = vmatpush1.bf16.msra.mxu1 %v15267_v56  ;;  %v15188_v55 = vcombine.high %v5096_v47, %v5104_v51  ;;  %v14630_v56 = vcombine.high %v4537_v39, %v4545_v52  ;;  %v4529_v37 = vld [vmem:[%s16679_s26 + $0x6e0] sm:$0xff]  ;;  %v5328_v44 = vld [vmem:[%s16679_s26 + $0x1fd8] sm:$0xff] }
 0x4da   : > { %v10779_v4 = vpop.f32.mrf.mxu1  ;;  %11072 = vmatprep.subr.bf16.mxu1 %v15252_v58  ;;  %11118 = vmatpush1.bf16.msra.mxu0 %v14453_v24  ;;  %v5088_v24 = vld [vmem:[%s16679_s26 + $0x1858] sm:$0xff]  ;;  %v4521_v58 = vld [vmem:[%s16679_s26 + $0x6a0] sm:$0xff] }
 0x4db   : > { %v17999_v18 = vrot.slane %v11782_v11, %v16729_v54  ;;  %11119 = vmatprep.subr.bf16.mxu0 %v14438_v60  ;;  %v15187_v60 = vcombine.low %v5096_v47, %v5104_v51  ;;  %v15172_v59 = vcombine.high %v5080_v57, %v5088_v24  ;;  %v14614_v31 = vcombine.high %v4521_v58, %v4529_v37  ;;  %v4505_v11 = vld [vmem:[%s16679_s26 + $0x620] sm:$0xff]  ;;  %v5304_v26 = vld [vmem:[%s16679_s26 + $0x1f18] sm:$0xff] }
 0x4dc   : > { %v15171_v4 = vcombine.low %v5080_v57, %v5088_v24  ;;  %v5312_v16 = vld [vmem:[%s16679_s26 + $0x1f58] sm:$0xff]  ;;  %v4473_v29 = vld [vmem:[%s16679_s26 + $0x520] sm:$0xff] }
 0x4dd   : > { %v11813_v20 = vcombine.low %v17996_v10, %v17999_v18  ;;  %11073 = vmatpush1.bf16.msra.mxu1 %v15251_v62  ;;  %v4513_v62 = vld [vmem:[%s16679_s26 + $0x660] sm:$0xff]  ;;  %v5288_v22 = vld [vmem:[%s16679_s26 + $0x1e98] sm:$0xff] }
 0x4de   : > { %11074 = vmatprep.subr.bf16.mxu1 %v15236_v6  ;;  %11120 = vmatpush1.bf16.msra.mxu0 %v14437_v7  ;;  %v14613_v7 = vcombine.low %v4521_v58, %v4529_v37  ;;  %v15412_v6 = vcombine.high %v5320_v8, %v5328_v44  ;;  %v5296_v23 = vld [vmem:[%s16679_s26 + $0x1ed8] sm:$0xff]  ;;  %v4481_v34 = vld [vmem:[%s16679_s26 + $0x560] sm:$0xff] }
 0x4df   : > { %11121 = vmatprep.subr.bf16.mxu0 %v14422_v12  ;;  %v14598_v12 = vcombine.high %v4505_v11, %v4513_v62  ;;  %v5272_v47 = vld [vmem:[%s16679_s26 + $0x1e18] sm:$0xff]  ;;  %v4457_v39 = vld [vmem:[%s16679_s26 + $0x4a0] sm:$0xff] }
 0x4e0   : > { %v5280_v51 = vld [vmem:[%s16679_s26 + $0x1e58] sm:$0xff]  ;;  %v4465_v52 = vld [vmem:[%s16679_s26 + $0x4e0] sm:$0xff] }
 0x4e1   : > { %11075 = vmatpush1.bf16.msra.mxu1 %v15235_v50  ;;  %v15411_v50 = vcombine.low %v5320_v8, %v5328_v44  ;;  %v5256_v57 = vld [vmem:[%s16679_s26 + $0x1d98] sm:$0xff]  ;;  %v4441_v58 = vld [vmem:[%s16679_s26 + $0x420] sm:$0xff] }
 0x4e2   : > { %11076 = vmatprep.subr.bf16.mxu1 %v15220_v3  ;;  %11122 = vmatpush1.bf16.msra.mxu0 %v14421_v15  ;;  %v14597_v15 = vcombine.low %v4505_v11, %v4513_v62  ;;  %v15396_v3 = vcombine.high %v5304_v26, %v5312_v16  ;;  %v5264_v24 = vld [vmem:[%s16679_s26 + $0x1dd8] sm:$0xff]  ;;  %v4449_v37 = vld [vmem:[%s16679_s26 + $0x460] sm:$0xff] }
 0x4e3   : > { %11123 = vmatprep.subr.bf16.mxu0 %v14406_v21  ;;  %v14582_v21 = vcombine.high %v4489_v63, %v4497_v19  ;;  %v5240_v8 = vld [vmem:[%s16679_s26 + $0x1d18] sm:$0xff]  ;;  %v4937_v11 = vld [vmem:[%s16679_s26 + $0x13a0] sm:$0xff] }
 0x4e4   : > { %v5248_v44 = vld [vmem:[%s16679_s26 + $0x1d58] sm:$0xff]  ;;  %v4945_v62 = vld [vmem:[%s16679_s26 + $0x13e0] sm:$0xff] }
 0x4e5   : > { %11077 = vmatpush1.bf16.msra.mxu1 %v15219_v32  ;;  %v15395_v32 = vcombine.low %v5304_v26, %v5312_v16  ;;  %v5224_v26 = vld [vmem:[%s16679_s26 + $0x1c98] sm:$0xff] }
 0x4e6   : > { %11078 = vmatprep.subr.bf16.mxu1 %v15204_v36  ;;  %11124 = vmatpush1.bf16.msra.mxu0 %v14405_v13  ;;  %v14581_v13 = vcombine.low %v4489_v63, %v4497_v19  ;;  %v15380_v36 = vcombine.high %v5288_v22, %v5296_v23  ;;  %v5232_v16 = vld [vmem:[%s16679_s26 + $0x1cd8] sm:$0xff]  ;;  %v4921_v63 = vld [vmem:[%s16679_s26 + $0x1320] sm:$0xff] }
 0x4e7   : > { %11125 = vmatprep.subr.bf16.mxu0 %v14646_v30  ;;  %v14566_v30 = vcombine.high %v4473_v29, %v4481_v34  ;;  %v4929_v19 = vld [vmem:[%s16679_s26 + $0x1360] sm:$0xff] }
 0x4e9   : > { %11079 = vmatpush1.bf16.msra.mxu1 %v15203_v41  ;;  %v15379_v41 = vcombine.low %v5288_v22, %v5296_v23  ;;  %v5208_v22 = vld [vmem:[%s16679_s26 + $0x1c18] sm:$0xff] }
 0x4ea   : > { %11080 = vmatprep.subr.bf16.mxu1 %v15188_v55  ;;  %11126 = vmatpush2.bf16.msra.mxu0 %v14645_v53  ;;  %v14565_v53 = vcombine.low %v4473_v29, %v4481_v34  ;;  %v15364_v55 = vcombine.high %v5272_v47, %v5280_v51  ;;  %v5216_v23 = vld [vmem:[%s16679_s26 + $0x1c58] sm:$0xff]  ;;  %v4905_v29 = vld [vmem:[%s16679_s26 + $0x12a0] sm:$0xff] }
 0x4eb   : > { %11127 = vmatprep.subr.bf16.mxu0 %v14630_v56  ;;  %v14550_v56 = vcombine.high %v4457_v39, %v4465_v52  ;;  %v4913_v34 = vld [vmem:[%s16679_s26 + $0x12e0] sm:$0xff] }
 0x4ed   : > { %11081 = vmatpush1.bf16.msra.mxu1 %v15187_v60  ;;  %v15363_v60 = vcombine.low %v5272_v47, %v5280_v51  ;;  %v14998_v51 = vcombine.high %v4905_v29, %v4913_v34 }
 0x4ee   : > { %11082 = vmatprep.subr.bf16.mxu1 %v15172_v59  ;;  %11128 = vmatpush2.bf16.msra.mxu0 %v14629_v14  ;;  %v14549_v14 = vcombine.low %v4457_v39, %v4465_v52  ;;  %v15348_v59 = vcombine.high %v5256_v57, %v5264_v24  ;;  %v4681_v39 = vld [vmem:[%s16679_s26 + $0xba0] sm:$0xff] }
 0x4ef   : > { %11129 = vmatprep.subr.bf16.mxu0 %v14614_v31  ;;  %v14534_v31 = vcombine.high %v4441_v58, %v4449_v37  ;;  %v4689_v52 = vld [vmem:[%s16679_s26 + $0xbe0] sm:$0xff] }
 0x4f1   : > { %11083 = vmatpush1.bf16.msra.mxu1 %v15171_v4  ;;  %v15347_v4 = vcombine.low %v5256_v57, %v5264_v24  ;;  %v14997_v57 = vcombine.low %v4905_v29, %v4913_v34  ;;  %v14774_v24 = vcombine.high %v4681_v39, %v4689_v52  ;;  %v4841_v34 = vld [vmem:[%s16679_s26 + $0x10a0] sm:$0xff] }
 0x4f2   : > { %11084 = vmatprep.subr.bf16.mxu1 %v15412_v6  ;;  %11130 = vmatpush2.bf16.msra.mxu0 %v14613_v7  ;;  %v14533_v7 = vcombine.low %v4441_v58, %v4449_v37  ;;  %v15332_v6 = vcombine.high %v5240_v8, %v5248_v44 }
 0x4f3   : > { %11131 = vmatprep.subr.bf16.mxu0 %v14598_v12  ;;  %v15030_v12 = vcombine.high %v4937_v11, %v4945_v62 }
 0x4f5   : > { %11085 = vmatpush2.bf16.msra.mxu1 %v15411_v50  ;;  %v15331_v50 = vcombine.low %v5240_v8, %v5248_v44  ;;  %v14773_v8 = vcombine.low %v4681_v39, %v4689_v52  ;;  %v4617_v52 = vld [vmem:[%s16679_s26 + $0x9a0] sm:$0xff] }
 0x4f6   : > { %11086 = vmatprep.subr.bf16.mxu1 %v15396_v3  ;;  %11132 = vmatpush2.bf16.msra.mxu0 %v14597_v15  ;;  %v15029_v15 = vcombine.low %v4937_v11, %v4945_v62  ;;  %v15316_v3 = vcombine.high %v5224_v26, %v5232_v16 }
 0x4f7   : > { %11133 = vmatprep.subr.bf16.mxu0 %v14582_v21  ;;  %v15014_v21 = vcombine.high %v4921_v63, %v4929_v19 }
 0x4f9   : > { %11087 = vmatpush2.bf16.msra.mxu1 %v15395_v32 }
 0x4fa   : > { %11088 = vmatprep.subr.bf16.mxu1 %v15380_v36  ;;  %11134 = vmatpush2.bf16.msra.mxu0 %v14581_v13  ;;  %v15315_v13 = vcombine.low %v5224_v26, %v5232_v16  ;;  %v15013_v36 = vcombine.low %v4921_v63, %v4929_v19  ;;  %v4865_v26 = vld [vmem:[%s16679_s26 + $0x1160] sm:$0xff] }
 0x4fb   : > { %11135 = vmatprep.subr.bf16.mxu0 %v14566_v30  ;;  %v15300_v30 = vcombine.high %v5208_v22, %v5216_v23 }
 0x4fd   : > { %11089 = vmatpush2.bf16.msra.mxu1 %v15379_v41  ;;  %v4889_v41 = vld [vmem:[%s16679_s26 + $0x1220] sm:$0xff] }
 0x4fe   : > { %11090 = vmatprep.subr.bf16.mxu1 %v15364_v55  ;;  %11136 = vmatpush2.bf16.msra.mxu0 %v14565_v53  ;;  %v4897_v53 = vld [vmem:[%s16679_s26 + $0x1260] sm:$0xff] }
 0x4ff   : > { %11137 = vmatprep.subr.bf16.mxu0 %v14550_v56  ;;  %v15299_v56 = vcombine.low %v5208_v22, %v5216_v23  ;;  %v14982_v37 = vcombine.high %v4889_v41, %v4897_v53  ;;  %v14981_v44 = vcombine.low %v4889_v41, %v4897_v53  ;;  %v4633_v22 = vld [vmem:[%s16679_s26 + $0xa20] sm:$0xff] }
 0x500   : > { %v4641_v23 = vld [vmem:[%s16679_s26 + $0xa60] sm:$0xff] }
 0x501   : > { %11091 = vmatpush2.bf16.msra.mxu1 %v15363_v60  ;;  %v4665_v60 = vld [vmem:[%s16679_s26 + $0xb20] sm:$0xff]  ;;  %v14726_v39 = vcombine.high %v4633_v22, %v4641_v23 }
 0x502   : > { %11092 = vmatprep.subr.bf16.mxu1 %v15348_v59  ;;  %11138 = vmatpush2.bf16.msra.mxu0 %v14549_v14  ;;  %v4673_v14 = vld [vmem:[%s16679_s26 + $0xb60] sm:$0xff] }
 0x503   : > { %11139 = vmatprep.subr.bf16.mxu0 %v14534_v31  ;;  %v4873_v59 = vld [vmem:[%s16679_s26 + $0x11a0] sm:$0xff]  ;;  %v14758_v11 = vcombine.high %v4665_v60, %v4673_v14  ;;  %v14757_v63 = vcombine.low %v4665_v60, %v4673_v14 }
 0x504   : > { %v4881_v31 = vld [vmem:[%s16679_s26 + $0x11e0] sm:$0xff] }
 0x505   : > { %11093 = vmatpush2.bf16.msra.mxu1 %v15347_v4  ;;  %v14966_v62 = vcombine.high %v4873_v59, %v4881_v31  ;;  %v4649_v4 = vld [vmem:[%s16679_s26 + $0xaa0] sm:$0xff] }
 0x506   : > { %11094 = vmatprep.subr.bf16.mxu1 %v15332_v6  ;;  %11140 = vmatpush2.bf16.msra.mxu0 %v14533_v7  ;;  %v4657_v7 = vld [vmem:[%s16679_s26 + $0xae0] sm:$0xff] }
 0x507   : > { %11191 = vmatprep.subr.bf16.mxu0 %v15030_v12  ;;  %v4857_v12 = vld [vmem:[%s16679_s26 + $0x1120] sm:$0xff] }
 0x508   : > { %v4625_v41 = vld [vmem:[%s16679_s26 + $0x9e0] sm:$0xff] }
 0x509   : > { %11095 = vmatpush2.bf16.msra.mxu1 %v15331_v50  ;;  %v10897_v32 = vpop.f32.mrf.mxu0  ;;  %11142 = vmatmul.mubr.bf16.vlgmr.msra.gmra.mxu0 %v17442_v42  ;;  %v14965_v50 = vcombine.low %v4873_v59, %v4881_v31  ;;  %v4825_v53 = vld [vmem:[%s16679_s26 + $0x1020] sm:$0xff]  ;;  %v14709_v59 = vcombine.low %v4617_v52, %v4625_v41 }
 0x50a   : > { %11096 = vmatprep.subr.bf16.mxu1 %v15316_v3  ;;  %11192 = vmatpush1.bf16.msra.mxu0 %v15029_v15  ;;  %v14742_v15 = vcombine.high %v4649_v4, %v4657_v7  ;;  %v5065_v60 = vld [vmem:[%s16679_s26 + $0x17a0] sm:$0xff] }
 0x50b   : > { %11223 = vmatprep.mubr.bf16.mxu0 %v17476_v40  ;;  %v10899_v47 = vpop.f32.mrf.mxu0  ;;  %11193 = vmatprep.subr.bf16.mxu0 %v15014_v21  ;;  %v14950_v21 = vcombine.high %v4857_v12, %v4865_v26  ;;  %v5073_v14 = vld [vmem:[%s16679_s26 + $0x17e0] sm:$0xff] }
 0x50d   : > { %11097 = vmatpush2.bf16.msra.mxu1 %v15315_v13  ;;  %v10901_v55 = vpop.f32.mrf.mxu0  ;;  %v4849_v13 = vld [vmem:[%s16679_s26 + $0x10e0] sm:$0xff] }
 0x50e   : > { %11098 = vmatprep.subr.bf16.mxu1 %v15300_v30  ;;  %11194 = vmatpush1.bf16.msra.mxu0 %v15013_v36  ;;  %v14741_v36 = vcombine.low %v4649_v4, %v4657_v7  ;;  %v4833_v55 = vld [vmem:[%s16679_s26 + $0x1060] sm:$0xff] }
 0x50f   : > { %v10902_v58 = vpop.f32.mrf.mxu0  ;;  %11195 = vmatprep.subr.bf16.mxu0 %v14998_v51  ;;  %v14917_v31 = vcombine.low %v4825_v53, %v4833_v55  ;;  %v5049_v4 = vld [vmem:[%s16679_s26 + $0x1720] sm:$0xff] }
 0x510   : > { %v4601_v58 = vld [vmem:[%s16679_s26 + $0x920] sm:$0xff] }
 0x511   : > { %11099 = vmatpush2.bf16.msra.mxu1 %v15299_v56  ;;  %v14725_v56 = vcombine.low %v4633_v22, %v4641_v23  ;;  %v5057_v7 = vld [vmem:[%s16679_s26 + $0x1760] sm:$0xff] }
 0x512   : > { %11150 = vmatprep.subr.bf16.mxu1 %v14774_v24  ;;  %11196 = vmatpush1.bf16.msra.mxu0 %v14997_v57  ;;  %v14710_v57 = vcombine.high %v4617_v52, %v4625_v41  ;;  %v14918_v24 = vcombine.high %v4825_v53, %v4833_v55  ;;  %v4793_v52 = vld [vmem:[%s16679_s26 + $0xf20] sm:$0xff] }
 0x513   : > { %11197 = vmatprep.subr.bf16.mxu0 %v14982_v37  ;;  %v4609_v37 = vld [vmem:[%s16679_s26 + $0x960] sm:$0xff] }
 0x514   : > { %v10856_v6 = vpop.f32.mrf.mxu1  ;;  %11101 = vmatmul.mubr.bf16.vlgmr.msra.gmra.mxu1 %v17602_v28  ;;  %v4801_v41 = vld [vmem:[%s16679_s26 + $0xf60] sm:$0xff] }
 0x515   : > { %v10857_v16 = vadd.f32 %v10856_v6, %v17966_v49  ;;  %11151 = vmatpush1.bf16.msra.mxu1 %v14773_v8  ;;  %11182 = vmatprep.mubr.bf16.mxu1 %v17359_v9  ;;  %v14694_v8 = vcombine.high %v4601_v58, %v4609_v37  ;;  %v14693_v6 = vcombine.low %v4601_v58, %v4609_v37  ;;  %v5001_v53 = vld [vmem:[%s16679_s26 + $0x15a0] sm:$0xff] }
 0x516   : > { %v10858_v19 = vpop.f32.mrf.mxu1  ;;  %11152 = vmatprep.subr.bf16.mxu1 %v14758_v11  ;;  %11198 = vmatpush1.bf16.msra.mxu0 %v14981_v44  ;;  %v15158_v44 = vcombine.high %v5065_v60, %v5073_v14  ;;  %v4585_v11 = vld [vmem:[%s16679_s26 + $0x8a0] sm:$0xff] }
 0x517   : > { %v10859_v3 = vadd.f32 %v10858_v19, %v17970_v5  ;;  %11199 = vmatprep.subr.bf16.mxu0 %v14966_v62  ;;  %v18071_v49 = vadd.f32 %v10897_v32, %v10857_v16  ;;  %v14949_v5 = vcombine.low %v4857_v12, %v4865_v26  ;;  %v14934_v32 = vcombine.high %v4841_v34, %v4849_v13  ;;  %v4593_v62 = vld [vmem:[%s16679_s26 + $0x8e0] sm:$0xff] }
 0x518   : > { %v10860_v29 = vpop.f32.mrf.mxu1  ;;  %v15157_v12 = vcombine.low %v5065_v60, %v5073_v14  ;;  %v14678_v26 = vcombine.high %v4585_v11, %v4593_v62  ;;  %v15142_v16 = vcombine.high %v5049_v4, %v5057_v7  ;;  %v4577_v19 = vld [vmem:[%s16679_s26 + $0x860] sm:$0xff] }
 0x519   : > { %11153 = vmatpush1.bf16.msra.mxu1 %v14757_v63  ;;  %v18075_v30 = vadd.f32 %v10899_v47, %v10859_v3  ;;  %v14933_v47 = vcombine.low %v4841_v34, %v4849_v13  ;;  %v4569_v63 = vld [vmem:[%s16679_s26 + $0x820] sm:$0xff]  ;;  %v14677_v3 = vcombine.low %v4585_v11, %v4593_v62 }
 0x51a   : > { %v10861_v51 = vpop.f32.mrf.mxu1  ;;  %11154 = vmatprep.subr.bf16.mxu1 %v14742_v15  ;;  %11200 = vmatpush1.bf16.msra.mxu0 %v14965_v50  ;;  %v5033_v50 = vld [vmem:[%s16679_s26 + $0x16a0] sm:$0xff]  ;;  %v14662_v22 = vcombine.high %v4569_v63, %v4577_v19 }
 0x51b   : > { %11201 = vmatprep.subr.bf16.mxu0 %v14950_v21  ;;  %v5041_v15 = vld [vmem:[%s16679_s26 + $0x16e0] sm:$0xff]  ;;  %v15141_v21 = vcombine.low %v5049_v4, %v5057_v7  ;;  %v14661_v51 = vcombine.low %v4569_v63, %v4577_v19 }
 0x51c   : > { %v15126_v23 = vcombine.high %v5033_v50, %v5041_v15  ;;  %v4809_v29 = vld [vmem:[%s16679_s26 + $0xfa0] sm:$0xff] }
 0x51d   : > { %11155 = vmatpush1.bf16.msra.mxu1 %v14741_v36  ;;  %v4817_v34 = vld [vmem:[%s16679_s26 + $0xfe0] sm:$0xff] }
 0x51e   : > { %11156 = vmatprep.subr.bf16.mxu1 %v14726_v39  ;;  %11202 = vmatpush1.bf16.msra.mxu0 %v14949_v5  ;;  %v5017_v13 = vld [vmem:[%s16679_s26 + $0x1620] sm:$0xff]  ;;  %v15125_v5 = vcombine.low %v5033_v50, %v5041_v15  ;;  %v14902_v39 = vcombine.high %v4809_v29, %v4817_v34 }
 0x51f   : > { %11203 = vmatprep.subr.bf16.mxu0 %v14934_v32  ;;  %v5025_v36 = vld [vmem:[%s16679_s26 + $0x1660] sm:$0xff] }
 0x520   : > { %v15110_v32 = vcombine.high %v5017_v13, %v5025_v36  ;;  %v5009_v55 = vld [vmem:[%s16679_s26 + $0x15e0] sm:$0xff] }
 0x521   : > { %11157 = vmatpush1.bf16.msra.mxu1 %v14725_v56  ;;  %v14901_v56 = vcombine.low %v4809_v29, %v4817_v34  ;;  %v4777_v58 = vld [vmem:[%s16679_s26 + $0xea0] sm:$0xff] }
 0x522   : > { %11158 = vmatprep.subr.bf16.mxu1 %v14710_v57  ;;  %11204 = vmatpush1.bf16.msra.mxu0 %v14933_v47  ;;  %v15109_v47 = vcombine.low %v5017_v13, %v5025_v36  ;;  %v14886_v57 = vcombine.high %v4793_v52, %v4801_v41  ;;  %v4785_v37 = vld [vmem:[%s16679_s26 + $0xee0] sm:$0xff]  ;;  %v4426_v13 = vld [vmem:[%s16679_s26 + $0x3a8] sm:$0xff] }
 0x523   : > { %11205 = vmatprep.subr.bf16.mxu0 %v14918_v24  ;;  %v15094_v24 = vcombine.high %v5001_v53, %v5009_v55  ;;  %v4985_v60 = vld [vmem:[%s16679_s26 + $0x1520] sm:$0xff]  ;;  %v4434_v36 = vld [vmem:[%s16679_s26 + $0x3e8] sm:$0xff] }
 0x524   : > { %v4993_v14 = vld [vmem:[%s16679_s26 + $0x1560] sm:$0xff] }
 0x525   : > { %11159 = vmatpush1.bf16.msra.mxu1 %v14709_v59  ;;  %v14885_v59 = vcombine.low %v4793_v52, %v4801_v41  ;;  %v4761_v11 = vld [vmem:[%s16679_s26 + $0xe20] sm:$0xff] }
 0x526   : > { %11160 = vmatprep.subr.bf16.mxu1 %v14694_v8  ;;  %11206 = vmatpush1.bf16.msra.mxu0 %v14917_v31  ;;  %v15093_v31 = vcombine.low %v5001_v53, %v5009_v55  ;;  %v14870_v8 = vcombine.high %v4777_v58, %v4785_v37  ;;  %v4769_v62 = vld [vmem:[%s16679_s26 + $0xe60] sm:$0xff]  ;;  %v4410_v53 = vld [vmem:[%s16679_s26 + $0x328] sm:$0xff] }
 0x527   : > { %11207 = vmatprep.subr.bf16.mxu0 %v15158_v44  ;;  %v15078_v44 = vcombine.high %v4985_v60, %v4993_v14  ;;  %v4969_v4 = vld [vmem:[%s16679_s26 + $0x14a0] sm:$0xff]  ;;  %v4418_v55 = vld [vmem:[%s16679_s26 + $0x368] sm:$0xff] }
 0x528   : > { %v4977_v7 = vld [vmem:[%s16679_s26 + $0x14e0] sm:$0xff] }
 0x529   : > { %11161 = vmatpush1.bf16.msra.mxu1 %v14693_v6  ;;  %v14869_v6 = vcombine.low %v4777_v58, %v4785_v37  ;;  %v4745_v63 = vld [vmem:[%s16679_s26 + $0xda0] sm:$0xff] }
 0x52a   : > { %11162 = vmatprep.subr.bf16.mxu1 %v14678_v26  ;;  %11208 = vmatpush2.bf16.msra.mxu0 %v15157_v12  ;;  %v15077_v12 = vcombine.low %v4985_v60, %v4993_v14  ;;  %v14854_v26 = vcombine.high %v4761_v11, %v4769_v62  ;;  %v4753_v19 = vld [vmem:[%s16679_s26 + $0xde0] sm:$0xff]  ;;  %v4394_v60 = vld [vmem:[%s16679_s26 + $0x2a8] sm:$0xff] }
 0x52b   : > { %11209 = vmatprep.subr.bf16.mxu0 %v15142_v16  ;;  %v15062_v16 = vcombine.high %v4969_v4, %v4977_v7  ;;  %v4953_v50 = vld [vmem:[%s16679_s26 + $0x1420] sm:$0xff]  ;;  %v4402_v14 = vld [vmem:[%s16679_s26 + $0x2e8] sm:$0xff] }
 0x52c   : > { %v4961_v15 = vld [vmem:[%s16679_s26 + $0x1460] sm:$0xff] }
 0x52d   : > { %11163 = vmatpush1.bf16.msra.mxu1 %v14677_v3  ;;  %v14853_v3 = vcombine.low %v4761_v11, %v4769_v62  ;;  %v4729_v29 = vld [vmem:[%s16679_s26 + $0xd20] sm:$0xff]  ;;  %v14488_v62 = vcombine.high %v4394_v60, %v4402_v14 }
 0x52e   : > { %11164 = vmatprep.subr.bf16.mxu1 %v14662_v22  ;;  %11210 = vmatpush2.bf16.msra.mxu0 %v15141_v21  ;;  %v15061_v21 = vcombine.low %v4969_v4, %v4977_v7  ;;  %v14838_v22 = vcombine.high %v4745_v63, %v4753_v19  ;;  %v4737_v34 = vld [vmem:[%s16679_s26 + $0xd60] sm:$0xff] }
 0x52f   : > { %11211 = vmatprep.subr.bf16.mxu0 %v15126_v23  ;;  %v15046_v23 = vcombine.high %v4953_v50, %v4961_v15  ;;  %v4713_v52 = vld [vmem:[%s16679_s26 + $0xca0] sm:$0xff] }
 0x530   : > { %v4721_v41 = vld [vmem:[%s16679_s26 + $0xce0] sm:$0xff] }
 0x531   : > { %11165 = vmatpush1.bf16.msra.mxu1 %v14661_v51  ;;  %v14837_v51 = vcombine.low %v4745_v63, %v4753_v19  ;;  %v4697_v58 = vld [vmem:[%s16679_s26 + $0xc20] sm:$0xff]  ;;  %v14487_v63 = vcombine.low %v4394_v60, %v4402_v14  ;;  %v4330_v60 = vld [vmem:[%s16679_s26 + $0xa8] sm:$0xff] }
 0x532   : > { %11166 = vmatprep.subr.bf16.mxu1 %v14902_v39  ;;  %11212 = vmatpush2.bf16.msra.mxu0 %v15125_v5  ;;  %v15045_v5 = vcombine.low %v4953_v50, %v4961_v15  ;;  %v14822_v39 = vcombine.high %v4729_v29, %v4737_v34  ;;  %v4705_v37 = vld [vmem:[%s16679_s26 + $0xc60] sm:$0xff]  ;;  %v4338_v14 = vld [vmem:[%s16679_s26 + $0xe8] sm:$0xff] }
 0x533   : > { %11213 = vmatprep.subr.bf16.mxu0 %v15110_v32  ;;  %v14520_v32 = vcombine.high %v4426_v13, %v4434_v36  ;;  %v5193_v4 = vld [vmem:[%s16679_s26 + $0x1ba0] sm:$0xff] }
 0x534   : > { %v5201_v7 = vld [vmem:[%s16679_s26 + $0x1be0] sm:$0xff] }
 0x535   : > { %11167 = vmatpush2.bf16.msra.mxu1 %v14901_v56  ;;  %v14821_v56 = vcombine.low %v4729_v29, %v4737_v34  ;;  %v15286_v19 = vcombine.high %v5193_v4, %v5201_v7  ;;  %v15285_v29 = vcombine.low %v5193_v4, %v5201_v7  ;;  %v14424_v4 = vcombine.high %v4330_v60, %v4338_v14  ;;  %v5129_v7 = vld [vmem:[%s16679_s26 + $0x19a0] sm:$0xff] }
 0x536   : > { %11168 = vmatprep.subr.bf16.mxu1 %v14886_v57  ;;  %11214 = vmatpush2.bf16.msra.mxu0 %v15109_v47  ;;  %v14519_v47 = vcombine.low %v4426_v13, %v4434_v36  ;;  %v14806_v57 = vcombine.high %v4713_v52, %v4721_v41 }
 0x537   : > { %11215 = vmatprep.subr.bf16.mxu0 %v15094_v24  ;;  %v14504_v24 = vcombine.high %v4410_v53, %v4418_v55 }
 0x539   : > { %11169 = vmatpush2.bf16.msra.mxu1 %v14885_v59 }
 0x53a   : > { %11170 = vmatprep.subr.bf16.mxu1 %v14870_v8  ;;  %11216 = vmatpush2.bf16.msra.mxu0 %v15093_v31  ;;  %v14805_v31 = vcombine.low %v4713_v52, %v4721_v41  ;;  %v14503_v8 = vcombine.low %v4410_v53, %v4418_v55  ;;  %v4354_v52 = vld [vmem:[%s16679_s26 + $0x168] sm:$0xff] }
 0x53b   : > { %11217 = vmatprep.subr.bf16.mxu0 %v15078_v44  ;;  %v14790_v44 = vcombine.high %v4697_v58, %v4705_v37 }
 0x53d   : > { %11171 = vmatpush2.bf16.msra.mxu1 %v14869_v6  ;;  %v4378_v6 = vld [vmem:[%s16679_s26 + $0x228] sm:$0xff] }
 0x53e   : > { %11172 = vmatprep.subr.bf16.mxu1 %v14854_v26  ;;  %11218 = vmatpush2.bf16.msra.mxu0 %v15077_v12  ;;  %v4386_v12 = vld [vmem:[%s16679_s26 + $0x268] sm:$0xff] }
 0x53f   : > { %11219 = vmatprep.subr.bf16.mxu0 %v15062_v16  ;;  %v14789_v16 = vcombine.low %v4697_v58, %v4705_v37  ;;  %v14472_v15 = vcombine.high %v4378_v6, %v4386_v12  ;;  %v14471_v34 = vcombine.low %v4378_v6, %v4386_v12  ;;  %v5145_v58 = vld [vmem:[%s16679_s26 + $0x1a20] sm:$0xff]  ;;  %v4314_v12 = vld [vmem:[%s16679_s26 + $0x28] sm:$0xff] }
 0x540   : > { %v5137_v6 = vld [vmem:[%s16679_s26 + $0x19e0] sm:$0xff] }
 0x541   : > { %11173 = vmatpush2.bf16.msra.mxu1 %v14853_v3  ;;  %v5177_v3 = vld [vmem:[%s16679_s26 + $0x1b20] sm:$0xff] }
 0x542   : > { %11174 = vmatprep.subr.bf16.mxu1 %v14838_v22  ;;  %11220 = vmatpush2.bf16.msra.mxu0 %v15061_v21  ;;  %v5185_v21 = vld [vmem:[%s16679_s26 + $0x1b60] sm:$0xff]  ;;  %v4362_v22 = vld [vmem:[%s16679_s26 + $0x1a8] sm:$0xff] }
 0x543   : > { %11221 = vmatprep.subr.bf16.mxu0 %v15046_v23  ;;  %v4370_v23 = vld [vmem:[%s16679_s26 + $0x1e8] sm:$0xff]  ;;  %v15270_v13 = vcombine.high %v5177_v3, %v5185_v21  ;;  %v15269_v53 = vcombine.low %v5177_v3, %v5185_v21  ;;  %v5121_v3 = vld [vmem:[%s16679_s26 + $0x1960] sm:$0xff] }
 0x544   : > { %v14456_v36 = vcombine.high %v4362_v22, %v4370_v23  ;;  %v4554_v21 = vld [vmem:[%s16679_s26 + $0x7a8] sm:$0xff] }
 0x545   : > { %11175 = vmatpush2.bf16.msra.mxu1 %v14837_v51  ;;  %v5161_v51 = vld [vmem:[%s16679_s26 + $0x1aa0] sm:$0xff] }
 0x546   : > { %11176 = vmatprep.subr.bf16.mxu1 %v14822_v39  ;;  %11222 = vmatpush2.bf16.msra.mxu0 %v15045_v5  ;;  %v5169_v5 = vld [vmem:[%s16679_s26 + $0x1ae0] sm:$0xff] }
 0x547   : > { %11273 = vmatprep.subr.bf16.mxu0 %v14520_v32  ;;  %v4346_v32 = vld [vmem:[%s16679_s26 + $0x128] sm:$0xff] }
 0x549   : > { %11177 = vmatpush2.bf16.msra.mxu1 %v14821_v56  ;;  %v18125_v59 = vpop.f32.mrf.mxu0  ;;  %11224 = vmatmul.mubr.bf16.vlgmr.msra.gmra.mxu0 %v17532_v2  ;;  %v14455_v56 = vcombine.low %v4362_v22, %v4370_v23  ;;  %v4562_v22 = vld [vmem:[%s16679_s26 + $0x7e8] sm:$0xff]  ;;  %v15221_v23 = vcombine.low %v5129_v7, %v5137_v6 }
 0x54a   : > { %11178 = vmatprep.subr.bf16.mxu1 %v14806_v57  ;;  %11274 = vmatpush1.bf16.msra.mxu0 %v14519_v47  ;;  %v15254_v47 = vcombine.high %v5161_v51, %v5169_v5 }
 0x54b   : > { %11305 = vmatprep.mubr.bf16.mxu0 %v17354_v43  ;;  %v18129_v11 = vpop.f32.mrf.mxu0  ;;  %11275 = vmatprep.subr.bf16.mxu0 %v14504_v24  ;;  %v14440_v24 = vcombine.high %v4346_v32, %v4354_v52 }
 0x54d   : > { %11179 = vmatpush2.bf16.msra.mxu1 %v14805_v31  ;;  %v10983_v26 = vpop.f32.mrf.mxu0 }
 0x54e   : > { %11180 = vmatprep.subr.bf16.mxu1 %v14790_v44  ;;  %11276 = vmatpush1.bf16.msra.mxu0 %v14503_v8  ;;  %v15253_v8 = vcombine.low %v5161_v51, %v5169_v5  ;;  %v4322_v26 = vld [vmem:[%s16679_s26 + $0x68] sm:$0xff]  ;;  %v5105_v51 = vld [vmem:[%s16679_s26 + $0x18e0] sm:$0xff] }
 0x54f   : > { %v10984_v50 = vpop.f32.mrf.mxu0  ;;  %11277 = vmatprep.subr.bf16.mxu0 %v14488_v62  ;;  %v4538_v5 = vld [vmem:[%s16679_s26 + $0x728] sm:$0xff] }
 0x550   : > { %v14408_v50 = vcombine.high %v4314_v12, %v4322_v26 }
 0x551   : > { %11181 = vmatpush2.bf16.msra.mxu1 %v14789_v16 }
 0x552   : > { %11232 = vmatprep.subr.bf16.mxu1 %v15286_v19  ;;  %11278 = vmatpush1.bf16.msra.mxu0 %v14487_v63  ;;  %v14423_v63 = vcombine.low %v4330_v60, %v4338_v14  ;;  %v15222_v19 = vcombine.high %v5129_v7, %v5137_v6 }
 0x553   : > { %11279 = vmatprep.subr.bf16.mxu0 %v14472_v15  ;;  %v5113_v15 = vld [vmem:[%s16679_s26 + $0x1920] sm:$0xff] }
 0x554   : > { %v10938_v39 = vpop.f32.mrf.mxu1  ;;  %11183 = vmatmul.mubr.bf16.vlgmr.msra.gmra.mxu1 %v17446_v61 }
 0x555   : > { %v18145_v41 = vadd.f32 %v10938_v39, %v18071_v49  ;;  %11233 = vmatpush1.bf16.msra.mxu1 %v15285_v29  ;;  %11264 = vmatprep.mubr.bf16.mxu1 %v17600_v25  ;;  %v5153_v49 = vld [vmem:[%s16679_s26 + $0x1a60] sm:$0xff]  ;;  %v14407_v29 = vcombine.low %v4314_v12, %v4322_v26  ;;  %v4546_v39 = vld [vmem:[%s16679_s26 + $0x768] sm:$0xff] }
 0x556   : > { %v10940_v55 = vpop.f32.mrf.mxu1  ;;  %11234 = vmatprep.subr.bf16.mxu1 %v15270_v13  ;;  %11280 = vmatpush1.bf16.msra.mxu0 %v14471_v34  ;;  %v15238_v62 = vcombine.high %v5145_v58, %v5153_v49  ;;  %v15237_v16 = vcombine.low %v5145_v58, %v5153_v49  ;;  %v15206_v34 = vcombine.high %v5113_v15, %v5121_v3  ;;  %v4530_v58 = vld [vmem:[%s16679_s26 + $0x6e8] sm:$0xff]  ;;  %v5305_v26 = vld [vmem:[%s16679_s26 + $0x1f20] sm:$0xff] }
 0x557   : > { %v18149_v57 = vadd.f32 %v10940_v55, %v18075_v30  ;;  %11281 = vmatprep.subr.bf16.mxu0 %v14456_v36  ;;  %v14439_v30 = vcombine.low %v4346_v32, %v4354_v52  ;;  %v14648_v13 = vcombine.high %v4554_v21, %v4562_v22  ;;  %v5097_v36 = vld [vmem:[%s16679_s26 + $0x18a0] sm:$0xff]  ;;  %v15205_v32 = vcombine.low %v5113_v15, %v5121_v3 }
 0x558   : > { %v10942_v37 = vpop.f32.mrf.mxu1  ;;  %v14647_v52 = vcombine.low %v4554_v21, %v4562_v22  ;;  %v14632_v55 = vcombine.high %v4538_v5, %v4546_v39  ;;  %v15189_v49 = vcombine.low %v5097_v36, %v5105_v51  ;;  %v5289_v22 = vld [vmem:[%s16679_s26 + $0x1ea0] sm:$0xff] }
 0x559   : > { %v11783_v31 = vcombine.low %v18145_v41, %v18149_v57  ;;  %11235 = vmatpush1.bf16.msra.mxu1 %v15269_v53  ;;  %v15190_v53 = vcombine.high %v5097_v36, %v5105_v51  ;;  %v14631_v37 = vcombine.low %v4538_v5, %v4546_v39  ;;  %v5273_v39 = vld [vmem:[%s16679_s26 + $0x1e20] sm:$0xff]  ;;  %v11821_v57 = vrot.slane %v11813_v20, %v16729_v54 }
 0x55a   : > { %v10943_v44 = vpop.f32.mrf.mxu1  ;;  %11236 = vmatprep.subr.bf16.mxu1 %v15254_v47  ;;  %11282 = vmatpush1.bf16.msra.mxu0 %v14455_v56  ;;  %v5081_v56 = vld [vmem:[%s16679_s26 + $0x1820] sm:$0xff] }
 0x55b   : > { %11283 = vmatprep.subr.bf16.mxu0 %v14440_v24  ;;  %v5089_v47 = vld [vmem:[%s16679_s26 + $0x1860] sm:$0xff]  ;;  %v4522_v24 = vld [vmem:[%s16679_s26 + $0x6a8] sm:$0xff] }
 0x55c   : > { %v15174_v60 = vcombine.high %v5081_v56, %v5089_v47  ;;  %v14616_v14 = vcombine.high %v4522_v24, %v4530_v58  ;;  %v5329_v44 = vld [vmem:[%s16679_s26 + $0x1fe0] sm:$0xff]  ;;  %v14615_v7 = vcombine.low %v4522_v24, %v4530_v58 }
 0x55d   : > { %11237 = vmatpush1.bf16.msra.mxu1 %v15253_v8  ;;  %v5321_v8 = vld [vmem:[%s16679_s26 + $0x1fa0] sm:$0xff] }
 0x55e   : > { %11238 = vmatprep.subr.bf16.mxu1 %v15238_v62  ;;  %11284 = vmatpush1.bf16.msra.mxu0 %v14439_v30  ;;  %v4506_v30 = vld [vmem:[%s16679_s26 + $0x628] sm:$0xff]  ;;  %v15414_v6 = vcombine.high %v5321_v8, %v5329_v44  ;;  %v5257_v58 = vld [vmem:[%s16679_s26 + $0x1da0] sm:$0xff] }
 0x55f   : > { %11285 = vmatprep.subr.bf16.mxu0 %v14424_v4  ;;  %v4514_v62 = vld [vmem:[%s16679_s26 + $0x668] sm:$0xff]  ;;  %v15173_v4 = vcombine.low %v5081_v56, %v5089_v47 }
 0x560   : > { %v14600_v12 = vcombine.high %v4506_v30, %v4514_v62  ;;  %v14599_v15 = vcombine.low %v4506_v30, %v4514_v62  ;;  %v5241_v62 = vld [vmem:[%s16679_s26 + $0x1d20] sm:$0xff] }
 0x561   : > { %11239 = vmatpush1.bf16.msra.mxu1 %v15237_v16  ;;  %v5313_v16 = vld [vmem:[%s16679_s26 + $0x1f60] sm:$0xff] }
 0x562   : > { %11240 = vmatprep.subr.bf16.mxu1 %v15222_v19  ;;  %11286 = vmatpush1.bf16.msra.mxu0 %v14423_v63  ;;  %v4490_v63 = vld [vmem:[%s16679_s26 + $0x5a8] sm:$0xff]  ;;  %v15398_v3 = vcombine.high %v5305_v26, %v5313_v16 }
 0x563   : > { %11287 = vmatprep.subr.bf16.mxu0 %v14408_v50  ;;  %v4498_v19 = vld [vmem:[%s16679_s26 + $0x5e8] sm:$0xff]  ;;  %v15413_v50 = vcombine.low %v5321_v8, %v5329_v44 }
 0x564   : > { %v14584_v21 = vcombine.high %v4490_v63, %v4498_v19  ;;  %v14583_v36 = vcombine.low %v4490_v63, %v4498_v19  ;;  %v5225_v19 = vld [vmem:[%s16679_s26 + $0x1ca0] sm:$0xff] }
 0x565   : > { %11241 = vmatpush1.bf16.msra.mxu1 %v15221_v23  ;;  %v5297_v23 = vld [vmem:[%s16679_s26 + $0x1ee0] sm:$0xff] }
 0x566   : > { %11242 = vmatprep.subr.bf16.mxu1 %v15206_v34  ;;  %11288 = vmatpush1.bf16.msra.mxu0 %v14407_v29  ;;  %v4474_v29 = vld [vmem:[%s16679_s26 + $0x528] sm:$0xff]  ;;  %v15382_v51 = vcombine.high %v5289_v22, %v5297_v23 }
 0x567   : > { %11289 = vmatprep.subr.bf16.mxu0 %v14648_v13  ;;  %v4482_v34 = vld [vmem:[%s16679_s26 + $0x568] sm:$0xff]  ;;  %v15397_v13 = vcombine.low %v5305_v26, %v5313_v16 }
 0x568   : > { %v14568_v5 = vcombine.high %v4474_v29, %v4482_v34  ;;  %v14567_v56 = vcombine.low %v4474_v29, %v4482_v34  ;;  %v5209_v34 = vld [vmem:[%s16679_s26 + $0x1c20] sm:$0xff] }
 0x569   : > { %11243 = vmatpush1.bf16.msra.mxu1 %v15205_v32  ;;  %v5281_v32 = vld [vmem:[%s16679_s26 + $0x1e60] sm:$0xff] }
 0x56a   : > { %11244 = vmatprep.subr.bf16.mxu1 %v15190_v53  ;;  %11290 = vmatpush2.bf16.msra.mxu0 %v14647_v52  ;;  %v4458_v52 = vld [vmem:[%s16679_s26 + $0x4a8] sm:$0xff]  ;;  %v15366_v47 = vcombine.high %v5273_v39, %v5281_v32 }
 0x56b   : > { %11291 = vmatprep.subr.bf16.mxu0 %v14632_v55  ;;  %v4466_v53 = vld [vmem:[%s16679_s26 + $0x4e8] sm:$0xff]  ;;  %v15381_v55 = vcombine.low %v5289_v22, %v5297_v23 }
 0x56c   : > { %v14552_v24 = vcombine.high %v4458_v52, %v4466_v53  ;;  %v14551_v8 = vcombine.low %v4458_v52, %v4466_v53 }
 0x56d   : > { %11245 = vmatpush1.bf16.msra.mxu1 %v15189_v49  ;;  %v5265_v49 = vld [vmem:[%s16679_s26 + $0x1de0] sm:$0xff] }
 0x56e   : > { %11246 = vmatprep.subr.bf16.mxu1 %v15174_v60  ;;  %11292 = vmatpush2.bf16.msra.mxu0 %v14631_v37  ;;  %v4442_v37 = vld [vmem:[%s16679_s26 + $0x428] sm:$0xff]  ;;  %v15350_v44 = vcombine.high %v5257_v58, %v5265_v49 }
 0x56f   : > { %11293 = vmatprep.subr.bf16.mxu0 %v14616_v14  ;;  %v4450_v60 = vld [vmem:[%s16679_s26 + $0x468] sm:$0xff]  ;;  %v15365_v14 = vcombine.low %v5273_v39, %v5281_v32 }
 0x570   : > { %v14536_v30 = vcombine.high %v4442_v37, %v4450_v60  ;;  %v14535_v26 = vcombine.low %v4442_v37, %v4450_v60 }
 0x571   : > { %11247 = vmatpush1.bf16.msra.mxu1 %v15173_v4  ;;  %v5249_v4 = vld [vmem:[%s16679_s26 + $0x1d60] sm:$0xff] }
 0x572   : > { %11248 = vmatprep.subr.bf16.mxu1 %v15414_v6  ;;  %11294 = vmatpush2.bf16.msra.mxu0 %v14615_v7  ;;  %v4938_v7 = vld [vmem:[%s16679_s26 + $0x13a8] sm:$0xff]  ;;  %v15334_v16 = vcombine.high %v5241_v62, %v5249_v4 }
 0x573   : > { %11295 = vmatprep.subr.bf16.mxu0 %v14600_v12  ;;  %v4946_v6 = vld [vmem:[%s16679_s26 + $0x13e8] sm:$0xff]  ;;  %v15349_v12 = vcombine.low %v5257_v58, %v5265_v49 }
 0x574   : > { %v15032_v63 = vcombine.high %v4938_v7, %v4946_v6  ;;  %v15031_v22 = vcombine.low %v4938_v7, %v4946_v6  ;;  %v4898_v58 = vld [vmem:[%s16679_s26 + $0x1268] sm:$0xff] }
 0x575   : > { %11249 = vmatpush2.bf16.msra.mxu1 %v15413_v50  ;;  %v5233_v50 = vld [vmem:[%s16679_s26 + $0x1ce0] sm:$0xff]  ;;  %v4882_v7 = vld [vmem:[%s16679_s26 + $0x11e8] sm:$0xff] }
 0x576   : > { %11250 = vmatprep.subr.bf16.mxu1 %v15398_v3  ;;  %11296 = vmatpush2.bf16.msra.mxu0 %v14599_v15  ;;  %v4922_v15 = vld [vmem:[%s16679_s26 + $0x1328] sm:$0xff]  ;;  %v15318_v23 = vcombine.high %v5225_v19, %v5233_v50  ;;  %v15317_v39 = vcombine.low %v5225_v19, %v5233_v50 }
 0x577   : > { %11297 = vmatprep.subr.bf16.mxu0 %v14584_v21  ;;  %v4930_v3 = vld [vmem:[%s16679_s26 + $0x1368] sm:$0xff]  ;;  %v15333_v21 = vcombine.low %v5241_v62, %v5249_v4 }
 0x578   : > { %v15016_v29 = vcombine.high %v4922_v15, %v4930_v3  ;;  %v15015_v32 = vcombine.low %v4922_v15, %v4930_v3  ;;  %v4674_v62 = vld [vmem:[%s16679_s26 + $0xb68] sm:$0xff] }
 0x579   : > { %11251 = vmatpush2.bf16.msra.mxu1 %v15397_v13  ;;  %v5217_v13 = vld [vmem:[%s16679_s26 + $0x1c60] sm:$0xff]  ;;  %v4874_v4 = vld [vmem:[%s16679_s26 + $0x11a8] sm:$0xff] }
 0x57a   : > { %11252 = vmatprep.subr.bf16.mxu1 %v15382_v51  ;;  %11298 = vmatpush2.bf16.msra.mxu0 %v14583_v36  ;;  %v4906_v36 = vld [vmem:[%s16679_s26 + $0x12a8] sm:$0xff]  ;;  %v15302_v52 = vcombine.high %v5209_v34, %v5217_v13  ;;  %v15301_v37 = vcombine.low %v5209_v34, %v5217_v13 }
 0x57b   : > { %11299 = vmatprep.subr.bf16.mxu0 %v14568_v5  ;;  %v4914_v51 = vld [vmem:[%s16679_s26 + $0x12e8] sm:$0xff] }
 0x57c   : > { %v14999_v60 = vcombine.low %v4906_v36, %v4914_v51  ;;  %v4658_v19 = vld [vmem:[%s16679_s26 + $0xae8] sm:$0xff] }
 0x57d   : > { %11253 = vmatpush2.bf16.msra.mxu1 %v15381_v55  ;;  %v15000_v55 = vcombine.high %v4906_v36, %v4914_v51  ;;  %v4858_v15 = vld [vmem:[%s16679_s26 + $0x1128] sm:$0xff] }
 0x57e   : > { %11254 = vmatprep.subr.bf16.mxu1 %v15366_v47  ;;  %11300 = vmatpush2.bf16.msra.mxu0 %v14567_v56  ;;  %v4682_v56 = vld [vmem:[%s16679_s26 + $0xba8] sm:$0xff] }
 0x57f   : > { %11301 = vmatprep.subr.bf16.mxu0 %v14552_v24  ;;  %v4690_v47 = vld [vmem:[%s16679_s26 + $0xbe8] sm:$0xff] }
 0x580   : > { %v4890_v24 = vld [vmem:[%s16679_s26 + $0x1228] sm:$0xff]  ;;  %v14775_v6 = vcombine.low %v4682_v56, %v4690_v47 }
 0x581   : > { %11255 = vmatpush2.bf16.msra.mxu1 %v15365_v14  ;;  %v14776_v14 = vcombine.high %v4682_v56, %v4690_v47  ;;  %v4866_v3 = vld [vmem:[%s16679_s26 + $0x1168] sm:$0xff] }
 0x582   : > { %11256 = vmatprep.subr.bf16.mxu1 %v15350_v44  ;;  %11302 = vmatpush2.bf16.msra.mxu0 %v14551_v8  ;;  %v14984_v44 = vcombine.high %v4890_v24, %v4898_v58  ;;  %v14952_v34 = vcombine.high %v4858_v15, %v4866_v3  ;;  %v4634_v13 = vld [vmem:[%s16679_s26 + $0xa28] sm:$0xff]  ;;  %v14951_v56 = vcombine.low %v4858_v15, %v4866_v3 }
 0x583   : > { %11303 = vmatprep.subr.bf16.mxu0 %v14536_v30  ;;  %v4666_v30 = vld [vmem:[%s16679_s26 + $0xb28] sm:$0xff] }
 0x584   : > { %v4642_v36 = vld [vmem:[%s16679_s26 + $0xa68] sm:$0xff] }
 0x585   : > { %11257 = vmatpush2.bf16.msra.mxu1 %v15349_v12  ;;  %v14983_v12 = vcombine.low %v4890_v24, %v4898_v58  ;;  %v14728_v47 = vcombine.high %v4634_v13, %v4642_v36  ;;  %v4618_v58 = vld [vmem:[%s16679_s26 + $0x9a8] sm:$0xff] }
 0x586   : > { %11258 = vmatprep.subr.bf16.mxu1 %v15334_v16  ;;  %11304 = vmatpush2.bf16.msra.mxu0 %v14535_v26  ;;  %v14760_v26 = vcombine.high %v4666_v30, %v4674_v62  ;;  %v14968_v16 = vcombine.high %v4874_v4, %v4882_v7  ;;  %v4594_v15 = vld [vmem:[%s16679_s26 + $0x8e8] sm:$0xff] }
 0x587   : > { %11355 = vmatprep.subr.bf16.mxu0 %v15032_v63  ;;  %v4650_v63 = vld [vmem:[%s16679_s26 + $0xaa8] sm:$0xff] }
 0x588   : > { %v5050_v3 = vld [vmem:[%s16679_s26 + $0x1728] sm:$0xff] }
 0x589   : > { %11259 = vmatpush2.bf16.msra.mxu1 %v15333_v21  ;;  %v18205_v5 = vpop.f32.mrf.mxu0  ;;  %11306 = vmatmul.mubr.bf16.vlgmr.msra.gmra.mxu0 %v17442_v42  ;;  %v14759_v21 = vcombine.low %v4666_v30, %v4674_v62  ;;  %v4602_v62 = vld [vmem:[%s16679_s26 + $0x928] sm:$0xff] }
 0x58a   : > { %11260 = vmatprep.subr.bf16.mxu1 %v15318_v23  ;;  %11356 = vmatpush1.bf16.msra.mxu0 %v15031_v22  ;;  %v14967_v23 = vcombine.low %v4874_v4, %v4882_v7  ;;  %v4610_v4 = vld [vmem:[%s16679_s26 + $0x968] sm:$0xff] }
 0x58b   : > { %11387 = vmatprep.mubr.bf16.mxu0 %v17476_v40  ;;  %v18209_v53 = vpop.f32.mrf.mxu0  ;;  %11357 = vmatprep.subr.bf16.mxu0 %v15016_v29  ;;  %v14744_v29 = vcombine.high %v4650_v63, %v4658_v19  ;;  %v5066_v7 = vld [vmem:[%s16679_s26 + $0x17a8] sm:$0xff] }
 0x58d   : > { %11261 = vmatpush2.bf16.msra.mxu1 %v15317_v39  ;;  %v11065_v49 = vpop.f32.mrf.mxu0  ;;  %v4842_v39 = vld [vmem:[%s16679_s26 + $0x10a8] sm:$0xff] }
 0x58e   : > { %11262 = vmatprep.subr.bf16.mxu1 %v15302_v52  ;;  %11358 = vmatpush1.bf16.msra.mxu0 %v15015_v32  ;;  %v4850_v32 = vld [vmem:[%s16679_s26 + $0x10e8] sm:$0xff]  ;;  %v14743_v52 = vcombine.low %v4650_v63, %v4658_v19 }
 0x58f   : > { %v11066_v8 = vpop.f32.mrf.mxu0  ;;  %11359 = vmatprep.subr.bf16.mxu0 %v15000_v55  ;;  %v14936_v24 = vcombine.high %v4842_v39, %v4850_v32  ;;  %v4626_v49 = vld [vmem:[%s16679_s26 + $0x9e8] sm:$0xff] }
 0x590   : > { %v14935_v8 = vcombine.low %v4842_v39, %v4850_v32  ;;  %v4586_v19 = vld [vmem:[%s16679_s26 + $0x8a8] sm:$0xff] }
 0x591   : > { %11263 = vmatpush2.bf16.msra.mxu1 %v15301_v37  ;;  %v4826_v37 = vld [vmem:[%s16679_s26 + $0x1028] sm:$0xff] }
 0x592   : > { %11314 = vmatprep.subr.bf16.mxu1 %v14776_v14  ;;  %11360 = vmatpush1.bf16.msra.mxu0 %v14999_v60  ;;  %v4834_v60 = vld [vmem:[%s16679_s26 + $0x1068] sm:$0xff]  ;;  %v14727_v14 = vcombine.low %v4634_v13, %v4642_v36 }
 0x593   : > { %11361 = vmatprep.subr.bf16.mxu0 %v14984_v44  ;;  %v14712_v44 = vcombine.high %v4618_v58, %v4626_v49  ;;  %v14920_v30 = vcombine.high %v4826_v37, %v4834_v60  ;;  %v4570_v36 = vld [vmem:[%s16679_s26 + $0x828] sm:$0xff] }
 0x594   : > { %v18221_v50 = vpop.f32.mrf.mxu1  ;;  %11265 = vmatmul.mubr.bf16.vlgmr.msra.gmra.mxu1 %v17602_v28  ;;  %v5034_v39 = vld [vmem:[%s16679_s26 + $0x16a8] sm:$0xff] }
 0x595   : > { %11315 = vmatpush1.bf16.msra.mxu1 %v14775_v6  ;;  %11346 = vmatprep.mubr.bf16.mxu1 %v17359_v9  ;;  %v5074_v6 = vld [vmem:[%s16679_s26 + $0x17e8] sm:$0xff] }
 0x596   : > { %v18227_v22 = vpop.f32.mrf.mxu1  ;;  %11316 = vmatprep.subr.bf16.mxu1 %v14760_v26  ;;  %11362 = vmatpush1.bf16.msra.mxu0 %v14983_v12  ;;  %v14711_v12 = vcombine.low %v4618_v58, %v4626_v49  ;;  %v14919_v26 = vcombine.low %v4826_v37, %v4834_v60  ;;  %v15160_v63 = vcombine.high %v5066_v7, %v5074_v6  ;;  %v5042_v32 = vld [vmem:[%s16679_s26 + $0x16e8] sm:$0xff] }
 0x597   : > { %11363 = vmatprep.subr.bf16.mxu0 %v14968_v16  ;;  %v14696_v16 = vcombine.high %v4602_v62, %v4610_v4  ;;  %v4818_v58 = vld [vmem:[%s16679_s26 + $0xfe8] sm:$0xff] }
 0x598   : > { %v11024_v51 = vpop.f32.mrf.mxu1  ;;  %v5018_v49 = vld [vmem:[%s16679_s26 + $0x1628] sm:$0xff] }
 0x599   : > { %11317 = vmatpush1.bf16.msra.mxu1 %v14759_v21  ;;  %v5058_v21 = vld [vmem:[%s16679_s26 + $0x1768] sm:$0xff] }
 0x59a   : > { %v11025_v55 = vpop.f32.mrf.mxu1  ;;  %11318 = vmatprep.subr.bf16.mxu1 %v14744_v29  ;;  %11364 = vmatpush1.bf16.msra.mxu0 %v14967_v23  ;;  %v14695_v23 = vcombine.low %v4602_v62, %v4610_v4  ;;  %v15159_v29 = vcombine.low %v5066_v7, %v5074_v6  ;;  %v15144_v13 = vcombine.high %v5050_v3, %v5058_v21  ;;  %v4578_v51 = vld [vmem:[%s16679_s26 + $0x868] sm:$0xff] }
 0x59b   : > { %11365 = vmatprep.subr.bf16.mxu0 %v14952_v34  ;;  %v14680_v34 = vcombine.high %v4586_v19, %v4594_v15  ;;  %v15143_v55 = vcombine.low %v5050_v3, %v5058_v21  ;;  %v5026_v37 = vld [vmem:[%s16679_s26 + $0x1668] sm:$0xff]  ;;  %v14663_v60 = vcombine.low %v4570_v36, %v4578_v51 }
 0x59c   : > { %v4802_v62 = vld [vmem:[%s16679_s26 + $0xf68] sm:$0xff] }
 0x59d   : > { %11319 = vmatpush1.bf16.msra.mxu1 %v14743_v52  ;;  %v14679_v52 = vcombine.low %v4586_v19, %v4594_v15  ;;  %v5002_v4 = vld [vmem:[%s16679_s26 + $0x15a8] sm:$0xff] }
 0x59e   : > { %11320 = vmatprep.subr.bf16.mxu1 %v14728_v47  ;;  %11366 = vmatpush1.bf16.msra.mxu0 %v14951_v56  ;;  %v14664_v56 = vcombine.high %v4570_v36, %v4578_v51  ;;  %v15128_v47 = vcombine.high %v5034_v39, %v5042_v32  ;;  %v5010_v7 = vld [vmem:[%s16679_s26 + $0x15e8] sm:$0xff] }
 0x59f   : > { %11367 = vmatprep.subr.bf16.mxu0 %v14936_v24  ;;  %v4810_v24 = vld [vmem:[%s16679_s26 + $0xfa8] sm:$0xff] }
 0x5a0   : > { %v14903_v6 = vcombine.low %v4810_v24, %v4818_v58  ;;  %v4786_v19 = vld [vmem:[%s16679_s26 + $0xee8] sm:$0xff] }
 0x5a1   : > { %11321 = vmatpush1.bf16.msra.mxu1 %v14727_v14  ;;  %v15127_v14 = vcombine.low %v5034_v39, %v5042_v32  ;;  %v4986_v15 = vld [vmem:[%s16679_s26 + $0x1528] sm:$0xff] }
 0x5a2   : > { %11322 = vmatprep.subr.bf16.mxu1 %v14712_v44  ;;  %11368 = vmatpush1.bf16.msra.mxu0 %v14935_v8  ;;  %v14904_v8 = vcombine.high %v4810_v24, %v4818_v58  ;;  %v15112_v44 = vcombine.high %v5018_v49, %v5026_v37  ;;  %v4994_v3 = vld [vmem:[%s16679_s26 + $0x1568] sm:$0xff] }
 0x5a3   : > { %11369 = vmatprep.subr.bf16.mxu0 %v14920_v30  ;;  %v4794_v30 = vld [vmem:[%s16679_s26 + $0xf28] sm:$0xff] }
 0x5a4   : > { %v14887_v21 = vcombine.low %v4794_v30, %v4802_v62  ;;  %v4770_v36 = vld [vmem:[%s16679_s26 + $0xe68] sm:$0xff] }
 0x5a5   : > { %11323 = vmatpush1.bf16.msra.mxu1 %v14711_v12  ;;  %v15111_v12 = vcombine.low %v5018_v49, %v5026_v37  ;;  %v4970_v51 = vld [vmem:[%s16679_s26 + $0x14a8] sm:$0xff] }
 0x5a6   : > { %11324 = vmatprep.subr.bf16.mxu1 %v14696_v16  ;;  %11370 = vmatpush1.bf16.msra.mxu0 %v14919_v26  ;;  %v14888_v26 = vcombine.high %v4794_v30, %v4802_v62  ;;  %v15096_v16 = vcombine.high %v5002_v4, %v5010_v7  ;;  %v4978_v39 = vld [vmem:[%s16679_s26 + $0x14e8] sm:$0xff]  ;;  %v4427_v62 = vld [vmem:[%s16679_s26 + $0x3b0] sm:$0xff] }
 0x5a7   : > { %11371 = vmatprep.subr.bf16.mxu0 %v15160_v63  ;;  %v4778_v63 = vld [vmem:[%s16679_s26 + $0xea8] sm:$0xff] }
 0x5a8   : > { %v14871_v32 = vcombine.low %v4778_v63, %v4786_v19  ;;  %v4754_v24 = vld [vmem:[%s16679_s26 + $0xde8] sm:$0xff] }
 0x5a9   : > { %11325 = vmatpush1.bf16.msra.mxu1 %v14695_v23  ;;  %v15095_v23 = vcombine.low %v5002_v4, %v5010_v7  ;;  %v4954_v58 = vld [vmem:[%s16679_s26 + $0x1428] sm:$0xff]  ;;  %v4435_v4 = vld [vmem:[%s16679_s26 + $0x3f0] sm:$0xff] }
 0x5aa   : > { %11326 = vmatprep.subr.bf16.mxu1 %v14680_v34  ;;  %11372 = vmatpush2.bf16.msra.mxu0 %v15159_v29  ;;  %v14872_v29 = vcombine.high %v4778_v63, %v4786_v19  ;;  %v15080_v34 = vcombine.high %v4986_v15, %v4994_v3  ;;  %v4962_v49 = vld [vmem:[%s16679_s26 + $0x1468] sm:$0xff]  ;;  %v4411_v19 = vld [vmem:[%s16679_s26 + $0x330] sm:$0xff] }
 0x5ab   : > { %11373 = vmatprep.subr.bf16.mxu0 %v15144_v13  ;;  %v4762_v13 = vld [vmem:[%s16679_s26 + $0xe28] sm:$0xff] }
 0x5ac   : > { %v14855_v37 = vcombine.low %v4762_v13, %v4770_v36  ;;  %v4738_v30 = vld [vmem:[%s16679_s26 + $0xd68] sm:$0xff] }
 0x5ad   : > { %11327 = vmatpush1.bf16.msra.mxu1 %v14679_v52  ;;  %v15079_v52 = vcombine.low %v4986_v15, %v4994_v3  ;;  %v4722_v63 = vld [vmem:[%s16679_s26 + $0xce8] sm:$0xff]  ;;  %v4419_v15 = vld [vmem:[%s16679_s26 + $0x370] sm:$0xff] }
 0x5ae   : > { %11328 = vmatprep.subr.bf16.mxu1 %v14664_v56  ;;  %11374 = vmatpush2.bf16.msra.mxu0 %v15143_v55  ;;  %v14856_v55 = vcombine.high %v4762_v13, %v4770_v36  ;;  %v15064_v56 = vcombine.high %v4970_v51, %v4978_v39  ;;  %v4706_v13 = vld [vmem:[%s16679_s26 + $0xc68] sm:$0xff]  ;;  %v4395_v36 = vld [vmem:[%s16679_s26 + $0x2b0] sm:$0xff] }
 0x5af   : > { %11375 = vmatprep.subr.bf16.mxu0 %v15128_v47  ;;  %v4746_v47 = vld [vmem:[%s16679_s26 + $0xda8] sm:$0xff] }
 0x5b0   : > { %v14839_v7 = vcombine.low %v4746_v47, %v4754_v24 }
 0x5b1   : > { %11329 = vmatpush1.bf16.msra.mxu1 %v14663_v60  ;;  %v15063_v60 = vcombine.low %v4970_v51, %v4978_v39  ;;  %v4403_v51 = vld [vmem:[%s16679_s26 + $0x2f0] sm:$0xff] }
 0x5b2   : > { %11330 = vmatprep.subr.bf16.mxu1 %v14904_v8  ;;  %11376 = vmatpush2.bf16.msra.mxu0 %v15127_v14  ;;  %v14840_v14 = vcombine.high %v4746_v47, %v4754_v24  ;;  %v15048_v8 = vcombine.high %v4954_v58, %v4962_v49  ;;  %v14490_v47 = vcombine.high %v4395_v36, %v4403_v51  ;;  %v5194_v24 = vld [vmem:[%s16679_s26 + $0x1ba8] sm:$0xff] }
 0x5b3   : > { %11377 = vmatprep.subr.bf16.mxu0 %v15112_v44  ;;  %v4730_v44 = vld [vmem:[%s16679_s26 + $0xd28] sm:$0xff] }
 0x5b4   : > { %v14823_v3 = vcombine.low %v4730_v44, %v4738_v30 }
 0x5b5   : > { %11331 = vmatpush2.bf16.msra.mxu1 %v14903_v6  ;;  %v15047_v6 = vcombine.low %v4954_v58, %v4962_v49  ;;  %v5202_v58 = vld [vmem:[%s16679_s26 + $0x1be8] sm:$0xff]  ;;  %v4379_v49 = vld [vmem:[%s16679_s26 + $0x230] sm:$0xff] }
 0x5b6   : > { %11332 = vmatprep.subr.bf16.mxu1 %v14888_v26  ;;  %11378 = vmatpush2.bf16.msra.mxu0 %v15111_v12  ;;  %v14824_v12 = vcombine.high %v4730_v44, %v4738_v30  ;;  %v14522_v26 = vcombine.high %v4427_v62, %v4435_v4  ;;  %v15288_v44 = vcombine.high %v5194_v24, %v5202_v58 }
 0x5b7   : > { %11379 = vmatprep.subr.bf16.mxu0 %v15096_v16  ;;  %v4714_v16 = vld [vmem:[%s16679_s26 + $0xca8] sm:$0xff] }
 0x5b9   : > { %11333 = vmatpush2.bf16.msra.mxu1 %v14887_v21  ;;  %v14521_v21 = vcombine.low %v4427_v62, %v4435_v4  ;;  %v5178_v4 = vld [vmem:[%s16679_s26 + $0x1b28] sm:$0xff] }
 0x5ba   : > { %11334 = vmatprep.subr.bf16.mxu1 %v14872_v29  ;;  %11380 = vmatpush2.bf16.msra.mxu0 %v15095_v23  ;;  %v14808_v23 = vcombine.high %v4714_v16, %v4722_v63  ;;  %v14506_v29 = vcombine.high %v4411_v19, %v4419_v15 }
 0x5bb   : > { %11381 = vmatprep.subr.bf16.mxu0 %v15080_v34  ;;  %v4698_v34 = vld [vmem:[%s16679_s26 + $0xc28] sm:$0xff] }
 0x5bd   : > { %11335 = vmatpush2.bf16.msra.mxu1 %v14871_v32  ;;  %v14807_v32 = vcombine.low %v4714_v16, %v4722_v63  ;;  %v11023_v16 = vadd.f32 %v18227_v22, %v18129_v11  ;;  %v15287_v63 = vcombine.low %v5194_v24, %v5202_v58  ;;  %v5154_v24 = vld [vmem:[%s16679_s26 + $0x1a68] sm:$0xff]  ;;  %v4331_v58 = vld [vmem:[%s16679_s26 + $0xb0] sm:$0xff] }
 0x5be   : > { %11336 = vmatprep.subr.bf16.mxu1 %v14856_v55  ;;  %11382 = vmatpush2.bf16.msra.mxu0 %v15079_v52  ;;  %v14505_v52 = vcombine.low %v4411_v19, %v4419_v15  ;;  %v14792_v55 = vcombine.high %v4698_v34, %v4706_v13 }
 0x5bf   : > { %11383 = vmatprep.subr.bf16.mxu0 %v15064_v56  ;;  %v11064_v11 = vadd.f32 %v18209_v53, %v11023_v16 }
 0x5c1   : > { %11337 = vmatpush2.bf16.msra.mxu1 %v14855_v37  ;;  %v4387_v37 = vld [vmem:[%s16679_s26 + $0x270] sm:$0xff] }
 0x5c2   : > { %11338 = vmatprep.subr.bf16.mxu1 %v14840_v14  ;;  %11384 = vmatpush2.bf16.msra.mxu0 %v15063_v60  ;;  %v14791_v14 = vcombine.low %v4698_v34, %v4706_v13  ;;  %v14474_v62 = vcombine.high %v4379_v49, %v4387_v37  ;;  %v14473_v19 = vcombine.low %v4379_v49, %v4387_v37  ;;  %v4347_v34 = vld [vmem:[%s16679_s26 + $0x130] sm:$0xff] }
 0x5c3   : > { %11385 = vmatprep.subr.bf16.mxu0 %v15048_v8  ;;  %v14489_v8 = vcombine.low %v4395_v36, %v4403_v51  ;;  %v4355_v13 = vld [vmem:[%s16679_s26 + $0x170] sm:$0xff] }
 0x5c4   : > { %v4339_v49 = vld [vmem:[%s16679_s26 + $0xf0] sm:$0xff] }
 0x5c5   : > { %11339 = vmatpush2.bf16.msra.mxu1 %v14839_v7  ;;  %v5186_v7 = vld [vmem:[%s16679_s26 + $0x1b68] sm:$0xff] }
 0x5c6   : > { %11340 = vmatprep.subr.bf16.mxu1 %v14824_v12  ;;  %11386 = vmatpush2.bf16.msra.mxu0 %v15047_v6  ;;  %v4363_v6 = vld [vmem:[%s16679_s26 + $0x1b0] sm:$0xff]  ;;  %v15272_v15 = vcombine.high %v5178_v4, %v5186_v7 }
 0x5c7   : > { %11437 = vmatprep.subr.bf16.mxu0 %v14522_v26  ;;  %v4371_v12 = vld [vmem:[%s16679_s26 + $0x1f0] sm:$0xff]  ;;  %v11021_v26 = vadd.f32 %v18221_v50, %v18125_v59  ;;  %v15271_v50 = vcombine.low %v5178_v4, %v5186_v7  ;;  %v5130_v4 = vld [vmem:[%s16679_s26 + $0x19a8] sm:$0xff] }
 0x5c8   : > { %v14457_v36 = vcombine.low %v4363_v6, %v4371_v12  ;;  %v5138_v7 = vld [vmem:[%s16679_s26 + $0x19e8] sm:$0xff] }
 0x5c9   : > { %11341 = vmatpush2.bf16.msra.mxu1 %v14823_v3  ;;  %v18281_v39 = vpop.f32.mrf.mxu0  ;;  %11388 = vmatmul.mubr.bf16.vlgmr.msra.gmra.mxu0 %v17532_v2  ;;  %v14458_v3 = vcombine.high %v4363_v6, %v4371_v12  ;;  %v11062_v59 = vadd.f32 %v18205_v5, %v11021_v26  ;;  %v4315_v6 = vld [vmem:[%s16679_s26 + $0x30] sm:$0xff]  ;;  %v15224_v41 = vcombine.high %v5130_v4, %v5138_v7 }
 0x5ca   : > { %11342 = vmatprep.subr.bf16.mxu1 %v14808_v23  ;;  %11438 = vmatpush1.bf16.msra.mxu0 %v14521_v21  ;;  %v5162_v21 = vld [vmem:[%s16679_s26 + $0x1aa8] sm:$0xff]  ;;  %v4323_v12 = vld [vmem:[%s16679_s26 + $0x70] sm:$0xff] }
 0x5cb   : > { %11469 = vmatprep.mubr.bf16.mxu0 %v17354_v43  ;;  %v18285_v56 = vpop.f32.mrf.mxu0  ;;  %11439 = vmatprep.subr.bf16.mxu0 %v14506_v29  ;;  %v5170_v23 = vld [vmem:[%s16679_s26 + $0x1ae8] sm:$0xff]  ;;  %v14409_v10 = vcombine.low %v4315_v6, %v4323_v12 }
 0x5cc   : > { %v15256_v51 = vcombine.high %v5162_v21, %v5170_v23  ;;  %v15255_v37 = vcombine.low %v5162_v21, %v5170_v23  ;;  %v4299_v21 = vld [vmem:[#allocation2] sm:$0xff]  ;;  %v4555_v23 = vld [vmem:[%s16679_s26 + $0x7b0] sm:$0xff] }
 0x5cd   : > { %11343 = vmatpush2.bf16.msra.mxu1 %v14807_v32  ;;  %v11147_v60 = vpop.f32.mrf.mxu0 }
 0x5ce   : > { %11344 = vmatprep.subr.bf16.mxu1 %v14792_v55  ;;  %11440 = vmatpush1.bf16.msra.mxu0 %v14505_v52  ;;  %v14442_v55 = vcombine.high %v4347_v34, %v4355_v13 }
 0x5cf   : > { %v11148_v30 = vpop.f32.mrf.mxu0  ;;  %11441 = vmatprep.subr.bf16.mxu0 %v14490_v47  ;;  %v5146_v47 = vld [vmem:[%s16679_s26 + $0x1a28] sm:$0xff] }
 0x5d0   : > { %v15239_v16 = vcombine.low %v5146_v47, %v5154_v24 }
 0x5d1   : > { %11345 = vmatpush2.bf16.msra.mxu1 %v14791_v14  ;;  %v14441_v14 = vcombine.low %v4347_v34, %v4355_v13  ;;  %v15223_v13 = vcombine.low %v5130_v4, %v5138_v7 }
 0x5d2   : > { %11396 = vmatprep.subr.bf16.mxu1 %v15288_v44  ;;  %11442 = vmatpush1.bf16.msra.mxu0 %v14489_v8  ;;  %v15240_v8 = vcombine.high %v5146_v47, %v5154_v24  ;;  %v11805_v44 = vrot.slane %v11783_v31, %v16729_v54  ;;  %v5082_v47 = vld [vmem:[%s16679_s26 + $0x1828] sm:$0xff] }
 0x5d3   : > { %11443 = vmatprep.subr.bf16.mxu0 %v14474_v62  ;;  %v14426_v62 = vcombine.high %v4331_v58, %v4339_v49  ;;  %v5090_v24 = vld [vmem:[%s16679_s26 + $0x1868] sm:$0xff] }
 0x5d4   : > { %v11102_v29 = vpop.f32.mrf.mxu1  ;;  %11347 = vmatmul.mubr.bf16.vlgmr.msra.gmra.mxu1 %v17446_v61 }
 0x5d5   : > { %11397 = vmatpush1.bf16.msra.mxu1 %v15287_v63  ;;  %11428 = vmatprep.mubr.bf16.mxu1 %v17600_v25  ;;  %v11103_v32 = vadd.f32 %v11102_v29, %v11062_v59  ;;  %v14425_v63 = vcombine.low %v4331_v58, %v4339_v49  ;;  %v4563_v29 = vld [vmem:[%s16679_s26 + $0x7f0] sm:$0xff] }
 0x5d6   : > { %v11104_v22 = vpop.f32.mrf.mxu1  ;;  %11398 = vmatprep.subr.bf16.mxu1 %v15272_v15  ;;  %11444 = vmatpush1.bf16.msra.mxu0 %v14473_v19  ;;  %v14410_v19 = vcombine.high %v4315_v6, %v4323_v12  ;;  %v5114_v15 = vld [vmem:[%s16679_s26 + $0x1928] sm:$0xff]  ;;  %v14650_v59 = vcombine.high %v4555_v23, %v4563_v29  ;;  %v4531_v58 = vld [vmem:[%s16679_s26 + $0x6f0] sm:$0xff] }
 0x5d7   : > { %v11105_v52 = vadd.f32 %v11104_v22, %v11064_v11  ;;  %11445 = vmatprep.subr.bf16.mxu0 %v14458_v3  ;;  %v5122_v3 = vld [vmem:[%s16679_s26 + $0x1968] sm:$0xff]  ;;  %v4539_v22 = vld [vmem:[%s16679_s26 + $0x730] sm:$0xff] }
 0x5d8   : > { %v11106_v5 = vpop.f32.mrf.mxu1  ;;  %v15208_v18 = vcombine.high %v5114_v15, %v5122_v3  ;;  %v5098_v11 = vld [vmem:[%s16679_s26 + $0x18a8] sm:$0xff] }
 0x5d9   : > { %v11784_v53 = vcombine.low %v11103_v32, %v11105_v52  ;;  %11399 = vmatpush1.bf16.msra.mxu1 %v15271_v50  ;;  %v5106_v50 = vld [vmem:[%s16679_s26 + $0x18e8] sm:$0xff]  ;;  %v14649_v32 = vcombine.low %v4555_v23, %v4563_v29  ;;  %v4523_v5 = vld [vmem:[%s16679_s26 + $0x6b0] sm:$0xff] }
 0x5da   : > { %v11107_v60 = vpop.f32.mrf.mxu1  ;;  %11400 = vmatprep.subr.bf16.mxu1 %v15256_v51  ;;  %11446 = vmatpush1.bf16.msra.mxu0 %v14457_v36  ;;  %v4547_v36 = vld [vmem:[%s16679_s26 + $0x770] sm:$0xff]  ;;  %v15207_v51 = vcombine.low %v5114_v15, %v5122_v3  ;;  %v15192_v52 = vcombine.high %v5098_v11, %v5106_v50  ;;  %v15191_v49 = vcombine.low %v5098_v11, %v5106_v50  ;;  %v5306_v12 = vld [vmem:[%s16679_s26 + $0x1f28] sm:$0xff] }
 0x5db   : > { %v11812_v30 = vrot.slane %v11784_v53, %v16729_v54  ;;  %11447 = vmatprep.subr.bf16.mxu0 %v14442_v55  ;;  %v14634_v55 = vcombine.high %v4539_v22, %v4547_v36  ;;  %v14633_v53 = vcombine.low %v4539_v22, %v4547_v36  ;;  %v14618_v60 = vcombine.high %v4523_v5, %v4531_v58  ;;  %v5290_v15 = vld [vmem:[%s16679_s26 + $0x1ea8] sm:$0xff]  ;;  %v4483_v23 = vld [vmem:[%s16679_s26 + $0x570] sm:$0xff] }
 0x5dc   : > { %v14617_v4 = vcombine.low %v4523_v5, %v4531_v58  ;;  %v5298_v3 = vld [vmem:[%s16679_s26 + $0x1ee8] sm:$0xff]  ;;  %v4467_v11 = vld [vmem:[%s16679_s26 + $0x4f0] sm:$0xff] }
 0x5dd   : > { %v11814_v26 = vcombine.low %v11805_v44, %v11812_v30  ;;  %11401 = vmatpush1.bf16.msra.mxu1 %v15255_v37  ;;  %v15176_v37 = vcombine.high %v5082_v47, %v5090_v24  ;;  %v4507_v44 = vld [vmem:[%s16679_s26 + $0x630] sm:$0xff]  ;;  %v15383_v50 = vcombine.low %v5290_v15, %v5298_v3 }
 0x5de   : > { %11402 = vmatprep.subr.bf16.mxu1 %v15240_v8  ;;  %11448 = vmatpush1.bf16.msra.mxu0 %v14441_v14  ;;  %v5322_v14 = vld [vmem:[%s16679_s26 + $0x1fa8] sm:$0xff]  ;;  %v4515_v30 = vld [vmem:[%s16679_s26 + $0x670] sm:$0xff] }
 0x5df   : > { %v11828_v31 = vrot.slane %v11814_v26, %v16729_v54  ;;  %11449 = vmatprep.subr.bf16.mxu0 %v14426_v62  ;;  %v5330_v8 = vld [vmem:[%s16679_s26 + $0x1fe8] sm:$0xff]  ;;  %v15175_v62 = vcombine.low %v5082_v47, %v5090_v24  ;;  %v14602_v6 = vcombine.high %v4507_v44, %v4515_v30  ;;  %v4451_v47 = vld [vmem:[%s16679_s26 + $0x470] sm:$0xff] }
 0x5e0   : > { %v15416_v7 = vcombine.high %v5322_v14, %v5330_v8  ;;  %v5314_v26 = vld [vmem:[%s16679_s26 + $0x1f68] sm:$0xff] }
 0x5e1   : > { %v11829_v34 = vcombine.low %v11821_v57, %v11828_v31  ;;  %11403 = vmatpush1.bf16.msra.mxu1 %v15239_v16  ;;  %v4491_v16 = vld [vmem:[%s16679_s26 + $0x5b0] sm:$0xff]  ;;  %v14601_v57 = vcombine.low %v4507_v44, %v4515_v30  ;;  %v15400_v31 = vcombine.high %v5306_v12, %v5314_v26  ;;  %v15399_v29 = vcombine.low %v5306_v12, %v5314_v26 }
 0x5e2   : > { %11404 = vmatprep.subr.bf16.mxu1 %v15224_v41  ;;  %11450 = vmatpush1.bf16.msra.mxu0 %v14425_v63  ;;  %v4499_v63 = vld [vmem:[%s16679_s26 + $0x5f0] sm:$0xff]  ;;  %v15415_v41 = vcombine.low %v5322_v14, %v5330_v8 }
 0x5e3   : > { %v11881_v20 = vadd.f32 %v11829_v34, %v4299_v21  ;;  %11451 = vmatprep.subr.bf16.mxu0 %v14410_v19  ;;  %v14586_v19 = vcombine.high %v4491_v16, %v4499_v63  ;;  %v4475_v21 = vld [vmem:[%s16679_s26 + $0x530] sm:$0xff]  ;;  %v14585_v34 = vcombine.low %v4491_v16, %v4499_v63 }
 0x5e4   : > { %v14569_v22 = vcombine.low %v4475_v21, %v4483_v23  ;;  %v4947_v14 = vld [vmem:[%s16679_s26 + $0x13f0] sm:$0xff] }
 0x5e5   : > { %11883 = vst [vmem:[#allocation2] sm:$0xff] %v11881_v20  ;;  %11405 = vmatpush1.bf16.msra.mxu1 %v15223_v13  ;;  %v15384_v13 = vcombine.high %v5290_v15, %v5298_v3  ;;  %v5282_v20 = vld [vmem:[%s16679_s26 + $0x1e68] sm:$0xff]  ;;  %v4931_v12 = vld [vmem:[%s16679_s26 + $0x1370] sm:$0xff] }
 0x5e6   : > { %11406 = vmatprep.subr.bf16.mxu1 %v15208_v18  ;;  %11452 = vmatpush1.bf16.msra.mxu0 %v14409_v10  ;;  %v14570_v10 = vcombine.high %v4475_v21, %v4483_v23  ;;  %v5274_v18 = vld [vmem:[%s16679_s26 + $0x1e28] sm:$0xff]  ;;  %v4915_v15 = vld [vmem:[%s16679_s26 + $0x12f0] sm:$0xff] }
 0x5e7   : > { %11453 = vmatprep.subr.bf16.mxu0 %v14650_v59  ;;  %v4459_v59 = vld [vmem:[%s16679_s26 + $0x4b0] sm:$0xff]  ;;  %v15368_v36 = vcombine.high %v5274_v18, %v5282_v20  ;;  %v15367_v24 = vcombine.low %v5274_v18, %v5282_v20 }
 0x5e8   : > { %v14553_v5 = vcombine.low %v4459_v59, %v4467_v11  ;;  %v4691_v18 = vld [vmem:[%s16679_s26 + $0xbf0] sm:$0xff] }
 0x5e9   : > { %11407 = vmatpush1.bf16.msra.mxu1 %v15207_v51  ;;  %v14554_v51 = vcombine.high %v4459_v59, %v4467_v11  ;;  %v4891_v20 = vld [vmem:[%s16679_s26 + $0x1230] sm:$0xff] }
 0x5ea   : > { %11408 = vmatprep.subr.bf16.mxu1 %v15192_v52  ;;  %11454 = vmatpush2.bf16.msra.mxu0 %v14649_v32  ;;  %v5258_v32 = vld [vmem:[%s16679_s26 + $0x1da8] sm:$0xff]  ;;  %v4899_v59 = vld [vmem:[%s16679_s26 + $0x1270] sm:$0xff] }
 0x5eb   : > { %11455 = vmatprep.subr.bf16.mxu0 %v14634_v55  ;;  %v5266_v52 = vld [vmem:[%s16679_s26 + $0x1de8] sm:$0xff]  ;;  %v4443_v55 = vld [vmem:[%s16679_s26 + $0x430] sm:$0xff] }
 0x5ec   : > { %v15352_v58 = vcombine.high %v5258_v32, %v5266_v52  ;;  %v15351_v8 = vcombine.low %v5258_v32, %v5266_v52  ;;  %v14537_v44 = vcombine.low %v4443_v55, %v4451_v47  ;;  %v14986_v32 = vcombine.high %v4891_v20, %v4899_v59  ;;  %v4667_v52 = vld [vmem:[%s16679_s26 + $0xb30] sm:$0xff] }
 0x5ed   : > { %11409 = vmatpush1.bf16.msra.mxu1 %v15191_v49  ;;  %v14538_v49 = vcombine.high %v4443_v55, %v4451_v47  ;;  %v4675_v55 = vld [vmem:[%s16679_s26 + $0xb70] sm:$0xff] }
 0x5ee   : > { %11410 = vmatprep.subr.bf16.mxu1 %v15176_v37  ;;  %11456 = vmatpush2.bf16.msra.mxu0 %v14633_v53  ;;  %v5242_v53 = vld [vmem:[%s16679_s26 + $0x1d28] sm:$0xff]  ;;  %v4875_v47 = vld [vmem:[%s16679_s26 + $0x11b0] sm:$0xff] }
 0x5ef   : > { %11457 = vmatprep.subr.bf16.mxu0 %v14618_v60  ;;  %v5250_v37 = vld [vmem:[%s16679_s26 + $0x1d68] sm:$0xff]  ;;  %v4939_v60 = vld [vmem:[%s16679_s26 + $0x13b0] sm:$0xff] }
 0x5f0   : > { %v15336_v30 = vcombine.high %v5242_v53, %v5250_v37  ;;  %v15335_v26 = vcombine.low %v5242_v53, %v5250_v37  ;;  %v15033_v16 = vcombine.low %v4939_v60, %v4947_v14  ;;  %v4651_v37 = vld [vmem:[%s16679_s26 + $0xab0] sm:$0xff] }
 0x5f1   : > { %11411 = vmatpush1.bf16.msra.mxu1 %v15175_v62  ;;  %v15034_v62 = vcombine.high %v4939_v60, %v4947_v14  ;;  %v4659_v60 = vld [vmem:[%s16679_s26 + $0xaf0] sm:$0xff] }
 0x5f2   : > { %11412 = vmatprep.subr.bf16.mxu1 %v15416_v7  ;;  %11458 = vmatpush2.bf16.msra.mxu0 %v14617_v4  ;;  %v5226_v4 = vld [vmem:[%s16679_s26 + $0x1ca8] sm:$0xff] }
 0x5f3   : > { %11459 = vmatprep.subr.bf16.mxu0 %v14602_v6  ;;  %v5234_v7 = vld [vmem:[%s16679_s26 + $0x1ce8] sm:$0xff]  ;;  %v4923_v6 = vld [vmem:[%s16679_s26 + $0x1330] sm:$0xff] }
 0x5f4   : > { %v15320_v63 = vcombine.high %v5226_v4, %v5234_v7  ;;  %v15319_v21 = vcombine.low %v5226_v4, %v5234_v7  ;;  %v15017_v23 = vcombine.low %v4923_v6, %v4931_v12 }
 0x5f5   : > { %11413 = vmatpush2.bf16.msra.mxu1 %v15415_v41  ;;  %v15018_v41 = vcombine.high %v4923_v6, %v4931_v12  ;;  %v14746_v6 = vcombine.high %v4651_v37, %v4659_v60 }
 0x5f6   : > { %11414 = vmatprep.subr.bf16.mxu1 %v15400_v31  ;;  %11460 = vmatpush2.bf16.msra.mxu0 %v14601_v57  ;;  %v5210_v57 = vld [vmem:[%s16679_s26 + $0x1c28] sm:$0xff] }
 0x5f7   : > { %11461 = vmatprep.subr.bf16.mxu0 %v14586_v19  ;;  %v5218_v31 = vld [vmem:[%s16679_s26 + $0x1c68] sm:$0xff]  ;;  %v4907_v19 = vld [vmem:[%s16679_s26 + $0x12b0] sm:$0xff] }
 0x5f9   : > { %11415 = vmatpush2.bf16.msra.mxu1 %v15399_v29  ;;  %v15304_v29 = vcombine.high %v5210_v57, %v5218_v31 }
 0x5fa   : > { %11416 = vmatprep.subr.bf16.mxu1 %v15384_v13  ;;  %11462 = vmatpush2.bf16.msra.mxu0 %v14585_v34  ;;  %v15002_v13 = vcombine.high %v4907_v19, %v4915_v15 }
 0x5fb   : > { %11463 = vmatprep.subr.bf16.mxu0 %v14570_v10  ;;  %v4683_v10 = vld [vmem:[%s16679_s26 + $0xbb0] sm:$0xff] }
 0x5fd   : > { %11417 = vmatpush2.bf16.msra.mxu1 %v15383_v50  ;;  %v15303_v50 = vcombine.low %v5210_v57, %v5218_v31  ;;  %v4843_v57 = vld [vmem:[%s16679_s26 + $0x10b0] sm:$0xff] }
 0x5fe   : > { %11418 = vmatprep.subr.bf16.mxu1 %v15368_v36  ;;  %11464 = vmatpush2.bf16.msra.mxu0 %v14569_v22  ;;  %v15001_v22 = vcombine.low %v4907_v19, %v4915_v15  ;;  %v14778_v36 = vcombine.high %v4683_v10, %v4691_v18  ;;  %v4851_v31 = vld [vmem:[%s16679_s26 + $0x10f0] sm:$0xff]  ;;  %v14745_v19 = vcombine.low %v4651_v37, %v4659_v60 }
 0x5ff   : > { %11465 = vmatprep.subr.bf16.mxu0 %v14554_v51 }
 0x601   : > { %11419 = vmatpush2.bf16.msra.mxu1 %v15367_v24  ;;  %v4883_v24 = vld [vmem:[%s16679_s26 + $0x11f0] sm:$0xff] }
 0x602   : > { %11420 = vmatprep.subr.bf16.mxu1 %v15352_v58  ;;  %11466 = vmatpush2.bf16.msra.mxu0 %v14553_v5  ;;  %v14777_v5 = vcombine.low %v4683_v10, %v4691_v18  ;;  %v14985_v58 = vcombine.low %v4891_v20, %v4899_v59  ;;  %v14970_v53 = vcombine.high %v4875_v47, %v4883_v24  ;;  %v4827_v10 = vld [vmem:[%s16679_s26 + $0x1030] sm:$0xff] }
 0x603   : > { %11467 = vmatprep.subr.bf16.mxu0 %v14538_v49  ;;  %v14762_v49 = vcombine.high %v4667_v52, %v4675_v55  ;;  %v14969_v7 = vcombine.low %v4875_v47, %v4883_v24  ;;  %v4835_v18 = vld [vmem:[%s16679_s26 + $0x1070] sm:$0xff] }
 0x604   : > { %v4587_v24 = vld [vmem:[%s16679_s26 + $0x8b0] sm:$0xff] }
 0x605   : > { %11421 = vmatpush2.bf16.msra.mxu1 %v15351_v8  ;;  %v4859_v8 = vld [vmem:[%s16679_s26 + $0x1130] sm:$0xff] }
 0x606   : > { %11422 = vmatprep.subr.bf16.mxu1 %v15336_v30  ;;  %11468 = vmatpush2.bf16.msra.mxu0 %v14537_v44  ;;  %v4867_v44 = vld [vmem:[%s16679_s26 + $0x1170] sm:$0xff] }
 0x607   : > { %11519 = vmatprep.subr.bf16.mxu0 %v15034_v62  ;;  %v14761_v62 = vcombine.low %v4667_v52, %v4675_v55  ;;  %v14921_v52 = vcombine.low %v4827_v10, %v4835_v18 }
 0x609   : > { %11423 = vmatpush2.bf16.msra.mxu1 %v15335_v26  ;;  %v11225_v3 = vpop.f32.mrf.mxu0  ;;  %11470 = vmatmul.mubr.bf16.vlgmr.msra.gmra.mxu0 %v17442_v42  ;;  %v14954_v26 = vcombine.high %v4859_v8, %v4867_v44 }
 0x60a   : > { %11424 = vmatprep.subr.bf16.mxu1 %v15320_v63  ;;  %11520 = vmatpush1.bf16.msra.mxu0 %v15033_v16  ;;  %v4635_v16 = vld [vmem:[%s16679_s26 + $0xa30] sm:$0xff] }
 0x60b   : > { %11551 = vmatprep.mubr.bf16.mxu0 %v17476_v40  ;;  %v11227_v34 = vpop.f32.mrf.mxu0  ;;  %11521 = vmatprep.subr.bf16.mxu0 %v15018_v41  ;;  %v4643_v63 = vld [vmem:[%s16679_s26 + $0xa70] sm:$0xff] }
 0x60c   : > { %v14729_v20 = vcombine.low %v4635_v16, %v4643_v63 }
 0x60d   : > { %11425 = vmatpush2.bf16.msra.mxu1 %v15319_v21  ;;  %v11229_v11 = vpop.f32.mrf.mxu0 }
 0x60e   : > { %11426 = vmatprep.subr.bf16.mxu1 %v15304_v29  ;;  %11522 = vmatpush1.bf16.msra.mxu0 %v15017_v23  ;;  %v14730_v23 = vcombine.high %v4635_v16, %v4643_v63  ;;  %v4619_v29 = vld [vmem:[%s16679_s26 + $0x9b0] sm:$0xff]  ;;  %v14922_v11 = vcombine.high %v4827_v10, %v4835_v18 }
 0x60f   : > { %v11230_v51 = vpop.f32.mrf.mxu0  ;;  %11523 = vmatprep.subr.bf16.mxu0 %v15002_v13  ;;  %v4627_v13 = vld [vmem:[%s16679_s26 + $0x9f0] sm:$0xff] }
 0x610   : > { %v14714_v59 = vcombine.high %v4619_v29, %v4627_v13  ;;  %v5075_v51 = vld [vmem:[%s16679_s26 + $0x17f0] sm:$0xff] }
 0x611   : > { %11427 = vmatpush2.bf16.msra.mxu1 %v15303_v50  ;;  %v4603_v50 = vld [vmem:[%s16679_s26 + $0x930] sm:$0xff] }
 0x612   : > { %11478 = vmatprep.subr.bf16.mxu1 %v14778_v36  ;;  %11524 = vmatpush1.bf16.msra.mxu0 %v15001_v22  ;;  %v4611_v22 = vld [vmem:[%s16679_s26 + $0x970] sm:$0xff] }
 0x613   : > { %11525 = vmatprep.subr.bf16.mxu0 %v14986_v32  ;;  %v5067_v36 = vld [vmem:[%s16679_s26 + $0x17b0] sm:$0xff]  ;;  %v14713_v32 = vcombine.low %v4619_v29, %v4627_v13  ;;  %v14698_v55 = vcombine.high %v4603_v50, %v4611_v22 }
 0x614   : > { %v11184_v14 = vpop.f32.mrf.mxu1  ;;  %11429 = vmatmul.mubr.bf16.vlgmr.msra.gmra.mxu1 %v17602_v28  ;;  %v15162_v47 = vcombine.high %v5067_v36, %v5075_v51  ;;  %v15161_v37 = vcombine.low %v5067_v36, %v5075_v51  ;;  %v4819_v16 = vld [vmem:[%s16679_s26 + $0xff0] sm:$0xff] }
 0x615   : > { %v11185_v30 = vadd.f32 %v11184_v14, %v18281_v39  ;;  %11479 = vmatpush1.bf16.msra.mxu1 %v14777_v5  ;;  %11510 = vmatprep.mubr.bf16.mxu1 %v17359_v9  ;;  %v4595_v5 = vld [vmem:[%s16679_s26 + $0x8f0] sm:$0xff] }
 0x616   : > { %v11186_v4 = vpop.f32.mrf.mxu1  ;;  %11480 = vmatprep.subr.bf16.mxu1 %v14762_v49  ;;  %11526 = vmatpush1.bf16.msra.mxu0 %v14985_v58  ;;  %v5051_v58 = vld [vmem:[%s16679_s26 + $0x1730] sm:$0xff]  ;;  %v14682_v60 = vcombine.high %v4587_v24, %v4595_v5 }
 0x617   : > { %v11187_v12 = vadd.f32 %v11186_v4, %v18285_v56  ;;  %11527 = vmatprep.subr.bf16.mxu0 %v14970_v53  ;;  %v18389_v39 = vadd.f32 %v11225_v3, %v11185_v30  ;;  %v14953_v56 = vcombine.low %v4859_v8, %v4867_v44  ;;  %v14938_v3 = vcombine.high %v4843_v57, %v4851_v31  ;;  %v5059_v49 = vld [vmem:[%s16679_s26 + $0x1770] sm:$0xff] }
 0x618   : > { %v11188_v41 = vpop.f32.mrf.mxu1  ;;  %v14697_v53 = vcombine.low %v4603_v50, %v4611_v22  ;;  %v15146_v14 = vcombine.high %v5051_v58, %v5059_v49  ;;  %v4571_v8 = vld [vmem:[%s16679_s26 + $0x830] sm:$0xff]  ;;  %v14681_v4 = vcombine.low %v4587_v24, %v4595_v5 }
 0x619   : > { %11481 = vmatpush1.bf16.msra.mxu1 %v14761_v62  ;;  %v18393_v15 = vadd.f32 %v11227_v34, %v11187_v12  ;;  %v14937_v34 = vcombine.low %v4843_v57, %v4851_v31  ;;  %v4579_v44 = vld [vmem:[%s16679_s26 + $0x870] sm:$0xff] }
 0x61a   : > { %v11189_v21 = vpop.f32.mrf.mxu1  ;;  %11482 = vmatprep.subr.bf16.mxu1 %v14746_v6  ;;  %11528 = vmatpush1.bf16.msra.mxu0 %v14969_v7  ;;  %v5035_v30 = vld [vmem:[%s16679_s26 + $0x16b0] sm:$0xff]  ;;  %v15145_v7 = vcombine.low %v5051_v58, %v5059_v49  ;;  %v14666_v6 = vcombine.high %v4571_v8, %v4579_v44  ;;  %v14665_v57 = vcombine.low %v4571_v8, %v4579_v44 }
 0x61b   : > { %11529 = vmatprep.subr.bf16.mxu0 %v14954_v26  ;;  %v5043_v62 = vld [vmem:[%s16679_s26 + $0x16f0] sm:$0xff] }
 0x61c   : > { %v15130_v12 = vcombine.high %v5035_v30, %v5043_v62  ;;  %v4811_v26 = vld [vmem:[%s16679_s26 + $0xfb0] sm:$0xff]  ;;  %v15129_v31 = vcombine.low %v5035_v30, %v5043_v62 }
 0x61d   : > { %11483 = vmatpush1.bf16.msra.mxu1 %v14745_v19  ;;  %v5019_v63 = vld [vmem:[%s16679_s26 + $0x1630] sm:$0xff]  ;;  %v14906_v19 = vcombine.high %v4811_v26, %v4819_v16  ;;  %v14905_v13 = vcombine.low %v4811_v26, %v4819_v16  ;;  %v4436_v26 = vld [vmem:[%s16679_s26 + $0x3f8] sm:$0xff] }
 0x61e   : > { %11484 = vmatprep.subr.bf16.mxu1 %v14730_v23  ;;  %11530 = vmatpush1.bf16.msra.mxu0 %v14953_v56  ;;  %v5027_v41 = vld [vmem:[%s16679_s26 + $0x1670] sm:$0xff] }
 0x61f   : > { %11531 = vmatprep.subr.bf16.mxu0 %v14938_v3  ;;  %v15114_v21 = vcombine.high %v5019_v63, %v5027_v41  ;;  %v4795_v56 = vld [vmem:[%s16679_s26 + $0xf30] sm:$0xff]  ;;  %v15113_v10 = vcombine.low %v5019_v63, %v5027_v41 }
 0x620   : > { %v4803_v23 = vld [vmem:[%s16679_s26 + $0xf70] sm:$0xff] }
 0x621   : > { %11485 = vmatpush1.bf16.msra.mxu1 %v14729_v20  ;;  %v5003_v3 = vld [vmem:[%s16679_s26 + $0x15b0] sm:$0xff]  ;;  %v14890_v18 = vcombine.high %v4795_v56, %v4803_v23  ;;  %v14889_v22 = vcombine.low %v4795_v56, %v4803_v23  ;;  %v4420_v56 = vld [vmem:[%s16679_s26 + $0x378] sm:$0xff] }
 0x622   : > { %11486 = vmatprep.subr.bf16.mxu1 %v14714_v59  ;;  %11532 = vmatpush1.bf16.msra.mxu0 %v14937_v34  ;;  %v5011_v29 = vld [vmem:[%s16679_s26 + $0x15f0] sm:$0xff] }
 0x623   : > { %11533 = vmatprep.subr.bf16.mxu0 %v14922_v11  ;;  %v15098_v20 = vcombine.high %v5003_v3, %v5011_v29  ;;  %v4779_v34 = vld [vmem:[%s16679_s26 + $0xeb0] sm:$0xff]  ;;  %v15097_v36 = vcombine.low %v5003_v3, %v5011_v29 }
 0x624   : > { %v4787_v59 = vld [vmem:[%s16679_s26 + $0xef0] sm:$0xff] }
 0x625   : > { %11487 = vmatpush1.bf16.msra.mxu1 %v14713_v32  ;;  %v4987_v11 = vld [vmem:[%s16679_s26 + $0x1530] sm:$0xff]  ;;  %v14874_v51 = vcombine.high %v4779_v34, %v4787_v59  ;;  %v14873_v5 = vcombine.low %v4779_v34, %v4787_v59  ;;  %v4404_v34 = vld [vmem:[%s16679_s26 + $0x2f8] sm:$0xff] }
 0x626   : > { %11488 = vmatprep.subr.bf16.mxu1 %v14698_v55  ;;  %11534 = vmatpush1.bf16.msra.mxu0 %v14921_v52  ;;  %v4995_v50 = vld [vmem:[%s16679_s26 + $0x1570] sm:$0xff] }
 0x627   : > { %11535 = vmatprep.subr.bf16.mxu0 %v15162_v47  ;;  %v15082_v32 = vcombine.high %v4987_v11, %v4995_v50  ;;  %v4763_v52 = vld [vmem:[%s16679_s26 + $0xe30] sm:$0xff]  ;;  %v15081_v58 = vcombine.low %v4987_v11, %v4995_v50 }
 0x628   : > { %v4771_v55 = vld [vmem:[%s16679_s26 + $0xe70] sm:$0xff] }
 0x629   : > { %11489 = vmatpush1.bf16.msra.mxu1 %v14697_v53  ;;  %v4971_v47 = vld [vmem:[%s16679_s26 + $0x14b0] sm:$0xff]  ;;  %v14858_v49 = vcombine.high %v4763_v52, %v4771_v55  ;;  %v14857_v44 = vcombine.low %v4763_v52, %v4771_v55  ;;  %v4380_v55 = vld [vmem:[%s16679_s26 + $0x238] sm:$0xff] }
 0x62a   : > { %11490 = vmatprep.subr.bf16.mxu1 %v14682_v60  ;;  %11536 = vmatpush2.bf16.msra.mxu0 %v15161_v37  ;;  %v4979_v24 = vld [vmem:[%s16679_s26 + $0x14f0] sm:$0xff] }
 0x62b   : > { %11537 = vmatprep.subr.bf16.mxu0 %v15146_v14  ;;  %v15066_v53 = vcombine.high %v4971_v47, %v4979_v24  ;;  %v4747_v37 = vld [vmem:[%s16679_s26 + $0xdb0] sm:$0xff]  ;;  %v15065_v30 = vcombine.low %v4971_v47, %v4979_v24  ;;  %v4388_v47 = vld [vmem:[%s16679_s26 + $0x278] sm:$0xff] }
 0x62c   : > { %v4755_v60 = vld [vmem:[%s16679_s26 + $0xdf0] sm:$0xff] }
 0x62d   : > { %11491 = vmatpush1.bf16.msra.mxu1 %v14681_v4  ;;  %v4955_v14 = vld [vmem:[%s16679_s26 + $0x1430] sm:$0xff]  ;;  %v14842_v62 = vcombine.high %v4747_v37, %v4755_v60  ;;  %v14841_v16 = vcombine.low %v4747_v37, %v4755_v60 }
 0x62e   : > { %11492 = vmatprep.subr.bf16.mxu1 %v14666_v6  ;;  %11538 = vmatpush2.bf16.msra.mxu0 %v15145_v7  ;;  %v4963_v8 = vld [vmem:[%s16679_s26 + $0x1470] sm:$0xff] }
 0x62f   : > { %11539 = vmatprep.subr.bf16.mxu0 %v15130_v12  ;;  %v15050_v4 = vcombine.high %v4955_v14, %v4963_v8  ;;  %v4731_v7 = vld [vmem:[%s16679_s26 + $0xd30] sm:$0xff]  ;;  %v4428_v12 = vld [vmem:[%s16679_s26 + $0x3b8] sm:$0xff]  ;;  %v15049_v63 = vcombine.low %v4955_v14, %v4963_v8 }
 0x630   : > { %v4739_v6 = vld [vmem:[%s16679_s26 + $0xd70] sm:$0xff]  ;;  %v14523_v3 = vcombine.low %v4428_v12, %v4436_v26  ;;  %v4364_v14 = vld [vmem:[%s16679_s26 + $0x1b8] sm:$0xff] }
 0x631   : > { %11493 = vmatpush1.bf16.msra.mxu1 %v14665_v57  ;;  %v14826_v41 = vcombine.high %v4731_v7, %v4739_v6  ;;  %v14524_v57 = vcombine.high %v4428_v12, %v4436_v26  ;;  %v14825_v23 = vcombine.low %v4731_v7, %v4739_v6  ;;  %v5203_v52 = vld [vmem:[%s16679_s26 + $0x1bf0] sm:$0xff]  ;;  %v4372_v8 = vld [vmem:[%s16679_s26 + $0x1f8] sm:$0xff] }
 0x632   : > { %11494 = vmatprep.subr.bf16.mxu1 %v14906_v19  ;;  %11540 = vmatpush2.bf16.msra.mxu0 %v15129_v31  ;;  %v4715_v31 = vld [vmem:[%s16679_s26 + $0xcb0] sm:$0xff]  ;;  %v4348_v26 = vld [vmem:[%s16679_s26 + $0x138] sm:$0xff] }
 0x633   : > { %11541 = vmatprep.subr.bf16.mxu0 %v15114_v21  ;;  %v4723_v19 = vld [vmem:[%s16679_s26 + $0xcf0] sm:$0xff]  ;;  %v4412_v21 = vld [vmem:[%s16679_s26 + $0x338] sm:$0xff] }
 0x634   : > { %v14810_v29 = vcombine.high %v4715_v31, %v4723_v19  ;;  %v14809_v11 = vcombine.low %v4715_v31, %v4723_v19  ;;  %v14507_v50 = vcombine.low %v4412_v21, %v4420_v56  ;;  %v5179_v37 = vld [vmem:[%s16679_s26 + $0x1b30] sm:$0xff]  ;;  %v14459_v31 = vcombine.low %v4364_v14, %v4372_v8 }
 0x635   : > { %11495 = vmatpush2.bf16.msra.mxu1 %v14905_v13  ;;  %v14508_v13 = vcombine.high %v4412_v21, %v4420_v56  ;;  %v5187_v60 = vld [vmem:[%s16679_s26 + $0x1b70] sm:$0xff] }
 0x636   : > { %11496 = vmatprep.subr.bf16.mxu1 %v14890_v18  ;;  %11542 = vmatpush2.bf16.msra.mxu0 %v15113_v10  ;;  %v4699_v10 = vld [vmem:[%s16679_s26 + $0xc30] sm:$0xff] }
 0x637   : > { %11543 = vmatprep.subr.bf16.mxu0 %v15098_v20  ;;  %v4707_v18 = vld [vmem:[%s16679_s26 + $0xc70] sm:$0xff]  ;;  %v4396_v20 = vld [vmem:[%s16679_s26 + $0x2b8] sm:$0xff] }
 0x638   : > { %v5163_v7 = vld [vmem:[%s16679_s26 + $0x1ab0] sm:$0xff] }
 0x639   : > { %11497 = vmatpush2.bf16.msra.mxu1 %v14889_v22  ;;  %v14794_v22 = vcombine.high %v4699_v10, %v4707_v18  ;;  %v5171_v6 = vld [vmem:[%s16679_s26 + $0x1af0] sm:$0xff] }
 0x63a   : > { %11498 = vmatprep.subr.bf16.mxu1 %v14874_v51  ;;  %11544 = vmatpush2.bf16.msra.mxu0 %v15097_v36  ;;  %v14492_v51 = vcombine.high %v4396_v20, %v4404_v34  ;;  %v15258_v19 = vcombine.high %v5163_v7, %v5171_v6 }
 0x63b   : > { %11545 = vmatprep.subr.bf16.mxu0 %v15082_v32  ;;  %v5195_v32 = vld [vmem:[%s16679_s26 + $0x1bb0] sm:$0xff] }
 0x63d   : > { %11499 = vmatpush2.bf16.msra.mxu1 %v14873_v5  ;;  %v14793_v5 = vcombine.low %v4699_v10, %v4707_v18  ;;  %v15257_v18 = vcombine.low %v5163_v7, %v5171_v6 }
 0x63e   : > { %11500 = vmatprep.subr.bf16.mxu1 %v14858_v49  ;;  %11546 = vmatpush2.bf16.msra.mxu0 %v15081_v58  ;;  %v14491_v58 = vcombine.low %v4396_v20, %v4404_v34  ;;  %v15290_v49 = vcombine.high %v5195_v32, %v5203_v52 }
 0x63f   : > { %11547 = vmatprep.subr.bf16.mxu0 %v15066_v53  ;;  %v14476_v53 = vcombine.high %v4380_v55, %v4388_v47 }
 0x641   : > { %11501 = vmatpush2.bf16.msra.mxu1 %v14857_v44  ;;  %v15289_v44 = vcombine.low %v5195_v32, %v5203_v52  ;;  %v4324_v32 = vld [vmem:[%s16679_s26 + $0x78] sm:$0xff] }
 0x642   : > { %11502 = vmatprep.subr.bf16.mxu1 %v14842_v62  ;;  %11548 = vmatpush2.bf16.msra.mxu0 %v15065_v30  ;;  %v14475_v30 = vcombine.low %v4380_v55, %v4388_v47  ;;  %v15274_v62 = vcombine.high %v5179_v37, %v5187_v60 }
 0x643   : > { %11549 = vmatprep.subr.bf16.mxu0 %v15050_v4  ;;  %v14460_v4 = vcombine.high %v4364_v14, %v4372_v8  ;;  %v5099_v8 = vld [vmem:[%s16679_s26 + $0x18b0] sm:$0xff] }
 0x645   : > { %11503 = vmatpush2.bf16.msra.mxu1 %v14841_v16  ;;  %v4356_v16 = vld [vmem:[%s16679_s26 + $0x178] sm:$0xff] }
 0x646   : > { %11504 = vmatprep.subr.bf16.mxu1 %v14826_v41  ;;  %11550 = vmatpush2.bf16.msra.mxu0 %v15049_v63  ;;  %v15273_v41 = vcombine.low %v5179_v37, %v5187_v60  ;;  %v14444_v56 = vcombine.high %v4348_v26, %v4356_v16 }
 0x647   : > { %11601 = vmatprep.subr.bf16.mxu0 %v14524_v57 }
 0x649   : > { %11505 = vmatpush2.bf16.msra.mxu1 %v14825_v23  ;;  %v18443_v59 = vpop.f32.mrf.mxu0  ;;  %11552 = vmatmul.mubr.bf16.vlgmr.msra.gmra.mxu0 %v17532_v2  ;;  %v5147_v23 = vld [vmem:[%s16679_s26 + $0x1a30] sm:$0xff] }
 0x64a   : > { %11506 = vmatprep.subr.bf16.mxu1 %v14810_v29  ;;  %11602 = vmatpush1.bf16.msra.mxu0 %v14523_v3  ;;  %v4332_v29 = vld [vmem:[%s16679_s26 + $0xb8] sm:$0xff] }
 0x64b   : > { %11633 = vmatprep.mubr.bf16.mxu0 %v17354_v43  ;;  %v18447_v36 = vpop.f32.mrf.mxu0  ;;  %11603 = vmatprep.subr.bf16.mxu0 %v14508_v13  ;;  %v4340_v13 = vld [vmem:[%s16679_s26 + $0xf8] sm:$0xff] }
 0x64c   : > { %v14427_v55 = vcombine.low %v4332_v29, %v4340_v13 }
 0x64d   : > { %11507 = vmatpush2.bf16.msra.mxu1 %v14809_v11  ;;  %v11311_v24 = vpop.f32.mrf.mxu0  ;;  %v14428_v11 = vcombine.high %v4332_v29, %v4340_v13  ;;  %v4508_v29 = vld [vmem:[%s16679_s26 + $0x638] sm:$0xff] }
 0x64e   : > { %11508 = vmatprep.subr.bf16.mxu1 %v14794_v22  ;;  %11604 = vmatpush1.bf16.msra.mxu0 %v14507_v50  ;;  %v5131_v50 = vld [vmem:[%s16679_s26 + $0x19b0] sm:$0xff]  ;;  %v4516_v13 = vld [vmem:[%s16679_s26 + $0x678] sm:$0xff] }
 0x64f   : > { %v11312_v43 = vpop.f32.mrf.mxu0  ;;  %11605 = vmatprep.subr.bf16.mxu0 %v14492_v51  ;;  %v5139_v22 = vld [vmem:[%s16679_s26 + $0x19f0] sm:$0xff]  ;;  %v4316_v51 = vld [vmem:[%s16679_s26 + $0x38] sm:$0xff] }
 0x650   : > { %v15226_v47 = vcombine.high %v5131_v50, %v5139_v22  ;;  %v14412_v24 = vcombine.high %v4316_v51, %v4324_v32  ;;  %v4564_v43 = vld [vmem:[%s16679_s26 + $0x7f8] sm:$0xff]  ;;  %v14411_v37 = vcombine.low %v4316_v51, %v4324_v32 }
 0x651   : > { %11509 = vmatpush2.bf16.msra.mxu1 %v14793_v5  ;;  %v5115_v5 = vld [vmem:[%s16679_s26 + $0x1930] sm:$0xff]  ;;  %v4500_v51 = vld [vmem:[%s16679_s26 + $0x5f8] sm:$0xff] }
 0x652   : > { %11560 = vmatprep.subr.bf16.mxu1 %v15290_v49  ;;  %11606 = vmatpush1.bf16.msra.mxu0 %v14491_v58  ;;  %v5123_v58 = vld [vmem:[%s16679_s26 + $0x1970] sm:$0xff]  ;;  %v4556_v49 = vld [vmem:[%s16679_s26 + $0x7b8] sm:$0xff] }
 0x653   : > { %11607 = vmatprep.subr.bf16.mxu0 %v14476_v53  ;;  %v15225_v53 = vcombine.low %v5131_v50, %v5139_v22  ;;  %v15210_v60 = vcombine.high %v5115_v5, %v5123_v58  ;;  %v14652_v14 = vcombine.high %v4556_v49, %v4564_v43  ;;  %v14651_v7 = vcombine.low %v4556_v49, %v4564_v43  ;;  %v5315_v50 = vld [vmem:[%s16679_s26 + $0x1f70] sm:$0xff]  ;;  %v4492_v22 = vld [vmem:[%s16679_s26 + $0x5b8] sm:$0xff] }
 0x654   : > { %v11266_v12 = vpop.f32.mrf.mxu1  ;;  %11511 = vmatmul.mubr.bf16.vlgmr.msra.gmra.mxu1 %v17446_v61  ;;  %v4484_v49 = vld [vmem:[%s16679_s26 + $0x578] sm:$0xff] }
 0x655   : > { %v18463_v63 = vadd.f32 %v11266_v12, %v18389_v39  ;;  %11561 = vmatpush1.bf16.msra.mxu1 %v15289_v44  ;;  %11592 = vmatprep.mubr.bf16.mxu1 %v17600_v25  ;;  %v5155_v39 = vld [vmem:[%s16679_s26 + $0x1a70] sm:$0xff] }
 0x656   : > { %v11268_v57 = vpop.f32.mrf.mxu1  ;;  %11562 = vmatprep.subr.bf16.mxu1 %v15274_v62  ;;  %11608 = vmatpush1.bf16.msra.mxu0 %v14475_v30  ;;  %v15242_v34 = vcombine.high %v5147_v23, %v5155_v39  ;;  %v15241_v52 = vcombine.low %v5147_v23, %v5155_v39  ;;  %v5107_v44 = vld [vmem:[%s16679_s26 + $0x18f0] sm:$0xff]  ;;  %v4540_v30 = vld [vmem:[%s16679_s26 + $0x738] sm:$0xff] }
 0x657   : > { %v18467_v21 = vadd.f32 %v11268_v57, %v18393_v15  ;;  %11609 = vmatprep.subr.bf16.mxu0 %v14460_v4  ;;  %v14443_v15 = vcombine.low %v4348_v26, %v4356_v16  ;;  %v4548_v62 = vld [vmem:[%s16679_s26 + $0x778] sm:$0xff]  ;;  %v15209_v4 = vcombine.low %v5115_v5, %v5123_v58  ;;  %v15194_v6 = vcombine.high %v5099_v8, %v5107_v44  ;;  %v5083_v26 = vld [vmem:[%s16679_s26 + $0x1830] sm:$0xff] }
 0x658   : > { %v11270_v3 = vpop.f32.mrf.mxu1  ;;  %v14636_v12 = vcombine.high %v4540_v30, %v4548_v62  ;;  %v5091_v16 = vld [vmem:[%s16679_s26 + $0x1870] sm:$0xff]  ;;  %v4532_v57 = vld [vmem:[%s16679_s26 + $0x6f8] sm:$0xff] }
 0x659   : > { %v11830_v10 = vcombine.low %v18463_v63, %v18467_v21  ;;  %11563 = vmatpush1.bf16.msra.mxu1 %v15273_v41  ;;  %v4524_v41 = vld [vmem:[%s16679_s26 + $0x6b8] sm:$0xff]  ;;  %v5323_v39 = vld [vmem:[%s16679_s26 + $0x1fb0] sm:$0xff] }
 0x65a   : > { %v11271_v20 = vpop.f32.mrf.mxu1  ;;  %11564 = vmatprep.subr.bf16.mxu1 %v15258_v19  ;;  %11610 = vmatpush1.bf16.msra.mxu0 %v14459_v31  ;;  %v15193_v31 = vcombine.low %v5099_v8, %v5107_v44  ;;  %v14635_v19 = vcombine.low %v4540_v30, %v4548_v62  ;;  %v14620_v23 = vcombine.high %v4524_v41, %v4532_v57  ;;  %v5331_v3 = vld [vmem:[%s16679_s26 + $0x1ff0] sm:$0xff]  ;;  %v4476_v58 = vld [vmem:[%s16679_s26 + $0x538] sm:$0xff] }
 0x65b   : > { %11611 = vmatprep.subr.bf16.mxu0 %v14444_v56  ;;  %v15178_v56 = vcombine.high %v5083_v26, %v5091_v16  ;;  %v14619_v20 = vcombine.low %v4524_v41, %v4532_v57  ;;  %v15417_v32 = vcombine.low %v5323_v39, %v5331_v3  ;;  %v5299_v5 = vld [vmem:[%s16679_s26 + $0x1ef0] sm:$0xff]  ;;  %v4460_v44 = vld [vmem:[%s16679_s26 + $0x4b8] sm:$0xff] }
 0x65c   : > { %v5283_v8 = vld [vmem:[%s16679_s26 + $0x1e70] sm:$0xff]  ;;  %v4468_v30 = vld [vmem:[%s16679_s26 + $0x4f8] sm:$0xff] }
 0x65d   : > { %11565 = vmatpush1.bf16.msra.mxu1 %v15257_v18  ;;  %v15177_v18 = vcombine.low %v5083_v26, %v5091_v16  ;;  %v5267_v26 = vld [vmem:[%s16679_s26 + $0x1df0] sm:$0xff]  ;;  %v4444_v16 = vld [vmem:[%s16679_s26 + $0x438] sm:$0xff] }
 0x65e   : > { %11566 = vmatprep.subr.bf16.mxu1 %v15242_v34  ;;  %11612 = vmatpush1.bf16.msra.mxu0 %v14443_v15  ;;  %v15418_v15 = vcombine.high %v5323_v39, %v5331_v3  ;;  %v14604_v34 = vcombine.high %v4508_v29, %v4516_v13  ;;  %v4452_v41 = vld [vmem:[%s16679_s26 + $0x478] sm:$0xff]  ;;  %v5251_v39 = vld [vmem:[%s16679_s26 + $0x1d70] sm:$0xff] }
 0x65f   : > { %11613 = vmatprep.subr.bf16.mxu0 %v14428_v11  ;;  %v5307_v11 = vld [vmem:[%s16679_s26 + $0x1f30] sm:$0xff]  ;;  %v4940_v3 = vld [vmem:[%s16679_s26 + $0x13b8] sm:$0xff] }
 0x660   : > { %v15401_v43 = vcombine.low %v5307_v11, %v5315_v50  ;;  %v5124_v63 = vld [vmem:[%s16679_s26 + $0x1978] sm:$0xff] }
 0x661   : > { %11567 = vmatpush1.bf16.msra.mxu1 %v15241_v52  ;;  %v14603_v52 = vcombine.low %v4508_v29, %v4516_v13  ;;  %v4948_v29 = vld [vmem:[%s16679_s26 + $0x13f8] sm:$0xff] }
 0x662   : > { %11568 = vmatprep.subr.bf16.mxu1 %v15226_v47  ;;  %11614 = vmatpush1.bf16.msra.mxu0 %v14427_v55  ;;  %v15402_v55 = vcombine.high %v5307_v11, %v5315_v50  ;;  %v14588_v47 = vcombine.high %v4492_v22, %v4500_v51  ;;  %v5235_v11 = vld [vmem:[%s16679_s26 + $0x1cf0] sm:$0xff]  ;;  %v4924_v50 = vld [vmem:[%s16679_s26 + $0x1338] sm:$0xff] }
 0x663   : > { %11615 = vmatprep.subr.bf16.mxu0 %v14412_v24  ;;  %v5291_v24 = vld [vmem:[%s16679_s26 + $0x1eb0] sm:$0xff] }
 0x664   : > { %v15385_v62 = vcombine.low %v5291_v24, %v5299_v5 }
 0x665   : > { %11569 = vmatpush1.bf16.msra.mxu1 %v15225_v53  ;;  %v14587_v53 = vcombine.low %v4492_v22, %v4500_v51  ;;  %v4932_v22 = vld [vmem:[%s16679_s26 + $0x1378] sm:$0xff] }
 0x666   : > { %11570 = vmatprep.subr.bf16.mxu1 %v15210_v60  ;;  %11616 = vmatpush1.bf16.msra.mxu0 %v14411_v37  ;;  %v15386_v37 = vcombine.high %v5291_v24, %v5299_v5  ;;  %v14572_v60 = vcombine.high %v4476_v58, %v4484_v49  ;;  %v5219_v24 = vld [vmem:[%s16679_s26 + $0x1c70] sm:$0xff]  ;;  %v4908_v5 = vld [vmem:[%s16679_s26 + $0x12b8] sm:$0xff] }
 0x667   : > { %11617 = vmatprep.subr.bf16.mxu0 %v14652_v14  ;;  %v5275_v14 = vld [vmem:[%s16679_s26 + $0x1e30] sm:$0xff] }
 0x668   : > { %v15369_v57 = vcombine.low %v5275_v14, %v5283_v8 }
 0x669   : > { %11571 = vmatpush1.bf16.msra.mxu1 %v15209_v4  ;;  %v14571_v4 = vcombine.low %v4476_v58, %v4484_v49  ;;  %v4916_v58 = vld [vmem:[%s16679_s26 + $0x12f8] sm:$0xff] }
 0x66a   : > { %11572 = vmatprep.subr.bf16.mxu1 %v15194_v6  ;;  %11618 = vmatpush2.bf16.msra.mxu0 %v14651_v7  ;;  %v15370_v7 = vcombine.high %v5275_v14, %v5283_v8  ;;  %v14556_v6 = vcombine.high %v4460_v44, %v4468_v30  ;;  %v15004_v14 = vcombine.high %v4908_v5, %v4916_v58  ;;  %v4684_v8 = vld [vmem:[%s16679_s26 + $0xbb8] sm:$0xff] }
 0x66b   : > { %11619 = vmatprep.subr.bf16.mxu0 %v14636_v12  ;;  %v5259_v12 = vld [vmem:[%s16679_s26 + $0x1db0] sm:$0xff] }
 0x66c   : > { %v15353_v13 = vcombine.low %v5259_v12, %v5267_v26 }
 0x66d   : > { %11573 = vmatpush1.bf16.msra.mxu1 %v15193_v31  ;;  %v14555_v31 = vcombine.low %v4460_v44, %v4468_v30  ;;  %v4692_v44 = vld [vmem:[%s16679_s26 + $0xbf8] sm:$0xff] }
 0x66e   : > { %11574 = vmatprep.subr.bf16.mxu1 %v15178_v56  ;;  %11620 = vmatpush2.bf16.msra.mxu0 %v14635_v19  ;;  %v15354_v19 = vcombine.high %v5259_v12, %v5267_v26  ;;  %v14540_v56 = vcombine.high %v4444_v16, %v4452_v41  ;;  %v4892_v30 = vld [vmem:[%s16679_s26 + $0x1238] sm:$0xff] }
 0x66f   : > { %11621 = vmatprep.subr.bf16.mxu0 %v14620_v23  ;;  %v5243_v23 = vld [vmem:[%s16679_s26 + $0x1d30] sm:$0xff]  ;;  %v4668_v26 = vld [vmem:[%s16679_s26 + $0xb38] sm:$0xff] }
 0x670   : > { %v15337_v51 = vcombine.low %v5243_v23, %v5251_v39 }
 0x671   : > { %11575 = vmatpush1.bf16.msra.mxu1 %v15177_v18  ;;  %v14539_v18 = vcombine.low %v4444_v16, %v4452_v41  ;;  %v4676_v16 = vld [vmem:[%s16679_s26 + $0xb78] sm:$0xff] }
 0x672   : > { %11576 = vmatprep.subr.bf16.mxu1 %v15418_v15  ;;  %11622 = vmatpush2.bf16.msra.mxu0 %v14619_v20  ;;  %v15338_v20 = vcombine.high %v5243_v23, %v5251_v39  ;;  %v15036_v15 = vcombine.high %v4940_v3, %v4948_v29  ;;  %v4876_v41 = vld [vmem:[%s16679_s26 + $0x11b8] sm:$0xff] }
 0x673   : > { %11623 = vmatprep.subr.bf16.mxu0 %v14604_v34  ;;  %v5227_v34 = vld [vmem:[%s16679_s26 + $0x1cb0] sm:$0xff]  ;;  %v4652_v39 = vld [vmem:[%s16679_s26 + $0xab8] sm:$0xff] }
 0x675   : > { %11577 = vmatpush2.bf16.msra.mxu1 %v15417_v32  ;;  %v15035_v32 = vcombine.low %v4940_v3, %v4948_v29  ;;  %v4660_v3 = vld [vmem:[%s16679_s26 + $0xaf8] sm:$0xff] }
 0x676   : > { %11578 = vmatprep.subr.bf16.mxu1 %v15402_v55  ;;  %11624 = vmatpush2.bf16.msra.mxu0 %v14603_v52  ;;  %v15322_v52 = vcombine.high %v5227_v34, %v5235_v11  ;;  %v15020_v55 = vcombine.high %v4924_v50, %v4932_v22 }
 0x677   : > { %11625 = vmatprep.subr.bf16.mxu0 %v14588_v47  ;;  %v5211_v47 = vld [vmem:[%s16679_s26 + $0x1c30] sm:$0xff] }
 0x679   : > { %11579 = vmatpush2.bf16.msra.mxu1 %v15401_v43  ;;  %v15321_v43 = vcombine.low %v5227_v34, %v5235_v11 }
 0x67a   : > { %11580 = vmatprep.subr.bf16.mxu1 %v15386_v37  ;;  %11626 = vmatpush2.bf16.msra.mxu0 %v14587_v53  ;;  %v15019_v53 = vcombine.low %v4924_v50, %v4932_v22  ;;  %v15306_v37 = vcombine.high %v5211_v47, %v5219_v24  ;;  %v14748_v50 = vcombine.high %v4652_v39, %v4660_v3 }
 0x67b   : > { %11627 = vmatprep.subr.bf16.mxu0 %v14572_v60 }
 0x67d   : > { %11581 = vmatpush2.bf16.msra.mxu1 %v15385_v62  ;;  %v4900_v62 = vld [vmem:[%s16679_s26 + $0x1278] sm:$0xff] }
 0x67e   : > { %11582 = vmatprep.subr.bf16.mxu1 %v15370_v7  ;;  %11628 = vmatpush2.bf16.msra.mxu0 %v14571_v4  ;;  %v15305_v4 = vcombine.low %v5211_v47, %v5219_v24  ;;  %v15003_v7 = vcombine.low %v4908_v5, %v4916_v58  ;;  %v14988_v12 = vcombine.high %v4892_v30, %v4900_v62  ;;  %v4852_v47 = vld [vmem:[%s16679_s26 + $0x10f8] sm:$0xff] }
 0x67f   : > { %11629 = vmatprep.subr.bf16.mxu0 %v14556_v6  ;;  %v14780_v6 = vcombine.high %v4684_v8, %v4692_v44  ;;  %v14747_v24 = vcombine.low %v4652_v39, %v4660_v3 }
 0x681   : > { %11583 = vmatpush2.bf16.msra.mxu1 %v15369_v57  ;;  %v4884_v57 = vld [vmem:[%s16679_s26 + $0x11f8] sm:$0xff] }
 0x682   : > { %11584 = vmatprep.subr.bf16.mxu1 %v15354_v19  ;;  %11630 = vmatpush2.bf16.msra.mxu0 %v14555_v31  ;;  %v14779_v31 = vcombine.low %v4684_v8, %v4692_v44  ;;  %v14987_v19 = vcombine.low %v4892_v30, %v4900_v62  ;;  %v14972_v23 = vcombine.high %v4876_v41, %v4884_v57  ;;  %v4836_v8 = vld [vmem:[%s16679_s26 + $0x1078] sm:$0xff] }
 0x683   : > { %11631 = vmatprep.subr.bf16.mxu0 %v14540_v56  ;;  %v14764_v56 = vcombine.high %v4668_v26, %v4676_v16  ;;  %v14971_v11 = vcombine.low %v4876_v41, %v4884_v57  ;;  %v4588_v41 = vld [vmem:[%s16679_s26 + $0x8b8] sm:$0xff] }
 0x684   : > { %v4596_v57 = vld [vmem:[%s16679_s26 + $0x8f8] sm:$0xff] }
 0x685   : > { %11585 = vmatpush2.bf16.msra.mxu1 %v15353_v13  ;;  %v4860_v13 = vld [vmem:[%s16679_s26 + $0x1138] sm:$0xff]  ;;  %v14684_v39 = vcombine.high %v4588_v41, %v4596_v57 }
 0x686   : > { %11586 = vmatprep.subr.bf16.mxu1 %v15338_v20  ;;  %11632 = vmatpush2.bf16.msra.mxu0 %v14539_v18  ;;  %v4868_v18 = vld [vmem:[%s16679_s26 + $0x1178] sm:$0xff] }
 0x687   : > { %11683 = vmatprep.subr.bf16.mxu0 %v15036_v15  ;;  %v14763_v15 = vcombine.low %v4668_v26, %v4676_v16 }
 0x689   : > { %11587 = vmatpush2.bf16.msra.mxu1 %v15337_v51  ;;  %v11389_v49 = vpop.f32.mrf.mxu0  ;;  %11634 = vmatmul.mubr.bf16.vlgmr.msra.gmra.mxu0 %v17442_v42  ;;  %v14956_v51 = vcombine.high %v4860_v13, %v4868_v18 }
 0x68a   : > { %11588 = vmatprep.subr.bf16.mxu1 %v15322_v52  ;;  %11684 = vmatpush1.bf16.msra.mxu0 %v15035_v32  ;;  %v4636_v32 = vld [vmem:[%s16679_s26 + $0xa38] sm:$0xff] }
 0x68b   : > { %11715 = vmatprep.mubr.bf16.mxu0 %v17476_v40  ;;  %v11391_v60 = vpop.f32.mrf.mxu0  ;;  %11685 = vmatprep.subr.bf16.mxu0 %v15020_v55  ;;  %v4644_v52 = vld [vmem:[%s16679_s26 + $0xa78] sm:$0xff] }
 0x68c   : > { %v14731_v44 = vcombine.low %v4636_v32, %v4644_v52 }
 0x68d   : > { %11589 = vmatpush2.bf16.msra.mxu1 %v15321_v43  ;;  %v11393_v42 = vpop.f32.mrf.mxu0  ;;  %v14732_v43 = vcombine.high %v4636_v32, %v4644_v52  ;;  %v5020_v32 = vld [vmem:[%s16679_s26 + $0x1638] sm:$0xff] }
 0x68e   : > { %11590 = vmatprep.subr.bf16.mxu1 %v15306_v37  ;;  %11686 = vmatpush1.bf16.msra.mxu0 %v15019_v53  ;;  %v4620_v53 = vld [vmem:[%s16679_s26 + $0x9b8] sm:$0xff] }
 0x68f   : > { %v11394_v40 = vpop.f32.mrf.mxu0  ;;  %11687 = vmatprep.subr.bf16.mxu0 %v15004_v14  ;;  %v4628_v37 = vld [vmem:[%s16679_s26 + $0x9f8] sm:$0xff] }
 0x690   : > { %v4828_v14 = vld [vmem:[%s16679_s26 + $0x1038] sm:$0xff]  ;;  %v14716_v30 = vcombine.high %v4620_v53, %v4628_v37  ;;  %v14715_v40 = vcombine.low %v4620_v53, %v4628_v37 }
 0x691   : > { %11591 = vmatpush2.bf16.msra.mxu1 %v15305_v4  ;;  %v14924_v62 = vcombine.high %v4828_v14, %v4836_v8  ;;  %v4604_v42 = vld [vmem:[%s16679_s26 + $0x938] sm:$0xff] }
 0x692   : > { %11642 = vmatprep.subr.bf16.mxu1 %v14780_v6  ;;  %11688 = vmatpush1.bf16.msra.mxu0 %v15003_v7  ;;  %v4612_v4 = vld [vmem:[%s16679_s26 + $0x978] sm:$0xff] }
 0x693   : > { %11689 = vmatprep.subr.bf16.mxu0 %v14988_v12  ;;  %v5068_v7 = vld [vmem:[%s16679_s26 + $0x17b8] sm:$0xff]  ;;  %v14923_v12 = vcombine.low %v4828_v14, %v4836_v8  ;;  %v14700_v26 = vcombine.high %v4604_v42, %v4612_v4 }
 0x694   : > { %v11348_v29 = vpop.f32.mrf.mxu1  ;;  %11593 = vmatmul.mubr.bf16.vlgmr.msra.gmra.mxu1 %v17602_v28  ;;  %v5076_v6 = vld [vmem:[%s16679_s26 + $0x17f8] sm:$0xff] }
 0x695   : > { %v11349_v20 = vadd.f32 %v11348_v29, %v18443_v59  ;;  %11643 = vmatpush1.bf16.msra.mxu1 %v14779_v31  ;;  %11674 = vmatprep.mubr.bf16.mxu1 %v17359_v9  ;;  %v4844_v9 = vld [vmem:[%s16679_s26 + $0x10b8] sm:$0xff]  ;;  %v15164_v16 = vcombine.high %v5068_v7, %v5076_v6 }
 0x696   : > { %v11350_v34 = vpop.f32.mrf.mxu1  ;;  %11644 = vmatprep.subr.bf16.mxu1 %v14764_v56  ;;  %11690 = vmatpush1.bf16.msra.mxu0 %v14987_v19  ;;  %v5052_v31 = vld [vmem:[%s16679_s26 + $0x1738] sm:$0xff]  ;;  %v14699_v56 = vcombine.low %v4604_v42, %v4612_v4 }
 0x697   : > { %v11351_v22 = vadd.f32 %v11350_v34, %v18447_v36  ;;  %11691 = vmatprep.subr.bf16.mxu0 %v14972_v23  ;;  %v18543_v59 = vadd.f32 %v11389_v49, %v11349_v20  ;;  %v14955_v36 = vcombine.low %v4860_v13, %v4868_v18  ;;  %v14940_v49 = vcombine.high %v4844_v9, %v4852_v47  ;;  %v5060_v19 = vld [vmem:[%s16679_s26 + $0x1778] sm:$0xff] }
 0x698   : > { %v11352_v55 = vpop.f32.mrf.mxu1  ;;  %v15163_v23 = vcombine.low %v5068_v7, %v5076_v6  ;;  %v15148_v3 = vcombine.high %v5052_v31, %v5060_v19  ;;  %v4572_v29 = vld [vmem:[%s16679_s26 + $0x838] sm:$0xff]  ;;  %v15147_v34 = vcombine.low %v5052_v31, %v5060_v19 }
 0x699   : > { %11645 = vmatpush1.bf16.msra.mxu1 %v14763_v15  ;;  %v18547_v5 = vadd.f32 %v11391_v60, %v11351_v22  ;;  %v14939_v60 = vcombine.low %v4844_v9, %v4852_v47  ;;  %v4580_v13 = vld [vmem:[%s16679_s26 + $0x878] sm:$0xff]  ;;  %v14683_v15 = vcombine.low %v4588_v41, %v4596_v57 }
 0x69a   : > { %v11353_v58 = vpop.f32.mrf.mxu1  ;;  %11646 = vmatprep.subr.bf16.mxu1 %v14748_v50  ;;  %11692 = vmatpush1.bf16.msra.mxu0 %v14971_v11  ;;  %v5036_v18 = vld [vmem:[%s16679_s26 + $0x16b8] sm:$0xff]  ;;  %v14668_v11 = vcombine.high %v4572_v29, %v4580_v13  ;;  %v14667_v55 = vcombine.low %v4572_v29, %v4580_v13 }
 0x69b   : > { %11693 = vmatprep.subr.bf16.mxu0 %v14956_v51  ;;  %v5044_v20 = vld [vmem:[%s16679_s26 + $0x16f8] sm:$0xff] }
 0x69c   : > { %v15132_v50 = vcombine.high %v5036_v18, %v5044_v20  ;;  %v4812_v22 = vld [vmem:[%s16679_s26 + $0xfb8] sm:$0xff]  ;;  %v15131_v9 = vcombine.low %v5036_v18, %v5044_v20 }
 0x69d   : > { %11647 = vmatpush1.bf16.msra.mxu1 %v14747_v24  ;;  %v4820_v51 = vld [vmem:[%s16679_s26 + $0xff8] sm:$0xff] }
 0x69e   : > { %11648 = vmatprep.subr.bf16.mxu1 %v14732_v43  ;;  %11694 = vmatpush1.bf16.msra.mxu0 %v14955_v36  ;;  %v5028_v52 = vld [vmem:[%s16679_s26 + $0x1678] sm:$0xff]  ;;  %v14908_v47 = vcombine.high %v4812_v22, %v4820_v51  ;;  %v14907_v53 = vcombine.low %v4812_v22, %v4820_v51 }
 0x69f   : > { %11695 = vmatprep.subr.bf16.mxu0 %v14940_v49  ;;  %v15116_v24 = vcombine.high %v5020_v32, %v5028_v52  ;;  %v4796_v58 = vld [vmem:[%s16679_s26 + $0xf38] sm:$0xff]  ;;  %v15115_v37 = vcombine.low %v5020_v32, %v5028_v52 }
 0x6a0   : > { %v4804_v36 = vld [vmem:[%s16679_s26 + $0xf78] sm:$0xff] }
 0x6a1   : > { %11649 = vmatpush1.bf16.msra.mxu1 %v14731_v44  ;;  %v5004_v43 = vld [vmem:[%s16679_s26 + $0x15b8] sm:$0xff]  ;;  %v14892_v14 = vcombine.high %v4796_v58, %v4804_v36  ;;  %v14891_v42 = vcombine.low %v4796_v58, %v4804_v36 }
 0x6a2   : > { %11650 = vmatprep.subr.bf16.mxu1 %v14716_v30  ;;  %11696 = vmatpush1.bf16.msra.mxu0 %v14939_v60  ;;  %v5012_v49 = vld [vmem:[%s16679_s26 + $0x15f8] sm:$0xff] }
 0x6a3   : > { %11697 = vmatprep.subr.bf16.mxu0 %v14924_v62  ;;  %v15100_v8 = vcombine.high %v5004_v43, %v5012_v49  ;;  %v4780_v44 = vld [vmem:[%s16679_s26 + $0xeb8] sm:$0xff]  ;;  %v15099_v4 = vcombine.low %v5004_v43, %v5012_v49 }
 0x6a4   : > { %v4788_v60 = vld [vmem:[%s16679_s26 + $0xef8] sm:$0xff] }
 0x6a5   : > { %11651 = vmatpush1.bf16.msra.mxu1 %v14715_v40  ;;  %v4988_v30 = vld [vmem:[%s16679_s26 + $0x1538] sm:$0xff]  ;;  %v14876_v7 = vcombine.high %v4780_v44, %v4788_v60  ;;  %v14875_v41 = vcombine.low %v4780_v44, %v4788_v60 }
 0x6a6   : > { %11652 = vmatprep.subr.bf16.mxu1 %v14700_v26  ;;  %11698 = vmatpush1.bf16.msra.mxu0 %v14923_v12  ;;  %v4996_v62 = vld [vmem:[%s16679_s26 + $0x1578] sm:$0xff] }
 0x6a7   : > { %11699 = vmatprep.subr.bf16.mxu0 %v15164_v16  ;;  %v15084_v6 = vcombine.high %v4988_v30, %v4996_v62  ;;  %v4764_v40 = vld [vmem:[%s16679_s26 + $0xe38] sm:$0xff]  ;;  %v15083_v57 = vcombine.low %v4988_v30, %v4996_v62 }
 0x6a8   : > { %v4772_v12 = vld [vmem:[%s16679_s26 + $0xe78] sm:$0xff] }
 0x6a9   : > { %11653 = vmatpush1.bf16.msra.mxu1 %v14699_v56  ;;  %v4972_v26 = vld [vmem:[%s16679_s26 + $0x14b8] sm:$0xff]  ;;  %v14860_v31 = vcombine.high %v4764_v40, %v4772_v12  ;;  %v14859_v29 = vcombine.low %v4764_v40, %v4772_v12 }
 0x6aa   : > { %11654 = vmatprep.subr.bf16.mxu1 %v14684_v39  ;;  %11700 = vmatpush2.bf16.msra.mxu0 %v15163_v23  ;;  %v4980_v16 = vld [vmem:[%s16679_s26 + $0x14f8] sm:$0xff] }
 0x6ab   : > { %11701 = vmatprep.subr.bf16.mxu0 %v15148_v3  ;;  %v15068_v19 = vcombine.high %v4972_v26, %v4980_v16  ;;  %v4748_v56 = vld [vmem:[%s16679_s26 + $0xdb8] sm:$0xff]  ;;  %v15067_v13 = vcombine.low %v4972_v26, %v4980_v16 }
 0x6ac   : > { %v4756_v23 = vld [vmem:[%s16679_s26 + $0xdf8] sm:$0xff] }
 0x6ad   : > { %11655 = vmatpush1.bf16.msra.mxu1 %v14683_v15  ;;  %v4956_v39 = vld [vmem:[%s16679_s26 + $0x1438] sm:$0xff]  ;;  %v14844_v18 = vcombine.high %v4748_v56, %v4756_v23 }
 0x6ae   : > { %11656 = vmatprep.subr.bf16.mxu1 %v14668_v11  ;;  %11702 = vmatpush2.bf16.msra.mxu0 %v15147_v34  ;;  %v4964_v3 = vld [vmem:[%s16679_s26 + $0x1478] sm:$0xff]  ;;  %v14843_v11 = vcombine.low %v4748_v56, %v4756_v23 }
 0x6af   : > { %11703 = vmatprep.subr.bf16.mxu0 %v15132_v50  ;;  %v15052_v20 = vcombine.high %v4956_v39, %v4964_v3  ;;  %v4732_v15 = vld [vmem:[%s16679_s26 + $0xd38] sm:$0xff]  ;;  %v15051_v50 = vcombine.low %v4956_v39, %v4964_v3 }
 0x6b0   : > { %v4740_v34 = vld [vmem:[%s16679_s26 + $0xd78] sm:$0xff] }
 0x6b1   : > { %11657 = vmatpush1.bf16.msra.mxu1 %v14667_v55  ;;  %v14828_v22 = vcombine.high %v4732_v15, %v4740_v34  ;;  %v4716_v51 = vld [vmem:[%s16679_s26 + $0xcb8] sm:$0xff]  ;;  %v14827_v52 = vcombine.low %v4732_v15, %v4740_v34 }
 0x6b2   : > { %11658 = vmatprep.subr.bf16.mxu1 %v14908_v47  ;;  %11704 = vmatpush2.bf16.msra.mxu0 %v15131_v9  ;;  %v4724_v32 = vld [vmem:[%s16679_s26 + $0xcf8] sm:$0xff] }
 0x6b3   : > { %11705 = vmatprep.subr.bf16.mxu0 %v15116_v24  ;;  %v14812_v55 = vcombine.high %v4716_v51, %v4724_v32  ;;  %v4700_v9 = vld [vmem:[%s16679_s26 + $0xc38] sm:$0xff]  ;;  %v14811_v58 = vcombine.low %v4716_v51, %v4724_v32 }
 0x6b4   : > { %v4708_v47 = vld [vmem:[%s16679_s26 + $0xc78] sm:$0xff] }
 0x6b5   : > { %11659 = vmatpush2.bf16.msra.mxu1 %v14907_v53  ;;  %v14796_v36 = vcombine.high %v4700_v9, %v4708_v47  ;;  %v5196_v49 = vld [vmem:[%s16679_s26 + $0x1bb8] sm:$0xff] }
 0x6b6   : > { %11660 = vmatprep.subr.bf16.mxu1 %v14892_v14  ;;  %11706 = vmatpush2.bf16.msra.mxu0 %v15115_v37  ;;  %v5204_v53 = vld [vmem:[%s16679_s26 + $0x1bf8] sm:$0xff]  ;;  %v14795_v14 = vcombine.low %v4700_v9, %v4708_v47 }
 0x6b7   : > { %11707 = vmatprep.subr.bf16.mxu0 %v15100_v8  ;;  %v15292_v8 = vcombine.high %v5196_v49, %v5204_v53  ;;  %v5180_v60 = vld [vmem:[%s16679_s26 + $0x1b38] sm:$0xff] }
 0x6b8   : > { %v5188_v30 = vld [vmem:[%s16679_s26 + $0x1b78] sm:$0xff] }
 0x6b9   : > { %11661 = vmatpush2.bf16.msra.mxu1 %v14891_v42  ;;  %v15276_v62 = vcombine.high %v5180_v60, %v5188_v30  ;;  %v5164_v42 = vld [vmem:[%s16679_s26 + $0x1ab8] sm:$0xff]  ;;  %v15275_v40 = vcombine.low %v5180_v60, %v5188_v30 }
 0x6ba   : > { %11662 = vmatprep.subr.bf16.mxu1 %v14876_v7  ;;  %11708 = vmatpush2.bf16.msra.mxu0 %v15099_v4  ;;  %v5172_v4 = vld [vmem:[%s16679_s26 + $0x1af8] sm:$0xff] }
 0x6bb   : > { %11709 = vmatprep.subr.bf16.mxu0 %v15084_v6  ;;  %v15260_v26 = vcombine.high %v5164_v42, %v5172_v4  ;;  %v5132_v23 = vld [vmem:[%s16679_s26 + $0x19b8] sm:$0xff] }
 0x6bc   : > { %v5140_v39 = vld [vmem:[%s16679_s26 + $0x19f8] sm:$0xff] }
 0x6bd   : > { %11663 = vmatpush2.bf16.msra.mxu1 %v14875_v41  ;;  %v5148_v41 = vld [vmem:[%s16679_s26 + $0x1a38] sm:$0xff]  ;;  %v15227_v21 = vcombine.low %v5132_v23, %v5140_v39 }
 0x6be   : > { %11664 = vmatprep.subr.bf16.mxu1 %v14860_v31  ;;  %11710 = vmatpush2.bf16.msra.mxu0 %v15083_v57  ;;  %v5156_v57 = vld [vmem:[%s16679_s26 + $0x1a78] sm:$0xff] }
 0x6bf   : > { %11711 = vmatprep.subr.bf16.mxu0 %v15068_v19  ;;  %v15244_v56 = vcombine.high %v5148_v41, %v5156_v57  ;;  %v5108_v15 = vld [vmem:[%s16679_s26 + $0x18f8] sm:$0xff] }
 0x6c0   : > { %v5276_v60 = vld [vmem:[%s16679_s26 + $0x1e38] sm:$0xff] }
 0x6c1   : > { %11665 = vmatpush2.bf16.msra.mxu1 %v14859_v29  ;;  %v15243_v29 = vcombine.low %v5148_v41, %v5156_v57  ;;  %v5284_v30 = vld [vmem:[%s16679_s26 + $0x1e78] sm:$0xff] }
 0x6c2   : > { %11666 = vmatprep.subr.bf16.mxu1 %v14844_v18  ;;  %11712 = vmatpush2.bf16.msra.mxu0 %v15067_v13  ;;  %v15228_v13 = vcombine.high %v5132_v23, %v5140_v39  ;;  %v5116_v18 = vld [vmem:[%s16679_s26 + $0x1938] sm:$0xff] }
 0x6c3   : > { %11713 = vmatprep.subr.bf16.mxu0 %v15052_v20  ;;  %v5100_v20 = vld [vmem:[%s16679_s26 + $0x18b8] sm:$0xff]  ;;  %v15211_v34 = vcombine.low %v5116_v18, %v5124_v63 }
 0x6c4   : > { %v15195_v51 = vcombine.low %v5100_v20, %v5108_v15  ;;  %v5228_v41 = vld [vmem:[%s16679_s26 + $0x1cb8] sm:$0xff] }
 0x6c5   : > { %11667 = vmatpush2.bf16.msra.mxu1 %v14843_v11  ;;  %v15196_v11 = vcombine.high %v5100_v20, %v5108_v15  ;;  %v5236_v57 = vld [vmem:[%s16679_s26 + $0x1cf8] sm:$0xff] }
 0x6c6   : > { %11668 = vmatprep.subr.bf16.mxu1 %v14828_v22  ;;  %11714 = vmatpush2.bf16.msra.mxu0 %v15051_v50  ;;  %v5084_v50 = vld [vmem:[%s16679_s26 + $0x1838] sm:$0xff]  ;;  %v15323_v23 = vcombine.low %v5228_v41, %v5236_v57 }
 0x6c7   : > { %v5092_v22 = vld [vmem:[%s16679_s26 + $0x1878] sm:$0xff] }
 0x6c8   : > { %v15180_v32 = vcombine.high %v5084_v50, %v5092_v22  ;;  %v15179_v9 = vcombine.low %v5084_v50, %v5092_v22 }
 0x6c9   : > { %11669 = vmatpush2.bf16.msra.mxu1 %v14827_v52  ;;  %v18591_v24 = vpop.f32.mrf.mxu0  ;;  %11716 = vmatmul.mubr.bf16.vlgmr.msra.gmra.mxu0 %v17532_v2  ;;  %v15291_v2 = vcombine.low %v5196_v49, %v5204_v53  ;;  %v5324_v52 = vld [vmem:[%s16679_s26 + $0x1fb8] sm:$0xff] }
 0x6ca   : > { %11670 = vmatprep.subr.bf16.mxu1 %v14812_v55  ;;  %v5332_v55 = vld [vmem:[%s16679_s26 + $0x1ff8] sm:$0xff] }
 0x6cb   : > { %v18594_v43 = vpop.f32.mrf.mxu0  ;;  %v15420_v47 = vcombine.high %v5324_v52, %v5332_v55  ;;  %v15419_v49 = vcombine.low %v5324_v52, %v5332_v55 }
 0x6cd   : > { %11671 = vmatpush2.bf16.msra.mxu1 %v14811_v58  ;;  %v11475_v37 = vpop.f32.mrf.mxu0  ;;  %v5308_v58 = vld [vmem:[%s16679_s26 + $0x1f38] sm:$0xff] }
 0x6ce   : > { %11672 = vmatprep.subr.bf16.mxu1 %v14796_v36  ;;  %v5316_v36 = vld [vmem:[%s16679_s26 + $0x1f78] sm:$0xff] }
 0x6cf   : > { %v11476_v44 = vpop.f32.mrf.mxu0  ;;  %v15404_v53 = vcombine.high %v5308_v58, %v5316_v36  ;;  %v5292_v37 = vld [vmem:[%s16679_s26 + $0x1eb8] sm:$0xff] }
 0x6d1   : > { %11673 = vmatpush2.bf16.msra.mxu1 %v14795_v14  ;;  %v5300_v14 = vld [vmem:[%s16679_s26 + $0x1ef8] sm:$0xff] }
 0x6d2   : > { %11724 = vmatprep.subr.bf16.mxu1 %v15292_v8  ;;  %v15403_v8 = vcombine.low %v5308_v58, %v5316_v36  ;;  %v15388_v44 = vcombine.high %v5292_v37, %v5300_v14 }
 0x6d4   : > { %v11430_v7 = vpop.f32.mrf.mxu1  ;;  %11675 = vmatmul.mubr.bf16.vlgmr.msra.gmra.mxu1 %v17446_v61  ;;  %v15259_v61 = vcombine.low %v5164_v42, %v5172_v4  ;;  %v5260_v42 = vld [vmem:[%s16679_s26 + $0x1db8] sm:$0xff] }
 0x6d5   : > { %v11431_v6 = vadd.f32 %v11430_v7, %v18543_v59  ;;  %11725 = vmatpush1.bf16.msra.mxu1 %v15291_v2  ;;  %11756 = vmatprep.mubr.bf16.mxu1 %v17600_v25  ;;  %v18612_v25 = vrot.slane %v11830_v10, %v16729_v54  ;;  %v15212_v10 = vcombine.high %v5116_v18, %v5124_v63  ;;  %v5268_v4 = vld [vmem:[%s16679_s26 + $0x1df8] sm:$0xff] }
 0x6d6   : > { %v11432_v12 = vpop.f32.mrf.mxu1  ;;  %11726 = vmatprep.subr.bf16.mxu1 %v15276_v62  ;;  %v15387_v2 = vcombine.low %v5292_v37, %v5300_v14  ;;  %v15372_v62 = vcombine.high %v5276_v60, %v5284_v30  ;;  %v15371_v7 = vcombine.low %v5276_v60, %v5284_v30 }
 0x6d7   : > { %v11433_v16 = vadd.f32 %v11432_v12, %v18547_v5  ;;  %v5252_v12 = vld [vmem:[%s16679_s26 + $0x1d78] sm:$0xff] }
 0x6d8   : > { %v11434_v31 = vpop.f32.mrf.mxu1 }
 0x6d9   : > { %v11831_v19 = vcombine.low %v11431_v6, %v11433_v16  ;;  %11727 = vmatpush1.bf16.msra.mxu1 %v15275_v40  ;;  %v15356_v6 = vcombine.high %v5260_v42, %v5268_v4  ;;  %v5244_v40 = vld [vmem:[%s16679_s26 + $0x1d38] sm:$0xff] }
 0x6da   : > { %v11435_v59 = vpop.f32.mrf.mxu1  ;;  %11728 = vmatprep.subr.bf16.mxu1 %v15260_v26  ;;  %v15355_v26 = vcombine.low %v5260_v42, %v5268_v4  ;;  %v15340_v16 = vcombine.high %v5244_v40, %v5252_v12  ;;  %v15339_v31 = vcombine.low %v5244_v40, %v5252_v12 }
 0x6db   : > { %v18615_v5 = vrot.slane %v11831_v19, %v16729_v54  ;;  %v15324_v19 = vcombine.high %v5228_v41, %v5236_v57  ;;  %v5220_v59 = vld [vmem:[%s16679_s26 + $0x1c78] sm:$0xff] }
 0x6dd   : > { %v11862_v3 = vcombine.low %v18612_v25, %v18615_v5  ;;  %11729 = vmatpush1.bf16.msra.mxu1 %v15259_v61  ;;  %v5212_v61 = vld [vmem:[%s16679_s26 + $0x1c38] sm:$0xff] }
 0x6de   : > { %11730 = vmatprep.subr.bf16.mxu1 %v15244_v56  ;;  %v15308_v39 = vcombine.high %v5212_v61, %v5220_v59  ;;  %v15307_v18 = vcombine.low %v5212_v61, %v5220_v59 }
 0x6df   : > { %v11870_v61 = vrot.slane %v11862_v3, %v16729_v54 }
 0x6e1   : > { %11731 = vmatpush1.bf16.msra.mxu1 %v15243_v29 }
 0x6e2   : > { %11732 = vmatprep.subr.bf16.mxu1 %v15228_v13 }
 0x6e5   : > { %11733 = vmatpush1.bf16.msra.mxu1 %v15227_v21 }
 0x6e6   : > { %11734 = vmatprep.subr.bf16.mxu1 %v15212_v10 }
 0x6e9   : > { %11735 = vmatpush1.bf16.msra.mxu1 %v15211_v34 }
 0x6ea   : > { %11736 = vmatprep.subr.bf16.mxu1 %v15196_v11 }
 0x6ed   : > { %11737 = vmatpush1.bf16.msra.mxu1 %v15195_v51 }
 0x6ee   : > { %11738 = vmatprep.subr.bf16.mxu1 %v15180_v32 }
 0x6f1   : > { %11739 = vmatpush1.bf16.msra.mxu1 %v15179_v9 }
 0x6f2   : > { %11740 = vmatprep.subr.bf16.mxu1 %v15420_v47 }
 0x6f5   : > { %11741 = vmatpush2.bf16.msra.mxu1 %v15419_v49 }
 0x6f6   : > { %11742 = vmatprep.subr.bf16.mxu1 %v15404_v53 }
 0x6f9   : > { %11743 = vmatpush2.bf16.msra.mxu1 %v15403_v8 }
 0x6fa   : > { %11744 = vmatprep.subr.bf16.mxu1 %v15388_v44 }
 0x6fd   : > { %11745 = vmatpush2.bf16.msra.mxu1 %v15387_v2 }
 0x6fe   : > { %11746 = vmatprep.subr.bf16.mxu1 %v15372_v62 }
 0x701   : > { %11747 = vmatpush2.bf16.msra.mxu1 %v15371_v7 }
 0x702   : > { %11748 = vmatprep.subr.bf16.mxu1 %v15356_v6 }
 0x705   : > { %11749 = vmatpush2.bf16.msra.mxu1 %v15355_v26 }
 0x706   : > { %11750 = vmatprep.subr.bf16.mxu1 %v15340_v16 }
 0x709   : > { %11751 = vmatpush2.bf16.msra.mxu1 %v15339_v31  ;;  %v11553_v56 = vpop.f32.mrf.mxu0 }
 0x70a   : > { %11752 = vmatprep.subr.bf16.mxu1 %v15324_v19 }
 0x70b   : > { %v11555_v29 = vpop.f32.mrf.mxu0 }
 0x70d   : > { %11753 = vmatpush2.bf16.msra.mxu1 %v15323_v23  ;;  %v11557_v13 = vpop.f32.mrf.mxu0 }
 0x70e   : > { %11754 = vmatprep.subr.bf16.mxu1 %v15308_v39 }
 0x70f   : > { %v11558_v63 = vpop.f32.mrf.mxu0 }
 0x711   : > { %11755 = vmatpush2.bf16.msra.mxu1 %v15307_v18 }
 0x714   : > { %v11512_v21 = vpop.f32.mrf.mxu1  ;;  %11757 = vmatmul.mubr.bf16.vlgmr.msra.gmra.mxu1 %v17602_v28 }
 0x715   : > { %v11513_v10 = vadd.f32 %v11512_v21, %v18591_v24 }
 0x716   : > { %v11514_v20 = vpop.f32.mrf.mxu1 }
 0x717   : > { %v11515_v15 = vadd.f32 %v11514_v20, %v18594_v43  ;;  %v11554_v34 = vadd.f32 %v11553_v56, %v11513_v10  ;;  %v4300_v56 = vld [vmem:[#allocation2 + $0x8] sm:$0xff] }
 0x718   : > { %v11516_v11 = vpop.f32.mrf.mxu1 }
 0x719   : > { %v11556_v50 = vadd.f32 %v11555_v29, %v11515_v15 }
 0x71a   : > { %v11517_v22 = vpop.f32.mrf.mxu1 }
 0x749   : > { %v11635_v51 = vpop.f32.mrf.mxu0 }
 0x74b   : > { %v11637_v32 = vpop.f32.mrf.mxu0 }
 0x74d   : > { %v11639_v52 = vpop.f32.mrf.mxu0 }
 0x74f   : > { %v11640_v55 = vpop.f32.mrf.mxu0 }
 0x754   : > { %v11594_v9 = vpop.f32.mrf.mxu1 }
 0x755   : > { %v11595_v47 = vadd.f32 %v11594_v9, %v11554_v34 }
 0x756   : > { %v11596_v58 = vpop.f32.mrf.mxu1 }
 0x757   : > { %v11597_v36 = vadd.f32 %v11596_v58, %v11556_v50 }
 0x758   : > { %v11598_v49 = vpop.f32.mrf.mxu1 }
 0x759   : > { %v11832_v53 = vcombine.low %v11595_v47, %v11597_v36 }
 0x75a   : > { %v11599_v28 = vpop.f32.mrf.mxu1 }
 0x75b   : > { %v11854_v57 = vrot.slane %v11832_v53, %v16729_v54 }
 0x789   : > { %v11717_v37 = vpop.f32.mrf.mxu0 }
 0x78b   : > { %v11719_v24 = vpop.f32.mrf.mxu0 }
 0x78d   : > { %v11721_v14 = vpop.f32.mrf.mxu0 }
 0x78f   : > { %v11722_v8 = vpop.f32.mrf.mxu0 }
 0x794   : > { %v11676_v43 = vpop.f32.mrf.mxu1 }
 0x795   : > { %v11677_v2 = vadd.f32 %v11676_v43, %v11635_v51 }
 0x796   : > { %v11678_v44 = vpop.f32.mrf.mxu1 }
 0x797   : > { %v11679_v62 = vadd.f32 %v11678_v44, %v11637_v32  ;;  %v11718_v4 = vadd.f32 %v11717_v37, %v11677_v2 }
 0x798   : > { %v11680_v60 = vpop.f32.mrf.mxu1 }
 0x799   : > { %v11720_v7 = vadd.f32 %v11719_v24, %v11679_v62 }
 0x79a   : > { %v11681_v30 = vpop.f32.mrf.mxu1 }
 0x7d4   : > { %v11758_v42 = vpop.f32.mrf.mxu1 }
 0x7d5   : > { %v11759_v40 = vadd.f32 %v11758_v42, %v11718_v4 }
 0x7d6   : > { %v11760_v6 = vpop.f32.mrf.mxu1 }
 0x7d7   : > { %v11761_v12 = vadd.f32 %v11760_v6, %v11720_v7 }
 0x7d8   : > { %v11762_v26 = vpop.f32.mrf.mxu1 }
 0x7d9   : > { %v11833_v16 = vcombine.low %v11759_v40, %v11761_v12 }
 0x7da   : > { %v11763_v41 = vpop.f32.mrf.mxu1 }
 0x7db   : > { %v11861_v31 = vrot.slane %v11833_v16, %v16729_v54 }
 0x7dd   : > { %v11863_v19 = vcombine.low %v11854_v57, %v11861_v31 }
 0x7df   : > { %v11877_v59 = vrot.slane %v11863_v19, %v16729_v54 }
 0x7e1   : > { %v11878_v23 = vcombine.low %v11870_v61, %v11877_v59  ;;  %11888 = sbr.rel (%p15421_p9) target bundleno = 3156 (0xc54), region = 96 }
 0x7e3   : > { %v11882_v39 = vadd.f32 %v11878_v23, %v4300_v56 }
 0x7e5   : > { %11884 = vst [vmem:[#allocation2 + $0x8] sm:$0xff] %v11882_v39 }
 0x7e6   : > { %v15932_v29 = vld [vmem:[%s19171_s5 + $0x78] sm:$0xff]   ;;  %v15936_v5 = vld [vmem:[%s19171_s5 + $0x70] sm:$0xff]   ;;  %v15940_v21 = vld [vmem:[%s19171_s5 + $0x68] sm:$0xff]   ;;  %vm16403_vm2 = vmmov 0   ;;  %vm13358_vm6 = vcmask 130048   ;;  %vm13343_vm7 = vcmask 122880  }
 0x7e7   : > { %v15933_v13 = vld [vmem:[%s19171_s5 + $0xf8] sm:$0xff]   ;;  %15580 = vmatprep.subr.bf16.mxu0 %v15932_v29  ;;  %v15937_v3 = vld [vmem:[%s19171_s5 + $0xf0] sm:$0xff]   ;;  %v15941_v10 = vld [vmem:[%s19171_s5 + $0xe8] sm:$0xff]  }
 0x7e8   : > { %v15934_v54 = vld [vmem:[%s19171_s5 + $0x38] sm:$0xff]   ;;  %15602 = vmatprep.subr.bf16.mxu1 %v15933_v13  ;;  %v15938_v18 = vld [vmem:[%s19171_s5 + $0x30] sm:$0xff]   ;;  %v15942_v20 = vld [vmem:[%s19171_s5 + $0x28] sm:$0xff]  }
 0x7e9   : > { %v15935_v25 = vld [vmem:[%s19171_s5 + $0xb8] sm:$0xff]   ;;  %15581 = vmatpush3.bf16.msra.mxu0 %v15934_v54  ;;  %v15939_v63 = vld [vmem:[%s19171_s5 + $0xb0] sm:$0xff]   ;;  %v15943_v15 = vld [vmem:[%s19171_s5 + $0xa8] sm:$0xff]  }
 0x7ea   : > { %15603 = vmatpush3.bf16.msra.mxu1 %v15935_v25  ;;  %15582 = vmatprep.subr.bf16.mxu0 %v15936_v5  ;;  %v15944_v34 = vld [vmem:[%s19171_s5 + $0x60] sm:$0xff]   ;;  %v15948_v51 = vld [vmem:[%s19171_s5 + $0x58] sm:$0xff]   ;;  %v15952_v9 = vld [vmem:[%s19171_s5 + $0x50] sm:$0xff]  }
 0x7eb   : > { %15604 = vmatprep.subr.bf16.mxu1 %v15937_v3  ;;  %v15945_v11 = vld [vmem:[%s19171_s5 + $0xe0] sm:$0xff]   ;;  %v15949_v32 = vld [vmem:[%s19171_s5 + $0xd8] sm:$0xff]   ;;  %v15953_v47 = vld [vmem:[%s19171_s5 + $0xd0] sm:$0xff]  }
 0x7ec   : > { %v15946_v50 = vld [vmem:[%s19171_s5 + $0x20] sm:$0xff]   ;;  %v15950_v52 = vld [vmem:[%s19171_s5 + $0x18] sm:$0xff]   ;;  %v15954_v58 = vld [vmem:[%s19171_s5 + $0x10] sm:$0xff]  }
 0x7ed   : > { %15583 = vmatpush3.bf16.msra.mxu0 %v15938_v18  ;;  %v15947_v22 = vld [vmem:[%s19171_s5 + $0xa0] sm:$0xff]   ;;  %v15951_v55 = vld [vmem:[%s19171_s5 + $0x98] sm:$0xff]   ;;  %v15955_v36 = vld [vmem:[%s19171_s5 + $0x90] sm:$0xff]  }
 0x7ee   : > { %15605 = vmatpush3.bf16.msra.mxu1 %v15939_v63  ;;  %15584 = vmatprep.subr.bf16.mxu0 %v15940_v21  ;;  %v15956_v49 = vld [vmem:[%s19171_s5 + $0x48] sm:$0xff]   ;;  %v15960_v24 = vld [vmem:[%s19171_s5 + $0x40] sm:$0xff]   ;;  %v15964_v2 = vld [vmem:[%s19171_s5 + $0x178] sm:$0xff]  }
 0x7ef   : > { %15606 = vmatprep.subr.bf16.mxu1 %v15941_v10  ;;  %v15957_v53 = vld [vmem:[%s19171_s5 + $0xc8] sm:$0xff]   ;;  %v15961_v14 = vld [vmem:[%s19171_s5 + $0xc0] sm:$0xff]   ;;  %v15965_v62 = vld [vmem:[%s19171_s5 + $0x1f8] sm:$0xff]  }
 0x7f0   : > { %v15958_v28 = vld [vmem:[%s19171_s5 + $0x8] sm:$0xff]   ;;  %v15962_v8 = vld [vmem:[%s19171_s5] sm:$0xff]   ;;  %v15966_v40 = vld [vmem:[%s19171_s5 + $0x138] sm:$0xff]  }
 0x7f1   : > { %15585 = vmatpush3.bf16.msra.mxu0 %v15942_v20  ;;  %v15959_v37 = vld [vmem:[%s19171_s5 + $0x88] sm:$0xff]   ;;  %v15963_v43 = vld [vmem:[%s19171_s5 + $0x80] sm:$0xff]   ;;  %v15967_v12 = vld [vmem:[%s19171_s5 + $0x1b8] sm:$0xff]  }
 0x7f2   : > { %15607 = vmatpush3.bf16.msra.mxu1 %v15943_v15  ;;  %15586 = vmatprep.subr.bf16.mxu0 %v15944_v34  ;;  %v11889_v44 = vld [vmem:[#allocation2] sm:$0xff]  ;;  %v11891_v60 = vld [vmem:[#allocation11] sm:$0xff]  ;;  %v15968_v61 = vld [vmem:[%s19171_s5 + $0x170] sm:$0xff]  }
 0x7f3   : > { %15608 = vmatprep.subr.bf16.mxu1 %v15945_v11  ;;  %v18750_v30 = vadd.f32 %v11891_v60, %v11889_v44  ;;  %v15969_v59 = vld [vmem:[%s19171_s5 + $0x1f0] sm:$0xff]   ;;  %v15972_v13 = vld [vmem:[%s19171_s5 + $0x168] sm:$0xff]   ;;  %v15976_v3 = vld [vmem:[%s19171_s5 + $0x160] sm:$0xff]  }
 0x7f4   : > { %v15970_v56 = vld [vmem:[%s19171_s5 + $0x130] sm:$0xff]   ;;  %v15973_v54 = vld [vmem:[%s19171_s5 + $0x1e8] sm:$0xff]   ;;  %v15977_v18 = vld [vmem:[%s19171_s5 + $0x1e0] sm:$0xff]  }
 0x7f5   : > { %15587 = vmatpush3.bf16.msra.mxu0 %v15946_v50  ;;  %v11904_v42 = vrot.slane %v18750_v30, %v17035_v46  ;;  %v11912_v4 = vrot.slane %v18750_v30, %v17194_v27  ;;  %v11900_v7 = vrot.slane %v18750_v30, %v17029_v38  ;;  %v11908_v6 = vrot.slane %v18750_v30, %v17186_v17  ;;  %v15971_v29 = vld [vmem:[%s19171_s5 + $0x1b0] sm:$0xff]   ;;  %v15974_v25 = vld [vmem:[%s19171_s5 + $0x128] sm:$0xff]   ;;  %v15978_v63 = vld [vmem:[%s19171_s5 + $0x120] sm:$0xff]  }
 0x7f6   : > { %15609 = vmatpush3.bf16.msra.mxu1 %v15947_v22  ;;  %15588 = vmatprep.subr.bf16.mxu0 %v15948_v51  ;;  %v11920_v26 = vrot.slane %v18750_v30, %v17432_v48  ;;  %v11928_v16 = vrot.slane %v18750_v30, %v17580_v0  ;;  %v15975_v5 = vld [vmem:[%s19171_s5 + $0x1a8] sm:$0xff]   ;;  %v15979_v21 = vld [vmem:[%s19171_s5 + $0x1a0] sm:$0xff]   ;;  %v15980_v10 = vld [vmem:[%s19171_s5 + $0x158] sm:$0xff]  }
 0x7f7   : > { %15610 = vmatprep.subr.bf16.mxu1 %v15949_v32  ;;  %v11978_v41 = vpack.c.bf16 %v11904_v42, %v11904_v42  ;;  %v11980_v57 = vpack.c.bf16 %v11912_v4, %v11912_v4  ;;  %v11977_v31 = vpack.c.bf16 %v11900_v7, %v11900_v7  ;;  %v11979_v19 = vpack.c.bf16 %v11908_v6, %v11908_v6  ;;  %v15981_v20 = vld [vmem:[%s19171_s5 + $0x1d8] sm:$0xff]   ;;  %v15984_v11 = vld [vmem:[%s19171_s5 + $0x150] sm:$0xff]   ;;  %v15988_v32 = vld [vmem:[%s19171_s5 + $0x148] sm:$0xff]  }
 0x7f8   : > { %v11982_v23 = vpack.c.bf16 %v11920_v26, %v11920_v26  ;;  %v11984_v39 = vpack.c.bf16 %v11928_v16, %v11928_v16  ;;  %v15982_v15 = vld [vmem:[%s19171_s5 + $0x118] sm:$0xff]   ;;  %v15985_v50 = vld [vmem:[%s19171_s5 + $0x1d0] sm:$0xff]   ;;  %v16004_v42 = vld [vmem:[%s19171_s5 + $0x268] sm:$0xff]  }
 0x7f9   : > { %15589 = vmatpush3.bf16.msra.mxu0 %v15950_v52  ;;  %13050 = vmatprep.mubr.bf16.mxu0 %v11978_v41  ;;  %v15983_v34 = vld [vmem:[%s19171_s5 + $0x198] sm:$0xff]   ;;  %v15986_v22 = vld [vmem:[%s19171_s5 + $0x110] sm:$0xff]   ;;  %v15989_v52 = vld [vmem:[%s19171_s5 + $0x1c8] sm:$0xff]  }
 0x7fa   : > { %15611 = vmatpush3.bf16.msra.mxu1 %v15951_v55  ;;  %15590 = vmatprep.subr.bf16.mxu0 %v15952_v9  ;;  %v15987_v51 = vld [vmem:[%s19171_s5 + $0x190] sm:$0xff]   ;;  %v15990_v55 = vld [vmem:[%s19171_s5 + $0x108] sm:$0xff]   ;;  %v15999_v44 = vld [vmem:[%s19171_s5 + $0x2b8] sm:$0xff]  }
 0x7fb   : > { %15612 = vmatprep.subr.bf16.mxu1 %v15953_v47  ;;  %13090 = vmatprep.mubr.bf16.mxu1 %v11980_v57  ;;  %v15991_v9 = vld [vmem:[%s19171_s5 + $0x188] sm:$0xff]   ;;  %v15992_v47 = vld [vmem:[%s19171_s5 + $0x140] sm:$0xff]   ;;  %v16000_v60 = vld [vmem:[%s19171_s5 + $0x270] sm:$0xff]  }
 0x7fc   : > { %v16005_v4 = vld [vmem:[%s19171_s5 + $0x2e8] sm:$0xff]   ;;  %v16010_v26 = vld [vmem:[%s19171_s5 + $0x220] sm:$0xff]   ;;  %v16012_v41 = vld [vmem:[%s19171_s5 + $0x258] sm:$0xff]  }
 0x7fd   : > { %15591 = vmatpush3.bf16.msra.mxu0 %v15954_v58  ;;  %v15993_v58 = vld [vmem:[%s19171_s5 + $0x1c0] sm:$0xff]   ;;  %v16006_v7 = vld [vmem:[%s19171_s5 + $0x228] sm:$0xff]   ;;  %v16013_v57 = vld [vmem:[%s19171_s5 + $0x2d8] sm:$0xff]  }
 0x7fe   : > { %15613 = vmatpush3.bf16.msra.mxu1 %v15955_v36  ;;  %15592 = vmatprep.subr.bf16.mxu0 %v15956_v49  ;;  %v15994_v36 = vld [vmem:[%s19171_s5 + $0x100] sm:$0xff]   ;;  %v16007_v6 = vld [vmem:[%s19171_s5 + $0x2a8] sm:$0xff]  }
 0x7ff   : > { %15614 = vmatprep.subr.bf16.mxu1 %v15957_v53  ;;  %v15995_v49 = vld [vmem:[%s19171_s5 + $0x180] sm:$0xff]   ;;  %v11916_v53 = vrot.slane %v18750_v30, %v17346_v1 }
 0x800   : > { %v16011_v16 = vld [vmem:[%s19171_s5 + $0x2a0] sm:$0xff]  }
 0x801   : > { %15593 = vmatpush3.bf16.msra.mxu0 %v15958_v28  ;;  %v11924_v28 = vrot.slane %v18750_v30, %v17573_v33  ;;  %v16001_v30 = vld [vmem:[%s19171_s5 + $0x2f0] sm:$0xff]  }
 0x802   : > { %15615 = vmatpush3.bf16.msra.mxu1 %v15959_v37  ;;  %15594 = vmatprep.subr.bf16.mxu0 %v15960_v24  ;;  %v15996_v37 = vld [vmem:[%s19171_s5 + $0x278] sm:$0xff]  }
 0x803   : > { %15616 = vmatprep.subr.bf16.mxu1 %v15961_v14  ;;  %v15997_v24 = vld [vmem:[%s19171_s5 + $0x2f8] sm:$0xff]  }
 0x804   : > { %v15998_v14 = vld [vmem:[%s19171_s5 + $0x238] sm:$0xff]  }
 0x805   : > { %15595 = vmatpush3.bf16.msra.mxu0 %v15962_v8  ;;  %v11981_v8 = vpack.c.bf16 %v11916_v53, %v11916_v53  ;;  %v16037_v53 = vld [vmem:[%s19171_s5 + $0x3e8] sm:$0xff]  }
 0x806   : > { %15617 = vmatpush3.bf16.msra.mxu1 %v15963_v43  ;;  %15624 = vmatprep.subr.bf16.mxu0 %v15964_v2  ;;  %v11983_v43 = vpack.c.bf16 %v11924_v28, %v11924_v28  ;;  %v16002_v2 = vld [vmem:[%s19171_s5 + $0x230] sm:$0xff]   ;;  %v16038_v28 = vld [vmem:[%s19171_s5 + $0x328] sm:$0xff]  }
 0x807   : > { %15646 = vmatprep.subr.bf16.mxu1 %v15965_v62  ;;  %v16003_v62 = vld [vmem:[%s19171_s5 + $0x2b0] sm:$0xff]  }
 0x808   : > { %13051 = vmatmul.mubr.bf16.vlgmr.msra.gmra.mxu0 %v11977_v31  ;;  %v16014_v31 = vld [vmem:[%s19171_s5 + $0x218] sm:$0xff]  }
 0x809   : > { %13091 = vmatmul.mubr.bf16.vlgmr.msra.gmra.mxu1 %v11979_v19  ;;  %15625 = vmatpush3.bf16.msra.mxu0 %v15966_v40  ;;  %v16008_v40 = vld [vmem:[%s19171_s5 + $0x260] sm:$0xff]   ;;  %v16015_v19 = vld [vmem:[%s19171_s5 + $0x298] sm:$0xff]  }
 0x80a   : > { %15647 = vmatpush3.bf16.msra.mxu1 %v15967_v12  ;;  %15626 = vmatprep.subr.bf16.mxu0 %v15968_v61  ;;  %v16009_v12 = vld [vmem:[%s19171_s5 + $0x2e0] sm:$0xff]   ;;  %v16016_v61 = vld [vmem:[%s19171_s5 + $0x250] sm:$0xff]  }
 0x80b   : > { %15648 = vmatprep.subr.bf16.mxu1 %v15969_v59  ;;  %13130 = vmatprep.mubr.bf16.mxu0 %v11982_v23  ;;  %v16017_v59 = vld [vmem:[%s19171_s5 + $0x2d0] sm:$0xff]  }
 0x80c   : > { %13170 = vmatprep.mubr.bf16.mxu1 %v11984_v39  ;;  %v16019_v23 = vld [vmem:[%s19171_s5 + $0x290] sm:$0xff]   ;;  %v16020_v39 = vld [vmem:[%s19171_s5 + $0x248] sm:$0xff]  }
 0x80d   : > { %15627 = vmatpush3.bf16.msra.mxu0 %v15970_v56  ;;  %v16018_v56 = vld [vmem:[%s19171_s5 + $0x210] sm:$0xff]  }
 0x80e   : > { %15649 = vmatpush3.bf16.msra.mxu1 %v15971_v29  ;;  %15628 = vmatprep.subr.bf16.mxu0 %v15972_v13  ;;  %v16021_v29 = vld [vmem:[%s19171_s5 + $0x2c8] sm:$0xff]  }
 0x80f   : > { %15650 = vmatprep.subr.bf16.mxu1 %v15973_v54  ;;  %v16022_v13 = vld [vmem:[%s19171_s5 + $0x208] sm:$0xff]  }
 0x810   : > { %v16023_v54 = vld [vmem:[%s19171_s5 + $0x288] sm:$0xff]  }
 0x811   : > { %15629 = vmatpush3.bf16.msra.mxu0 %v15974_v25  ;;  %v16024_v25 = vld [vmem:[%s19171_s5 + $0x240] sm:$0xff]  }
 0x812   : > { %15651 = vmatpush3.bf16.msra.mxu1 %v15975_v5  ;;  %15630 = vmatprep.subr.bf16.mxu0 %v15976_v3  ;;  %v16025_v5 = vld [vmem:[%s19171_s5 + $0x2c0] sm:$0xff]  }
 0x813   : > { %15652 = vmatprep.subr.bf16.mxu1 %v15977_v18  ;;  %v16026_v3 = vld [vmem:[%s19171_s5 + $0x200] sm:$0xff]  }
 0x814   : > { %v16027_v18 = vld [vmem:[%s19171_s5 + $0x280] sm:$0xff]  }
 0x815   : > { %15631 = vmatpush3.bf16.msra.mxu0 %v15978_v63  ;;  %v11890_v63 = vld [vmem:[#allocation2 + $0x8] sm:$0xff] }
 0x816   : > { %15653 = vmatpush3.bf16.msra.mxu1 %v15979_v21  ;;  %15632 = vmatprep.subr.bf16.mxu0 %v15980_v10  ;;  %v11892_v21 = vld [vmem:[#allocation11 + $0x8] sm:$0xff] }
 0x817   : > { %15654 = vmatprep.subr.bf16.mxu1 %v15981_v20  ;;  %v18960_v10 = vadd.f32 %v11892_v21, %v11890_v63  ;;  %v16028_v20 = vld [vmem:[%s19171_s5 + $0x378] sm:$0xff]  }
 0x819   : > { %15633 = vmatpush3.bf16.msra.mxu0 %v15982_v15  ;;  %v16029_v15 = vld [vmem:[%s19171_s5 + $0x3f8] sm:$0xff]  }
 0x81a   : > { %15655 = vmatpush3.bf16.msra.mxu1 %v15983_v34  ;;  %15634 = vmatprep.subr.bf16.mxu0 %v15984_v11  ;;  %v11936_v34 = vrot.slane %v18960_v10, %v17035_v46  ;;  %v11944_v11 = vrot.slane %v18960_v10, %v17194_v27  ;;  %v11952_v46 = vrot.slane %v18960_v10, %v17432_v48  ;;  %v16034_v48 = vld [vmem:[%s19171_s5 + $0x330] sm:$0xff]  }
 0x81b   : > { %15656 = vmatprep.subr.bf16.mxu1 %v15985_v50  ;;  %v11932_v50 = vrot.slane %v18960_v10, %v17029_v38  ;;  %v11960_v27 = vrot.slane %v18960_v10, %v17580_v0 }
 0x81c   : > { %v11986_v38 = vpack.c.bf16 %v11936_v34, %v11936_v34  ;;  %v11990_v0 = vpack.c.bf16 %v11952_v46, %v11952_v46 }
 0x81d   : > { %15635 = vmatpush3.bf16.msra.mxu0 %v15986_v22  ;;  %v11940_v22 = vrot.slane %v18960_v10, %v17186_v17 }
 0x81e   : > { %15657 = vmatpush3.bf16.msra.mxu1 %v15987_v51  ;;  %15636 = vmatprep.subr.bf16.mxu0 %v15988_v32  ;;  %v16030_v51 = vld [vmem:[%s19171_s5 + $0x338] sm:$0xff]  }
 0x81f   : > { %15658 = vmatprep.subr.bf16.mxu1 %v15989_v52  ;;  %v16031_v32 = vld [vmem:[%s19171_s5 + $0x3b8] sm:$0xff]   ;;  %v11988_v52 = vpack.c.bf16 %v11944_v11, %v11944_v11  ;;  %v11987_v17 = vpack.c.bf16 %v11940_v22, %v11940_v22 }
 0x821   : > { %15637 = vmatpush3.bf16.msra.mxu0 %v15990_v55  ;;  %v11985_v55 = vpack.c.bf16 %v11932_v50, %v11932_v50 }
 0x822   : > { %15659 = vmatpush3.bf16.msra.mxu1 %v15991_v9  ;;  %15638 = vmatprep.subr.bf16.mxu0 %v15992_v47  ;;  %v16032_v9 = vld [vmem:[%s19171_s5 + $0x370] sm:$0xff]  }
 0x823   : > { %15660 = vmatprep.subr.bf16.mxu1 %v15993_v58  ;;  %v16033_v47 = vld [vmem:[%s19171_s5 + $0x3f0] sm:$0xff]   ;;  %v11992_v58 = vpack.c.bf16 %v11960_v27, %v11960_v27 }
 0x825   : > { %15639 = vmatpush3.bf16.msra.mxu0 %v15994_v36  ;;  %v16035_v36 = vld [vmem:[%s19171_s5 + $0x3b0] sm:$0xff]  }
 0x826   : > { %15661 = vmatpush3.bf16.msra.mxu1 %v15995_v49  ;;  %15668 = vmatprep.subr.bf16.mxu0 %v15996_v37  ;;  %v16036_v49 = vld [vmem:[%s19171_s5 + $0x368] sm:$0xff]  }
 0x827   : > { %15690 = vmatprep.subr.bf16.mxu1 %v15997_v24  ;;  %v16039_v37 = vld [vmem:[%s19171_s5 + $0x3a8] sm:$0xff]   ;;  %v16040_v24 = vld [vmem:[%s19171_s5 + $0x360] sm:$0xff]  }
 0x828   : > { %13131 = vmatmul.mubr.bf16.vlgmr.msra.gmra.mxu0 %v11981_v8  ;;  %v16042_v8 = vld [vmem:[%s19171_s5 + $0x320] sm:$0xff]  }
 0x829   : > { %13171 = vmatmul.mubr.bf16.vlgmr.msra.gmra.mxu1 %v11983_v43  ;;  %15669 = vmatpush3.bf16.msra.mxu0 %v15998_v14  ;;  %v16041_v14 = vld [vmem:[%s19171_s5 + $0x3e0] sm:$0xff]  }
 0x82a   : > { %15691 = vmatpush3.bf16.msra.mxu1 %v15999_v44  ;;  %15670 = vmatprep.subr.bf16.mxu0 %v16000_v60  ;;  %v16043_v43 = vld [vmem:[%s19171_s5 + $0x3a0] sm:$0xff]   ;;  %v16044_v44 = vld [vmem:[%s19171_s5 + $0x358] sm:$0xff]  }
 0x82b   : > { %15692 = vmatprep.subr.bf16.mxu1 %v16001_v30  ;;  %13210 = vmatprep.mubr.bf16.mxu0 %v11986_v38  ;;  %v16045_v60 = vld [vmem:[%s19171_s5 + $0x3d8] sm:$0xff]  }
 0x82c   : > { %13250 = vmatprep.mubr.bf16.mxu1 %v11988_v52  ;;  %v16046_v30 = vld [vmem:[%s19171_s5 + $0x318] sm:$0xff]  }
 0x82d   : > { %15671 = vmatpush3.bf16.msra.mxu0 %v16002_v2  ;;  %v16047_v2 = vld [vmem:[%s19171_s5 + $0x398] sm:$0xff]  }
 0x82e   : > { %15693 = vmatpush3.bf16.msra.mxu1 %v16003_v62  ;;  %15672 = vmatprep.subr.bf16.mxu0 %v16004_v42  ;;  %v16048_v62 = vld [vmem:[%s19171_s5 + $0x350] sm:$0xff]  }
 0x82f   : > { %15694 = vmatprep.subr.bf16.mxu1 %v16005_v4  ;;  %v16049_v42 = vld [vmem:[%s19171_s5 + $0x3d0] sm:$0xff]  }
 0x830   : > { %v16050_v4 = vld [vmem:[%s19171_s5 + $0x310] sm:$0xff]  }
 0x831   : > { %15673 = vmatpush3.bf16.msra.mxu0 %v16006_v7  ;;  %v16051_v7 = vld [vmem:[%s19171_s5 + $0x390] sm:$0xff]  }
 0x832   : > { %15695 = vmatpush3.bf16.msra.mxu1 %v16007_v6  ;;  %15674 = vmatprep.subr.bf16.mxu0 %v16008_v40  ;;  %v16052_v6 = vld [vmem:[%s19171_s5 + $0x348] sm:$0xff]  }
 0x833   : > { %15696 = vmatprep.subr.bf16.mxu1 %v16009_v12  ;;  %v16053_v40 = vld [vmem:[%s19171_s5 + $0x3c8] sm:$0xff]  }
 0x834   : > { %v16054_v12 = vld [vmem:[%s19171_s5 + $0x308] sm:$0xff]  }
 0x835   : > { %15675 = vmatpush3.bf16.msra.mxu0 %v16010_v26  ;;  %v16055_v26 = vld [vmem:[%s19171_s5 + $0x388] sm:$0xff]  }
 0x836   : > { %15697 = vmatpush3.bf16.msra.mxu1 %v16011_v16  ;;  %15676 = vmatprep.subr.bf16.mxu0 %v16012_v41  ;;  %v16056_v16 = vld [vmem:[%s19171_s5 + $0x340] sm:$0xff]  }
 0x837   : > { %15698 = vmatprep.subr.bf16.mxu1 %v16013_v57  ;;  %v16057_v41 = vld [vmem:[%s19171_s5 + $0x3c0] sm:$0xff]   ;;  %v11948_v57 = vrot.slane %v18960_v10, %v17346_v1  ;;  %v19075_v1 = vand.u32 127, %v1021_v35  ;;  %v16404_v35 = vmov 1.0  }
 0x839   : > { %15677 = vmatpush3.bf16.msra.mxu0 %v16014_v31  ;;  %v11956_v31 = vrot.slane %v18960_v10, %v17573_v33  ;;  %v19078_v33 = vadd.s32 8, %v16722_v45  ;;  %vm13432_vm9 = vcmp.ge.s32.totalorder %v19075_v1, 1  ;;  %vm13516_vm12 = vcmp.ge.s32.totalorder %v19075_v1, 2 }
 0x83a   : > { %15699 = vmatpush3.bf16.msra.mxu1 %v16015_v19  ;;  %15678 = vmatprep.subr.bf16.mxu0 %v16016_v61  ;;  %v16058_v19 = vld [vmem:[%s19171_s5 + $0x300] sm:$0xff]   ;;  %vm13600_vm15 = vcmp.ge.s32.totalorder %v19075_v1, 4  ;;  %vm13683_vm0 = vcmp.ge.s32.totalorder %v19075_v1, 8 }
 0x83b   : > { %15700 = vmatprep.subr.bf16.mxu1 %v16017_v59  ;;  %v16059_v61 = vld [vmem:[%s19171_s5 + $0x380] sm:$0xff]   ;;  %v11989_v59 = vpack.c.bf16 %v11948_v57, %v11948_v57  ;;  %vm13604_vm14 = vcmp.eq.s32.totalorder %v19078_v33, %v19075_v1 }
 0x83d   : > { %15679 = vmatpush3.bf16.msra.mxu0 %v16018_v56  ;;  %v11991_v56 = vpack.c.bf16 %v11956_v31, %v11956_v31  ;;  %v13339_v31 = vld [vmem:[#allocation14] sm:$0x1] }
 0x83e   : > { %15701 = vmatpush3.bf16.msra.mxu1 %v16019_v23  ;;  %15680 = vmatprep.subr.bf16.mxu0 %v16020_v39  ;;  %v16402_v23 = vmov 0.0   ;;  %v13350_v39 = vadd.s32 1, %v16722_v45 }
 0x83f   : > { %15702 = vmatprep.subr.bf16.mxu1 %v16021_v29  ;;  %v13351_v29 = vadd.s32 1, %v19078_v33 }
 0x840   : > { %vm13352_vm4 = vcmp.eq.s32.totalorder %v13350_v39, %v19075_v1 }
 0x841   : > { %15681 = vmatpush3.bf16.msra.mxu0 %v16022_v13  ;;  %vm13353_vm3 = vcmp.eq.s32.totalorder %v13351_v29, %v19075_v1  ;;  %v13436_v13 = vadd.s32 2, %v19078_v33 }
 0x842   : > { %15703 = vmatpush3.bf16.msra.mxu1 %v16023_v54  ;;  %15682 = vmatprep.subr.bf16.mxu0 %v16024_v25 }
 0x843   : > { %15704 = vmatprep.subr.bf16.mxu1 %v16025_v5  ;;  %vm13438_vm5 = vcmp.eq.s32.totalorder %v13436_v13, %v19075_v1  ;;  %v12249_v5 = vld [vmem:[#allocation12] sm:$0x1] }
 0x845   : > { %15683 = vmatpush3.bf16.msra.mxu0 %v16026_v3 }
 0x846   : > { %15705 = vmatpush3.bf16.msra.mxu1 %v16027_v18  ;;  %15712 = vmatprep.subr.bf16.mxu0 %v16028_v20 }
 0x847   : > { %15734 = vmatprep.subr.bf16.mxu1 %v16029_v15 }
 0x848   : > { %13211 = vmatmul.mubr.bf16.vlgmr.msra.gmra.mxu0 %v11985_v55 }
 0x849   : > { %13251 = vmatmul.mubr.bf16.vlgmr.msra.gmra.mxu1 %v11987_v17  ;;  %15713 = vmatpush3.bf16.msra.mxu0 %v16030_v51 }
 0x84a   : > { %15735 = vmatpush3.bf16.msra.mxu1 %v16031_v32  ;;  %15714 = vmatprep.subr.bf16.mxu0 %v16032_v9 }
 0x84b   : > { %15736 = vmatprep.subr.bf16.mxu1 %v16033_v47  ;;  %13290 = vmatprep.mubr.bf16.mxu0 %v11990_v0 }
 0x84c   : > { %13330 = vmatprep.mubr.bf16.mxu1 %v11992_v58 }
 0x84d   : > { %15715 = vmatpush3.bf16.msra.mxu0 %v16034_v48 }
 0x84e   : > { %15737 = vmatpush3.bf16.msra.mxu1 %v16035_v36  ;;  %15716 = vmatprep.subr.bf16.mxu0 %v16036_v49 }
 0x84f   : > { %15738 = vmatprep.subr.bf16.mxu1 %v16037_v53 }
 0x851   : > { %15717 = vmatpush3.bf16.msra.mxu0 %v16038_v28 }
 0x852   : > { %15739 = vmatpush3.bf16.msra.mxu1 %v16039_v37  ;;  %15718 = vmatprep.subr.bf16.mxu0 %v16040_v24 }
 0x853   : > { %15740 = vmatprep.subr.bf16.mxu1 %v16041_v14 }
 0x855   : > { %15719 = vmatpush3.bf16.msra.mxu0 %v16042_v8 }
 0x856   : > { %15741 = vmatpush3.bf16.msra.mxu1 %v16043_v43  ;;  %15720 = vmatprep.subr.bf16.mxu0 %v16044_v44 }
 0x857   : > { %15742 = vmatprep.subr.bf16.mxu1 %v16045_v60 }
 0x859   : > { %15721 = vmatpush3.bf16.msra.mxu0 %v16046_v30 }
 0x85a   : > { %15743 = vmatpush3.bf16.msra.mxu1 %v16047_v2  ;;  %15722 = vmatprep.subr.bf16.mxu0 %v16048_v62 }
 0x85b   : > { %15744 = vmatprep.subr.bf16.mxu1 %v16049_v42 }
 0x85d   : > { %15723 = vmatpush3.bf16.msra.mxu0 %v16050_v4 }
 0x85e   : > { %15745 = vmatpush3.bf16.msra.mxu1 %v16051_v7  ;;  %15724 = vmatprep.subr.bf16.mxu0 %v16052_v6 }
 0x85f   : > { %15746 = vmatprep.subr.bf16.mxu1 %v16053_v40 }
 0x861   : > { %15725 = vmatpush3.bf16.msra.mxu0 %v16054_v12 }
 0x862   : > { %15747 = vmatpush3.bf16.msra.mxu1 %v16055_v26  ;;  %15726 = vmatprep.subr.bf16.mxu0 %v16056_v16 }
 0x863   : > { %15748 = vmatprep.subr.bf16.mxu1 %v16057_v41  ;;  %v13340_v41 = vld [vmem:[#allocation15] sm:$0x1] }
 0x865   : > { %15727 = vmatpush3.bf16.msra.mxu0 %v16058_v19 }
 0x866   : > { %15749 = vmatpush3.bf16.msra.mxu1 %v16059_v61  ;;  %15768 = vmatprep.subr.mxu0 %v16402_v23 }
 0x867   : > { %15775 = vmatprep.subr.mxu1 %v16402_v23 }
 0x868   : > { %13291 = vmatmul.mubr.bf16.vlgmr.msra.gmra.mxu0 %v11989_v59  ;;  %v13435_v59 = vadd.s32 2, %v16722_v45 }
 0x869   : > { %13331 = vmatmul.mubr.bf16.vlgmr.msra.gmra.mxu1 %v11991_v56  ;;  %15772 = vmatprep.mubr.msk.f32.mxu0 %vm16403_vm2, %v16402_v23 }
 0x86a   : > { %15779 = vmatprep.mubr.msk.f32.mxu1 %vm16403_vm2, %v16402_v23  ;;  %15769 = vmatpush3.msk.msra.mxu0 %vm13353_vm3, %v16404_v35  ;;  %vm13437_vm8 = vcmp.eq.s32.totalorder %v13435_v59, %v19075_v1 }
 0x86b   : > { %15770 = vmatprep.subr.mxu0 %v16402_v23  ;;  %15776 = vmatpush3.msk.msra.mxu1 %vm13438_vm5, %v16404_v35 }
 0x86c   : > { %15771 = vmatpush3.msk.msra.mxu0 %vm13352_vm4, %v16404_v35  ;;  %15777 = vmatprep.subr.mxu1 %v16402_v23 }
 0x86d   : > { %15782 = vmatprep.subr.mxu0 %v16402_v23  ;;  %15778 = vmatpush3.msk.msra.mxu1 %vm13437_vm8, %v16404_v35 }
 0x86e   : > { %15789 = vmatprep.subr.mxu1 %v16402_v23 }
 0x8c8   : > { %v15596_v54 = vpop.f32.mrf.mxu0 }
 0x8c9   : > { %v15618_v25 = vpop.f32.mrf.mxu1 }
 0x8ca   : > { %v15597_v3 = vpop.f32.mrf.mxu0 }
 0x8cb   : > { %v15619_v18 = vpop.f32.mrf.mxu1  ;;  %v15598_v63 = vadd.f32 %v15597_v3, %v15596_v54  ;;  %v13520_v54 = vadd.s32 4, %v19078_v33 }
 0x8cc   : > { %v15620_v21 = vadd.f32 %v15619_v18, %v15618_v25  ;;  %v15599_v10 = vpop.f32.mrf.mxu0  ;;  %v13519_v25 = vadd.s32 4, %v16722_v45 }
 0x8cd   : > { %v15621_v20 = vpop.f32.mrf.mxu1  ;;  %v13053_v15 = vadd.f32 %v15598_v63, %v12249_v5  ;;  %vm13522_vm10 = vcmp.eq.s32.totalorder %v13520_v54, %v19075_v1 }
 0x8ce   : > { %v15600_v34 = vpop.f32.mrf.mxu0  ;;  %vm13521_vm11 = vcmp.eq.s32.totalorder %v13519_v25, %v19075_v1 }
 0x8cf   : > { %v15622_v11 = vpop.f32.mrf.mxu1  ;;  %v13093_v50 = vadd.f32 %v15620_v21, %v13053_v15  ;;  %v13603_v21 = vadd.s32 8, %v19078_v33 }
 0x8d1   : > { %vm13605_vm13 = vcmp.eq.s32.totalorder %v13603_v21, %v19075_v1 }
 0x8e8   : > { %v15640_v22 = vpop.f32.mrf.mxu0 }
 0x8e9   : > { %v15662_v51 = vpop.f32.mrf.mxu1 }
 0x8ea   : > { %v15641_v32 = vpop.f32.mrf.mxu0 }
 0x8eb   : > { %v15663_v46 = vpop.f32.mrf.mxu1  ;;  %v15642_v53 = vadd.f32 %v15641_v32, %v15640_v22 }
 0x8ec   : > { %v15643_v27 = vpop.f32.mrf.mxu0  ;;  %v15664_v37 = vadd.f32 %v15663_v46, %v15662_v51 }
 0x8ed   : > { %v15665_v38 = vpop.f32.mrf.mxu1  ;;  %v13133_v28 = vadd.f32 %v15642_v53, %v13093_v50 }
 0x8ee   : > { %v15644_v52 = vpop.f32.mrf.mxu0 }
 0x8ef   : > { %v15666_v55 = vpop.f32.mrf.mxu1  ;;  %v13173_v14 = vadd.f32 %v15664_v37, %v13133_v28 }
 0x908   : > { %v15684_v17 = vpop.f32.mrf.mxu0 }
 0x909   : > { %v15706_v9 = vpop.f32.mrf.mxu1 }
 0x90a   : > { %v15685_v47 = vpop.f32.mrf.mxu0 }
 0x90b   : > { %v15707_v48 = vpop.f32.mrf.mxu1  ;;  %v15686_v24 = vadd.f32 %v15685_v47, %v15684_v17 }
 0x90c   : > { %v15687_v0 = vpop.f32.mrf.mxu0  ;;  %v15708_v43 = vadd.f32 %v15707_v48, %v15706_v9 }
 0x90d   : > { %v15709_v58 = vpop.f32.mrf.mxu1  ;;  %v13213_v8 = vadd.f32 %v15686_v24, %v13173_v14 }
 0x90e   : > { %v15688_v36 = vpop.f32.mrf.mxu0 }
 0x90f   : > { %v15710_v49 = vpop.f32.mrf.mxu1  ;;  %v13253_v62 = vadd.f32 %v15708_v43, %v13213_v8 }
 0x928   : > { %v15728_v44 = vpop.f32.mrf.mxu0 }
 0x929   : > { %v15750_v60 = vpop.f32.mrf.mxu1 }
 0x92a   : > { %v15729_v30 = vpop.f32.mrf.mxu0 }
 0x92b   : > { %v15751_v2 = vpop.f32.mrf.mxu1  ;;  %v15730_v42 = vadd.f32 %v15729_v30, %v15728_v44 }
 0x92c   : > { %v15731_v4 = vpop.f32.mrf.mxu0  ;;  %v15752_v40 = vadd.f32 %v15751_v2, %v15750_v60 }
 0x92d   : > { %v15753_v7 = vpop.f32.mrf.mxu1  ;;  %v13293_v6 = vadd.f32 %v15730_v42, %v13253_v62 }
 0x92e   : > { %v15732_v12 = vpop.f32.mrf.mxu0 }
 0x92f   : > { %v15754_v26 = vpop.f32.mrf.mxu1  ;;  %v13333_v16 = vadd.f32 %v15752_v40, %v13293_v6 }
 0x931   : > { %16060 = vtanh.f32 %v13333_v16 }
 0x93e   : > { %v16061_v57 = vpop.eup %16060 }
 0x93f   : > { %v13341_v19 = vmul.f32 %v16061_v57, %v13340_v41 }
 0x941   : > { %v13342_v61 = vadd.f32 %v13341_v19, %v13339_v31 }
 0x943   : > { %15773 = vmatmul.mubr.msk.f32.vlgmr.msra.gmra.mxu0 %vm13358_vm6, %v13342_v61  ;;  %13344 = vst.msk [vmem:[#allocation17] sm:$0x1] %vm13343_vm7, %v13342_v61 }
 0x944   : > { %15786 = vmatprep.mubr.msk.f32.mxu0 %vm16403_vm2, %v16402_v23  ;;  %15783 = vmatpush3.msk.msra.mxu0 %vm13522_vm10, %v16404_v35 }
 0x945   : > { %15784 = vmatprep.subr.mxu0 %v16402_v23 }
 0x946   : > { %15785 = vmatpush3.msk.msra.mxu0 %vm13521_vm11, %v16404_v35 }
 0xa03   : > { %v13428_v56 = vpop.f32.mrf.mxu0 }
 0xa04   : > { %v13433_v39 = vsel %vm13432_vm9, %v13428_v56, 1.0 }
 0xa05   : > { %v13434_v29 = vmul.f32 %v13433_v39, %v13342_v61  ;;  %v15774_v13 = vpop.f32.mrf.mxu0 }
 0xa07   : > { %15780 = vmatmul.mubr.msk.f32.vlgmr.msra.gmra.mxu1 %vm13358_vm6, %v13434_v29 }
 0xa08   : > { %15793 = vmatprep.mubr.msk.f32.mxu1 %vm16403_vm2, %v16402_v23  ;;  %15790 = vmatpush3.msk.msra.mxu1 %vm13605_vm13, %v16404_v35 }
 0xa09   : > { %15791 = vmatprep.subr.mxu1 %v16402_v23 }
 0xa0a   : > { %15792 = vmatpush3.msk.msra.mxu1 %vm13604_vm14, %v16404_v35 }
 0xac7   : > { %v13512_v5 = vpop.f32.mrf.mxu1 }
 0xac8   : > { %v13517_v3 = vsel %vm13516_vm12, %v13512_v5, 1.0 }
 0xac9   : > { %v13518_v18 = vmul.f32 %v13517_v3, %v13434_v29  ;;  %v15781_v63 = vpop.f32.mrf.mxu1 }
 0xacb   : > { %15787 = vmatmul.mubr.msk.f32.vlgmr.msra.gmra.mxu0 %vm13358_vm6, %v13518_v18 }
 0xb8b   : > { %v13596_v45 = vpop.f32.mrf.mxu0 }
 0xb8c   : > { %v13601_v10 = vsel %vm13600_vm15, %v13596_v45, 1.0 }
 0xb8d   : > { %v13602_v20 = vmul.f32 %v13601_v10, %v13518_v18  ;;  %v15788_v15 = vpop.f32.mrf.mxu0 }
 0xb8f   : > { %15794 = vmatmul.mubr.msk.f32.vlgmr.msra.gmra.mxu1 %vm13358_vm6, %v13602_v20 }
 0xc4f   : > { %v13679_v34 = vpop.f32.mrf.mxu1 }
 0xc50   : > { %v13684_v11 = vsel %vm13683_vm0, %v13679_v34, 1.0 }
 0xc51   : > { %v13685_v50 = vmul.f32 %v13684_v11, %v13602_v20  ;;  %v15795_v22 = vpop.f32.mrf.mxu1 }
 0xc53   : > { %13686 = vst.msk [vmem:[#allocation18] sm:$0x1] %vm13343_vm7, %v13685_v50 }
 0xc54 PF: > { %p15869_p3 = scmp.eq.s32.totalorder %s16481_s17, 1  ;;  %s16405_s23 = smov [#allocation17]  }
 0xc55   : > { %s13694_s11 = sshll.u32 %s16405_s23, 4  ;;  %s16406_s24 = smov [#allocation18]   ;;  %s13695_s11 = int_to_ptr.vmem [resolvable:$true] %s13694_s11 }
 0xc56   : > { %s13705_s19 = sshll.u32 %s16406_s24, 4  ;;  %s16276_s27 = scalar_lea.vmem %s13695_s11, 16  ;;  %s13706_s19 = int_to_ptr.vmem [resolvable:$true] %s13705_s19 }
 0xc57   : > { %p16277_p6 = scmp.ne.s32.totalorder %s13695_s11, %s16276_s27  ;;  %s16282_s13 = scalar_lea.vmem %s13695_s11, 32 }
 0xc58   : > { %p16283_p7 = scmp.lt.s32.totalorder %s13695_s11, %s13695_s11  ;;  %p16284_p10 = scmp.lt.s32.totalorder %s16282_s13, %s16276_s27 }
 0xc59   : > { %p16278_p12 = pnand %p16277_p6, %p15869_p3 }
 0xc5a   : > { %p16285_p0 = por %p16284_p10, %p16283_p7 }
 0xc5b   : > { %p16279_p8 = pneg %p16278_p12 }
 0xc5d   : > { %p16286_p11 = pnand %p16285_p0, %p16279_p8 }
 0xc5f   : > { %16289 = shalt.err (!%p16286_p11)
}
 0xc60   : > { %15825 = dma.vmem_to_hbm [thread:$0]  (%p15869_p3), %s13695_s11, 16, %s19175_s9, [#allocation5]  }
 0xc61   : > { %s16300_s18 = scalar_lea.vmem %s13706_s19, 16  ;;  %s16306_s4 = scalar_lea.vmem %s13706_s19, 32 }
 0xc62   : > { %p16301_p13 = scmp.ne.s32.totalorder %s13706_s19, %s16300_s18  ;;  %p16307_p1 = scmp.lt.s32.totalorder %s13706_s19, %s13706_s19 }
 0xc63   : > { %p16308_p5 = scmp.lt.s32.totalorder %s16306_s4, %s16300_s18 }
 0xc64   : > { %p16302_p2 = pnand %p16301_p13, %p15869_p3 }
 0xc65   : > { %p16309_p9 = por %p16308_p5, %p16307_p1 }
 0xc66   : > { %p16303_p4 = pneg %p16302_p2 }
 0xc68   : > { %p16310_p6 = pnand %p16309_p9, %p16303_p4 }
 0xc6a   : > { %16313 = shalt.err (!%p16310_p6)
}
 0xc6b   : > { %15827 = dma.vmem_to_hbm [thread:$0]  (%p15869_p3), %s13706_s19, 16, %s19176_s10, [#allocation19]  }
 0xc6c   : > { %16365 = dma.done.wait (%p15869_p3), [#allocation5], 16  }
 0xc6d   : > { %16367 = vsyncadd (%p15869_p3), [#allocation5], 4294967280 }
 0xc6e   : > { %16369 = dma.done.wait (%p15869_p3), [#allocation19], 16  }
 0xc6f   : > { %16371 = vsyncadd (%p15869_p3), [#allocation19], 4294967280 }
 0xc70 PF: > { %s19227_s16 = sld [smem:[#allocation29_spill]]  ;;  %s19230_s13 = smov %s16378_s14 }
 0xc71   : > { %s19228_s20 = sld [smem:[#allocation28_spill]] }
 0xc72   : > { %s19229_s15 = sld [smem:[#allocation30_spill]] }
 0xc76   : > { %p29_p12 = scmp.ge.s32.totalorder %s19227_s16, 4  }
 0xc77   : > { %s19231_s14 = smov %s19228_s20 }
 0xc78   :  { %31 = sbr.rel (!%p29_p12) target bundleno = 15 (0xf), region = 154 }
 0xc7d   :  { %13722 = vsyncpa [#allocation4], 1 }
 0xc7e   :  { %13724 = vsyncpa [#allocation4 + $0x1], 1 }
 0xc7f   :  { %13725 = vsyncpa [#allocation7], 1 }
 0xc80   :  { %13727 = vsyncpa [#allocation7 + $0x1], 1 }
 0xc81   :  { %13728 = vsyncpa [#allocation10], 1 }
 0xc82   :  { %13730 = vsyncpa [#allocation10 + $0x1], 1 }
 0xc83   :  { %13731 = vsyncpa [#allocation13], 1 }
 0xc84   :  { %13732 = vsyncpa [#allocation16], 1 }
 0xc85   :  { %13733 = vsyncpa [#allocation5], 1 }
 0xc86   :  { %13735 = vsyncpa [#allocation5 + $0x1], 1 }
 0xc87   :  { %13736 = vsyncpa [#allocation19], 1 }

</bundles_post_ra>
